<compile_context>
chip_gen: v7x
topology: tpu7x:2x2x1
jax: 0.10.0
libtpu: 0.0.40
codegen_flags: <defaults>
</compile_context>

<pallas_src>
import functools

import numpy as np
import jax
import jax.numpy as jnp
from jax.experimental import pallas as pl
from jax.experimental.pallas import tpu as pltpu

BOARD_ROWS = 6
BOARD_COLS = 7
HW = BOARD_ROWS * BOARD_COLS          # 42 spatial positions per board
FLAT = 32 * HW                        # 1344 = 32 * 6 * 7
_PAD_HW = 8                           # max |row shift| of a 3x3 tap = 7 + 1


# ----------------------------------------------------------------------------
# Host-side constant: per-row validity mask for the 9 conv taps.  Depends only
# on the spatial position (r // bt), independent of batch.  Shape (bt*42, 9).
# ----------------------------------------------------------------------------
@functools.lru_cache(maxsize=None)
def _tap_masks_np(bt):
    n = bt * HW
    hw = np.arange(n) // bt
    h, w = hw // BOARD_COLS, hw % BOARD_COLS
    m = np.zeros((n, 9), np.float32)
    for kh in range(3):
        for kw in range(3):
            hh, ww = h + kh - 1, w + kw - 1
            valid = (hh >= 0) & (hh < BOARD_ROWS) & (ww >= 0) & (ww < BOARD_COLS)
            m[:, kh * 3 + kw] = valid.astype(np.float32)
    return m


# ----------------------------------------------------------------------------
# Fused kernel: conv stack + heads, one batch tile of `bt` boards per step.
# ----------------------------------------------------------------------------
def _connect4_kernel(x_ref, mask_ref,
                     w1_ref, b1_ref, w2_ref, b2_ref, w3_ref, b3_ref,
                     wh_ref, bh_ref, wp_ref, bp_ref,
                     wv1_ref, bv1_ref, wv2_ref, bv2_ref,
                     policy_ref, value_ref,
                     hpad_ref, pol_flat_ref, val_flat_ref, *, bt):
    f32, bf16 = jnp.float32, jnp.bfloat16
    n = bt * HW
    pad = _PAD_HW * bt

    # Zero the halo rows of the padded activation scratch once per tile.
    hpad_ref[0:pad, :] = jnp.zeros((pad, 128), f32)
    hpad_ref[pad + n:pad + n + pad, :] = jnp.zeros((pad, 128), f32)

    mask_cols = [mask_ref[:, o:o + 1] for o in range(9)]          # 9 x (n, 1)

    def conv3x3_relu(h, w_ref, b_ref):
        """h: (n, Cin) f32 -> relu((n, 9*Cin) @ (9*Cin, Cout) + b): (n, Cout)."""
        cin = h.shape[1]
        hpad_ref[pad:pad + n, :cin] = h                           # interior
        pieces = []
        for o in range(9):
            kh, kw = o // 3, o % 3
            s = (kh - 1) * BOARD_COLS + (kw - 1)                  # row shift (hw units)
            start = pad + s * bt
            # out[r] = h[r + s*bt] (zero halo), masked to the 6x7 board.
            pieces.append(hpad_ref[start:start + n, :cin] * mask_cols[o])
        xcat = jnp.concatenate(pieces, axis=1).astype(bf16)       # (n, 9*cin)
        z = jnp.dot(xcat, w_ref[...], preferred_element_type=f32)
        return jnp.maximum(z + b_ref[...], 0.0)                   # f32 epilogue

    h = x_ref[...]                                                # (n, 3) f32
    h = conv3x3_relu(h, w1_ref, b1_ref)                           # (n, 64)
    h = conv3x3_relu(h, w2_ref, b2_ref)                           # (n, 128)
    h = conv3x3_relu(h, w3_ref, b3_ref)                           # (n, 256)

    # policy_conv and value_conv fused into one (256, 64) 1x1 conv + ReLU.
    heads = jnp.dot(h.astype(bf16), wh_ref[...], preferred_element_type=f32)
    heads = jnp.maximum(heads + bh_ref[...], 0.0)                 # (n, 64) f32

    # Flatten to per-board (bt, 1344) vectors in (hw*32 + c) order (the FC
    # weights were row-permuted at init so this matches torch's view()).
    hpad_ref[pad:pad + n, :64] = heads
    for hw in range(HW):
        blk = hpad_ref[pad + hw * bt:pad + (hw + 1) * bt, :64]    # (bt, 64)
        pol_flat_ref[:, hw * 32:(hw + 1) * 32] = blk[:, :32]
        val_flat_ref[:, hw * 32:(hw + 1) * 32] = blk[:, 32:64]

    # Policy head: Linear(1344 -> 7) + max-stabilized log_softmax (f32).
    logits = jnp.dot(pol_flat_ref[...].astype(bf16), wp_ref[...],
                     preferred_element_type=f32) + bp_ref[...]    # (bt, 7)
    shifted = logits - jnp.max(logits, axis=-1, keepdims=True)
    policy_ref[...] = shifted - jnp.log(
        jnp.sum(jnp.exp(shifted), axis=-1, keepdims=True))

    # Value head: Linear(1344 -> 256) + ReLU, then Linear(256 -> 1) + tanh.
    v = jnp.dot(val_flat_ref[...].astype(bf16), wv1_ref[...],
                preferred_element_type=f32) + bv1_ref[...]
    v = jnp.maximum(v, 0.0)                                       # (bt, 256)
    # value_fc2 as VPU multiply + lane reduction (MXU pass would waste 127/128 lanes).
    v = jnp.sum(v * wv2_ref[...], axis=-1, keepdims=True) + bv2_ref[...]
    value_ref[...] = jnp.tanh(v)


# ----------------------------------------------------------------------------
# Forward pass (matches Connect4Net.forward semantics).
# ----------------------------------------------------------------------------
def connect4_forward(params, x_nchw, *, board_tile=8):
    B = x_nchw.shape[0]
    bt = B if B <= board_tile else board_tile
    B_pad = ((B + bt - 1) // bt) * bt
    T = B_pad // bt
    n_tile = bt * HW

    x = x_nchw.astype(jnp.float32)
    if B_pad != B:
        x = jnp.concatenate(
            [x, jnp.zeros((B_pad - B,) + x.shape[1:], jnp.float32)], axis=0)

    # NCHW -> tiled hw-major rows: global row = t*(42*bt) + hw*bt + b_local.
    # TODO(synk): tiny (B*126-element) layout transpose left in the XLA wrapper;
    # folding it into the kernel would need an in-kernel NCHW transpose.
    x2d = (jnp.transpose(x, (0, 2, 3, 1))          # (B_pad, 6, 7, 3)
           .reshape(T, bt, HW, 3)
           .transpose(0, 2, 1, 3)
           .reshape(T * n_tile, 3))
    mask = jnp.asarray(_tap_masks_np(bt))          # (n_tile, 9) f32

    tiled = lambda shape: pl.BlockSpec(shape, lambda t: (t, 0))
    resident = lambda shape: pl.BlockSpec(shape, lambda t: (0, 0))

    kernel = functools.partial(_connect4_kernel, bt=bt)
    policy, value = pl.pallas_call(
        kernel,
        out_shape=(jax.ShapeDtypeStruct((B_pad, BOARD_COLS), jnp.float32),
                   jax.ShapeDtypeStruct((B_pad, 1), jnp.float32)),
        grid=(T,),
        in_specs=[
            tiled((n_tile, 3)),                    # x2d (per tile)
            resident((n_tile, 9)),                 # tap masks
            resident((9 * 3, 64)), resident((1, 64)),      # conv1
            resident((9 * 64, 128)), resident((1, 128)),   # conv2
            resident((9 * 128, 256)), resident((1, 256)),  # conv3
            resident((256, 64)), resident((1, 64)),        # fused 1x1 heads
            resident((FLAT, BOARD_COLS)), resident((1, BOARD_COLS)),  # policy_fc
            resident((FLAT, 256)), resident((1, 256)),     # value_fc1
            resident((1, 256)), resident((1, 1)),          # value_fc2
        ],
        out_specs=(pl.BlockSpec((bt, BOARD_COLS), lambda t: (t, 0)),
                   pl.BlockSpec((bt, 1), lambda t: (t, 0))),
        scratch_shapes=[
            pltpu.VMEM(((2 * _PAD_HW + HW) * bt, 128), jnp.float32),  # haloed acts
            pltpu.VMEM((bt, FLAT), jnp.float32),                      # policy flat
            pltpu.VMEM((bt, FLAT), jnp.float32),                      # value flat
        ],
        compiler_params=pltpu.CompilerParams(
            dimension_semantics=("parallel",)),
    )(x2d, mask,
      params["conv1_w"], params["conv1_b"],
      params["conv2_w"], params["conv2_b"],
      params["conv3_w"], params["conv3_b"],
      params["head_w"], params["head_b"],
      params["policy_fc_w"], params["policy_fc_b"],
      params["value_fc1_w"], params["value_fc1_b"],
      params["value_fc2_w"], params["value_fc2_b"])
    return policy[:B], value[:B]


# ----------------------------------------------------------------------------
# Parameters: synthetic weights in PyTorch-native layouts, converted ONCE into
# the kernel layouts (bf16 MXU operands, f32 biases, folded flatten perm).
# ----------------------------------------------------------------------------
def init_torch_params(key):
    """Conv2d: (Cout, Cin, kh, kw); Linear: (out, in); uniform(+-1/sqrt(fan_in))."""
    def uni(k, shape, fan_in):
        b = 1.0 / np.sqrt(fan_in)
        return jax.random.uniform(k, shape, jnp.float32, -b, b)

    ks = jax.random.split(key, 16)
    return {
        "conv1": (uni(ks[0], (64, 3, 3, 3), 3 * 9), uni(ks[1], (64,), 3 * 9)),
        "conv2": (uni(ks[2], (128, 64, 3, 3), 64 * 9), uni(ks[3], (128,), 64 * 9)),
        "conv3": (uni(ks[4], (256, 128, 3, 3), 128 * 9), uni(ks[5], (256,), 128 * 9)),
        "policy_conv": (uni(ks[6], (32, 256, 1, 1), 256), uni(ks[7], (32,), 256)),
        "policy_fc": (uni(ks[8], (BOARD_COLS, FLAT), FLAT), uni(ks[9], (BOARD_COLS,), FLAT)),
        "value_conv": (uni(ks[10], (32, 256, 1, 1), 256), uni(ks[11], (32,), 256)),
        "value_fc1": (uni(ks[12], (256, FLAT), FLAT), uni(ks[13], (256,), FLAT)),
        "value_fc2": (uni(ks[14], (1, 256), 256), uni(ks[15], (1,), 256)),
    }


def convert_params(tp):
    bf16, f32 = jnp.bfloat16, jnp.float32

    def conv_w(w):   # (Cout, Cin, 3, 3) -> (9*Cin, Cout), row = (kh*3+kw)*Cin + ci
        cout, cin = w.shape[0], w.shape[1]
        return jnp.transpose(w, (2, 3, 1, 0)).reshape(9 * cin, cout).astype(bf16)

    def fc_w(w):     # torch (out, 1344) -> (1344, out); rows permuted so the
        # kernel's (hw*32 + c) flatten order matches torch's (c*42 + hw) order.
        j = np.arange(FLAT)
        perm = (j % 32) * HW + (j // 32)
        return jnp.asarray(w[:, perm].T, dtype=bf16)

    def bias(b):
        return b.reshape(1, -1).astype(f32)

    p = {}
    p["conv1_w"], p["conv1_b"] = conv_w(tp["conv1"][0]), bias(tp["conv1"][1])
    p["conv2_w"], p["conv2_b"] = conv_w(tp["conv2"][0]), bias(tp["conv2"][1])
    p["conv3_w"], p["conv3_b"] = conv_w(tp["conv3"][0]), bias(tp["conv3"][1])
    pw, pb = tp["policy_conv"]
    vw, vb = tp["value_conv"]
    p["head_w"] = jnp.concatenate([pw[:, :, 0, 0].T, vw[:, :, 0, 0].T],
                                  axis=1).astype(bf16)            # (256, 64)
    p["head_b"] = jnp.concatenate([pb, vb]).reshape(1, 64).astype(f32)
    p["policy_fc_w"], p["policy_fc_b"] = fc_w(tp["policy_fc"][0]), bias(tp["policy_fc"][1])
    p["value_fc1_w"], p["value_fc1_b"] = fc_w(tp["value_fc1"][0]), bias(tp["value_fc1"][1])
    p["value_fc2_w"] = tp["value_fc2"][0].astype(f32)             # (1, 256) f32 (VPU)
    p["value_fc2_b"] = bias(tp["value_fc2"][1])
    return p


# ----------------------------------------------------------------------------
# Pure-JAX f32 reference (mirrors the PyTorch module) -- validation only.
# ----------------------------------------------------------------------------
def reference_forward(tp, x_nchw):
    def conv3x3(x, w, b):
        y = jax.lax.conv_general_dilated(x, w, (1, 1), "SAME",
                                         dimension_numbers=("NCHW", "OIHW", "NCHW"))
        return jax.nn.relu(y + b[None, :, None, None])

    def conv1x1(x, w, b):
        y = jnp.einsum("bchw,oc->bohw", x, w[:, :, 0, 0]) + b[None, :, None, None]
        return jax.nn.relu(y)

    x = x_nchw.astype(jnp.float32)
    x = conv3x3(x, *tp["conv1"])
    x = conv3x3(x, *tp["conv2"])
    x = conv3x3(x, *tp["conv3"])

    pol = conv1x1(x, *tp["policy_conv"]).reshape(x.shape[0], -1)
    pol = pol @ tp["policy_fc"][0].T + tp["policy_fc"][1]
    pol = jax.nn.log_softmax(pol, axis=1)

    val = conv1x1(x, *tp["value_conv"]).reshape(x.shape[0], -1)
    val = jax.nn.relu(val @ tp["value_fc1"][0].T + tp["value_fc1"][1])
    val = jnp.tanh(val @ tp["value_fc2"][0].T + tp["value_fc2"][1])
    return pol, val


if __name__ == "__main__":
    key = jax.random.PRNGKey(0)
    pkey, xkey = jax.random.split(key)
    torch_params = init_torch_params(pkey)
    params = convert_params(torch_params)

    # Connect-4 boards: batch=2, 3 input planes, 6 rows x 7 cols (NCHW).
    x = jax.random.normal(xkey, (2, 3, BOARD_ROWS, BOARD_COLS), jnp.float32)

    fwd = jax.jit(connect4_forward)
    policy, value = fwd(params, x)
    jax.block_until_ready((policy, value))

    assert policy.shape == (2, BOARD_COLS)
    assert value.shape == (2, 1)
    # log_softmax rows must (log-)normalize to ~1.
    assert jnp.allclose(jnp.sum(jnp.exp(policy), axis=1), 1.0, atol=1e-4)
    # Cross-check vs a pure-JAX f32 reference (bf16 MXU operands => loose tol).
    ref_pol, ref_val = reference_forward(torch_params, x)
    assert jnp.allclose(policy, ref_pol, atol=0.1, rtol=0.1), \
        float(jnp.max(jnp.abs(policy - ref_pol)))
    assert jnp.allclose(value, ref_val, atol=0.1, rtol=0.1), \
        float(jnp.max(jnp.abs(value - ref_val)))

    print("KERNEL_OK")
</pallas_src>

<mosaic_0001>
module attributes {stable_mosaic.version = 11 : i64} {
  func.func @_connect4_kernel(%arg0: i32, %arg1: memref<84x3xf32, #tpu.memory_space<vmem>>, %arg2: memref<84x9xf32, #tpu.memory_space<vmem>>, %arg3: memref<27x64xbf16, #tpu.memory_space<vmem>>, %arg4: memref<1x64xf32, #tpu.memory_space<vmem>>, %arg5: memref<576x128xbf16, #tpu.memory_space<vmem>>, %arg6: memref<1x128xf32, #tpu.memory_space<vmem>>, %arg7: memref<1152x256xbf16, #tpu.memory_space<vmem>>, %arg8: memref<1x256xf32, #tpu.memory_space<vmem>>, %arg9: memref<256x64xbf16, #tpu.memory_space<vmem>>, %arg10: memref<1x64xf32, #tpu.memory_space<vmem>>, %arg11: memref<1344x7xbf16, #tpu.memory_space<vmem>>, %arg12: memref<1x7xf32, #tpu.memory_space<vmem>>, %arg13: memref<1344x256xbf16, #tpu.memory_space<vmem>>, %arg14: memref<1x256xf32, #tpu.memory_space<vmem>>, %arg15: memref<1x256xf32, #tpu.memory_space<vmem>>, %arg16: memref<1x1xf32, #tpu.memory_space<vmem>>, %arg17: memref<2x7xf32, #tpu.memory_space<vmem>>, %arg18: memref<2x1xf32, #tpu.memory_space<vmem>>, %arg19: memref<116x128xf32, #tpu.memory_space<vmem>>, %arg20: memref<2x1344xf32, #tpu.memory_space<vmem>>, %arg21: memref<2x1344xf32, #tpu.memory_space<vmem>>) attributes {dimension_semantics = [#tpu.dimension_semantics<parallel>], iteration_bounds = array<i64: 1>, scalar_prefetch = 0 : i64, scratch_operands = 3 : i64, tpu.core_type = #tpu.core_type<tc>, window_params = [{transform_indices = @transform_0, window_bounds = array<i64: 84, 3>}, {pipeline_mode = #tpu.pipeline_mode<synchronous>, transform_indices = @transform_1, window_bounds = array<i64: 84, 9>}, {pipeline_mode = #tpu.pipeline_mode<synchronous>, transform_indices = @transform_2, window_bounds = array<i64: 27, 64>}, {pipeline_mode = #tpu.pipeline_mode<synchronous>, transform_indices = @transform_3, window_bounds = array<i64: 1, 64>}, {pipeline_mode = #tpu.pipeline_mode<synchronous>, transform_indices = @transform_4, window_bounds = array<i64: 576, 128>}, {pipeline_mode = #tpu.pipeline_mode<synchronous>, transform_indices = @transform_5, window_bounds = array<i64: 1, 128>}, {pipeline_mode = #tpu.pipeline_mode<synchronous>, transform_indices = @transform_6, window_bounds = array<i64: 1152, 256>}, {pipeline_mode = #tpu.pipeline_mode<synchronous>, transform_indices = @transform_7, window_bounds = array<i64: 1, 256>}, {pipeline_mode = #tpu.pipeline_mode<synchronous>, transform_indices = @transform_8, window_bounds = array<i64: 256, 64>}, {pipeline_mode = #tpu.pipeline_mode<synchronous>, transform_indices = @transform_9, window_bounds = array<i64: 1, 64>}, {pipeline_mode = #tpu.pipeline_mode<synchronous>, transform_indices = @transform_10, window_bounds = array<i64: 1344, 7>}, {pipeline_mode = #tpu.pipeline_mode<synchronous>, transform_indices = @transform_11, window_bounds = array<i64: 1, 7>}, {pipeline_mode = #tpu.pipeline_mode<synchronous>, transform_indices = @transform_12, window_bounds = array<i64: 1344, 256>}, {pipeline_mode = #tpu.pipeline_mode<synchronous>, transform_indices = @transform_13, window_bounds = array<i64: 1, 256>}, {pipeline_mode = #tpu.pipeline_mode<synchronous>, transform_indices = @transform_14, window_bounds = array<i64: 1, 256>}, {pipeline_mode = #tpu.pipeline_mode<synchronous>, transform_indices = @transform_15, window_bounds = array<i64: 1, 1>}, {transform_indices = @transform_16, window_bounds = array<i64: 2, 7>}, {transform_indices = @transform_17, window_bounds = array<i64: 2, 1>}]} {
    %cst = arith.constant 0.000000e+00 : f32
    %0 = vector.broadcast %cst : f32 to vector<16x128xf32>
    %c0 = arith.constant 0 : index
    %c0_0 = arith.constant 0 : index
    %1 = vector.load %arg19[%c0, %c0_0] : memref<116x128xf32, #tpu.memory_space<vmem>>, vector<16x128xf32>
    tpu.vector_store %arg19[%c0, %c0_0], %0 {strides = array<i32>} : memref<116x128xf32, #tpu.memory_space<vmem>>, vector<16x128xf32>,
    %cst_1 = arith.constant 0.000000e+00 : f32
    %2 = vector.broadcast %cst_1 : f32 to vector<16x128xf32>
    %c100 = arith.constant 100 : index
    %c0_2 = arith.constant 0 : index
    %3 = vector.load %arg19[%c100, %c0_2] : memref<116x128xf32, #tpu.memory_space<vmem>>, vector<16x128xf32>
    tpu.vector_store %arg19[%c100, %c0_2], %2 {strides = array<i32>} : memref<116x128xf32, #tpu.memory_space<vmem>>, vector<16x128xf32>,
    %c0_3 = arith.constant 0 : index
    %c0_4 = arith.constant 0 : index
    %4 = vector.load %arg2[%c0_3, %c0_4] : memref<84x9xf32, #tpu.memory_space<vmem>>, vector<84x1xf32>
    %c0_5 = arith.constant 0 : index
    %c1 = arith.constant 1 : index
    %5 = vector.load %arg2[%c0_5, %c1] : memref<84x9xf32, #tpu.memory_space<vmem>>, vector<84x1xf32>
    %c0_6 = arith.constant 0 : index
    %c2 = arith.constant 2 : index
    %6 = vector.load %arg2[%c0_6, %c2] : memref<84x9xf32, #tpu.memory_space<vmem>>, vector<84x1xf32>
    %c0_7 = arith.constant 0 : index
    %c3 = arith.constant 3 : index
    %7 = vector.load %arg2[%c0_7, %c3] : memref<84x9xf32, #tpu.memory_space<vmem>>, vector<84x1xf32>
    %c0_8 = arith.constant 0 : index
    %c4 = arith.constant 4 : index
    %8 = vector.load %arg2[%c0_8, %c4] : memref<84x9xf32, #tpu.memory_space<vmem>>, vector<84x1xf32>
    %c0_9 = arith.constant 0 : index
    %c5 = arith.constant 5 : index
    %9 = vector.load %arg2[%c0_9, %c5] : memref<84x9xf32, #tpu.memory_space<vmem>>, vector<84x1xf32>
    %c0_10 = arith.constant 0 : index
    %c6 = arith.constant 6 : index
    %10 = vector.load %arg2[%c0_10, %c6] : memref<84x9xf32, #tpu.memory_space<vmem>>, vector<84x1xf32>
    %c0_11 = arith.constant 0 : index
    %c7 = arith.constant 7 : index
    %11 = vector.load %arg2[%c0_11, %c7] : memref<84x9xf32, #tpu.memory_space<vmem>>, vector<84x1xf32>
    %c0_12 = arith.constant 0 : index
    %c8 = arith.constant 8 : index
    %12 = vector.load %arg2[%c0_12, %c8] : memref<84x9xf32, #tpu.memory_space<vmem>>, vector<84x1xf32>
    %c0_13 = arith.constant 0 : index
    %c0_14 = arith.constant 0 : index
    %13 = vector.load %arg1[%c0_13, %c0_14] : memref<84x3xf32, #tpu.memory_space<vmem>>, vector<84x3xf32>
    %c16 = arith.constant 16 : index
    %c0_15 = arith.constant 0 : index
    %14 = vector.load %arg19[%c16, %c0_15] : memref<116x128xf32, #tpu.memory_space<vmem>>, vector<84x3xf32>
    tpu.vector_store %arg19[%c16, %c0_15], %13 {strides = array<i32>} : memref<116x128xf32, #tpu.memory_space<vmem>>, vector<84x3xf32>,
    %c0_16 = arith.constant 0 : index
    %c0_17 = arith.constant 0 : index
    %15 = vector.load %arg19[%c0_16, %c0_17] : memref<116x128xf32, #tpu.memory_space<vmem>>, vector<84x3xf32>
    %16 = vector.broadcast %4 : vector<84x1xf32> to vector<84x3xf32>
    %17 = arith.mulf %15, %16 : vector<84x3xf32>
    %c2_18 = arith.constant 2 : index
    %c0_19 = arith.constant 0 : index
    %18 = vector.load %arg19[%c2_18, %c0_19] : memref<116x128xf32, #tpu.memory_space<vmem>>, vector<84x3xf32>
    %19 = vector.broadcast %5 : vector<84x1xf32> to vector<84x3xf32>
    %20 = arith.mulf %18, %19 : vector<84x3xf32>
    %c4_20 = arith.constant 4 : index
    %c0_21 = arith.constant 0 : index
    %21 = vector.load %arg19[%c4_20, %c0_21] : memref<116x128xf32, #tpu.memory_space<vmem>>, vector<84x3xf32>
    %22 = vector.broadcast %6 : vector<84x1xf32> to vector<84x3xf32>
    %23 = arith.mulf %21, %22 : vector<84x3xf32>
    %c14 = arith.constant 14 : index
    %c0_22 = arith.constant 0 : index
    %24 = vector.load %arg19[%c14, %c0_22] : memref<116x128xf32, #tpu.memory_space<vmem>>, vector<84x3xf32>
    %25 = vector.broadcast %7 : vector<84x1xf32> to vector<84x3xf32>
    %26 = arith.mulf %24, %25 : vector<84x3xf32>
    %c16_23 = arith.constant 16 : index
    %c0_24 = arith.constant 0 : index
    %27 = vector.load %arg19[%c16_23, %c0_24] : memref<116x128xf32, #tpu.memory_space<vmem>>, vector<84x3xf32>
    %28 = vector.broadcast %8 : vector<84x1xf32> to vector<84x3xf32>
    %29 = arith.mulf %27, %28 : vector<84x3xf32>
    %c18 = arith.constant 18 : index
    %c0_25 = arith.constant 0 : index
    %30 = vector.load %arg19[%c18, %c0_25] : memref<116x128xf32, #tpu.memory_space<vmem>>, vector<84x3xf32>
    %31 = vector.broadcast %9 : vector<84x1xf32> to vector<84x3xf32>
    %32 = arith.mulf %30, %31 : vector<84x3xf32>
    %c28 = arith.constant 28 : index
    %c0_26 = arith.constant 0 : index
    %33 = vector.load %arg19[%c28, %c0_26] : memref<116x128xf32, #tpu.memory_space<vmem>>, vector<84x3xf32>
    %34 = vector.broadcast %10 : vector<84x1xf32> to vector<84x3xf32>
    %35 = arith.mulf %33, %34 : vector<84x3xf32>
    %c30 = arith.constant 30 : index
    %c0_27 = arith.constant 0 : index
    %36 = vector.load %arg19[%c30, %c0_27] : memref<116x128xf32, #tpu.memory_space<vmem>>, vector<84x3xf32>
    %37 = vector.broadcast %11 : vector<84x1xf32> to vector<84x3xf32>
    %38 = arith.mulf %36, %37 : vector<84x3xf32>
    %c32 = arith.constant 32 : index
    %c0_28 = arith.constant 0 : index
    %39 = vector.load %arg19[%c32, %c0_28] : memref<116x128xf32, #tpu.memory_space<vmem>>, vector<84x3xf32>
    %40 = vector.broadcast %12 : vector<84x1xf32> to vector<84x3xf32>
    %41 = arith.mulf %39, %40 : vector<84x3xf32>
    %42 = tpu.concatenate %17, %20, %23, %26, %29, %32, %35, %38, %41 in 1 : vector<84x3xf32>, vector<84x3xf32>, vector<84x3xf32>, vector<84x3xf32>, vector<84x3xf32>, vector<84x3xf32>, vector<84x3xf32>, vector<84x3xf32>, vector<84x3xf32> -> vector<84x27xf32>
    %43 = arith.truncf %42 : vector<84x27xf32> to vector<84x27xbf16>
    %c0_29 = arith.constant 0 : index
    %c0_30 = arith.constant 0 : index
    %44 = vector.load %arg3[%c0_29, %c0_30] : memref<27x64xbf16, #tpu.memory_space<vmem>>, vector<27x64xbf16>
    %cst_31 = arith.constant dense<0.000000e+00> : vector<84x64xf32>
    %45 = tpu.matmul %43, %44, %cst_31 {dimension_numbers = #tpu.dot_dimension_numbers<[1], [0], [0], [1], [0, 0, 1, 1], [], []>} : vector<84x27xbf16>, vector<27x64xbf16>, vector<84x64xf32> -> vector<84x64xf32>
    %c0_32 = arith.constant 0 : index
    %c0_33 = arith.constant 0 : index
    %46 = vector.load %arg4[%c0_32, %c0_33] : memref<1x64xf32, #tpu.memory_space<vmem>>, vector<1x64xf32>
    %47 = vector.broadcast %46 : vector<1x64xf32> to vector<84x64xf32>
    %48 = arith.addf %45, %47 : vector<84x64xf32>
    %cst_34 = arith.constant 0.000000e+00 : f32
    %49 = vector.broadcast %cst_34 : f32 to vector<84x64xf32>
    %50 = arith.maximumf %48, %49 : vector<84x64xf32>
    %c16_35 = arith.constant 16 : index
    %c0_36 = arith.constant 0 : index
    %51 = vector.load %arg19[%c16_35, %c0_36] : memref<116x128xf32, #tpu.memory_space<vmem>>, vector<84x64xf32>
    tpu.vector_store %arg19[%c16_35, %c0_36], %50 {strides = array<i32>} : memref<116x128xf32, #tpu.memory_space<vmem>>, vector<84x64xf32>,
    %c0_37 = arith.constant 0 : index
    %c0_38 = arith.constant 0 : index
    %52 = vector.load %arg19[%c0_37, %c0_38] : memref<116x128xf32, #tpu.memory_space<vmem>>, vector<84x64xf32>
    %53 = vector.broadcast %4 : vector<84x1xf32> to vector<84x64xf32>
    %54 = arith.mulf %52, %53 : vector<84x64xf32>
    %c2_39 = arith.constant 2 : index
    %c0_40 = arith.constant 0 : index
    %55 = vector.load %arg19[%c2_39, %c0_40] : memref<116x128xf32, #tpu.memory_space<vmem>>, vector<84x64xf32>
    %56 = vector.broadcast %5 : vector<84x1xf32> to vector<84x64xf32>
    %57 = arith.mulf %55, %56 : vector<84x64xf32>
    %c4_41 = arith.constant 4 : index
    %c0_42 = arith.constant 0 : index
    %58 = vector.load %arg19[%c4_41, %c0_42] : memref<116x128xf32, #tpu.memory_space<vmem>>, vector<84x64xf32>
    %59 = vector.broadcast %6 : vector<84x1xf32> to vector<84x64xf32>
    %60 = arith.mulf %58, %59 : vector<84x64xf32>
    %c14_43 = arith.constant 14 : index
    %c0_44 = arith.constant 0 : index
    %61 = vector.load %arg19[%c14_43, %c0_44] : memref<116x128xf32, #tpu.memory_space<vmem>>, vector<84x64xf32>
    %62 = vector.broadcast %7 : vector<84x1xf32> to vector<84x64xf32>
    %63 = arith.mulf %61, %62 : vector<84x64xf32>
    %c16_45 = arith.constant 16 : index
    %c0_46 = arith.constant 0 : index
    %64 = vector.load %arg19[%c16_45, %c0_46] : memref<116x128xf32, #tpu.memory_space<vmem>>, vector<84x64xf32>
    %65 = vector.broadcast %8 : vector<84x1xf32> to vector<84x64xf32>
    %66 = arith.mulf %64, %65 : vector<84x64xf32>
    %c18_47 = arith.constant 18 : index
    %c0_48 = arith.constant 0 : index
    %67 = vector.load %arg19[%c18_47, %c0_48] : memref<116x128xf32, #tpu.memory_space<vmem>>, vector<84x64xf32>
    %68 = vector.broadcast %9 : vector<84x1xf32> to vector<84x64xf32>
    %69 = arith.mulf %67, %68 : vector<84x64xf32>
    %c28_49 = arith.constant 28 : index
    %c0_50 = arith.constant 0 : index
    %70 = vector.load %arg19[%c28_49, %c0_50] : memref<116x128xf32, #tpu.memory_space<vmem>>, vector<84x64xf32>
    %71 = vector.broadcast %10 : vector<84x1xf32> to vector<84x64xf32>
    %72 = arith.mulf %70, %71 : vector<84x64xf32>
    %c30_51 = arith.constant 30 : index
    %c0_52 = arith.constant 0 : index
    %73 = vector.load %arg19[%c30_51, %c0_52] : memref<116x128xf32, #tpu.memory_space<vmem>>, vector<84x64xf32>
    %74 = vector.broadcast %11 : vector<84x1xf32> to vector<84x64xf32>
    %75 = arith.mulf %73, %74 : vector<84x64xf32>
    %c32_53 = arith.constant 32 : index
    %c0_54 = arith.constant 0 : index
    %76 = vector.load %arg19[%c32_53, %c0_54] : memref<116x128xf32, #tpu.memory_space<vmem>>, vector<84x64xf32>
    %77 = vector.broadcast %12 : vector<84x1xf32> to vector<84x64xf32>
    %78 = arith.mulf %76, %77 : vector<84x64xf32>
    %79 = tpu.concatenate %54, %57, %60, %63, %66, %69, %72, %75, %78 in 1 : vector<84x64xf32>, vector<84x64xf32>, vector<84x64xf32>, vector<84x64xf32>, vector<84x64xf32>, vector<84x64xf32>, vector<84x64xf32>, vector<84x64xf32>, vector<84x64xf32> -> vector<84x576xf32>
    %80 = arith.truncf %79 : vector<84x576xf32> to vector<84x576xbf16>
    %c0_55 = arith.constant 0 : index
    %c0_56 = arith.constant 0 : index
    %81 = vector.load %arg5[%c0_55, %c0_56] : memref<576x128xbf16, #tpu.memory_space<vmem>>, vector<576x128xbf16>
    %cst_57 = arith.constant dense<0.000000e+00> : vector<84x128xf32>
    %82 = tpu.matmul %80, %81, %cst_57 {dimension_numbers = #tpu.dot_dimension_numbers<[1], [0], [0], [1], [0, 0, 1, 1], [], []>} : vector<84x576xbf16>, vector<576x128xbf16>, vector<84x128xf32> -> vector<84x128xf32>
    %c0_58 = arith.constant 0 : index
    %c0_59 = arith.constant 0 : index
    %83 = vector.load %arg6[%c0_58, %c0_59] : memref<1x128xf32, #tpu.memory_space<vmem>>, vector<1x128xf32>
    %84 = vector.broadcast %83 : vector<1x128xf32> to vector<84x128xf32>
    %85 = arith.addf %82, %84 : vector<84x128xf32>
    %cst_60 = arith.constant 0.000000e+00 : f32
    %86 = vector.broadcast %cst_60 : f32 to vector<84x128xf32>
    %87 = arith.maximumf %85, %86 : vector<84x128xf32>
    %c16_61 = arith.constant 16 : index
    %c0_62 = arith.constant 0 : index
    %88 = vector.load %arg19[%c16_61, %c0_62] : memref<116x128xf32, #tpu.memory_space<vmem>>, vector<84x128xf32>
    tpu.vector_store %arg19[%c16_61, %c0_62], %87 {strides = array<i32>} : memref<116x128xf32, #tpu.memory_space<vmem>>, vector<84x128xf32>,
    %c0_63 = arith.constant 0 : index
    %c0_64 = arith.constant 0 : index
    %89 = vector.load %arg19[%c0_63, %c0_64] : memref<116x128xf32, #tpu.memory_space<vmem>>, vector<84x128xf32>
    %90 = vector.broadcast %4 : vector<84x1xf32> to vector<84x128xf32>
    %91 = arith.mulf %89, %90 : vector<84x128xf32>
    %c2_65 = arith.constant 2 : index
    %c0_66 = arith.constant 0 : index
    %92 = vector.load %arg19[%c2_65, %c0_66] : memref<116x128xf32, #tpu.memory_space<vmem>>, vector<84x128xf32>
    %93 = vector.broadcast %5 : vector<84x1xf32> to vector<84x128xf32>
    %94 = arith.mulf %92, %93 : vector<84x128xf32>
    %c4_67 = arith.constant 4 : index
    %c0_68 = arith.constant 0 : index
    %95 = vector.load %arg19[%c4_67, %c0_68] : memref<116x128xf32, #tpu.memory_space<vmem>>, vector<84x128xf32>
    %96 = vector.broadcast %6 : vector<84x1xf32> to vector<84x128xf32>
    %97 = arith.mulf %95, %96 : vector<84x128xf32>
    %c14_69 = arith.constant 14 : index
    %c0_70 = arith.constant 0 : index
    %98 = vector.load %arg19[%c14_69, %c0_70] : memref<116x128xf32, #tpu.memory_space<vmem>>, vector<84x128xf32>
    %99 = vector.broadcast %7 : vector<84x1xf32> to vector<84x128xf32>
    %100 = arith.mulf %98, %99 : vector<84x128xf32>
    %c16_71 = arith.constant 16 : index
    %c0_72 = arith.constant 0 : index
    %101 = vector.load %arg19[%c16_71, %c0_72] : memref<116x128xf32, #tpu.memory_space<vmem>>, vector<84x128xf32>
    %102 = vector.broadcast %8 : vector<84x1xf32> to vector<84x128xf32>
    %103 = arith.mulf %101, %102 : vector<84x128xf32>
    %c18_73 = arith.constant 18 : index
    %c0_74 = arith.constant 0 : index
    %104 = vector.load %arg19[%c18_73, %c0_74] : memref<116x128xf32, #tpu.memory_space<vmem>>, vector<84x128xf32>
    %105 = vector.broadcast %9 : vector<84x1xf32> to vector<84x128xf32>
    %106 = arith.mulf %104, %105 : vector<84x128xf32>
    %c28_75 = arith.constant 28 : index
    %c0_76 = arith.constant 0 : index
    %107 = vector.load %arg19[%c28_75, %c0_76] : memref<116x128xf32, #tpu.memory_space<vmem>>, vector<84x128xf32>
    %108 = vector.broadcast %10 : vector<84x1xf32> to vector<84x128xf32>
    %109 = arith.mulf %107, %108 : vector<84x128xf32>
    %c30_77 = arith.constant 30 : index
    %c0_78 = arith.constant 0 : index
    %110 = vector.load %arg19[%c30_77, %c0_78] : memref<116x128xf32, #tpu.memory_space<vmem>>, vector<84x128xf32>
    %111 = vector.broadcast %11 : vector<84x1xf32> to vector<84x128xf32>
    %112 = arith.mulf %110, %111 : vector<84x128xf32>
    %c32_79 = arith.constant 32 : index
    %c0_80 = arith.constant 0 : index
    %113 = vector.load %arg19[%c32_79, %c0_80] : memref<116x128xf32, #tpu.memory_space<vmem>>, vector<84x128xf32>
    %114 = vector.broadcast %12 : vector<84x1xf32> to vector<84x128xf32>
    %115 = arith.mulf %113, %114 : vector<84x128xf32>
    %116 = tpu.concatenate %91, %94, %97, %100, %103, %106, %109, %112, %115 in 1 : vector<84x128xf32>, vector<84x128xf32>, vector<84x128xf32>, vector<84x128xf32>, vector<84x128xf32>, vector<84x128xf32>, vector<84x128xf32>, vector<84x128xf32>, vector<84x128xf32> -> vector<84x1152xf32>
    %117 = arith.truncf %116 : vector<84x1152xf32> to vector<84x1152xbf16>
    %c0_81 = arith.constant 0 : index
    %c0_82 = arith.constant 0 : index
    %118 = vector.load %arg7[%c0_81, %c0_82] : memref<1152x256xbf16, #tpu.memory_space<vmem>>, vector<1152x256xbf16>
    %cst_83 = arith.constant dense<0.000000e+00> : vector<84x256xf32>
    %119 = tpu.matmul %117, %118, %cst_83 {dimension_numbers = #tpu.dot_dimension_numbers<[1], [0], [0], [1], [0, 0, 1, 1], [], []>} : vector<84x1152xbf16>, vector<1152x256xbf16>, vector<84x256xf32> -> vector<84x256xf32>
    %c0_84 = arith.constant 0 : index
    %c0_85 = arith.constant 0 : index
    %120 = vector.load %arg8[%c0_84, %c0_85] : memref<1x256xf32, #tpu.memory_space<vmem>>, vector<1x256xf32>
    %121 = vector.broadcast %120 : vector<1x256xf32> to vector<84x256xf32>
    %122 = arith.addf %119, %121 : vector<84x256xf32>
    %cst_86 = arith.constant 0.000000e+00 : f32
    %123 = vector.broadcast %cst_86 : f32 to vector<84x256xf32>
    %124 = arith.maximumf %122, %123 : vector<84x256xf32>
    %125 = arith.truncf %124 : vector<84x256xf32> to vector<84x256xbf16>
    %c0_87 = arith.constant 0 : index
    %c0_88 = arith.constant 0 : index
    %126 = vector.load %arg9[%c0_87, %c0_88] : memref<256x64xbf16, #tpu.memory_space<vmem>>, vector<256x64xbf16>
    %cst_89 = arith.constant dense<0.000000e+00> : vector<84x64xf32>
    %127 = tpu.matmul %125, %126, %cst_89 {dimension_numbers = #tpu.dot_dimension_numbers<[1], [0], [0], [1], [0, 0, 1, 1], [], []>} : vector<84x256xbf16>, vector<256x64xbf16>, vector<84x64xf32> -> vector<84x64xf32>
    %c0_90 = arith.constant 0 : index
    %c0_91 = arith.constant 0 : index
    %128 = vector.load %arg10[%c0_90, %c0_91] : memref<1x64xf32, #tpu.memory_space<vmem>>, vector<1x64xf32>
    %129 = vector.broadcast %128 : vector<1x64xf32> to vector<84x64xf32>
    %130 = arith.addf %127, %129 : vector<84x64xf32>
    %cst_92 = arith.constant 0.000000e+00 : f32
    %131 = vector.broadcast %cst_92 : f32 to vector<84x64xf32>
    %132 = arith.maximumf %130, %131 : vector<84x64xf32>
    %c16_93 = arith.constant 16 : index
    %c0_94 = arith.constant 0 : index
    %133 = vector.load %arg19[%c16_93, %c0_94] : memref<116x128xf32, #tpu.memory_space<vmem>>, vector<84x64xf32>
    tpu.vector_store %arg19[%c16_93, %c0_94], %132 {strides = array<i32>} : memref<116x128xf32, #tpu.memory_space<vmem>>, vector<84x64xf32>,
    %c16_95 = arith.constant 16 : index
    %c0_96 = arith.constant 0 : index
    %134 = vector.load %arg19[%c16_95, %c0_96] : memref<116x128xf32, #tpu.memory_space<vmem>>, vector<2x64xf32>
    %135 = vector.extract_strided_slice %134 {offsets = [0, 0], sizes = [2, 32], strides = [1, 1]} : vector<2x64xf32> to vector<2x32xf32>
    %c0_97 = arith.constant 0 : index
    %c0_98 = arith.constant 0 : index
    %136 = vector.load %arg20[%c0_97, %c0_98] : memref<2x1344xf32, #tpu.memory_space<vmem>>, vector<2x32xf32>
    tpu.vector_store %arg20[%c0_97, %c0_98], %135 {strides = array<i32>} : memref<2x1344xf32, #tpu.memory_space<vmem>>, vector<2x32xf32>,
    %137 = vector.extract_strided_slice %134 {offsets = [0, 32], sizes = [2, 32], strides = [1, 1]} : vector<2x64xf32> to vector<2x32xf32>
    %c0_99 = arith.constant 0 : index
    %c0_100 = arith.constant 0 : index
    %138 = vector.load %arg21[%c0_99, %c0_100] : memref<2x1344xf32, #tpu.memory_space<vmem>>, vector<2x32xf32>
    tpu.vector_store %arg21[%c0_99, %c0_100], %137 {strides = array<i32>} : memref<2x1344xf32, #tpu.memory_space<vmem>>, vector<2x32xf32>,
    %c18_101 = arith.constant 18 : index
    %c0_102 = arith.constant 0 : index
    %139 = vector.load %arg19[%c18_101, %c0_102] : memref<116x128xf32, #tpu.memory_space<vmem>>, vector<2x64xf32>
    %140 = vector.extract_strided_slice %139 {offsets = [0, 0], sizes = [2, 32], strides = [1, 1]} : vector<2x64xf32> to vector<2x32xf32>
    %c0_103 = arith.constant 0 : index
    %c32_104 = arith.constant 32 : index
    %141 = vector.load %arg20[%c0_103, %c32_104] : memref<2x1344xf32, #tpu.memory_space<vmem>>, vector<2x32xf32>
    tpu.vector_store %arg20[%c0_103, %c32_104], %140 {strides = array<i32>} : memref<2x1344xf32, #tpu.memory_space<vmem>>, vector<2x32xf32>,
    %142 = vector.extract_strided_slice %139 {offsets = [0, 32], sizes = [2, 32], strides = [1, 1]} : vector<2x64xf32> to vector<2x32xf32>
    %c0_105 = arith.constant 0 : index
    %c32_106 = arith.constant 32 : index
    %143 = vector.load %arg21[%c0_105, %c32_106] : memref<2x1344xf32, #tpu.memory_space<vmem>>, vector<2x32xf32>
    tpu.vector_store %arg21[%c0_105, %c32_106], %142 {strides = array<i32>} : memref<2x1344xf32, #tpu.memory_space<vmem>>, vector<2x32xf32>,
    %c20 = arith.constant 20 : index
    %c0_107 = arith.constant 0 : index
    %144 = vector.load %arg19[%c20, %c0_107] : memref<116x128xf32, #tpu.memory_space<vmem>>, vector<2x64xf32>
    %145 = vector.extract_strided_slice %144 {offsets = [0, 0], sizes = [2, 32], strides = [1, 1]} : vector<2x64xf32> to vector<2x32xf32>
    %c0_108 = arith.constant 0 : index
    %c64 = arith.constant 64 : index
    %146 = vector.load %arg20[%c0_108, %c64] : memref<2x1344xf32, #tpu.memory_space<vmem>>, vector<2x32xf32>
    tpu.vector_store %arg20[%c0_108, %c64], %145 {strides = array<i32>} : memref<2x1344xf32, #tpu.memory_space<vmem>>, vector<2x32xf32>,
    %147 = vector.extract_strided_slice %144 {offsets = [0, 32], sizes = [2, 32], strides = [1, 1]} : vector<2x64xf32> to vector<2x32xf32>
    %c0_109 = arith.constant 0 : index
    %c64_110 = arith.constant 64 : index
    %148 = vector.load %arg21[%c0_109, %c64_110] : memref<2x1344xf32, #tpu.memory_space<vmem>>, vector<2x32xf32>
    tpu.vector_store %arg21[%c0_109, %c64_110], %147 {strides = array<i32>} : memref<2x1344xf32, #tpu.memory_space<vmem>>, vector<2x32xf32>,
    %c22 = arith.constant 22 : index
    %c0_111 = arith.constant 0 : index
    %149 = vector.load %arg19[%c22, %c0_111] : memref<116x128xf32, #tpu.memory_space<vmem>>, vector<2x64xf32>
    %150 = vector.extract_strided_slice %149 {offsets = [0, 0], sizes = [2, 32], strides = [1, 1]} : vector<2x64xf32> to vector<2x32xf32>
    %c0_112 = arith.constant 0 : index
    %c96 = arith.constant 96 : index
    %151 = vector.load %arg20[%c0_112, %c96] : memref<2x1344xf32, #tpu.memory_space<vmem>>, vector<2x32xf32>
    tpu.vector_store %arg20[%c0_112, %c96], %150 {strides = array<i32>} : memref<2x1344xf32, #tpu.memory_space<vmem>>, vector<2x32xf32>,
    %152 = vector.extract_strided_slice %149 {offsets = [0, 32], sizes = [2, 32], strides = [1, 1]} : vector<2x64xf32> to vector<2x32xf32>
    %c0_113 = arith.constant 0 : index
    %c96_114 = arith.constant 96 : index
    %153 = vector.load %arg21[%c0_113, %c96_114] : memref<2x1344xf32, #tpu.memory_space<vmem>>, vector<2x32xf32>
    tpu.vector_store %arg21[%c0_113, %c96_114], %152 {strides = array<i32>} : memref<2x1344xf32, #tpu.memory_space<vmem>>, vector<2x32xf32>,
    %c24 = arith.constant 24 : index
    %c0_115 = arith.constant 0 : index
    %154 = vector.load %arg19[%c24, %c0_115] : memref<116x128xf32, #tpu.memory_space<vmem>>, vector<2x64xf32>
    %155 = vector.extract_strided_slice %154 {offsets = [0, 0], sizes = [2, 32], strides = [1, 1]} : vector<2x64xf32> to vector<2x32xf32>
    %c0_116 = arith.constant 0 : index
    %c128 = arith.constant 128 : index
    %156 = vector.load %arg20[%c0_116, %c128] : memref<2x1344xf32, #tpu.memory_space<vmem>>, vector<2x32xf32>
    tpu.vector_store %arg20[%c0_116, %c128], %155 {strides = array<i32>} : memref<2x1344xf32, #tpu.memory_space<vmem>>, vector<2x32xf32>,
    %157 = vector.extract_strided_slice %154 {offsets = [0, 32], sizes = [2, 32], strides = [1, 1]} : vector<2x64xf32> to vector<2x32xf32>
    %c0_117 = arith.constant 0 : index
    %c128_118 = arith.constant 128 : index
    %158 = vector.load %arg21[%c0_117, %c128_118] : memref<2x1344xf32, #tpu.memory_space<vmem>>, vector<2x32xf32>
    tpu.vector_store %arg21[%c0_117, %c128_118], %157 {strides = array<i32>} : memref<2x1344xf32, #tpu.memory_space<vmem>>, vector<2x32xf32>,
    %c26 = arith.constant 26 : index
    %c0_119 = arith.constant 0 : index
    %159 = vector.load %arg19[%c26, %c0_119] : memref<116x128xf32, #tpu.memory_space<vmem>>, vector<2x64xf32>
    %160 = vector.extract_strided_slice %159 {offsets = [0, 0], sizes = [2, 32], strides = [1, 1]} : vector<2x64xf32> to vector<2x32xf32>
    %c0_120 = arith.constant 0 : index
    %c160 = arith.constant 160 : index
    %161 = vector.load %arg20[%c0_120, %c160] : memref<2x1344xf32, #tpu.memory_space<vmem>>, vector<2x32xf32>
    tpu.vector_store %arg20[%c0_120, %c160], %160 {strides = array<i32>} : memref<2x1344xf32, #tpu.memory_space<vmem>>, vector<2x32xf32>,
    %162 = vector.extract_strided_slice %159 {offsets = [0, 32], sizes = [2, 32], strides = [1, 1]} : vector<2x64xf32> to vector<2x32xf32>
    %c0_121 = arith.constant 0 : index
    %c160_122 = arith.constant 160 : index
    %163 = vector.load %arg21[%c0_121, %c160_122] : memref<2x1344xf32, #tpu.memory_space<vmem>>, vector<2x32xf32>
    tpu.vector_store %arg21[%c0_121, %c160_122], %162 {strides = array<i32>} : memref<2x1344xf32, #tpu.memory_space<vmem>>, vector<2x32xf32>,
    %c28_123 = arith.constant 28 : index
    %c0_124 = arith.constant 0 : index
    %164 = vector.load %arg19[%c28_123, %c0_124] : memref<116x128xf32, #tpu.memory_space<vmem>>, vector<2x64xf32>
    %165 = vector.extract_strided_slice %164 {offsets = [0, 0], sizes = [2, 32], strides = [1, 1]} : vector<2x64xf32> to vector<2x32xf32>
    %c0_125 = arith.constant 0 : index
    %c192 = arith.constant 192 : index
    %166 = vector.load %arg20[%c0_125, %c192] : memref<2x1344xf32, #tpu.memory_space<vmem>>, vector<2x32xf32>
    tpu.vector_store %arg20[%c0_125, %c192], %165 {strides = array<i32>} : memref<2x1344xf32, #tpu.memory_space<vmem>>, vector<2x32xf32>,
    %167 = vector.extract_strided_slice %164 {offsets = [0, 32], sizes = [2, 32], strides = [1, 1]} : vector<2x64xf32> to vector<2x32xf32>
    %c0_126 = arith.constant 0 : index
    %c192_127 = arith.constant 192 : index
    %168 = vector.load %arg21[%c0_126, %c192_127] : memref<2x1344xf32, #tpu.memory_space<vmem>>, vector<2x32xf32>
    tpu.vector_store %arg21[%c0_126, %c192_127], %167 {strides = array<i32>} : memref<2x1344xf32, #tpu.memory_space<vmem>>, vector<2x32xf32>,
    %c30_128 = arith.constant 30 : index
    %c0_129 = arith.constant 0 : index
    %169 = vector.load %arg19[%c30_128, %c0_129] : memref<116x128xf32, #tpu.memory_space<vmem>>, vector<2x64xf32>
    %170 = vector.extract_strided_slice %169 {offsets = [0, 0], sizes = [2, 32], strides = [1, 1]} : vector<2x64xf32> to vector<2x32xf32>
    %c0_130 = arith.constant 0 : index
    %c224 = arith.constant 224 : index
    %171 = vector.load %arg20[%c0_130, %c224] : memref<2x1344xf32, #tpu.memory_space<vmem>>, vector<2x32xf32>
    tpu.vector_store %arg20[%c0_130, %c224], %170 {strides = array<i32>} : memref<2x1344xf32, #tpu.memory_space<vmem>>, vector<2x32xf32>,
    %172 = vector.extract_strided_slice %169 {offsets = [0, 32], sizes = [2, 32], strides = [1, 1]} : vector<2x64xf32> to vector<2x32xf32>
    %c0_131 = arith.constant 0 : index
    %c224_132 = arith.constant 224 : index
    %173 = vector.load %arg21[%c0_131, %c224_132] : memref<2x1344xf32, #tpu.memory_space<vmem>>, vector<2x32xf32>
    tpu.vector_store %arg21[%c0_131, %c224_132], %172 {strides = array<i32>} : memref<2x1344xf32, #tpu.memory_space<vmem>>, vector<2x32xf32>,
    %c32_133 = arith.constant 32 : index
    %c0_134 = arith.constant 0 : index
    %174 = vector.load %arg19[%c32_133, %c0_134] : memref<116x128xf32, #tpu.memory_space<vmem>>, vector<2x64xf32>
    %175 = vector.extract_strided_slice %174 {offsets = [0, 0], sizes = [2, 32], strides = [1, 1]} : vector<2x64xf32> to vector<2x32xf32>
    %c0_135 = arith.constant 0 : index
    %c256 = arith.constant 256 : index
    %176 = vector.load %arg20[%c0_135, %c256] : memref<2x1344xf32, #tpu.memory_space<vmem>>, vector<2x32xf32>
    tpu.vector_store %arg20[%c0_135, %c256], %175 {strides = array<i32>} : memref<2x1344xf32, #tpu.memory_space<vmem>>, vector<2x32xf32>,
    %177 = vector.extract_strided_slice %174 {offsets = [0, 32], sizes = [2, 32], strides = [1, 1]} : vector<2x64xf32> to vector<2x32xf32>
    %c0_136 = arith.constant 0 : index
    %c256_137 = arith.constant 256 : index
    %178 = vector.load %arg21[%c0_136, %c256_137] : memref<2x1344xf32, #tpu.memory_space<vmem>>, vector<2x32xf32>
    tpu.vector_store %arg21[%c0_136, %c256_137], %177 {strides = array<i32>} : memref<2x1344xf32, #tpu.memory_space<vmem>>, vector<2x32xf32>,
    %c34 = arith.constant 34 : index
    %c0_138 = arith.constant 0 : index
    %179 = vector.load %arg19[%c34, %c0_138] : memref<116x128xf32, #tpu.memory_space<vmem>>, vector<2x64xf32>
    %180 = vector.extract_strided_slice %179 {offsets = [0, 0], sizes = [2, 32], strides = [1, 1]} : vector<2x64xf32> to vector<2x32xf32>
    %c0_139 = arith.constant 0 : index
    %c288 = arith.constant 288 : index
    %181 = vector.load %arg20[%c0_139, %c288] : memref<2x1344xf32, #tpu.memory_space<vmem>>, vector<2x32xf32>
    tpu.vector_store %arg20[%c0_139, %c288], %180 {strides = array<i32>} : memref<2x1344xf32, #tpu.memory_space<vmem>>, vector<2x32xf32>,
    %182 = vector.extract_strided_slice %179 {offsets = [0, 32], sizes = [2, 32], strides = [1, 1]} : vector<2x64xf32> to vector<2x32xf32>
    %c0_140 = arith.constant 0 : index
    %c288_141 = arith.constant 288 : index
    %183 = vector.load %arg21[%c0_140, %c288_141] : memref<2x1344xf32, #tpu.memory_space<vmem>>, vector<2x32xf32>
    tpu.vector_store %arg21[%c0_140, %c288_141], %182 {strides = array<i32>} : memref<2x1344xf32, #tpu.memory_space<vmem>>, vector<2x32xf32>,
    %c36 = arith.constant 36 : index
    %c0_142 = arith.constant 0 : index
    %184 = vector.load %arg19[%c36, %c0_142] : memref<116x128xf32, #tpu.memory_space<vmem>>, vector<2x64xf32>
    %185 = vector.extract_strided_slice %184 {offsets = [0, 0], sizes = [2, 32], strides = [1, 1]} : vector<2x64xf32> to vector<2x32xf32>
    %c0_143 = arith.constant 0 : index
    %c320 = arith.constant 320 : index
    %186 = vector.load %arg20[%c0_143, %c320] : memref<2x1344xf32, #tpu.memory_space<vmem>>, vector<2x32xf32>
    tpu.vector_store %arg20[%c0_143, %c320], %185 {strides = array<i32>} : memref<2x1344xf32, #tpu.memory_space<vmem>>, vector<2x32xf32>,
    %187 = vector.extract_strided_slice %184 {offsets = [0, 32], sizes = [2, 32], strides = [1, 1]} : vector<2x64xf32> to vector<2x32xf32>
    %c0_144 = arith.constant 0 : index
    %c320_145 = arith.constant 320 : index
    %188 = vector.load %arg21[%c0_144, %c320_145] : memref<2x1344xf32, #tpu.memory_space<vmem>>, vector<2x32xf32>
    tpu.vector_store %arg21[%c0_144, %c320_145], %187 {strides = array<i32>} : memref<2x1344xf32, #tpu.memory_space<vmem>>, vector<2x32xf32>,
    %c38 = arith.constant 38 : index
    %c0_146 = arith.constant 0 : index
    %189 = vector.load %arg19[%c38, %c0_146] : memref<116x128xf32, #tpu.memory_space<vmem>>, vector<2x64xf32>
    %190 = vector.extract_strided_slice %189 {offsets = [0, 0], sizes = [2, 32], strides = [1, 1]} : vector<2x64xf32> to vector<2x32xf32>
    %c0_147 = arith.constant 0 : index
    %c352 = arith.constant 352 : index
    %191 = vector.load %arg20[%c0_147, %c352] : memref<2x1344xf32, #tpu.memory_space<vmem>>, vector<2x32xf32>
    tpu.vector_store %arg20[%c0_147, %c352], %190 {strides = array<i32>} : memref<2x1344xf32, #tpu.memory_space<vmem>>, vector<2x32xf32>,
    %192 = vector.extract_strided_slice %189 {offsets = [0, 32], sizes = [2, 32], strides = [1, 1]} : vector<2x64xf32> to vector<2x32xf32>
    %c0_148 = arith.constant 0 : index
    %c352_149 = arith.constant 352 : index
    %193 = vector.load %arg21[%c0_148, %c352_149] : memref<2x1344xf32, #tpu.memory_space<vmem>>, vector<2x32xf32>
    tpu.vector_store %arg21[%c0_148, %c352_149], %192 {strides = array<i32>} : memref<2x1344xf32, #tpu.memory_space<vmem>>, vector<2x32xf32>,
    %c40 = arith.constant 40 : index
    %c0_150 = arith.constant 0 : index
    %194 = vector.load %arg19[%c40, %c0_150] : memref<116x128xf32, #tpu.memory_space<vmem>>, vector<2x64xf32>
    %195 = vector.extract_strided_slice %194 {offsets = [0, 0], sizes = [2, 32], strides = [1, 1]} : vector<2x64xf32> to vector<2x32xf32>
    %c0_151 = arith.constant 0 : index
    %c384 = arith.constant 384 : index
    %196 = vector.load %arg20[%c0_151, %c384] : memref<2x1344xf32, #tpu.memory_space<vmem>>, vector<2x32xf32>
    tpu.vector_store %arg20[%c0_151, %c384], %195 {strides = array<i32>} : memref<2x1344xf32, #tpu.memory_space<vmem>>, vector<2x32xf32>,
    %197 = vector.extract_strided_slice %194 {offsets = [0, 32], sizes = [2, 32], strides = [1, 1]} : vector<2x64xf32> to vector<2x32xf32>
    %c0_152 = arith.constant 0 : index
    %c384_153 = arith.constant 384 : index
    %198 = vector.load %arg21[%c0_152, %c384_153] : memref<2x1344xf32, #tpu.memory_space<vmem>>, vector<2x32xf32>
    tpu.vector_store %arg21[%c0_152, %c384_153], %197 {strides = array<i32>} : memref<2x1344xf32, #tpu.memory_space<vmem>>, vector<2x32xf32>,
    %c42 = arith.constant 42 : index
    %c0_154 = arith.constant 0 : index
    %199 = vector.load %arg19[%c42, %c0_154] : memref<116x128xf32, #tpu.memory_space<vmem>>, vector<2x64xf32>
    %200 = vector.extract_strided_slice %199 {offsets = [0, 0], sizes = [2, 32], strides = [1, 1]} : vector<2x64xf32> to vector<2x32xf32>
    %c0_155 = arith.constant 0 : index
    %c416 = arith.constant 416 : index
    %201 = vector.load %arg20[%c0_155, %c416] : memref<2x1344xf32, #tpu.memory_space<vmem>>, vector<2x32xf32>
    tpu.vector_store %arg20[%c0_155, %c416], %200 {strides = array<i32>} : memref<2x1344xf32, #tpu.memory_space<vmem>>, vector<2x32xf32>,
    %202 = vector.extract_strided_slice %199 {offsets = [0, 32], sizes = [2, 32], strides = [1, 1]} : vector<2x64xf32> to vector<2x32xf32>
    %c0_156 = arith.constant 0 : index
    %c416_157 = arith.constant 416 : index
    %203 = vector.load %arg21[%c0_156, %c416_157] : memref<2x1344xf32, #tpu.memory_space<vmem>>, vector<2x32xf32>
    tpu.vector_store %arg21[%c0_156, %c416_157], %202 {strides = array<i32>} : memref<2x1344xf32, #tpu.memory_space<vmem>>, vector<2x32xf32>,
    %c44 = arith.constant 44 : index
    %c0_158 = arith.constant 0 : index
    %204 = vector.load %arg19[%c44, %c0_158] : memref<116x128xf32, #tpu.memory_space<vmem>>, vector<2x64xf32>
    %205 = vector.extract_strided_slice %204 {offsets = [0, 0], sizes = [2, 32], strides = [1, 1]} : vector<2x64xf32> to vector<2x32xf32>
    %c0_159 = arith.constant 0 : index
    %c448 = arith.constant 448 : index
    %206 = vector.load %arg20[%c0_159, %c448] : memref<2x1344xf32, #tpu.memory_space<vmem>>, vector<2x32xf32>
    tpu.vector_store %arg20[%c0_159, %c448], %205 {strides = array<i32>} : memref<2x1344xf32, #tpu.memory_space<vmem>>, vector<2x32xf32>,
    %207 = vector.extract_strided_slice %204 {offsets = [0, 32], sizes = [2, 32], strides = [1, 1]} : vector<2x64xf32> to vector<2x32xf32>
    %c0_160 = arith.constant 0 : index
    %c448_161 = arith.constant 448 : index
    %208 = vector.load %arg21[%c0_160, %c448_161] : memref<2x1344xf32, #tpu.memory_space<vmem>>, vector<2x32xf32>
    tpu.vector_store %arg21[%c0_160, %c448_161], %207 {strides = array<i32>} : memref<2x1344xf32, #tpu.memory_space<vmem>>, vector<2x32xf32>,
    %c46 = arith.constant 46 : index
    %c0_162 = arith.constant 0 : index
    %209 = vector.load %arg19[%c46, %c0_162] : memref<116x128xf32, #tpu.memory_space<vmem>>, vector<2x64xf32>
    %210 = vector.extract_strided_slice %209 {offsets = [0, 0], sizes = [2, 32], strides = [1, 1]} : vector<2x64xf32> to vector<2x32xf32>
    %c0_163 = arith.constant 0 : index
    %c480 = arith.constant 480 : index
    %211 = vector.load %arg20[%c0_163, %c480] : memref<2x1344xf32, #tpu.memory_space<vmem>>, vector<2x32xf32>
    tpu.vector_store %arg20[%c0_163, %c480], %210 {strides = array<i32>} : memref<2x1344xf32, #tpu.memory_space<vmem>>, vector<2x32xf32>,
    %212 = vector.extract_strided_slice %209 {offsets = [0, 32], sizes = [2, 32], strides = [1, 1]} : vector<2x64xf32> to vector<2x32xf32>
    %c0_164 = arith.constant 0 : index
    %c480_165 = arith.constant 480 : index
    %213 = vector.load %arg21[%c0_164, %c480_165] : memref<2x1344xf32, #tpu.memory_space<vmem>>, vector<2x32xf32>
    tpu.vector_store %arg21[%c0_164, %c480_165], %212 {strides = array<i32>} : memref<2x1344xf32, #tpu.memory_space<vmem>>, vector<2x32xf32>,
    %c48 = arith.constant 48 : index
    %c0_166 = arith.constant 0 : index
    %214 = vector.load %arg19[%c48, %c0_166] : memref<116x128xf32, #tpu.memory_space<vmem>>, vector<2x64xf32>
    %215 = vector.extract_strided_slice %214 {offsets = [0, 0], sizes = [2, 32], strides = [1, 1]} : vector<2x64xf32> to vector<2x32xf32>
    %c0_167 = arith.constant 0 : index
    %c512 = arith.constant 512 : index
    %216 = vector.load %arg20[%c0_167, %c512] : memref<2x1344xf32, #tpu.memory_space<vmem>>, vector<2x32xf32>
    tpu.vector_store %arg20[%c0_167, %c512], %215 {strides = array<i32>} : memref<2x1344xf32, #tpu.memory_space<vmem>>, vector<2x32xf32>,
    %217 = vector.extract_strided_slice %214 {offsets = [0, 32], sizes = [2, 32], strides = [1, 1]} : vector<2x64xf32> to vector<2x32xf32>
    %c0_168 = arith.constant 0 : index
    %c512_169 = arith.constant 512 : index
    %218 = vector.load %arg21[%c0_168, %c512_169] : memref<2x1344xf32, #tpu.memory_space<vmem>>, vector<2x32xf32>
    tpu.vector_store %arg21[%c0_168, %c512_169], %217 {strides = array<i32>} : memref<2x1344xf32, #tpu.memory_space<vmem>>, vector<2x32xf32>,
    %c50 = arith.constant 50 : index
    %c0_170 = arith.constant 0 : index
    %219 = vector.load %arg19[%c50, %c0_170] : memref<116x128xf32, #tpu.memory_space<vmem>>, vector<2x64xf32>
    %220 = vector.extract_strided_slice %219 {offsets = [0, 0], sizes = [2, 32], strides = [1, 1]} : vector<2x64xf32> to vector<2x32xf32>
    %c0_171 = arith.constant 0 : index
    %c544 = arith.constant 544 : index
    %221 = vector.load %arg20[%c0_171, %c544] : memref<2x1344xf32, #tpu.memory_space<vmem>>, vector<2x32xf32>
    tpu.vector_store %arg20[%c0_171, %c544], %220 {strides = array<i32>} : memref<2x1344xf32, #tpu.memory_space<vmem>>, vector<2x32xf32>,
    %222 = vector.extract_strided_slice %219 {offsets = [0, 32], sizes = [2, 32], strides = [1, 1]} : vector<2x64xf32> to vector<2x32xf32>
    %c0_172 = arith.constant 0 : index
    %c544_173 = arith.constant 544 : index
    %223 = vector.load %arg21[%c0_172, %c544_173] : memref<2x1344xf32, #tpu.memory_space<vmem>>, vector<2x32xf32>
    tpu.vector_store %arg21[%c0_172, %c544_173], %222 {strides = array<i32>} : memref<2x1344xf32, #tpu.memory_space<vmem>>, vector<2x32xf32>,
    %c52 = arith.constant 52 : index
    %c0_174 = arith.constant 0 : index
    %224 = vector.load %arg19[%c52, %c0_174] : memref<116x128xf32, #tpu.memory_space<vmem>>, vector<2x64xf32>
    %225 = vector.extract_strided_slice %224 {offsets = [0, 0], sizes = [2, 32], strides = [1, 1]} : vector<2x64xf32> to vector<2x32xf32>
    %c0_175 = arith.constant 0 : index
    %c576 = arith.constant 576 : index
    %226 = vector.load %arg20[%c0_175, %c576] : memref<2x1344xf32, #tpu.memory_space<vmem>>, vector<2x32xf32>
    tpu.vector_store %arg20[%c0_175, %c576], %225 {strides = array<i32>} : memref<2x1344xf32, #tpu.memory_space<vmem>>, vector<2x32xf32>,
    %227 = vector.extract_strided_slice %224 {offsets = [0, 32], sizes = [2, 32], strides = [1, 1]} : vector<2x64xf32> to vector<2x32xf32>
    %c0_176 = arith.constant 0 : index
    %c576_177 = arith.constant 576 : index
    %228 = vector.load %arg21[%c0_176, %c576_177] : memref<2x1344xf32, #tpu.memory_space<vmem>>, vector<2x32xf32>
    tpu.vector_store %arg21[%c0_176, %c576_177], %227 {strides = array<i32>} : memref<2x1344xf32, #tpu.memory_space<vmem>>, vector<2x32xf32>,
    %c54 = arith.constant 54 : index
    %c0_178 = arith.constant 0 : index
    %229 = vector.load %arg19[%c54, %c0_178] : memref<116x128xf32, #tpu.memory_space<vmem>>, vector<2x64xf32>
    %230 = vector.extract_strided_slice %229 {offsets = [0, 0], sizes = [2, 32], strides = [1, 1]} : vector<2x64xf32> to vector<2x32xf32>
    %c0_179 = arith.constant 0 : index
    %c608 = arith.constant 608 : index
    %231 = vector.load %arg20[%c0_179, %c608] : memref<2x1344xf32, #tpu.memory_space<vmem>>, vector<2x32xf32>
    tpu.vector_store %arg20[%c0_179, %c608], %230 {strides = array<i32>} : memref<2x1344xf32, #tpu.memory_space<vmem>>, vector<2x32xf32>,
    %232 = vector.extract_strided_slice %229 {offsets = [0, 32], sizes = [2, 32], strides = [1, 1]} : vector<2x64xf32> to vector<2x32xf32>
    %c0_180 = arith.constant 0 : index
    %c608_181 = arith.constant 608 : index
    %233 = vector.load %arg21[%c0_180, %c608_181] : memref<2x1344xf32, #tpu.memory_space<vmem>>, vector<2x32xf32>
    tpu.vector_store %arg21[%c0_180, %c608_181], %232 {strides = array<i32>} : memref<2x1344xf32, #tpu.memory_space<vmem>>, vector<2x32xf32>,
    %c56 = arith.constant 56 : index
    %c0_182 = arith.constant 0 : index
    %234 = vector.load %arg19[%c56, %c0_182] : memref<116x128xf32, #tpu.memory_space<vmem>>, vector<2x64xf32>
    %235 = vector.extract_strided_slice %234 {offsets = [0, 0], sizes = [2, 32], strides = [1, 1]} : vector<2x64xf32> to vector<2x32xf32>
    %c0_183 = arith.constant 0 : index
    %c640 = arith.constant 640 : index
    %236 = vector.load %arg20[%c0_183, %c640] : memref<2x1344xf32, #tpu.memory_space<vmem>>, vector<2x32xf32>
    tpu.vector_store %arg20[%c0_183, %c640], %235 {strides = array<i32>} : memref<2x1344xf32, #tpu.memory_space<vmem>>, vector<2x32xf32>,
    %237 = vector.extract_strided_slice %234 {offsets = [0, 32], sizes = [2, 32], strides = [1, 1]} : vector<2x64xf32> to vector<2x32xf32>
    %c0_184 = arith.constant 0 : index
    %c640_185 = arith.constant 640 : index
    %238 = vector.load %arg21[%c0_184, %c640_185] : memref<2x1344xf32, #tpu.memory_space<vmem>>, vector<2x32xf32>
    tpu.vector_store %arg21[%c0_184, %c640_185], %237 {strides = array<i32>} : memref<2x1344xf32, #tpu.memory_space<vmem>>, vector<2x32xf32>,
    %c58 = arith.constant 58 : index
    %c0_186 = arith.constant 0 : index
    %239 = vector.load %arg19[%c58, %c0_186] : memref<116x128xf32, #tpu.memory_space<vmem>>, vector<2x64xf32>
    %240 = vector.extract_strided_slice %239 {offsets = [0, 0], sizes = [2, 32], strides = [1, 1]} : vector<2x64xf32> to vector<2x32xf32>
    %c0_187 = arith.constant 0 : index
    %c672 = arith.constant 672 : index
    %241 = vector.load %arg20[%c0_187, %c672] : memref<2x1344xf32, #tpu.memory_space<vmem>>, vector<2x32xf32>
    tpu.vector_store %arg20[%c0_187, %c672], %240 {strides = array<i32>} : memref<2x1344xf32, #tpu.memory_space<vmem>>, vector<2x32xf32>,
    %242 = vector.extract_strided_slice %239 {offsets = [0, 32], sizes = [2, 32], strides = [1, 1]} : vector<2x64xf32> to vector<2x32xf32>
    %c0_188 = arith.constant 0 : index
    %c672_189 = arith.constant 672 : index
    %243 = vector.load %arg21[%c0_188, %c672_189] : memref<2x1344xf32, #tpu.memory_space<vmem>>, vector<2x32xf32>
    tpu.vector_store %arg21[%c0_188, %c672_189], %242 {strides = array<i32>} : memref<2x1344xf32, #tpu.memory_space<vmem>>, vector<2x32xf32>,
    %c60 = arith.constant 60 : index
    %c0_190 = arith.constant 0 : index
    %244 = vector.load %arg19[%c60, %c0_190] : memref<116x128xf32, #tpu.memory_space<vmem>>, vector<2x64xf32>
    %245 = vector.extract_strided_slice %244 {offsets = [0, 0], sizes = [2, 32], strides = [1, 1]} : vector<2x64xf32> to vector<2x32xf32>
    %c0_191 = arith.constant 0 : index
    %c704 = arith.constant 704 : index
    %246 = vector.load %arg20[%c0_191, %c704] : memref<2x1344xf32, #tpu.memory_space<vmem>>, vector<2x32xf32>
    tpu.vector_store %arg20[%c0_191, %c704], %245 {strides = array<i32>} : memref<2x1344xf32, #tpu.memory_space<vmem>>, vector<2x32xf32>,
    %247 = vector.extract_strided_slice %244 {offsets = [0, 32], sizes = [2, 32], strides = [1, 1]} : vector<2x64xf32> to vector<2x32xf32>
    %c0_192 = arith.constant 0 : index
    %c704_193 = arith.constant 704 : index
    %248 = vector.load %arg21[%c0_192, %c704_193] : memref<2x1344xf32, #tpu.memory_space<vmem>>, vector<2x32xf32>
    tpu.vector_store %arg21[%c0_192, %c704_193], %247 {strides = array<i32>} : memref<2x1344xf32, #tpu.memory_space<vmem>>, vector<2x32xf32>,
    %c62 = arith.constant 62 : index
    %c0_194 = arith.constant 0 : index
    %249 = vector.load %arg19[%c62, %c0_194] : memref<116x128xf32, #tpu.memory_space<vmem>>, vector<2x64xf32>
    %250 = vector.extract_strided_slice %249 {offsets = [0, 0], sizes = [2, 32], strides = [1, 1]} : vector<2x64xf32> to vector<2x32xf32>
    %c0_195 = arith.constant 0 : index
    %c736 = arith.constant 736 : index
    %251 = vector.load %arg20[%c0_195, %c736] : memref<2x1344xf32, #tpu.memory_space<vmem>>, vector<2x32xf32>
    tpu.vector_store %arg20[%c0_195, %c736], %250 {strides = array<i32>} : memref<2x1344xf32, #tpu.memory_space<vmem>>, vector<2x32xf32>,
    %252 = vector.extract_strided_slice %249 {offsets = [0, 32], sizes = [2, 32], strides = [1, 1]} : vector<2x64xf32> to vector<2x32xf32>
    %c0_196 = arith.constant 0 : index
    %c736_197 = arith.constant 736 : index
    %253 = vector.load %arg21[%c0_196, %c736_197] : memref<2x1344xf32, #tpu.memory_space<vmem>>, vector<2x32xf32>
    tpu.vector_store %arg21[%c0_196, %c736_197], %252 {strides = array<i32>} : memref<2x1344xf32, #tpu.memory_space<vmem>>, vector<2x32xf32>,
    %c64_198 = arith.constant 64 : index
    %c0_199 = arith.constant 0 : index
    %254 = vector.load %arg19[%c64_198, %c0_199] : memref<116x128xf32, #tpu.memory_space<vmem>>, vector<2x64xf32>
    %255 = vector.extract_strided_slice %254 {offsets = [0, 0], sizes = [2, 32], strides = [1, 1]} : vector<2x64xf32> to vector<2x32xf32>
    %c0_200 = arith.constant 0 : index
    %c768 = arith.constant 768 : index
    %256 = vector.load %arg20[%c0_200, %c768] : memref<2x1344xf32, #tpu.memory_space<vmem>>, vector<2x32xf32>
    tpu.vector_store %arg20[%c0_200, %c768], %255 {strides = array<i32>} : memref<2x1344xf32, #tpu.memory_space<vmem>>, vector<2x32xf32>,
    %257 = vector.extract_strided_slice %254 {offsets = [0, 32], sizes = [2, 32], strides = [1, 1]} : vector<2x64xf32> to vector<2x32xf32>
    %c0_201 = arith.constant 0 : index
    %c768_202 = arith.constant 768 : index
    %258 = vector.load %arg21[%c0_201, %c768_202] : memref<2x1344xf32, #tpu.memory_space<vmem>>, vector<2x32xf32>
    tpu.vector_store %arg21[%c0_201, %c768_202], %257 {strides = array<i32>} : memref<2x1344xf32, #tpu.memory_space<vmem>>, vector<2x32xf32>,
    %c66 = arith.constant 66 : index
    %c0_203 = arith.constant 0 : index
    %259 = vector.load %arg19[%c66, %c0_203] : memref<116x128xf32, #tpu.memory_space<vmem>>, vector<2x64xf32>
    %260 = vector.extract_strided_slice %259 {offsets = [0, 0], sizes = [2, 32], strides = [1, 1]} : vector<2x64xf32> to vector<2x32xf32>
    %c0_204 = arith.constant 0 : index
    %c800 = arith.constant 800 : index
    %261 = vector.load %arg20[%c0_204, %c800] : memref<2x1344xf32, #tpu.memory_space<vmem>>, vector<2x32xf32>
    tpu.vector_store %arg20[%c0_204, %c800], %260 {strides = array<i32>} : memref<2x1344xf32, #tpu.memory_space<vmem>>, vector<2x32xf32>,
    %262 = vector.extract_strided_slice %259 {offsets = [0, 32], sizes = [2, 32], strides = [1, 1]} : vector<2x64xf32> to vector<2x32xf32>
    %c0_205 = arith.constant 0 : index
    %c800_206 = arith.constant 800 : index
    %263 = vector.load %arg21[%c0_205, %c800_206] : memref<2x1344xf32, #tpu.memory_space<vmem>>, vector<2x32xf32>
    tpu.vector_store %arg21[%c0_205, %c800_206], %262 {strides = array<i32>} : memref<2x1344xf32, #tpu.memory_space<vmem>>, vector<2x32xf32>,
    %c68 = arith.constant 68 : index
    %c0_207 = arith.constant 0 : index
    %264 = vector.load %arg19[%c68, %c0_207] : memref<116x128xf32, #tpu.memory_space<vmem>>, vector<2x64xf32>
    %265 = vector.extract_strided_slice %264 {offsets = [0, 0], sizes = [2, 32], strides = [1, 1]} : vector<2x64xf32> to vector<2x32xf32>
    %c0_208 = arith.constant 0 : index
    %c832 = arith.constant 832 : index
    %266 = vector.load %arg20[%c0_208, %c832] : memref<2x1344xf32, #tpu.memory_space<vmem>>, vector<2x32xf32>
    tpu.vector_store %arg20[%c0_208, %c832], %265 {strides = array<i32>} : memref<2x1344xf32, #tpu.memory_space<vmem>>, vector<2x32xf32>,
    %267 = vector.extract_strided_slice %264 {offsets = [0, 32], sizes = [2, 32], strides = [1, 1]} : vector<2x64xf32> to vector<2x32xf32>
    %c0_209 = arith.constant 0 : index
    %c832_210 = arith.constant 832 : index
    %268 = vector.load %arg21[%c0_209, %c832_210] : memref<2x1344xf32, #tpu.memory_space<vmem>>, vector<2x32xf32>
    tpu.vector_store %arg21[%c0_209, %c832_210], %267 {strides = array<i32>} : memref<2x1344xf32, #tpu.memory_space<vmem>>, vector<2x32xf32>,
    %c70 = arith.constant 70 : index
    %c0_211 = arith.constant 0 : index
    %269 = vector.load %arg19[%c70, %c0_211] : memref<116x128xf32, #tpu.memory_space<vmem>>, vector<2x64xf32>
    %270 = vector.extract_strided_slice %269 {offsets = [0, 0], sizes = [2, 32], strides = [1, 1]} : vector<2x64xf32> to vector<2x32xf32>
    %c0_212 = arith.constant 0 : index
    %c864 = arith.constant 864 : index
    %271 = vector.load %arg20[%c0_212, %c864] : memref<2x1344xf32, #tpu.memory_space<vmem>>, vector<2x32xf32>
    tpu.vector_store %arg20[%c0_212, %c864], %270 {strides = array<i32>} : memref<2x1344xf32, #tpu.memory_space<vmem>>, vector<2x32xf32>,
    %272 = vector.extract_strided_slice %269 {offsets = [0, 32], sizes = [2, 32], strides = [1, 1]} : vector<2x64xf32> to vector<2x32xf32>
    %c0_213 = arith.constant 0 : index
    %c864_214 = arith.constant 864 : index
    %273 = vector.load %arg21[%c0_213, %c864_214] : memref<2x1344xf32, #tpu.memory_space<vmem>>, vector<2x32xf32>
    tpu.vector_store %arg21[%c0_213, %c864_214], %272 {strides = array<i32>} : memref<2x1344xf32, #tpu.memory_space<vmem>>, vector<2x32xf32>,
    %c72 = arith.constant 72 : index
    %c0_215 = arith.constant 0 : index
    %274 = vector.load %arg19[%c72, %c0_215] : memref<116x128xf32, #tpu.memory_space<vmem>>, vector<2x64xf32>
    %275 = vector.extract_strided_slice %274 {offsets = [0, 0], sizes = [2, 32], strides = [1, 1]} : vector<2x64xf32> to vector<2x32xf32>
    %c0_216 = arith.constant 0 : index
    %c896 = arith.constant 896 : index
    %276 = vector.load %arg20[%c0_216, %c896] : memref<2x1344xf32, #tpu.memory_space<vmem>>, vector<2x32xf32>
    tpu.vector_store %arg20[%c0_216, %c896], %275 {strides = array<i32>} : memref<2x1344xf32, #tpu.memory_space<vmem>>, vector<2x32xf32>,
    %277 = vector.extract_strided_slice %274 {offsets = [0, 32], sizes = [2, 32], strides = [1, 1]} : vector<2x64xf32> to vector<2x32xf32>
    %c0_217 = arith.constant 0 : index
    %c896_218 = arith.constant 896 : index
    %278 = vector.load %arg21[%c0_217, %c896_218] : memref<2x1344xf32, #tpu.memory_space<vmem>>, vector<2x32xf32>
    tpu.vector_store %arg21[%c0_217, %c896_218], %277 {strides = array<i32>} : memref<2x1344xf32, #tpu.memory_space<vmem>>, vector<2x32xf32>,
    %c74 = arith.constant 74 : index
    %c0_219 = arith.constant 0 : index
    %279 = vector.load %arg19[%c74, %c0_219] : memref<116x128xf32, #tpu.memory_space<vmem>>, vector<2x64xf32>
    %280 = vector.extract_strided_slice %279 {offsets = [0, 0], sizes = [2, 32], strides = [1, 1]} : vector<2x64xf32> to vector<2x32xf32>
    %c0_220 = arith.constant 0 : index
    %c928 = arith.constant 928 : index
    %281 = vector.load %arg20[%c0_220, %c928] : memref<2x1344xf32, #tpu.memory_space<vmem>>, vector<2x32xf32>
    tpu.vector_store %arg20[%c0_220, %c928], %280 {strides = array<i32>} : memref<2x1344xf32, #tpu.memory_space<vmem>>, vector<2x32xf32>,
    %282 = vector.extract_strided_slice %279 {offsets = [0, 32], sizes = [2, 32], strides = [1, 1]} : vector<2x64xf32> to vector<2x32xf32>
    %c0_221 = arith.constant 0 : index
    %c928_222 = arith.constant 928 : index
    %283 = vector.load %arg21[%c0_221, %c928_222] : memref<2x1344xf32, #tpu.memory_space<vmem>>, vector<2x32xf32>
    tpu.vector_store %arg21[%c0_221, %c928_222], %282 {strides = array<i32>} : memref<2x1344xf32, #tpu.memory_space<vmem>>, vector<2x32xf32>,
    %c76 = arith.constant 76 : index
    %c0_223 = arith.constant 0 : index
    %284 = vector.load %arg19[%c76, %c0_223] : memref<116x128xf32, #tpu.memory_space<vmem>>, vector<2x64xf32>
    %285 = vector.extract_strided_slice %284 {offsets = [0, 0], sizes = [2, 32], strides = [1, 1]} : vector<2x64xf32> to vector<2x32xf32>
    %c0_224 = arith.constant 0 : index
    %c960 = arith.constant 960 : index
    %286 = vector.load %arg20[%c0_224, %c960] : memref<2x1344xf32, #tpu.memory_space<vmem>>, vector<2x32xf32>
    tpu.vector_store %arg20[%c0_224, %c960], %285 {strides = array<i32>} : memref<2x1344xf32, #tpu.memory_space<vmem>>, vector<2x32xf32>,
    %287 = vector.extract_strided_slice %284 {offsets = [0, 32], sizes = [2, 32], strides = [1, 1]} : vector<2x64xf32> to vector<2x32xf32>
    %c0_225 = arith.constant 0 : index
    %c960_226 = arith.constant 960 : index
    %288 = vector.load %arg21[%c0_225, %c960_226] : memref<2x1344xf32, #tpu.memory_space<vmem>>, vector<2x32xf32>
    tpu.vector_store %arg21[%c0_225, %c960_226], %287 {strides = array<i32>} : memref<2x1344xf32, #tpu.memory_space<vmem>>, vector<2x32xf32>,
    %c78 = arith.constant 78 : index
    %c0_227 = arith.constant 0 : index
    %289 = vector.load %arg19[%c78, %c0_227] : memref<116x128xf32, #tpu.memory_space<vmem>>, vector<2x64xf32>
    %290 = vector.extract_strided_slice %289 {offsets = [0, 0], sizes = [2, 32], strides = [1, 1]} : vector<2x64xf32> to vector<2x32xf32>
    %c0_228 = arith.constant 0 : index
    %c992 = arith.constant 992 : index
    %291 = vector.load %arg20[%c0_228, %c992] : memref<2x1344xf32, #tpu.memory_space<vmem>>, vector<2x32xf32>
    tpu.vector_store %arg20[%c0_228, %c992], %290 {strides = array<i32>} : memref<2x1344xf32, #tpu.memory_space<vmem>>, vector<2x32xf32>,
    %292 = vector.extract_strided_slice %289 {offsets = [0, 32], sizes = [2, 32], strides = [1, 1]} : vector<2x64xf32> to vector<2x32xf32>
    %c0_229 = arith.constant 0 : index
    %c992_230 = arith.constant 992 : index
    %293 = vector.load %arg21[%c0_229, %c992_230] : memref<2x1344xf32, #tpu.memory_space<vmem>>, vector<2x32xf32>
    tpu.vector_store %arg21[%c0_229, %c992_230], %292 {strides = array<i32>} : memref<2x1344xf32, #tpu.memory_space<vmem>>, vector<2x32xf32>,
    %c80 = arith.constant 80 : index
    %c0_231 = arith.constant 0 : index
    %294 = vector.load %arg19[%c80, %c0_231] : memref<116x128xf32, #tpu.memory_space<vmem>>, vector<2x64xf32>
    %295 = vector.extract_strided_slice %294 {offsets = [0, 0], sizes = [2, 32], strides = [1, 1]} : vector<2x64xf32> to vector<2x32xf32>
    %c0_232 = arith.constant 0 : index
    %c1024 = arith.constant 1024 : index
    %296 = vector.load %arg20[%c0_232, %c1024] : memref<2x1344xf32, #tpu.memory_space<vmem>>, vector<2x32xf32>
    tpu.vector_store %arg20[%c0_232, %c1024], %295 {strides = array<i32>} : memref<2x1344xf32, #tpu.memory_space<vmem>>, vector<2x32xf32>,
    %297 = vector.extract_strided_slice %294 {offsets = [0, 32], sizes = [2, 32], strides = [1, 1]} : vector<2x64xf32> to vector<2x32xf32>
    %c0_233 = arith.constant 0 : index
    %c1024_234 = arith.constant 1024 : index
    %298 = vector.load %arg21[%c0_233, %c1024_234] : memref<2x1344xf32, #tpu.memory_space<vmem>>, vector<2x32xf32>
    tpu.vector_store %arg21[%c0_233, %c1024_234], %297 {strides = array<i32>} : memref<2x1344xf32, #tpu.memory_space<vmem>>, vector<2x32xf32>,
    %c82 = arith.constant 82 : index
    %c0_235 = arith.constant 0 : index
    %299 = vector.load %arg19[%c82, %c0_235] : memref<116x128xf32, #tpu.memory_space<vmem>>, vector<2x64xf32>
    %300 = vector.extract_strided_slice %299 {offsets = [0, 0], sizes = [2, 32], strides = [1, 1]} : vector<2x64xf32> to vector<2x32xf32>
    %c0_236 = arith.constant 0 : index
    %c1056 = arith.constant 1056 : index
    %301 = vector.load %arg20[%c0_236, %c1056] : memref<2x1344xf32, #tpu.memory_space<vmem>>, vector<2x32xf32>
    tpu.vector_store %arg20[%c0_236, %c1056], %300 {strides = array<i32>} : memref<2x1344xf32, #tpu.memory_space<vmem>>, vector<2x32xf32>,
    %302 = vector.extract_strided_slice %299 {offsets = [0, 32], sizes = [2, 32], strides = [1, 1]} : vector<2x64xf32> to vector<2x32xf32>
    %c0_237 = arith.constant 0 : index
    %c1056_238 = arith.constant 1056 : index
    %303 = vector.load %arg21[%c0_237, %c1056_238] : memref<2x1344xf32, #tpu.memory_space<vmem>>, vector<2x32xf32>
    tpu.vector_store %arg21[%c0_237, %c1056_238], %302 {strides = array<i32>} : memref<2x1344xf32, #tpu.memory_space<vmem>>, vector<2x32xf32>,
    %c84 = arith.constant 84 : index
    %c0_239 = arith.constant 0 : index
    %304 = vector.load %arg19[%c84, %c0_239] : memref<116x128xf32, #tpu.memory_space<vmem>>, vector<2x64xf32>
    %305 = vector.extract_strided_slice %304 {offsets = [0, 0], sizes = [2, 32], strides = [1, 1]} : vector<2x64xf32> to vector<2x32xf32>
    %c0_240 = arith.constant 0 : index
    %c1088 = arith.constant 1088 : index
    %306 = vector.load %arg20[%c0_240, %c1088] : memref<2x1344xf32, #tpu.memory_space<vmem>>, vector<2x32xf32>
    tpu.vector_store %arg20[%c0_240, %c1088], %305 {strides = array<i32>} : memref<2x1344xf32, #tpu.memory_space<vmem>>, vector<2x32xf32>,
    %307 = vector.extract_strided_slice %304 {offsets = [0, 32], sizes = [2, 32], strides = [1, 1]} : vector<2x64xf32> to vector<2x32xf32>
    %c0_241 = arith.constant 0 : index
    %c1088_242 = arith.constant 1088 : index
    %308 = vector.load %arg21[%c0_241, %c1088_242] : memref<2x1344xf32, #tpu.memory_space<vmem>>, vector<2x32xf32>
    tpu.vector_store %arg21[%c0_241, %c1088_242], %307 {strides = array<i32>} : memref<2x1344xf32, #tpu.memory_space<vmem>>, vector<2x32xf32>,
    %c86 = arith.constant 86 : index
    %c0_243 = arith.constant 0 : index
    %309 = vector.load %arg19[%c86, %c0_243] : memref<116x128xf32, #tpu.memory_space<vmem>>, vector<2x64xf32>
    %310 = vector.extract_strided_slice %309 {offsets = [0, 0], sizes = [2, 32], strides = [1, 1]} : vector<2x64xf32> to vector<2x32xf32>
    %c0_244 = arith.constant 0 : index
    %c1120 = arith.constant 1120 : index
    %311 = vector.load %arg20[%c0_244, %c1120] : memref<2x1344xf32, #tpu.memory_space<vmem>>, vector<2x32xf32>
    tpu.vector_store %arg20[%c0_244, %c1120], %310 {strides = array<i32>} : memref<2x1344xf32, #tpu.memory_space<vmem>>, vector<2x32xf32>,
    %312 = vector.extract_strided_slice %309 {offsets = [0, 32], sizes = [2, 32], strides = [1, 1]} : vector<2x64xf32> to vector<2x32xf32>
    %c0_245 = arith.constant 0 : index
    %c1120_246 = arith.constant 1120 : index
    %313 = vector.load %arg21[%c0_245, %c1120_246] : memref<2x1344xf32, #tpu.memory_space<vmem>>, vector<2x32xf32>
    tpu.vector_store %arg21[%c0_245, %c1120_246], %312 {strides = array<i32>} : memref<2x1344xf32, #tpu.memory_space<vmem>>, vector<2x32xf32>,
    %c88 = arith.constant 88 : index
    %c0_247 = arith.constant 0 : index
    %314 = vector.load %arg19[%c88, %c0_247] : memref<116x128xf32, #tpu.memory_space<vmem>>, vector<2x64xf32>
    %315 = vector.extract_strided_slice %314 {offsets = [0, 0], sizes = [2, 32], strides = [1, 1]} : vector<2x64xf32> to vector<2x32xf32>
    %c0_248 = arith.constant 0 : index
    %c1152 = arith.constant 1152 : index
    %316 = vector.load %arg20[%c0_248, %c1152] : memref<2x1344xf32, #tpu.memory_space<vmem>>, vector<2x32xf32>
    tpu.vector_store %arg20[%c0_248, %c1152], %315 {strides = array<i32>} : memref<2x1344xf32, #tpu.memory_space<vmem>>, vector<2x32xf32>,
    %317 = vector.extract_strided_slice %314 {offsets = [0, 32], sizes = [2, 32], strides = [1, 1]} : vector<2x64xf32> to vector<2x32xf32>
    %c0_249 = arith.constant 0 : index
    %c1152_250 = arith.constant 1152 : index
    %318 = vector.load %arg21[%c0_249, %c1152_250] : memref<2x1344xf32, #tpu.memory_space<vmem>>, vector<2x32xf32>
    tpu.vector_store %arg21[%c0_249, %c1152_250], %317 {strides = array<i32>} : memref<2x1344xf32, #tpu.memory_space<vmem>>, vector<2x32xf32>,
    %c90 = arith.constant 90 : index
    %c0_251 = arith.constant 0 : index
    %319 = vector.load %arg19[%c90, %c0_251] : memref<116x128xf32, #tpu.memory_space<vmem>>, vector<2x64xf32>
    %320 = vector.extract_strided_slice %319 {offsets = [0, 0], sizes = [2, 32], strides = [1, 1]} : vector<2x64xf32> to vector<2x32xf32>
    %c0_252 = arith.constant 0 : index
    %c1184 = arith.constant 1184 : index
    %321 = vector.load %arg20[%c0_252, %c1184] : memref<2x1344xf32, #tpu.memory_space<vmem>>, vector<2x32xf32>
    tpu.vector_store %arg20[%c0_252, %c1184], %320 {strides = array<i32>} : memref<2x1344xf32, #tpu.memory_space<vmem>>, vector<2x32xf32>,
    %322 = vector.extract_strided_slice %319 {offsets = [0, 32], sizes = [2, 32], strides = [1, 1]} : vector<2x64xf32> to vector<2x32xf32>
    %c0_253 = arith.constant 0 : index
    %c1184_254 = arith.constant 1184 : index
    %323 = vector.load %arg21[%c0_253, %c1184_254] : memref<2x1344xf32, #tpu.memory_space<vmem>>, vector<2x32xf32>
    tpu.vector_store %arg21[%c0_253, %c1184_254], %322 {strides = array<i32>} : memref<2x1344xf32, #tpu.memory_space<vmem>>, vector<2x32xf32>,
    %c92 = arith.constant 92 : index
    %c0_255 = arith.constant 0 : index
    %324 = vector.load %arg19[%c92, %c0_255] : memref<116x128xf32, #tpu.memory_space<vmem>>, vector<2x64xf32>
    %325 = vector.extract_strided_slice %324 {offsets = [0, 0], sizes = [2, 32], strides = [1, 1]} : vector<2x64xf32> to vector<2x32xf32>
    %c0_256 = arith.constant 0 : index
    %c1216 = arith.constant 1216 : index
    %326 = vector.load %arg20[%c0_256, %c1216] : memref<2x1344xf32, #tpu.memory_space<vmem>>, vector<2x32xf32>
    tpu.vector_store %arg20[%c0_256, %c1216], %325 {strides = array<i32>} : memref<2x1344xf32, #tpu.memory_space<vmem>>, vector<2x32xf32>,
    %327 = vector.extract_strided_slice %324 {offsets = [0, 32], sizes = [2, 32], strides = [1, 1]} : vector<2x64xf32> to vector<2x32xf32>
    %c0_257 = arith.constant 0 : index
    %c1216_258 = arith.constant 1216 : index
    %328 = vector.load %arg21[%c0_257, %c1216_258] : memref<2x1344xf32, #tpu.memory_space<vmem>>, vector<2x32xf32>
    tpu.vector_store %arg21[%c0_257, %c1216_258], %327 {strides = array<i32>} : memref<2x1344xf32, #tpu.memory_space<vmem>>, vector<2x32xf32>,
    %c94 = arith.constant 94 : index
    %c0_259 = arith.constant 0 : index
    %329 = vector.load %arg19[%c94, %c0_259] : memref<116x128xf32, #tpu.memory_space<vmem>>, vector<2x64xf32>
    %330 = vector.extract_strided_slice %329 {offsets = [0, 0], sizes = [2, 32], strides = [1, 1]} : vector<2x64xf32> to vector<2x32xf32>
    %c0_260 = arith.constant 0 : index
    %c1248 = arith.constant 1248 : index
    %331 = vector.load %arg20[%c0_260, %c1248] : memref<2x1344xf32, #tpu.memory_space<vmem>>, vector<2x32xf32>
    tpu.vector_store %arg20[%c0_260, %c1248], %330 {strides = array<i32>} : memref<2x1344xf32, #tpu.memory_space<vmem>>, vector<2x32xf32>,
    %332 = vector.extract_strided_slice %329 {offsets = [0, 32], sizes = [2, 32], strides = [1, 1]} : vector<2x64xf32> to vector<2x32xf32>
    %c0_261 = arith.constant 0 : index
    %c1248_262 = arith.constant 1248 : index
    %333 = vector.load %arg21[%c0_261, %c1248_262] : memref<2x1344xf32, #tpu.memory_space<vmem>>, vector<2x32xf32>
    tpu.vector_store %arg21[%c0_261, %c1248_262], %332 {strides = array<i32>} : memref<2x1344xf32, #tpu.memory_space<vmem>>, vector<2x32xf32>,
    %c96_263 = arith.constant 96 : index
    %c0_264 = arith.constant 0 : index
    %334 = vector.load %arg19[%c96_263, %c0_264] : memref<116x128xf32, #tpu.memory_space<vmem>>, vector<2x64xf32>
    %335 = vector.extract_strided_slice %334 {offsets = [0, 0], sizes = [2, 32], strides = [1, 1]} : vector<2x64xf32> to vector<2x32xf32>
    %c0_265 = arith.constant 0 : index
    %c1280 = arith.constant 1280 : index
    %336 = vector.load %arg20[%c0_265, %c1280] : memref<2x1344xf32, #tpu.memory_space<vmem>>, vector<2x32xf32>
    tpu.vector_store %arg20[%c0_265, %c1280], %335 {strides = array<i32>} : memref<2x1344xf32, #tpu.memory_space<vmem>>, vector<2x32xf32>,
    %337 = vector.extract_strided_slice %334 {offsets = [0, 32], sizes = [2, 32], strides = [1, 1]} : vector<2x64xf32> to vector<2x32xf32>
    %c0_266 = arith.constant 0 : index
    %c1280_267 = arith.constant 1280 : index
    %338 = vector.load %arg21[%c0_266, %c1280_267] : memref<2x1344xf32, #tpu.memory_space<vmem>>, vector<2x32xf32>
    tpu.vector_store %arg21[%c0_266, %c1280_267], %337 {strides = array<i32>} : memref<2x1344xf32, #tpu.memory_space<vmem>>, vector<2x32xf32>,
    %c98 = arith.constant 98 : index
    %c0_268 = arith.constant 0 : index
    %339 = vector.load %arg19[%c98, %c0_268] : memref<116x128xf32, #tpu.memory_space<vmem>>, vector<2x64xf32>
    %340 = vector.extract_strided_slice %339 {offsets = [0, 0], sizes = [2, 32], strides = [1, 1]} : vector<2x64xf32> to vector<2x32xf32>
    %c0_269 = arith.constant 0 : index
    %c1312 = arith.constant 1312 : index
    %341 = vector.load %arg20[%c0_269, %c1312] : memref<2x1344xf32, #tpu.memory_space<vmem>>, vector<2x32xf32>
    tpu.vector_store %arg20[%c0_269, %c1312], %340 {strides = array<i32>} : memref<2x1344xf32, #tpu.memory_space<vmem>>, vector<2x32xf32>,
    %342 = vector.extract_strided_slice %339 {offsets = [0, 32], sizes = [2, 32], strides = [1, 1]} : vector<2x64xf32> to vector<2x32xf32>
    %c0_270 = arith.constant 0 : index
    %c1312_271 = arith.constant 1312 : index
    %343 = vector.load %arg21[%c0_270, %c1312_271] : memref<2x1344xf32, #tpu.memory_space<vmem>>, vector<2x32xf32>
    tpu.vector_store %arg21[%c0_270, %c1312_271], %342 {strides = array<i32>} : memref<2x1344xf32, #tpu.memory_space<vmem>>, vector<2x32xf32>,
    %c0_272 = arith.constant 0 : index
    %c0_273 = arith.constant 0 : index
    %344 = vector.load %arg20[%c0_272, %c0_273] : memref<2x1344xf32, #tpu.memory_space<vmem>>, vector<2x1344xf32>
    %345 = arith.truncf %344 : vector<2x1344xf32> to vector<2x1344xbf16>
    %c0_274 = arith.constant 0 : index
    %c0_275 = arith.constant 0 : index
    %346 = vector.load %arg11[%c0_274, %c0_275] : memref<1344x7xbf16, #tpu.memory_space<vmem>>, vector<1344x7xbf16>
    %cst_276 = arith.constant dense<0.000000e+00> : vector<2x7xf32>
    %347 = tpu.matmul %345, %346, %cst_276 {dimension_numbers = #tpu.dot_dimension_numbers<[1], [0], [0], [1], [0, 0, 1, 1], [], []>} : vector<2x1344xbf16>, vector<1344x7xbf16>, vector<2x7xf32> -> vector<2x7xf32>
    %c0_277 = arith.constant 0 : index
    %c0_278 = arith.constant 0 : index
    %348 = vector.load %arg12[%c0_277, %c0_278] : memref<1x7xf32, #tpu.memory_space<vmem>>, vector<1x7xf32>
    %349 = vector.broadcast %348 : vector<1x7xf32> to vector<2x7xf32>
    %350 = arith.addf %347, %349 : vector<2x7xf32>
    %cst_279 = arith.constant dense<0xFF800000> : vector<2xf32>
    %351 = vector.multi_reduction <maximumf>, %350, %cst_279 [1] : vector<2x7xf32> to vector<2xf32>
    %352 = vector.shape_cast %351 : vector<2xf32> to vector<2x1xf32>
    %353 = vector.broadcast %352 : vector<2x1xf32> to vector<2x7xf32>
    %354 = arith.subf %350, %353 : vector<2x7xf32>
    %355 = math.exp %354 : vector<2x7xf32>
    %cst_280 = arith.constant dense<0.000000e+00> : vector<2xf32>
    %356 = vector.multi_reduction <add>, %355, %cst_280 [1] : vector<2x7xf32> to vector<2xf32>
    %357 = vector.shape_cast %356 : vector<2xf32> to vector<2x1xf32>
    %358 = math.log %357 : vector<2x1xf32>
    %359 = vector.broadcast %358 : vector<2x1xf32> to vector<2x7xf32>
    %360 = arith.subf %354, %359 : vector<2x7xf32>
    %c0_281 = arith.constant 0 : index
    %c0_282 = arith.constant 0 : index
    %361 = vector.load %arg17[%c0_281, %c0_282] : memref<2x7xf32, #tpu.memory_space<vmem>>, vector<2x7xf32>
    tpu.vector_store %arg17[%c0_281, %c0_282], %360 {strides = array<i32>} : memref<2x7xf32, #tpu.memory_space<vmem>>, vector<2x7xf32>,
    %c0_283 = arith.constant 0 : index
    %c0_284 = arith.constant 0 : index
    %362 = vector.load %arg21[%c0_283, %c0_284] : memref<2x1344xf32, #tpu.memory_space<vmem>>, vector<2x1344xf32>
    %363 = arith.truncf %362 : vector<2x1344xf32> to vector<2x1344xbf16>
    %c0_285 = arith.constant 0 : index
    %c0_286 = arith.constant 0 : index
    %364 = vector.load %arg13[%c0_285, %c0_286] : memref<1344x256xbf16, #tpu.memory_space<vmem>>, vector<1344x256xbf16>
    %cst_287 = arith.constant dense<0.000000e+00> : vector<2x256xf32>
    %365 = tpu.matmul %363, %364, %cst_287 {dimension_numbers = #tpu.dot_dimension_numbers<[1], [0], [0], [1], [0, 0, 1, 1], [], []>} : vector<2x1344xbf16>, vector<1344x256xbf16>, vector<2x256xf32> -> vector<2x256xf32>
    %c0_288 = arith.constant 0 : index
    %c0_289 = arith.constant 0 : index
    %366 = vector.load %arg14[%c0_288, %c0_289] : memref<1x256xf32, #tpu.memory_space<vmem>>, vector<1x256xf32>
    %367 = vector.broadcast %366 : vector<1x256xf32> to vector<2x256xf32>
    %368 = arith.addf %365, %367 : vector<2x256xf32>
    %cst_290 = arith.constant 0.000000e+00 : f32
    %369 = vector.broadcast %cst_290 : f32 to vector<2x256xf32>
    %370 = arith.maximumf %368, %369 : vector<2x256xf32>
    %c0_291 = arith.constant 0 : index
    %c0_292 = arith.constant 0 : index
    %371 = vector.load %arg15[%c0_291, %c0_292] : memref<1x256xf32, #tpu.memory_space<vmem>>, vector<1x256xf32>
    %372 = vector.broadcast %371 : vector<1x256xf32> to vector<2x256xf32>
    %373 = arith.mulf %370, %372 : vector<2x256xf32>
    %cst_293 = arith.constant dense<0.000000e+00> : vector<2xf32>
    %374 = vector.multi_reduction <add>, %373, %cst_293 [1] : vector<2x256xf32> to vector<2xf32>
    %375 = vector.shape_cast %374 : vector<2xf32> to vector<2x1xf32>
    %c0_294 = arith.constant 0 : index
    %c0_295 = arith.constant 0 : index
    %376 = vector.load %arg16[%c0_294, %c0_295] : memref<1x1xf32, #tpu.memory_space<vmem>>, vector<1x1xf32>
    %377 = vector.broadcast %376 : vector<1x1xf32> to vector<2x1xf32>
    %378 = arith.addf %375, %377 : vector<2x1xf32>
    %379 = math.tanh %378 : vector<2x1xf32>
    %c0_296 = arith.constant 0 : index
    %c0_297 = arith.constant 0 : index
    %380 = vector.load %arg18[%c0_296, %c0_297] : memref<2x1xf32, #tpu.memory_space<vmem>>, vector<2x1xf32>
    tpu.vector_store %arg18[%c0_296, %c0_297], %379 {strides = array<i32>} : memref<2x1xf32, #tpu.memory_space<vmem>>, vector<2x1xf32>,
    return
  }
  func.func @transform_0(%arg0: i32) -> (i32, i32) {
    %c0_i32 = arith.constant 0 : i32
    %c0_i32_0 = arith.constant 0 : i32
    return %arg0, %c0_i32 : i32, i32
  }
  func.func @transform_1(%arg0: i32) -> (i32, i32) {
    %c0_i32 = arith.constant 0 : i32
    %c0_i32_0 = arith.constant 0 : i32
    %c0_i32_1 = arith.constant 0 : i32
    return %c0_i32, %c0_i32_0 : i32, i32
  }
  func.func @transform_2(%arg0: i32) -> (i32, i32) {
    %c0_i32 = arith.constant 0 : i32
    %c0_i32_0 = arith.constant 0 : i32
    %c0_i32_1 = arith.constant 0 : i32
    return %c0_i32, %c0_i32_0 : i32, i32
  }
  func.func @transform_3(%arg0: i32) -> (i32, i32) {
    %c0_i32 = arith.constant 0 : i32
    %c0_i32_0 = arith.constant 0 : i32
    %c0_i32_1 = arith.constant 0 : i32
    return %c0_i32, %c0_i32_0 : i32, i32
  }
  func.func @transform_4(%arg0: i32) -> (i32, i32) {
    %c0_i32 = arith.constant 0 : i32
    %c0_i32_0 = arith.constant 0 : i32
    %c0_i32_1 = arith.constant 0 : i32
    return %c0_i32, %c0_i32_0 : i32, i32
  }
  func.func @transform_5(%arg0: i32) -> (i32, i32) {
    %c0_i32 = arith.constant 0 : i32
    %c0_i32_0 = arith.constant 0 : i32
    %c0_i32_1 = arith.constant 0 : i32
    return %c0_i32, %c0_i32_0 : i32, i32
  }
  func.func @transform_6(%arg0: i32) -> (i32, i32) {
    %c0_i32 = arith.constant 0 : i32
    %c0_i32_0 = arith.constant 0 : i32
    %c0_i32_1 = arith.constant 0 : i32
    return %c0_i32, %c0_i32_0 : i32, i32
  }
  func.func @transform_7(%arg0: i32) -> (i32, i32) {
    %c0_i32 = arith.constant 0 : i32
    %c0_i32_0 = arith.constant 0 : i32
    %c0_i32_1 = arith.constant 0 : i32
    return %c0_i32, %c0_i32_0 : i32, i32
  }
  func.func @transform_8(%arg0: i32) -> (i32, i32) {
    %c0_i32 = arith.constant 0 : i32
    %c0_i32_0 = arith.constant 0 : i32
    %c0_i32_1 = arith.constant 0 : i32
    return %c0_i32, %c0_i32_0 : i32, i32
  }
  func.func @transform_9(%arg0: i32) -> (i32, i32) {
    %c0_i32 = arith.constant 0 : i32
    %c0_i32_0 = arith.constant 0 : i32
    %c0_i32_1 = arith.constant 0 : i32
    return %c0_i32, %c0_i32_0 : i32, i32
  }
  func.func @transform_10(%arg0: i32) -> (i32, i32) {
    %c0_i32 = arith.constant 0 : i32
    %c0_i32_0 = arith.constant 0 : i32
    %c0_i32_1 = arith.constant 0 : i32
    return %c0_i32, %c0_i32_0 : i32, i32
  }
  func.func @transform_11(%arg0: i32) -> (i32, i32) {
    %c0_i32 = arith.constant 0 : i32
    %c0_i32_0 = arith.constant 0 : i32
    %c0_i32_1 = arith.constant 0 : i32
    return %c0_i32, %c0_i32_0 : i32, i32
  }
  func.func @transform_12(%arg0: i32) -> (i32, i32) {
    %c0_i32 = arith.constant 0 : i32
    %c0_i32_0 = arith.constant 0 : i32
    %c0_i32_1 = arith.constant 0 : i32
    return %c0_i32, %c0_i32_0 : i32, i32
  }
  func.func @transform_13(%arg0: i32) -> (i32, i32) {
    %c0_i32 = arith.constant 0 : i32
    %c0_i32_0 = arith.constant 0 : i32
    %c0_i32_1 = arith.constant 0 : i32
    return %c0_i32, %c0_i32_0 : i32, i32
  }
  func.func @transform_14(%arg0: i32) -> (i32, i32) {
    %c0_i32 = arith.constant 0 : i32
    %c0_i32_0 = arith.constant 0 : i32
    %c0_i32_1 = arith.constant 0 : i32
    return %c0_i32, %c0_i32_0 : i32, i32
  }
  func.func @transform_15(%arg0: i32) -> (i32, i32) {
    %c0_i32 = arith.constant 0 : i32
    %c0_i32_0 = arith.constant 0 : i32
    %c0_i32_1 = arith.constant 0 : i32
    return %c0_i32, %c0_i32_0 : i32, i32
  }
  func.func @transform_16(%arg0: i32) -> (i32, i32) {
    %c0_i32 = arith.constant 0 : i32
    %c0_i32_0 = arith.constant 0 : i32
    return %arg0, %c0_i32 : i32, i32
  }
  func.func @transform_17(%arg0: i32) -> (i32, i32) {
    %c0_i32 = arith.constant 0 : i32
    %c0_i32_0 = arith.constant 0 : i32
    return %arg0, %c0_i32 : i32, i32
  }
}

</mosaic_0001>

<bundles_post_ra>
// kernel: connect4_forward.1
= control target key start
LH: loop header
LB: loop body
LE: loop exit
PB: predicated region body
PF: predicated region fallthrough
CT: control target
= control target key end

     0   :  { %s12534_s0 = inlined_call_operand.vmem [shape: f32[84,3], index: 0, kind: input, shape index: {}]   ;;  %s12535_s1 = inlined_call_operand.hbm [shape: f32[84,9], index: 1, kind: input, shape index: {}]   ;;  %s12536_s2 = inlined_call_operand.vmem [shape: bf16[27,64], index: 2, kind: input, shape index: {}]   ;;  %s12537_s3 = inlined_call_operand.hbm [shape: f32[1,64], index: 3, kind: input, shape index: {}]   ;;  %s12538_s4 = inlined_call_operand.hbm [shape: bf16[576,128], index: 4, kind: input, shape index: {}]   ;;  %s12539_s5 = inlined_call_operand.hbm [shape: f32[1,128], index: 5, kind: input, shape index: {}]   ;;  %s12540_s6 = inlined_call_operand.hbm [shape: bf16[1152,256], index: 6, kind: input, shape index: {}]   ;;  %s12541_s7 = inlined_call_operand.hbm [shape: f32[1,256], index: 7, kind: input, shape index: {}]   ;;  %s12542_s8 = inlined_call_operand.vmem [shape: bf16[256,64], index: 8, kind: input, shape index: {}]   ;;  %s12543_s9 = inlined_call_operand.hbm [shape: f32[1,64], index: 9, kind: input, shape index: {}]   ;;  %s12544_s10 = inlined_call_operand.vmem [shape: bf16[1344,7], index: 10, kind: input, shape index: {}]   ;;  %s12545_s11 = inlined_call_operand.hbm [shape: f32[1,7], index: 11, kind: input, shape index: {}]   ;;  %s12546_s12 = inlined_call_operand.vmem [shape: bf16[1344,256], index: 12, kind: input, shape index: {}]   ;;  %s12547_s13 = inlined_call_operand.hbm [shape: f32[1,256], index: 13, kind: input, shape index: {}]   ;;  %s12548_s14 = inlined_call_operand.hbm [shape: f32[1,256], index: 14, kind: input, shape index: {}]   ;;  %s12549_s15 = inlined_call_operand.<no memory space> [shape: f32[1,1], index: 15, kind: input, shape index: {}]   ;;  %s12550_s16 = inlined_call_operand.hbm [shape: f32[2,7], index: 16, kind: output, shape index: {0}]   ;;  %s12551_s17 = inlined_call_operand.vmem [shape: f32[2,1], index: 17, kind: output, shape index: {1}]  }
   0x1   :  { %12716 = sst [smem:[#allocation125_spill]] %s12534_s0  ;;  %v23_v0 = vstv %s12549_s15 }
   0x2   :  { %12717 = sst [smem:[#allocation126_spill]] %s12535_s1  ;;  %24 = vst [vmem:[#allocation5] sm:$0x1] %v23_v0 }
   0x3   :  { %25 = vsyncpa [#allocation7], 0 }
   0x4   :  { %26 = vsyncpa [#allocation10], 0 }
   0x5   :  { %27 = vsyncpa [#allocation13], 0 }
   0x6   :  { %28 = vsyncpa [#allocation16], 0 }
   0x7   :  { %29 = vsyncpa [#allocation19], 0 }
   0x8   :  { %30 = vsyncpa [#allocation22], 0 }
   0x9   :  { %31 = vsyncpa [#allocation8], 0  ;;  %s9547_s26 = smov [#allocation9]   ;;  %s9548_s28 = smov [#allocation12]  }
   0xa   :  { %s54_s27 = sshll.u32 %s9547_s26, 4  ;;  %s76_s29 = sshll.u32 %s9548_s28, 4  ;;  %s55_s27 = int_to_ptr.vmem [resolvable:$true] %s54_s27  ;;  %s77_s29 = int_to_ptr.vmem [resolvable:$true] %s76_s29 }
   0xb   :  { %s9291_s18 = scalar_lea.hbm %s12537_s3, 16 }
   0xc   :  { %p9292_p0 = scmp.ne.s32.totalorder %s12537_s3, %s9291_s18  ;;  %p9295_p1 = scmp.lt.u32.totalorder %s9291_s18, %s12537_s3 }
   0xe   :  { %p9297_p2 = pnand %p9295_p1, %p9292_p0 }
  0x10   :  { %9300 = shalt.err (!%p9297_p2)
}
  0x11   :  { %s9301_s21 = scalar_lea.vmem %s55_s27, 16  ;;  %s9305_s22 = scalar_lea.vmem %s55_s27, 32 }
  0x12   :  { %p9302_p3 = scmp.ne.s32.totalorder %s55_s27, %s9301_s21  ;;  %p9306_p4 = scmp.lt.s32.totalorder %s55_s27, %s55_s27 }
  0x13   :  { %p9307_p5 = scmp.lt.s32.totalorder %s9305_s22, %s9301_s21 }
  0x15   :  { %p9308_p6 = por %p9307_p5, %p9306_p4 }
  0x17   :  { %p9309_p7 = pnand %p9308_p6, %p9302_p3 }
  0x19   :  { %9312 = shalt.err (!%p9309_p7)
}
  0x1a   :  { %57 = dma.hbm_to_vmem [thread:$0]  %s12537_s3, 16, %s55_s27, [#allocation10]  }
  0x1b   :  { %s9313_s28 = scalar_lea.hbm %s12539_s5, 16 }
  0x1c   :  { %p9314_p8 = scmp.ne.s32.totalorder %s12539_s5, %s9313_s28  ;;  %p9317_p9 = scmp.lt.u32.totalorder %s9313_s28, %s12539_s5 }
  0x1e   :  { %p9319_p10 = pnand %p9317_p9, %p9314_p8 }
  0x20   :  { %9322 = shalt.err (!%p9319_p10)
}
  0x21   :  { %s9323_s15 = scalar_lea.vmem %s77_s29, 16  ;;  %s9327_s1 = scalar_lea.vmem %s77_s29, 32 }
  0x22   :  { %p9324_p11 = scmp.ne.s32.totalorder %s77_s29, %s9323_s15  ;;  %p9328_p12 = scmp.lt.s32.totalorder %s77_s29, %s77_s29 }
  0x23   :  { %p9329_p13 = scmp.lt.s32.totalorder %s9327_s1, %s9323_s15 }
  0x25   :  { %p9330_p0 = por %p9329_p13, %p9328_p12 }
  0x27   :  { %p9331_p1 = pnand %p9330_p0, %p9324_p11 }
  0x29   :  { %9334 = shalt.err (!%p9331_p1)
}
  0x2a   :  { %79 = dma.hbm_to_vmem [thread:$0]  %s12539_s5, 16, %s77_s29, [#allocation13]  }
  0x2b   :  { %s9549_s20 = smov [#allocation15]   ;;  %s9550_s22 = smov [#allocation18]  }
  0x2c   :  { %s98_s21 = sshll.u32 %s9549_s20, 4  ;;  %s122_s23 = sshll.u32 %s9550_s22, 4  ;;  %s99_s21 = int_to_ptr.vmem [resolvable:$true] %s98_s21  ;;  %s123_s23 = int_to_ptr.vmem [resolvable:$true] %s122_s23 }
  0x2d   :  { %s9335_s26 = scalar_lea.hbm %s12541_s7, 32 }
  0x2e   :  { %p9336_p2 = scmp.ne.s32.totalorder %s12541_s7, %s9335_s26  ;;  %p9339_p3 = scmp.lt.u32.totalorder %s9335_s26, %s12541_s7 }
  0x30   :  { %p9341_p4 = pnand %p9339_p3, %p9336_p2 }
  0x32   :  { %9344 = shalt.err (!%p9341_p4)
}
  0x33   :  { %s9345_s5 = scalar_lea.vmem %s99_s21, 32  ;;  %p9350_p6 = scmp.lt.s32.totalorder %s99_s21, %s99_s21 }
  0x34   :  { %p9346_p5 = scmp.ne.s32.totalorder %s99_s21, %s9345_s5  ;;  %p9351_p7 = scmp.lt.s32.totalorder %s9345_s5, %s9345_s5 }
  0x36   :  { %p9352_p8 = por %p9351_p7, %p9350_p6 }
  0x38   :  { %p9353_p9 = pnand %p9352_p8, %p9346_p5 }
  0x3a   :  { %9356 = shalt.err (!%p9353_p9)
}
  0x3b   :  { %101 = dma.hbm_to_vmem [thread:$0]  %s12541_s7, 32, %s99_s21, [#allocation16]  }
  0x3c   :  { %s9357_s3 = scalar_lea.hbm %s12545_s11, 16 }
  0x3d   :  { %p9358_p10 = scmp.ne.s32.totalorder %s12545_s11, %s9357_s3  ;;  %p9361_p11 = scmp.lt.u32.totalorder %s9357_s3, %s12545_s11 }
  0x3f   :  { %p9363_p12 = pnand %p9361_p11, %p9358_p10 }
  0x41   :  { %9366 = shalt.err (!%p9363_p12)
}
  0x42   :  { %s9367_s25 = scalar_lea.vmem %s123_s23, 16  ;;  %s9371_s26 = scalar_lea.vmem %s123_s23, 32 }
  0x43   :  { %p9368_p13 = scmp.ne.s32.totalorder %s123_s23, %s9367_s25  ;;  %p9372_p0 = scmp.lt.s32.totalorder %s123_s23, %s123_s23 }
  0x44   :  { %p9373_p1 = scmp.lt.s32.totalorder %s9371_s26, %s9367_s25 }
  0x46   :  { %p9374_p2 = por %p9373_p1, %p9372_p0 }
  0x48   :  { %p9375_p3 = pnand %p9374_p2, %p9368_p13 }
  0x4a   :  { %9378 = shalt.err (!%p9375_p3)
}
  0x4b   :  { %125 = dma.hbm_to_vmem [thread:$0]  %s12545_s11, 16, %s123_s23, [#allocation19]  }
  0x4c   :  { %s9551_s28 = smov [#allocation6]   ;;  %s12718_s5 = sld [smem:[#allocation126_spill]] }
  0x4d   :  { %s39_s0 = sshll.u32 %s9551_s28, 4  ;;  %s40_s0 = int_to_ptr.vmem [resolvable:$true] %s39_s0 }
  0x52   :  { %s9379_s29 = scalar_lea.hbm %s12718_s5, 1408 }
  0x53   :  { %p9380_p4 = scmp.ne.s32.totalorder %s12718_s5, %s9379_s29  ;;  %p9383_p5 = scmp.lt.u32.totalorder %s9379_s29, %s12718_s5 }
  0x55   :  { %p9385_p6 = pnand %p9383_p5, %p9380_p4 }
  0x57   :  { %9388 = shalt.err (!%p9385_p6)
}
  0x58   :  { %s9389_s27 = scalar_lea.vmem %s40_s0, 1408  ;;  %p9394_p8 = scmp.lt.s32.totalorder %s40_s0, %s40_s0 }
  0x59   :  { %p9390_p7 = scmp.ne.s32.totalorder %s40_s0, %s9389_s27  ;;  %p9395_p9 = scmp.lt.s32.totalorder %s9389_s27, %s9389_s27 }
  0x5b   :  { %p9396_p10 = por %p9395_p9, %p9394_p8 }
  0x5d   :  { %p9397_p11 = pnand %p9396_p10, %p9390_p7 }
  0x5f   :  { %9400 = shalt.err (!%p9397_p11)
}
  0x60   :  { %s9552_s11 = smov 128   ;;  %s9553_s23 = smov 8  }
  0x61   :  { %45 = dma.hbm_to_vmem [thread:$0]  %s12718_s5, 1408, %s40_s0, [#allocation7], %s9552_s11, %s9552_s11, %s9553_s23  }
  0x62   :  { %s9554_s24 = smov [#allocation11]   ;;  %s9401_s21 = scalar_lea.hbm %s12538_s4, 4608 }
  0x63   :  { %s63_s25 = sshll.u32 %s9554_s24, 4  ;;  %p9402_p12 = scmp.ne.s32.totalorder %s12538_s4, %s9401_s21  ;;  %s64_s25 = int_to_ptr.vmem [resolvable:$true] %s63_s25 }
  0x64   :  { %p9405_p13 = scmp.lt.u32.totalorder %s9401_s21, %s12538_s4 }
  0x66   :  { %p9407_p0 = pnand %p9405_p13, %p9402_p12 }
  0x68   :  { %9410 = shalt.err (!%p9407_p0)
}
  0x69   :  { %s9411_s19 = scalar_lea.vmem %s64_s25, 4608  ;;  %p9416_p2 = scmp.lt.s32.totalorder %s64_s25, %s64_s25 }
  0x6a   :  { %p9412_p1 = scmp.ne.s32.totalorder %s64_s25, %s9411_s19  ;;  %p9417_p3 = scmp.lt.s32.totalorder %s9411_s19, %s9411_s19 }
  0x6c   :  { %p9418_p4 = por %p9417_p3, %p9416_p2 }
  0x6e   :  { %p9419_p5 = pnand %p9418_p4, %p9412_p1 }
  0x70   :  { %9422 = shalt.err (!%p9419_p5)
}
  0x71   :  { %s9555_s0 = smov 64   ;;  %s9556_s5 = smov 4  }
  0x72   :  { %69 = dma.hbm_to_vmem [thread:$0]  %s12538_s4, 4608, %s64_s25, [#allocation10], %s9555_s0, %s9555_s0, %s9556_s5  }
  0x73   :  { %s9557_s3 = smov [#allocation14]   ;;  %s9558_s20 = smov [#allocation17]  }
  0x74   :  { %s85_s27 = sshll.u32 %s9557_s3, 4  ;;  %s110_s22 = sshll.u32 %s9558_s20, 4  ;;  %s86_s27 = int_to_ptr.vmem [resolvable:$true] %s85_s27  ;;  %s111_s22 = int_to_ptr.vmem [resolvable:$true] %s110_s22 }
  0x75   :  { %s9423_s7 = scalar_lea.hbm %s12540_s6, 18432 }
  0x76   :  { %p9424_p6 = scmp.ne.s32.totalorder %s12540_s6, %s9423_s7  ;;  %p9427_p7 = scmp.lt.u32.totalorder %s9423_s7, %s12540_s6 }
  0x78   :  { %p9429_p8 = pnand %p9427_p7, %p9424_p6 }
  0x7a   :  { %9432 = shalt.err (!%p9429_p8)
}
  0x7b   :  { %s9433_s4 = scalar_lea.vmem %s86_s27, 18432  ;;  %p9438_p10 = scmp.lt.s32.totalorder %s86_s27, %s86_s27 }
  0x7c   :  { %p9434_p9 = scmp.ne.s32.totalorder %s86_s27, %s9433_s4  ;;  %p9439_p11 = scmp.lt.s32.totalorder %s9433_s4, %s9433_s4 }
  0x7e   :  { %p9440_p12 = por %p9439_p11, %p9438_p10 }
  0x80   :  { %p9441_p13 = pnand %p9440_p12, %p9434_p9 }
  0x82   :  { %9444 = shalt.err (!%p9441_p13)
}
  0x83   :  { %91 = dma.hbm_to_vmem [thread:$0]  %s12540_s6, 18432, %s86_s27, [#allocation13], %s9552_s11, %s9552_s11, %s9553_s23  }
  0x84   :  { %s9445_s15 = scalar_lea.hbm %s12543_s9, 16 }
  0x85   :  { %p9446_p0 = scmp.ne.s32.totalorder %s12543_s9, %s9445_s15  ;;  %p9449_p1 = scmp.lt.u32.totalorder %s9445_s15, %s12543_s9 }
  0x87   :  { %p9451_p2 = pnand %p9449_p1, %p9446_p0 }
  0x89   :  { %9454 = shalt.err (!%p9451_p2)
}
  0x8a   :  { %s9455_s26 = scalar_lea.vmem %s111_s22, 16  ;;  %s9459_s7 = scalar_lea.vmem %s111_s22, 32 }
  0x8b   :  { %p9456_p3 = scmp.ne.s32.totalorder %s111_s22, %s9455_s26  ;;  %p9460_p4 = scmp.lt.s32.totalorder %s111_s22, %s111_s22 }
  0x8c   :  { %p9461_p5 = scmp.lt.s32.totalorder %s9459_s7, %s9455_s26 }
  0x8e   :  { %p9462_p6 = por %p9461_p5, %p9460_p4 }
  0x90   :  { %p9463_p7 = pnand %p9462_p6, %p9456_p3 }
  0x92   :  { %9466 = shalt.err (!%p9463_p7)
}
  0x93   :  { %113 = dma.hbm_to_vmem [thread:$0]  %s12543_s9, 16, %s111_s22, [#allocation16]  }
  0x94   :  { %s9559_s23 = smov [#allocation20]   ;;  %s9560_s21 = smov [#allocation21]  }
  0x95   :  { %s134_s27 = sshll.u32 %s9559_s23, 4  ;;  %s144_s28 = sshll.u32 %s9560_s21, 4  ;;  %s135_s27 = int_to_ptr.vmem [resolvable:$true] %s134_s27  ;;  %s145_s28 = int_to_ptr.vmem [resolvable:$true] %s144_s28 }
  0x96   :  { %s9467_s4 = scalar_lea.hbm %s12547_s13, 32 }
  0x97   :  { %p9468_p8 = scmp.ne.s32.totalorder %s12547_s13, %s9467_s4  ;;  %p9471_p9 = scmp.lt.u32.totalorder %s9467_s4, %s12547_s13 }
  0x99   :  { %p9473_p10 = pnand %p9471_p9, %p9468_p8 }
  0x9b   :  { %9476 = shalt.err (!%p9473_p10)
}
  0x9c   :  { %s9477_s9 = scalar_lea.vmem %s135_s27, 32  ;;  %p9482_p12 = scmp.lt.s32.totalorder %s135_s27, %s135_s27 }
  0x9d   :  { %p9478_p11 = scmp.ne.s32.totalorder %s135_s27, %s9477_s9  ;;  %p9483_p13 = scmp.lt.s32.totalorder %s9477_s9, %s9477_s9 }
  0x9f   :  { %p9484_p0 = por %p9483_p13, %p9482_p12 }
  0xa1   :  { %p9485_p1 = pnand %p9484_p0, %p9478_p11 }
  0xa3   :  { %9488 = shalt.err (!%p9485_p1)
}
  0xa4   :  { %137 = dma.hbm_to_vmem [thread:$0]  %s12547_s13, 32, %s135_s27, [#allocation19]  }
  0xa5   :  { %s9489_s20 = scalar_lea.hbm %s12548_s14, 32 }
  0xa6   :  { %p9490_p2 = scmp.ne.s32.totalorder %s12548_s14, %s9489_s20  ;;  %p9493_p3 = scmp.lt.u32.totalorder %s9489_s20, %s12548_s14 }
  0xa8   :  { %p9495_p4 = pnand %p9493_p3, %p9490_p2 }
  0xaa   :  { %9498 = shalt.err (!%p9495_p4)
}
  0xab   :  { %s9499_s11 = scalar_lea.vmem %s145_s28, 32  ;;  %p9504_p6 = scmp.lt.s32.totalorder %s145_s28, %s145_s28 }
  0xac   :  { %p9500_p5 = scmp.ne.s32.totalorder %s145_s28, %s9499_s11  ;;  %p9505_p7 = scmp.lt.s32.totalorder %s9499_s11, %s9499_s11 }
  0xae   :  { %p9506_p8 = por %p9505_p7, %p9504_p6 }
  0xb0   :  { %p9507_p9 = pnand %p9506_p8, %p9500_p5 }
  0xb2   :  { %9510 = shalt.err (!%p9507_p9)
}
  0xb3   :  { %147 = dma.hbm_to_vmem [thread:$0]  %s12548_s14, 32, %s145_s28, [#allocation22]  }
  0xb4   :  { %9533 = dma.done.wait [#allocation7], 1408  }
  0xb5   :  { %9534 = vsyncadd [#allocation7], 4294965888 }
  0xb6   :  { %9535 = dma.done.wait [#allocation10], 4624  }
  0xb7   :  { %9536 = vsyncadd [#allocation10], 4294962672 }
  0xb8   :  { %9537 = dma.done.wait [#allocation13], 18448  }
  0xb9   :  { %9538 = vsyncadd [#allocation13], 4294948848 }
  0xba   :  { %9539 = dma.done.wait [#allocation16], 48  }
  0xbb   :  { %9540 = vsyncadd [#allocation16], 4294967248 }
  0xbc   :  { %9541 = dma.done.wait [#allocation19], 48  }
  0xbd   :  { %9542 = vsyncadd [#allocation19], 4294967248 }
  0xbe   :  { %9543 = dma.done.wait [#allocation22], 32  }
  0xbf   :  { %9544 = vsyncadd [#allocation22], 4294967264  ;;  %v9561_v1 = vmov 1   ;;  %v9808_v2 = vld [vmem:[#allocation6 + $0x10] sm:$0xff]  ;;  %v9810_v3 = vld [vmem:[#allocation6] sm:$0xff]  ;;  %vm207_vm0 = vcmask 23552  }
  0xc0   :  { %8316 = vset.pattern.permute.xlu1 %v9561_v1  ;;  %8315 = vset.pattern.permute.xlu0 %v9561_v1  ;;  %v9814_v4 = vld [vmem:[#allocation6 + $0x18] sm:$0xff]  ;;  %v9816_v5 = vld [vmem:[#allocation6 + $0x8] sm:$0xff]  ;;  %v9562_v6 = vmov 0.0   ;;  %s12719_s21 = sld [smem:[#allocation125_spill]]  ;;  %v9563_v11 = vmov 2   ;;  %v9564_v17 = vmov 3  }
  0xc1   :  { %317 = vperm.xlu1 %8316, %v9808_v2   ;;  %309 = vperm.xlu0 %8315, %v9810_v3   ;;  %181 = vst [vmem:[#allocation2] sm:$0xff] %v9562_v6  ;;  %182 = vst [vmem:[#allocation2 + $0x8] sm:$0xff] %v9562_v6  ;;  %v9827_v10 = vld [vmem:[#allocation6 + $0x28] sm:$0xff]  ;;  %v9863_v18 = vld [vmem:[#allocation6 + $0x20] sm:$0xff]  ;;  %v9565_v22 = vmov 4   ;;  %v9566_v23 = vmov 5  }
  0xc2   :  { %183 = vst [vmem:[#allocation2 + $0x64] sm:$0xff] %v9562_v6  ;;  %184 = vst [vmem:[#allocation2 + $0x6c] sm:$0xff] %v9562_v6  ;;  %v9836_v12 = vld [vmem:[#allocation6 + $0x48] sm:$0xff]  ;;  %v9867_v19 = vld [vmem:[#allocation6 + $0x38] sm:$0xff]  ;;  %v9567_v25 = vmov 6   ;;  %v9568_v26 = vmov 7  }
  0xc3   :  { %v12566_v27 = vmov 8   ;;  %vm218_vm1 = vcmask 19456   ;;  %v9921_v29 = vld [vmem:[#allocation6 + $0x30] sm:$0xff]  ;;  %v12554_v40 = vmov 0   ;;  %s9571_s23 = smov 3   ;;  %s9572_s14 = smov 6  }
  0xc4   :  { %v10005_v61 = vld [vmem:[#allocation6 + $0x28] sm:$0xff]  ;;  %s9573_s27 = smov 9   ;;  %s9575_s28 = smov 15   ;;  %vm1319_vm2 = vcmask 1044480   ;;  %vm1320_vm3 = vcmask 1045504   ;;  %vm1188_vm4 = vcmask 48128  }
  0xc5   :  { %321 = vperm.xlu1 %8316, %v9814_v4   ;;  %313 = vperm.xlu0 %8315, %v9816_v5   ;;  %s9576_s30 = smov 18   ;;  %s9577_s18 = smov 21   ;;  %vm1200_vm5 = vcmask 72704   ;;  %vm1212_vm6 = vcmask 97280   ;;  %vm1224_vm7 = vcmask 121856   ;;  %vm1236_vm8 = vcmask 146432  }
  0xc6   :  { %v196_v7 = vld [vmem:[%s12719_s21] sm:$0xff]  ;;  %v197_v8 = vld [vmem:[%s12719_s21 + $0x8] sm:$0xff]  ;;  %v198_v9 = vld [vmem:[%s12719_s21 + $0x10] sm:$0xff]  ;;  %s9578_s4 = smov 24   ;;  %vm1248_vm9 = vcmask 171008   ;;  %vm1260_vm10 = vcmask 195584  }
  0xc7   :  { %208 = vst.msk [vmem:[#allocation2 + $0x10] sm:$0xff] %vm207_vm0, %v196_v7  ;;  %209 = vst.msk [vmem:[#allocation2 + $0x18] sm:$0xff] %vm207_vm0, %v197_v8  ;;  %v199_v13 = vld [vmem:[%s12719_s21 + $0x18] sm:$0xff]  ;;  %v200_v14 = vld [vmem:[%s12719_s21 + $0x20] sm:$0xff]  ;;  %vm1300_vm11 = vcmask 220160   ;;  %vm1417_vm12 = vcmask 523264  }
  0xc8   :  { %210 = vst.msk [vmem:[#allocation2 + $0x20] sm:$0xff] %vm207_vm0, %v198_v9  ;;  %211 = vst.msk [vmem:[#allocation2 + $0x28] sm:$0xff] %vm207_vm0, %v199_v13  ;;  %v203_v15 = vld [vmem:[%s12719_s21 + $0x38] sm:$0xff]  ;;  %v204_v16 = vld [vmem:[%s12719_s21 + $0x40] sm:$0xff]  ;;  %vm1428_vm13 = vcmask 519168   ;;  %vm4246_vm14 = vcmask 254976  }
  0xc9   :  { %8317 = vset.pattern.permute.xlu1 %v9563_v11  ;;  %329 = vperm.xlu0 %8315, %v9827_v10   ;;  %212 = vst.msk [vmem:[#allocation2 + $0x30] sm:$0xff] %vm207_vm0, %v200_v14  ;;  %215 = vst.msk [vmem:[#allocation2 + $0x48] sm:$0xff] %vm207_vm0, %v203_v15  ;;  %v201_v20 = vld [vmem:[%s12719_s21 + $0x28] sm:$0xff]  ;;  %v202_v21 = vld [vmem:[%s12719_s21 + $0x30] sm:$0xff]  ;;  %s9581_s9 = smov 96   ;;  %s9582_s1 = smov 32  }
  0xca   :  { %379 = vperm.xlu1 %8317, %v9816_v5   ;;  %216 = vst.msk [vmem:[#allocation2 + $0x50] sm:$0xff] %vm207_vm0, %v204_v16  ;;  %213 = vst.msk [vmem:[#allocation2 + $0x38] sm:$0xff] %vm207_vm0, %v201_v20  ;;  %v205_v24 = vld [vmem:[%s12719_s21 + $0x48] sm:$0xff]  ;;  %v206_v28 = vld [vmem:[%s12719_s21 + $0x50] sm:$0xf]  ;;  %s9574_s21 = smov 12  }
  0xcb   :  { %214 = vst.msk [vmem:[#allocation2 + $0x40] sm:$0xff] %vm207_vm0, %v202_v21  ;;  %217 = vst.msk [vmem:[#allocation2 + $0x58] sm:$0xff] %vm207_vm0, %v205_v24  ;;  %v297_v32 = vld [vmem:[#allocation2 + $0x2] sm:$0xff]  ;;  %v10024_v7 = vld [vmem:[#allocation6 + $0x50] sm:$0xf]  ;;  %vm4272_vm15 = vcmask 517376  }
  0xcc   :  { %219 = vst.msk [vmem:[#allocation2 + $0x60] sm:$0xf] %vm218_vm1, %v206_v28  ;;  %v363_v44 = vld [vmem:[#allocation2 + $0x4] sm:$0xff]  ;;  %vm4305_vm1 = vcmask 1042176  }
  0xcd   :  { %345 = vperm.xlu0 %8315, %v9836_v12  }
  0xce   :  { %383 = vperm.xlu1 %8317, %v9808_v2   ;;  %v298_v35 = vld [vmem:[#allocation2 + $0xa] sm:$0xff]  ;;  %v430_v59 = vld [vmem:[#allocation2 + $0x16] sm:$0xff] }
  0xcf   :  { %v364_v42 = vld [vmem:[#allocation2 + $0xc] sm:$0xff]  ;;  %v496_v9 = vld [vmem:[#allocation2 + $0x18] sm:$0xff] }
  0xd0   :  { %v429_v58 = vld [vmem:[#allocation2 + $0xe] sm:$0xff] }
  0xd1   :  { %8333 = vset.pattern.permute.xlu0 %v9563_v11 }
  0xd2   :  { %8318 = vset.pattern.permute.xlu1 %v9564_v17  ;;  %375 = vperm.xlu0 %8333, %v9810_v3  }
  0xd3   :  { %441 = vperm.xlu1 %8318, %v9810_v3  }
  0xd6   :  { %387 = vperm.xlu0 %8333, %v9814_v4  }
  0xd7   :  { %449 = vperm.xlu1 %8318, %v9808_v2  }
  0xda   :  { %391 = vperm.xlu0 %8333, %v9863_v18  }
  0xdb   :  { %453 = vperm.xlu1 %8318, %v9814_v4  }
  0xde   :  { %403 = vperm.xlu0 %8333, %v9867_v19  }
  0xdf   :  { %8319 = vset.pattern.permute.xlu1 %v9565_v22 }
  0xe0   :  { %511 = vperm.xlu1 %8319, %v9816_v5  }
  0xe2   :  { %411 = vperm.xlu0 %8333, %v9836_v12  }
  0xe4   :  { %515 = vperm.xlu1 %8319, %v9808_v2  }
  0xe6   :  { %8335 = vset.pattern.permute.xlu0 %v9564_v17 }
  0xe7   :  { %445 = vperm.xlu0 %8335, %v9816_v5  }
  0xe8   :  { %8320 = vset.pattern.permute.xlu1 %v9566_v23 }
  0xe9   :  { %573 = vperm.xlu1 %8320, %v9810_v3  }
  0xeb   :  { %461 = vperm.xlu0 %8335, %v9827_v10  }
  0xed   :  { %581 = vperm.xlu1 %8320, %v9808_v2  }
  0xef   :  { %477 = vperm.xlu0 %8335, %v9836_v12  }
  0xf1   :  { %585 = vperm.xlu1 %8320, %v9814_v4  }
  0xf3   :  { %8337 = vset.pattern.permute.xlu0 %v9565_v22 }
  0xf4   :  { %507 = vperm.xlu0 %8337, %v9810_v3  }
  0xf5   :  { %8321 = vset.pattern.permute.xlu1 %v9567_v25 }
  0xf6   :  { %643 = vperm.xlu1 %8321, %v9816_v5  }
  0xf8   :  { %519 = vperm.xlu0 %8337, %v9814_v4  }
  0xfa   :  { %647 = vperm.xlu1 %8321, %v9808_v2  }
  0xfc   :  { %523 = vperm.xlu0 %8337, %v9863_v18  }
  0xfe   :  { %8322 = vset.pattern.permute.xlu1 %v9568_v26 }
  0xff   :  { %705 = vperm.xlu1 %8322, %v9810_v3  }
 0x100   :  { %535 = vperm.xlu0 %8337, %v9867_v19  }
 0x103   :  { %713 = vperm.xlu1 %8322, %v9808_v2  }
 0x104   :  { %543 = vperm.xlu0 %8337, %v9836_v12  }
 0x107   :  { %717 = vperm.xlu1 %8322, %v9814_v4  }
 0x108   :  { %8339 = vset.pattern.permute.xlu0 %v9566_v23 }
 0x109   :  { %577 = vperm.xlu0 %8339, %v9816_v5  }
 0x10b   :  { %8323 = vset.pattern.permute.xlu1 %v12566_v27 }
 0x10c   :  { %775 = vperm.xlu1 %8323, %v9816_v5  }
 0x10d   :  { %593 = vperm.xlu0 %8339, %v9827_v10  }
 0x110   :  { %779 = vperm.xlu1 %8323, %v9808_v2  }
 0x111   :  { %609 = vperm.xlu0 %8339, %v9836_v12  }
 0x114   :  { %8324 = vset.pattern.permute.xlu1 %v9561_v1 }
 0x115   :  { %325 = vperm.xlu1 %8324, %v9863_v18   ;;  %8341 = vset.pattern.permute.xlu0 %v9567_v25 }
 0x116   :  { %639 = vperm.xlu0 %8341, %v9810_v3  }
 0x119   :  { %333 = vperm.xlu1 %8324, %v9921_v29  }
 0x11a   :  { %651 = vperm.xlu0 %8341, %v9814_v4  }
 0x11d   :  { %337 = vperm.xlu1 %8324, %v9867_v19  }
 0x11e   :  { %655 = vperm.xlu0 %8341, %v9863_v18  }
 0x121   :  { %8325 = vset.pattern.permute.xlu1 %v9563_v11 }
 0x122   :  { %395 = vperm.xlu1 %8325, %v9827_v10   ;;  %667 = vperm.xlu0 %8341, %v9867_v19  }
 0x126   :  { %399 = vperm.xlu1 %8325, %v9921_v29   ;;  %675 = vperm.xlu0 %8341, %v9836_v12  }
 0x12a   :  { %8326 = vset.pattern.permute.xlu1 %v9564_v17  ;;  %8343 = vset.pattern.permute.xlu0 %v9568_v26 }
 0x12b   :  { %457 = vperm.xlu1 %8326, %v9863_v18   ;;  %709 = vperm.xlu0 %8343, %v9816_v5  }
 0x12f   :  { %465 = vperm.xlu1 %8326, %v9921_v29   ;;  %725 = vperm.xlu0 %8343, %v9827_v10  }
 0x133   :  { %469 = vperm.xlu1 %8326, %v9867_v19   ;;  %741 = vperm.xlu0 %8343, %v9836_v12  }
 0x137   :  { %8327 = vset.pattern.permute.xlu1 %v9565_v22  ;;  %8345 = vset.pattern.permute.xlu0 %v12566_v27 }
 0x138   :  { %527 = vperm.xlu1 %8327, %v9827_v10   ;;  %771 = vperm.xlu0 %8345, %v9810_v3   ;;  %v10015_v3 = vld [vmem:[#allocation6 + $0x40] sm:$0xff] }
 0x13c   :  { %531 = vperm.xlu1 %8327, %v9921_v29   ;;  %783 = vperm.xlu0 %8345, %v9814_v4  }
 0x140   :  { %v9946_v30 = vpop.permute.xlu1 %317  ;;  %8328 = vset.pattern.permute.xlu1 %v9566_v23  ;;  %787 = vperm.xlu0 %8345, %v9863_v18   ;;  %v9950_v31 = vpop.permute.xlu0 %309 }
 0x141   :  { %12720 = vst [vmem:[#allocation31_spill] sm:$0xff] %v9946_v30  ;;  %12721 = vst [vmem:[#allocation32_spill] sm:$0xff] %v9950_v31  ;;  %589 = vperm.xlu1 %8328, %v9863_v18   ;;  %v352_v37 = vmul.f32 %v9950_v31, %v297_v32  ;;  %v10060_v32 = vld [vmem:[#allocation2 + $0x1a] sm:$0xff] }
 0x144   :  { %v9953_v33 = vpop.permute.xlu1 %321  ;;  %799 = vperm.xlu0 %8345, %v9867_v19   ;;  %v9956_v34 = vpop.permute.xlu0 %313 }
 0x145   :  { %12722 = vst [vmem:[#allocation33_spill] sm:$0xff] %v9953_v33  ;;  %12723 = vst [vmem:[#allocation34_spill] sm:$0xff] %v9956_v34  ;;  %597 = vperm.xlu1 %8328, %v9921_v29   ;;  %v353_v38 = vmul.f32 %v9956_v34, %v298_v35  ;;  %v365_v34 = vld [vmem:[#allocation2 + $0x14] sm:$0xff] }
 0x147   :  { %v8349_v45 = vpack.i.bf16 %v353_v38, %v352_v37 }
 0x148   :  { %807 = vperm.xlu0 %8345, %v9836_v12   ;;  %v9960_v36 = vpop.permute.xlu0 %329 }
 0x149   :  { %v9964_v39 = vpop.permute.xlu1 %379  ;;  %601 = vperm.xlu1 %8328, %v9867_v19  }
 0x14a   :  { %12724 = vst [vmem:[#allocation35_spill] sm:$0xff] %v9964_v39  ;;  %v419_v47 = vmul.f32 %v9964_v39, %v364_v42  ;;  %v12773_v39 = vmov 0  }
 0x14c   :  { %8348 = vset.pattern.permute.xlu0 %v12554_v40  ;;  %v9968_v41 = vpop.permute.xlu0 %345 }
 0x14d   :  { %12725 = vst [vmem:[#allocation36_spill] sm:$0xff] %v9968_v41  ;;  %v9970_v43 = vpop.permute.xlu1 %383  ;;  %8329 = vset.pattern.permute.xlu1 %v9567_v25  ;;  %238 = vperm.xlu0 %8348, %v9816_v5  }
 0x14e   :  { %12726 = vst [vmem:[#allocation37_spill] sm:$0xff] %v9970_v43  ;;  %659 = vperm.xlu1 %8329, %v9827_v10   ;;  %v495_v10 = vld [vmem:[#allocation2 + $0x10] sm:$0xff] }
 0x151   :  { %v9975_v46 = vpop.permute.xlu0 %375  ;;  %8350 = vrot.lane.b32.xlu0 %v8349_v45, %s9571_s23 }
 0x152   :  { %12727 = vst [vmem:[#allocation38_spill] sm:$0xff] %v9975_v46  ;;  %v418_v48 = vmul.f32 %v9975_v46, %v363_v44  ;;  %663 = vperm.xlu1 %8329, %v9921_v29   ;;  %v9981_v49 = vpop.permute.xlu1 %441 }
 0x153   :  { %12728 = vst [vmem:[#allocation39_spill] sm:$0xff] %v9981_v49  ;;  %v484_v63 = vmul.f32 %v9981_v49, %v429_v58  ;;  %v563_v49 = vld [vmem:[#allocation2 + $0x22] sm:$0xff] }
 0x154   :  { %v8359_v50 = vpack.i.bf16 %v419_v47, %v418_v48  ;;  %v10083_v48 = vld [vmem:[#allocation2 + $0x24] sm:$0xff] }
 0x155   :  { %v9983_v51 = vpop.permute.xlu0 %387 }
 0x156   :  { %12729 = vst [vmem:[#allocation40_spill] sm:$0xff] %v9983_v51  ;;  %8330 = vset.pattern.permute.xlu1 %v9568_v26  ;;  %v9986_v52 = vpop.permute.xlu1 %449  ;;  %8360 = vrot.lane.b32.xlu0 %v8359_v50, %s9572_s14  ;;  %v10086_v50 = vld [vmem:[#allocation2 + $0x1c] sm:$0xff] }
 0x157   :  { %12730 = vst [vmem:[#allocation41_spill] sm:$0xff] %v9986_v52  ;;  %721 = vperm.xlu1 %8330, %v9863_v18  }
 0x159   :  { %v9990_v53 = vpop.permute.xlu0 %391 }
 0x15a   :  { %12731 = vst [vmem:[#allocation42_spill] sm:$0xff] %v9990_v53  ;;  %v9992_v54 = vpop.permute.xlu1 %453 }
 0x15b   :  { %12732 = vst [vmem:[#allocation43_spill] sm:$0xff] %v9992_v54  ;;  %729 = vperm.xlu1 %8330, %v9921_v29  }
 0x15d   :  { %v9995_v55 = vpop.permute.xlu0 %403 }
 0x15e   :  { %12733 = vst [vmem:[#allocation44_spill] sm:$0xff] %v9995_v55 }
 0x15f   :  { %733 = vperm.xlu1 %8330, %v9867_v19   ;;  %v9998_v56 = vpop.permute.xlu1 %511 }
 0x160   :  { %12734 = vst [vmem:[#allocation45_spill] sm:$0xff] %v9998_v56  ;;  %v551_v14 = vmul.f32 %v9998_v56, %v496_v9 }
 0x161   :  { %v10000_v57 = vpop.permute.xlu0 %411 }
 0x162   :  { %12735 = vst [vmem:[#allocation46_spill] sm:$0xff] %v10000_v57 }
 0x163   :  { %8331 = vset.pattern.permute.xlu1 %v12566_v27  ;;  %v10003_v60 = vpop.permute.xlu1 %515 }
 0x164   :  { %12736 = vst [vmem:[#allocation47_spill] sm:$0xff] %v10003_v60  ;;  %791 = vperm.xlu1 %8331, %v10005_v61  }
 0x166   :  { %v10008_v62 = vpop.permute.xlu0 %445 }
 0x167   :  { %12737 = vst [vmem:[#allocation48_spill] sm:$0xff] %v10008_v62  ;;  %v485_v0 = vmul.f32 %v10008_v62, %v430_v59  ;;  %v302_v62 = vld [vmem:[#allocation2 + $0x2a] sm:$0xff] }
 0x168   :  { %795 = vperm.xlu1 %8331, %v9921_v29   ;;  %v10013_v2 = vpop.permute.xlu1 %573  ;;  %v10058_v29 = vld [vmem:[#allocation2 + $0x12] sm:$0xff] }
 0x169   :  { %12738 = vst [vmem:[#allocation49_spill] sm:$0xff] %v10013_v2  ;;  %v8369_v4 = vpack.i.bf16 %v485_v0, %v484_v63  ;;  %v616_v37 = vmul.f32 %v10013_v2, %v10058_v29 }
 0x16a   :  { %v10017_v5 = vpop.permute.xlu0 %461 }
 0x16b   :  { %12739 = vst [vmem:[#allocation50_spill] sm:$0xff] %v10017_v5  ;;  %8370 = vrot.lane.b32.xlu0 %v8369_v4, %s9573_s27 }
 0x16c   :  { %8332 = vset.pattern.permute.xlu1 %v9561_v1  ;;  %v10021_v6 = vpop.permute.xlu1 %581 }
 0x16d   :  { %12740 = vst [vmem:[#allocation51_spill] sm:$0xff] %v10021_v6  ;;  %341 = vperm.xlu1 %8332, %v10015_v3  }
 0x16e   :  { %v10026_v8 = vpop.permute.xlu0 %477 }
 0x16f   :  { %12741 = vst [vmem:[#allocation52_spill] sm:$0xff] %v10026_v8 }
 0x170   :  { %v10028_v12 = vpop.permute.xlu1 %585 }
 0x171   :  { %12742 = vst [vmem:[#allocation53_spill] sm:$0xff] %v10028_v12  ;;  %349 = vperm.xlu1 %8332, %v10024_v7  }
 0x173   :  { %v10031_v13 = vpop.permute.xlu0 %507 }
 0x174   :  { %12743 = vst [vmem:[#allocation54_spill] sm:$0xff] %v10031_v13  ;;  %v550_v1 = vmul.f32 %v10031_v13, %v495_v10 }
 0x175   :  { %8334 = vset.pattern.permute.xlu1 %v9563_v11  ;;  %v10036_v15 = vpop.permute.xlu1 %643 }
 0x176   :  { %12744 = vst [vmem:[#allocation55_spill] sm:$0xff] %v10036_v15  ;;  %407 = vperm.xlu1 %8334, %v10015_v3   ;;  %v8379_v16 = vpack.i.bf16 %v551_v14, %v550_v1  ;;  %v683_v63 = vmul.f32 %v10036_v15, %v10083_v48 }
 0x177   :  { %v10039_v18 = vpop.permute.xlu0 %519 }
 0x178   :  { %12745 = vst [vmem:[#allocation56_spill] sm:$0xff] %v10039_v18  ;;  %8380 = vrot.lane.b32.xlu0 %v8379_v16, %s9574_s21 }
 0x179   :  { %v10042_v19 = vpop.permute.xlu1 %647 }
 0x17a   :  { %12746 = vst [vmem:[#allocation57_spill] sm:$0xff] %v10042_v19  ;;  %415 = vperm.xlu1 %8334, %v10024_v7  }
 0x17b   :  { %v10045_v20 = vpop.permute.xlu0 %523 }
 0x17c   :  { %12747 = vst [vmem:[#allocation58_spill] sm:$0xff] %v10045_v20 }
 0x17e   :  { %8336 = vset.pattern.permute.xlu1 %v9564_v17  ;;  %v10048_v21 = vpop.permute.xlu1 %705 }
 0x17f   :  { %12748 = vst [vmem:[#allocation59_spill] sm:$0xff] %v10048_v21  ;;  %473 = vperm.xlu1 %8336, %v10015_v3   ;;  %v10051_v11 = vpop.permute.xlu0 %535 }
 0x180   :  { %12749 = vst [vmem:[#allocation60_spill] sm:$0xff] %v10051_v11 }
 0x182   :  { %v10053_v24 = vpop.permute.xlu1 %713 }
 0x183   :  { %12750 = vst [vmem:[#allocation61_spill] sm:$0xff] %v10053_v24  ;;  %481 = vperm.xlu1 %8336, %v10024_v7   ;;  %v10056_v28 = vpop.permute.xlu0 %543 }
 0x184   :  { %12751 = vst [vmem:[#allocation62_spill] sm:$0xff] %v10056_v28 }
 0x186   :  { %v10062_v35 = vpop.permute.xlu1 %717 }
 0x187   :  { %12752 = vst [vmem:[#allocation63_spill] sm:$0xff] %v10062_v35  ;;  %8338 = vset.pattern.permute.xlu1 %v9565_v22 }
 0x188   :  { %539 = vperm.xlu1 %8338, %v10015_v3   ;;  %v10066_v17 = vpop.permute.xlu0 %577 }
 0x189   :  { %12753 = vst [vmem:[#allocation64_spill] sm:$0xff] %v10066_v17  ;;  %v617_v38 = vmul.f32 %v10066_v17, %v10060_v32 }
 0x18b   :  { %v10072_v42 = vpop.permute.xlu1 %775  ;;  %v8389_v44 = vpack.i.bf16 %v617_v38, %v616_v37  ;;  %v431_v38 = vld [vmem:[#allocation2 + $0x1e] sm:$0xff] }
 0x18c   :  { %12754 = vst [vmem:[#allocation65_spill] sm:$0xff] %v10072_v42  ;;  %547 = vperm.xlu1 %8338, %v10024_v7   ;;  %v10075_v45 = vpop.permute.xlu0 %593 }
 0x18d   :  { %12755 = vst [vmem:[#allocation66_spill] sm:$0xff] %v10075_v45  ;;  %8390 = vrot.lane.b32.xlu0 %v8389_v44, %s9575_s28  ;;  %v432_v44 = vld [vmem:[#allocation2 + $0x26] sm:$0xff] }
 0x18f   :  { %v10078_v22 = vpop.permute.xlu1 %779 }
 0x190   :  { %12756 = vst [vmem:[#allocation67_spill] sm:$0xff] %v10078_v22  ;;  %8340 = vset.pattern.permute.xlu1 %v9566_v23  ;;  %v10081_v47 = vpop.permute.xlu0 %609 }
 0x191   :  { %12757 = vst [vmem:[#allocation68_spill] sm:$0xff] %v10081_v47  ;;  %605 = vperm.xlu1 %8340, %v10015_v3  }
 0x194   :  { %v10088_v58 = vpop.permute.xlu1 %325 }
 0x195   :  { %12758 = vst [vmem:[#allocation69_spill] sm:$0xff] %v10088_v58  ;;  %613 = vperm.xlu1 %8340, %v10024_v7   ;;  %v10091_v59 = vpop.permute.xlu0 %639 }
 0x196   :  { %12759 = vst [vmem:[#allocation70_spill] sm:$0xff] %v10091_v59  ;;  %v682_v23 = vmul.f32 %v10091_v59, %v10086_v50 }
 0x198   :  { %v10097_v0 = vpop.permute.xlu1 %333  ;;  %v8399_v4 = vpack.i.bf16 %v683_v63, %v682_v23 }
 0x199   :  { %12760 = vst [vmem:[#allocation71_spill] sm:$0xff] %v10097_v0  ;;  %8342 = vset.pattern.permute.xlu1 %v9567_v25  ;;  %v10100_v9 = vpop.permute.xlu0 %651 }
 0x19a   :  { %12761 = vst [vmem:[#allocation72_spill] sm:$0xff] %v10100_v9  ;;  %671 = vperm.xlu1 %8342, %v10015_v3   ;;  %8400 = vrot.lane.b32.xlu0 %v8399_v4, %s9576_s30  ;;  %v748_v4 = vmul.f32 %v10048_v21, %v431_v38  ;;  %v354_v21 = vmul.f32 %v9946_v30, %v10058_v29  ;;  %v629_v29 = vld [vmem:[#allocation2 + $0x2c] sm:$0xff] }
 0x19c   :  { %v10104_v10 = vpop.permute.xlu1 %337 }
 0x19d   :  { %12762 = vst [vmem:[#allocation73_spill] sm:$0xff] %v10104_v10  ;;  %v10106_v14 = vpop.permute.xlu0 %655 }
 0x19e   :  { %12763 = vst [vmem:[#allocation74_spill] sm:$0xff] %v10106_v14  ;;  %679 = vperm.xlu1 %8342, %v10024_v7  }
 0x1a1   :  { %v10109_v1 = vpop.permute.xlu1 %395  ;;  %v10111_v16 = vpop.permute.xlu0 %667 }
 0x1a2   :  { %12764 = vst [vmem:[#allocation75_spill] sm:$0xff] %v10109_v1  ;;  %12765 = vst [vmem:[#allocation76_spill] sm:$0xff] %v10111_v16  ;;  %8344 = vset.pattern.permute.xlu1 %v9568_v26 }
 0x1a3   :  { %737 = vperm.xlu1 %8344, %v10015_v3  }
 0x1a5   :  { %v10115_v25 = vpop.permute.xlu1 %399  ;;  %v10117_v37 = vpop.permute.xlu0 %675 }
 0x1a6   :  { %12766 = vst [vmem:[#allocation77_spill] sm:$0xff] %v10115_v25  ;;  %12767 = vst [vmem:[#allocation78_spill] sm:$0xff] %v10117_v37 }
 0x1a7   :  { %745 = vperm.xlu1 %8344, %v10024_v7  }
 0x1aa   :  { %v10120_v63 = vpop.permute.xlu1 %457  ;;  %v10122_v23 = vpop.permute.xlu0 %709 }
 0x1ab   :  { %12768 = vst [vmem:[#allocation79_spill] sm:$0xff] %v10120_v63  ;;  %12769 = vst [vmem:[#allocation80_spill] sm:$0xff] %v10122_v23  ;;  %v749_v40 = vmul.f32 %v10122_v23, %v432_v44  ;;  %8346 = vset.pattern.permute.xlu1 %v12566_v27  ;;  %v9277_v27 = vld [vmem:[#allocation6] sm:$0xff]  ;;  %v9278_v23 = vld [vmem:[#allocation6 + $0x10] sm:$0xff] }
 0x1ac   :  { %803 = vperm.xlu1 %8346, %v10015_v3  }
 0x1ad   :  { %v8409_v26 = vpack.i.bf16 %v749_v40, %v748_v4  ;;  %v10140_v40 = vld [vmem:[#allocation2 + $0x20] sm:$0xff]  ;;  %v10142_v4 = vld [vmem:[#allocation2 + $0x28] sm:$0xff] }
 0x1ae   :  { %v10128_v13 = vpop.permute.xlu1 %465  ;;  %v10130_v56 = vpop.permute.xlu0 %725 }
 0x1af   :  { %12770 = vst [vmem:[#allocation81_spill] sm:$0xff] %v10128_v13  ;;  %12771 = vst [vmem:[#allocation82_spill] sm:$0xff] %v10130_v56  ;;  %8410 = vrot.lane.b32.xlu0 %v8409_v26, %s9577_s18  ;;  %v815_v26 = vmul.f32 %v10072_v42, %v10142_v4  ;;  %v9279_v42 = vld [vmem:[#allocation6 + $0x18] sm:$0xff] }
 0x1b0   :  { %811 = vperm.xlu1 %8346, %v10024_v7  }
 0x1b2   :  { %v10134_v15 = vpop.permute.xlu1 %469  ;;  %v10136_v59 = vpop.permute.xlu0 %741 }
 0x1b3   :  { %12772 = vst [vmem:[#allocation83_spill] sm:$0xff] %v10134_v15  ;;  %258 = vperm.xlu0 %8348, %v10005_v61  }
 0x1b4   :  { %8347 = vset.pattern.permute.xlu1 %v12773_v39 }
 0x1b5   :  { %233 = vperm.xlu1 %8347, %v9277_v27   ;;  %v355_v27 = vmul.f32 %v9953_v33, %v10060_v32  ;;  %v357_v32 = vmul.f32 %v9960_v36, %v302_v62  ;;  %v9280_v33 = vld [vmem:[#allocation6 + $0x38] sm:$0xff] }
 0x1b7   :  { %v10144_v46 = vpop.permute.xlu1 %527  ;;  %v10146_v17 = vpop.permute.xlu0 %771 }
 0x1b8   :  { %12774 = vst [vmem:[#allocation84_spill] sm:$0xff] %v10144_v46  ;;  %12775 = vst [vmem:[#allocation85_spill] sm:$0xff] %v10146_v17  ;;  %v814_v2 = vmul.f32 %v10146_v17, %v10140_v40  ;;  %v356_v17 = vmul.f32 %v563_v49, %v10088_v58  ;;  %v487_v58 = vmul.f32 %v9992_v54, %v432_v44  ;;  %v10179_v44 = vld [vmem:[#allocation2 + $0x38] sm:$0xff] }
 0x1b9   :  { %243 = vperm.xlu1 %8347, %v9278_v23   ;;  %v8354_v23 = vpack.i.bf16 %v355_v27, %v354_v21  ;;  %v422_v21 = vmul.f32 %v9990_v53, %v10083_v48  ;;  %v695_v27 = vld [vmem:[#allocation2 + $0x2e] sm:$0xff] }
 0x1ba   :  { %v8419_v61 = vpack.i.bf16 %v815_v26, %v814_v2  ;;  %v421_v2 = vmul.f32 %v9983_v51, %v10086_v50  ;;  %v8429_v30 = vpack.i.bf16 %v357_v32, %v356_v17  ;;  %v553_v17 = vmul.f32 %v10039_v18, %v10142_v4  ;;  %v10199_v18 = vld [vmem:[#allocation2 + $0x32] sm:$0xff] }
 0x1bb   :  { %v10154_v39 = vpop.permute.xlu1 %531 }
 0x1bc   :  { %12776 = vst [vmem:[#allocation86_spill] sm:$0xff] %v10154_v39  ;;  %8420 = vrot.lane.b32.xlu0 %v8419_v61, %s9578_s4  ;;  %v420_v61 = vmul.f32 %v9970_v43, %v365_v34  ;;  %v488_v34 = vmul.f32 %v695_v27, %v10120_v63 }
 0x1bd   :  { %248 = vperm.xlu1 %8347, %v9279_v42   ;;  %v423_v42 = vmul.f32 %v629_v29, %v10109_v1  ;;  %v434_v1 = vld [vmem:[#allocation2 + $0x36] sm:$0xff] }
 0x1be   :  { %v8364_v31 = vpack.i.bf16 %v421_v2, %v420_v61  ;;  %v489_v48 = vmul.f32 %v10017_v5, %v434_v1  ;;  %v619_v61 = vmul.f32 %v10028_v12, %v302_v62 }
 0x1c0   :  { %v10163_v26 = vpop.permute.xlu1 %589  ;;  %268 = vperm.xlu0 %8348, %v9280_v33   ;;  %v486_v33 = vmul.f32 %v9986_v52, %v431_v38  ;;  %v8449_v38 = vpack.i.bf16 %v489_v48, %v488_v34 }
 0x1c1   :  { %12777 = vst [vmem:[#allocation87_spill] sm:$0xff] %v10163_v26  ;;  %8355 = vrot.lane.b32.xlu1 %v8354_v23, %s9571_s23  ;;  %v8439_v23 = vpack.i.bf16 %v423_v42, %v422_v21  ;;  %v10191_v42 = vld [vmem:[#allocation2 + $0x30] sm:$0xff]  ;;  %v620_v62 = vmul.f32 %v10163_v26, %v10199_v18  ;;  %v12788_v26 = vmov 8  }
 0x1c2   :  { %v8374_v2 = vpack.i.bf16 %v487_v58, %v486_v33  ;;  %v554_v21 = vmul.f32 %v10045_v20, %v10191_v42  ;;  %v10195_v33 = vld [vmem:[#allocation2 + $0x34] sm:$0xff] }
 0x1c3   :  { %v685_v48 = vmul.f32 %v10100_v9, %v10195_v33 }
 0x1c4   :  { %v10171_v50 = vpop.permute.xlu1 %597  ;;  %8430 = vrot.lane.b32.xlu0 %v8429_v30, %s9571_s23  ;;  %v552_v30 = vmul.f32 %v10003_v60, %v10140_v40 }
 0x1c5   :  { %12778 = vst [vmem:[#allocation88_spill] sm:$0xff] %v10171_v50  ;;  %8365 = vrot.lane.b32.xlu1 %v8364_v31, %s9572_s14  ;;  %v555_v31 = vmul.f32 %v10144_v46, %v10179_v44 }
 0x1c6   :  { %v8384_v58 = vpack.i.bf16 %v553_v17, %v552_v30  ;;  %v566_v17 = vld [vmem:[#allocation2 + $0x3a] sm:$0xff]  ;;  %v10208_v30 = vld [vmem:[#allocation2 + $0x44] sm:$0xff] }
 0x1c7   :  { %v8459_v34 = vpack.i.bf16 %v555_v31, %v554_v21  ;;  %v370_v21 = vld [vmem:[#allocation2 + $0x3c] sm:$0xff] }
 0x1c8   :  { %v10182_v32 = vpop.permute.xlu1 %601  ;;  %8440 = vrot.lane.b32.xlu0 %v8439_v23, %s9572_s14  ;;  %v618_v23 = vmul.f32 %v10021_v6, %v563_v49  ;;  %v684_v49 = vmul.f32 %v10042_v19, %v629_v29  ;;  %v686_v9 = vmul.f32 %v10106_v14, %v370_v21 }
 0x1c9   :  { %12779 = vst [vmem:[#allocation89_spill] sm:$0xff] %v10182_v32  ;;  %8375 = vrot.lane.b32.xlu1 %v8374_v2, %s9573_s27 }
 0x1ca   :  { %v8394_v46 = vpack.i.bf16 %v619_v61, %v618_v23  ;;  %v8404_v60 = vpack.i.bf16 %v685_v48, %v684_v49  ;;  %v10221_v61 = vld [vmem:[#allocation2 + $0x3e] sm:$0xff]  ;;  %v698_v23 = vld [vmem:[#allocation2 + $0x46] sm:$0xff]  ;;  %v750_v48 = vmul.f32 %v10053_v24, %v695_v27  ;;  %v816_v27 = vmul.f32 %v10078_v22, %v10191_v42 }
 0x1cb   :  { %v753_v19 = vmul.f32 %v10130_v56, %v698_v23 }
 0x1cc   :  { %8450 = vrot.lane.b32.xlu0 %v8449_v38, %s9573_s27  ;;  %v621_v38 = vmul.f32 %v10075_v45, %v566_v17 }
 0x1cd   :  { %v10201_v2 = vpop.permute.xlu1 %659  ;;  %8385 = vrot.lane.b32.xlu1 %v8384_v58, %s9574_s21 }
 0x1ce   :  { %12780 = vst [vmem:[#allocation90_spill] sm:$0xff] %v10201_v2  ;;  %v687_v31 = vmul.f32 %v10201_v2, %v10208_v30  ;;  %v8469_v58 = vpack.i.bf16 %v621_v38, %v620_v62  ;;  %v9281_v38 = vld [vmem:[#allocation6 + $0x20] sm:$0xff] }
 0x1d0   :  { %8460 = vrot.lane.b32.xlu0 %v8459_v34, %s9574_s21  ;;  %v8479_v34 = vpack.i.bf16 %v687_v31, %v686_v9  ;;  %v9282_v31 = vld [vmem:[#allocation6 + $0x48] sm:$0xff] }
 0x1d1   :  { %v10213_v20 = vpop.permute.xlu1 %663  ;;  %8395 = vrot.lane.b32.xlu1 %v8394_v46, %s9575_s28  ;;  %v751_v46 = vmul.f32 %v10062_v35, %v434_v1 }
 0x1d2   :  { %12781 = vst [vmem:[#allocation91_spill] sm:$0xff] %v10213_v20 }
 0x1d3   :  { %v8414_v2 = vpack.i.bf16 %v751_v46, %v750_v48  ;;  %v9283_v46 = vld [vmem:[#allocation6 + $0x30] sm:$0xff] }
 0x1d4   :  { %8470 = vrot.lane.b32.xlu0 %v8469_v58, %s9575_s28  ;;  %v10233_v58 = vpop.permute.xlu0 %783 }
 0x1d5   :  { %8405 = vrot.lane.b32.xlu1 %v8404_v60, %s9576_s30  ;;  %12784 = vst [vmem:[#allocation94_spill] sm:$0xff] %v10233_v58  ;;  %v817_v1 = vmul.f32 %v10233_v58, %v10179_v44 }
 0x1d6   :  { %v10223_v29 = vpop.permute.xlu1 %721 }
 0x1d7   :  { %12782 = vst [vmem:[#allocation92_spill] sm:$0xff] %v10223_v29  ;;  %v752_v62 = vmul.f32 %v10223_v29, %v10221_v61  ;;  %v8424_v53 = vpack.i.bf16 %v817_v1, %v816_v27  ;;  %v10268_v1 = vld [vmem:[#allocation2 + $0x58] sm:$0xff] }
 0x1d8   :  { %8480 = vrot.lane.b32.xlu0 %v8479_v34, %s9576_s30  ;;  %v10246_v34 = vpop.permute.xlu0 %787 }
 0x1d9   :  { %253 = vperm.xlu1 %8347, %v9281_v38   ;;  %v8489_v60 = vpack.i.bf16 %v753_v19, %v752_v62  ;;  %v8660_v19 = vld [vmem:[%s12536_s2] sm:$0xff]   ;;  %12786 = vst [vmem:[#allocation96_spill] sm:$0xff] %v10246_v34  ;;  %v9579_v62 = vmov 65535   ;;  %v10251_v38 = vld [vmem:[#allocation2 + $0x48] sm:$0xff] }
 0x1da   :  { %v10231_v49 = vpop.permute.xlu1 %729  ;;  %8093 = vmatprep.subr.bf16.mxu0 %v8660_v19  ;;  %v1321_v48 = vsel %vm1319_vm2, 4294967295, %v9579_v62  ;;  %v358_v62 = vmul.f32 %v10097_v0, %v10199_v18  ;;  %vm9583_vm2 = vmmov 0  }
 0x1db   :  { %12783 = vst [vmem:[#allocation93_spill] sm:$0xff] %v10231_v49  ;;  %8094 = vmatpush3.bf16.msra.mxu0 %v8660_v19  ;;  %v424_v19 = vmul.f32 %v10195_v33, %v10115_v25 }
 0x1dc   :  { %8490 = vrot.lane.b32.xlu0 %v8489_v60, %s9577_s18  ;;  %v359_v60 = vmul.f32 %v566_v17, %v10104_v10  ;;  %v10266_v17 = vld [vmem:[#allocation2 + $0x50] sm:$0xff]  ;;  %v10272_v27 = vpop.permute.xlu0 %799 }
 0x1dd   :  { %8415 = vrot.lane.b32.xlu1 %v8414_v2, %s9577_s18  ;;  %v8661_v2 = vld [vmem:[%s12536_s2 + $0x8] sm:$0x3f]   ;;  %12789 = vst [vmem:[#allocation98_spill] sm:$0xff] %v10272_v27  ;;  %v821_v18 = vmul.f32 %v10272_v27, %v10268_v1 }
 0x1de   :  { %v10237_v9 = vpop.permute.xlu1 %733 }
 0x1df   :  { %12785 = vst [vmem:[#allocation95_spill] sm:$0xff] %v10237_v9 }
 0x1e0   :  { %278 = vperm.xlu0 %8348, %v9282_v31   ;;  %v10254_v31 = vld [vmem:[#allocation2 + $0x40] sm:$0xff] }
 0x1e1   :  { %263 = vperm.xlu1 %8347, %v9283_v46   ;;  %v1322_v46 = vsel %vm1320_vm3, %v1321_v48, 0  ;;  %v818_v51 = vmul.f32 %v10246_v34, %v10254_v31  ;;  %vm5897_vm3 = vcmask 50176  }
 0x1e2   :  { %v1324_v45 = vand.u32 %v8661_v2, %v1322_v46  ;;  %v8434_v2 = vpack.i.bf16 %v359_v60, %v358_v62  ;;  %v307_v60 = vld [vmem:[#allocation2 + $0x52] sm:$0xf] }
 0x1e3   :  { %v10256_v14 = vpop.permute.xlu1 %791 }
 0x1e4   :  { %12787 = vst [vmem:[#allocation97_spill] sm:$0xff] %v10256_v14  ;;  %v819_v43 = vmul.f32 %v10256_v14, %v10251_v38  ;;  %8659 = vset.pattern.permute.xlu0 %v12788_v26  ;;  %8095 = vmatprep.subr.bf16.mxu0 %v1324_v45  ;;  %v491_v26 = vmul.f32 %v698_v23, %v10134_v15 }
 0x1e5   :  { %8425 = vrot.lane.b32.xlu1 %v8424_v53, %s9578_s4  ;;  %8096 = vmatpush3.bf16.msra.mxu0 %v1324_v45  ;;  %v490_v45 = vmul.f32 %v10128_v13, %v10221_v61  ;;  %v557_v23 = vmul.f32 %v10051_v11, %v10251_v38 }
 0x1e6   :  { %v8499_v6 = vpack.i.bf16 %v819_v43, %v818_v51  ;;  %v425_v43 = vmul.f32 %v9995_v55, %v370_v21 }
 0x1e7   :  { %v10274_v48 = vpop.permute.xlu1 %795  ;;  %v8454_v21 = vpack.i.bf16 %v491_v26, %v490_v45  ;;  %v372_v26 = vld [vmem:[#allocation2 + $0x4c] sm:$0xff] }
 0x1e8   :  { %12790 = vst [vmem:[#allocation99_spill] sm:$0xff] %v10274_v48  ;;  %v820_v53 = vmul.f32 %v10274_v48, %v10266_v17  ;;  %8500 = vrot.lane.b32.xlu0 %v8499_v6, %s9578_s4  ;;  %v8444_v33 = vpack.i.bf16 %v425_v43, %v424_v19  ;;  %v556_v6 = vmul.f32 %v10154_v39, %v10254_v31 }
 0x1e9   :  { %8435 = vrot.lane.b32.xlu1 %v8434_v2, %s9571_s23  ;;  %v306_v2 = vld [vmem:[#allocation2 + $0x4a] sm:$0xff]  ;;  %v688_v45 = vmul.f32 %v10213_v20, %v372_v26 }
 0x1ea   :  { %v8504_v51 = vpack.i.bf16 %v821_v18, %v820_v53  ;;  %v567_v18 = vld [vmem:[#allocation2 + $0x42] sm:$0xff]  ;;  %v623_v61 = vmul.f32 %v10182_v32, %v306_v2  ;;  %v8464_v53 = vpack.i.bf16 %v557_v23, %v556_v6 }
 0x1eb   :  { %v622_v43 = vmul.f32 %v10171_v50, %v567_v18 }
 0x1ec   :  { %v10284_v46 = vpop.permute.xlu1 %341  ;;  %8505 = vrot.lane.b32.xlu0 %v8504_v51, %s9578_s4 }
 0x1ed   :  { %12791 = vst [vmem:[#allocation100_spill] sm:$0xff] %v10284_v46  ;;  %8445 = vrot.lane.b32.xlu1 %v8444_v33, %s9572_s14  ;;  %v634_v33 = vld [vmem:[#allocation2 + $0x54] sm:$0xff]  ;;  %v8474_v11 = vpack.i.bf16 %v623_v61, %v622_v43  ;;  %v439_v61 = vld [vmem:[#allocation2 + $0x5e] sm:$0xf] }
 0x1f0   :  { %v10292_v62 = vpop.permute.xlu1 %349 }
 0x1f1   :  { %12792 = vst [vmem:[#allocation101_spill] sm:$0xff] %v10292_v62  ;;  %v362_v19 = vmul.f32 %v10292_v62, %v307_v60  ;;  %8455 = vrot.lane.b32.xlu1 %v8454_v21, %s9573_s27  ;;  %v373_v60 = vld [vmem:[#allocation2 + $0x54] sm:$0xf]  ;;  %v689_v21 = vmul.f32 %v10111_v16, %v634_v33 }
 0x1f3   :  { %856 = vrot.lane.b32.xlu0 %v362_v19, %s9571_s23  ;;  %v8484_v23 = vpack.i.bf16 %v689_v21, %v688_v45  ;;  %v438_v19 = vld [vmem:[#allocation2 + $0x56] sm:$0xff] }
 0x1f4   :  { %v755_v20 = vmul.f32 %v10237_v9, %v438_v19 }
 0x1f5   :  { %v10301_v51 = vpop.permute.xlu1 %407  ;;  %8465 = vrot.lane.b32.xlu1 %v8464_v53, %s9574_s21  ;;  %v699_v53 = vld [vmem:[#allocation2 + $0x4e] sm:$0xff] }
 0x1f6   :  { %12793 = vst [vmem:[#allocation102_spill] sm:$0xff] %v10301_v51  ;;  %v754_v43 = vmul.f32 %v10231_v49, %v699_v53  ;;  %v426_v16 = vmul.f32 %v10208_v30, %v10301_v51  ;;  %v493_v30 = vmul.f32 %v10026_v8, %v438_v19  ;;  %v570_v19 = vld [vmem:[#allocation2 + $0x5a] sm:$0xff] }
 0x1f8   :  { %v8494_v45 = vpack.i.bf16 %v755_v20, %v754_v43 }
 0x1f9   :  { %v10306_v39 = vpop.permute.xlu1 %415  ;;  %8475 = vrot.lane.b32.xlu1 %v8474_v11, %s9575_s28 }
 0x1fa   :  { %12794 = vst [vmem:[#allocation103_spill] sm:$0xff] %v10306_v39  ;;  %v428_v6 = vmul.f32 %v10306_v39, %v373_v60  ;;  %v360_v60 = vmul.f32 %v567_v18, %v10284_v46 }
 0x1fc   :  { %900 = vrot.lane.b32.xlu0 %v428_v6, %s9572_s14  ;;  %v10325_v6 = vpop.permute.xlu0 %807 }
 0x1fd   :  { %8485 = vrot.lane.b32.xlu1 %v8484_v23, %s9576_s30  ;;  %v361_v23 = vmul.f32 %v9968_v41, %v306_v2 }
 0x1fe   :  { %v10312_v55 = vpop.permute.xlu1 %473 }
 0x1ff   :  { %12795 = vst [vmem:[#allocation104_spill] sm:$0xff] %v10312_v55  ;;  %v8509_v20 = vpack.i.bf16 %v361_v23, %v360_v60  ;;  %v492_v2 = vmul.f32 %v699_v53, %v10312_v55  ;;  %v571_v60 = vld [vmem:[#allocation2 + $0x62] sm:$0xf]  ;;  %v559_v53 = vmul.f32 %v10056_v28, %v10268_v1 }
 0x200   :  { %v10336_v18 = vpop.permute.xlu0 %238 }
 0x201   :  { %273 = vperm.xlu1 %8347, %v10015_v3   ;;  %v505_v3 = vld [vmem:[#allocation2 + $0x60] sm:$0xf]  ;;  %12799 = vst [vmem:[#allocation108_spill] sm:$0xff] %v10336_v18 }
 0x202   :  { %v10317_v33 = vpop.permute.xlu1 %481 }
 0x203   :  { %12796 = vst [vmem:[#allocation105_spill] sm:$0xff] %v10317_v33  ;;  %v494_v11 = vmul.f32 %v10317_v33, %v439_v61 }
 0x205   :  { %8495 = vrot.lane.b32.xlu1 %v8494_v45, %s9577_s18  ;;  %944 = vrot.lane.b32.xlu0 %v494_v11, %s9573_s27  ;;  %v427_v11 = vmul.f32 %v10000_v57, %v372_v26  ;;  %v8519_v26 = vpack.i.bf16 %v493_v30, %v492_v2  ;;  %v625_v2 = vmul.f32 %v10081_v47, %v570_v19  ;;  %v702_v19 = vld [vmem:[#allocation2 + $0x66] sm:$0xff] }
 0x207   :  { %v10323_v21 = vpop.permute.xlu1 %539 }
 0x208   :  { %12797 = vst [vmem:[#allocation106_spill] sm:$0xff] %v10323_v21  ;;  %v558_v23 = vmul.f32 %v10266_v17, %v10323_v21  ;;  %v635_v17 = vld [vmem:[#allocation2 + $0x5c] sm:$0xff] }
 0x209   :  { %283 = vperm.xlu1 %8347, %v10024_v7   ;;  %v8514_v7 = vpack.i.bf16 %v427_v11, %v426_v16 }
 0x20a   :  { %v8524_v11 = vpack.i.bf16 %v559_v53, %v558_v23 }
 0x20b   :  { %v10331_v61 = vpop.permute.xlu1 %547 }
 0x20c   :  { %12798 = vst [vmem:[#allocation107_spill] sm:$0xff] %v10331_v61  ;;  %v560_v43 = vmul.f32 %v10331_v61, %v505_v3  ;;  %v10346_v3 = vpop.permute.xlu0 %8350 }
 0x20d   :  { %8510 = vrot.lane.b32.xlu1 %v8509_v20, %s9571_s23  ;;  %v569_v20 = vld [vmem:[#allocation2 + $0x52] sm:$0xff] }
 0x20e   :  { %988 = vrot.lane.b32.xlu0 %v560_v43, %s9574_s21 }
 0x210   :  { %v10340_v45 = vpop.permute.xlu1 %605  ;;  %v10360_v30 = vpop.permute.xlu0 %8360 }
 0x211   :  { %12800 = vst [vmem:[#allocation109_spill] sm:$0xff] %v10340_v45  ;;  %8515 = vrot.lane.b32.xlu1 %v8514_v7, %s9572_s14  ;;  %v624_v43 = vmul.f32 %v10340_v45, %v569_v20 }
 0x213   :  { %v8529_v28 = vpack.i.bf16 %v625_v2, %v624_v43  ;;  %v10373_v43 = vmul.f32 %v10136_v59, %v702_v19 }
 0x214   :  { %v10348_v61 = vpop.permute.xlu1 %613  ;;  %v8371_v23 = vpop.permute.xlu0 %8370 }
 0x215   :  { %12801 = vst [vmem:[#allocation110_spill] sm:$0xff] %v10348_v61  ;;  %v626_v16 = vmul.f32 %v10348_v61, %v571_v60  ;;  %8520 = vrot.lane.b32.xlu1 %v8519_v26, %s9573_s27  ;;  %v637_v60 = vld [vmem:[#allocation2 + $0x6c] sm:$0xf]  ;;  %v9284_v26 = vld [vmem:[#allocation2] sm:$0xff]  ;;  %12805 = vst [vmem:[#allocation114_spill] sm:$0xff] %v10373_v43 }
 0x216   :  { %v691_v21 = vmul.f32 %v9284_v26, %v10117_v37  ;;  %v703_v37 = vld [vmem:[#allocation2 + $0x6e] sm:$0xf] }
 0x217   :  { %1032 = vrot.lane.b32.xlu0 %v626_v16, %s9575_s28 }
 0x219   :  { %v10357_v7 = vpop.permute.xlu1 %671  ;;  %8525 = vrot.lane.b32.xlu1 %v8524_v11, %s9574_s21  ;;  %v701_v11 = vld [vmem:[#allocation2 + $0x5e] sm:$0xff] }
 0x21a   :  { %12802 = vst [vmem:[#allocation111_spill] sm:$0xff] %v10357_v7  ;;  %v690_v1 = vmul.f32 %v10357_v7, %v635_v17  ;;  %v8381_v17 = vpop.permute.xlu0 %8380 }
 0x21b   :  { %v8383_v47 = vunpack.i.h.bf16 %v8381_v17 }
 0x21c   :  { %v8534_v16 = vpack.i.bf16 %v691_v21, %v690_v1  ;;  %v768_v1 = vld [vmem:[#allocation2 + $0x68] sm:$0xff] }
 0x21d   :  { %v10364_v20 = vpop.permute.xlu1 %679  ;;  %8530 = vrot.lane.b32.xlu1 %v8529_v28, %s9575_s28  ;;  %v10385_v59 = vmul.f32 %v10325_v6, %v768_v1  ;;  %v8363_v1 = vunpack.i.h.bf16 %v10360_v30 }
 0x21e   :  { %12803 = vst [vmem:[#allocation112_spill] sm:$0xff] %v10364_v20  ;;  %v692_v53 = vmul.f32 %v10364_v20, %v637_v60  ;;  %v8391_v39 = vpop.permute.xlu0 %8390 }
 0x21f   :  { %12808 = vst [vmem:[#allocation117_spill] sm:$0xff] %v10385_v59  ;;  %v8393_v45 = vunpack.i.h.bf16 %v8391_v39 }
 0x220   :  { %1076 = vrot.lane.b32.xlu0 %v692_v53, %s9576_s30  ;;  %v767_v53 = vld [vmem:[#allocation2 + $0x60] sm:$0xff] }
 0x221   :  { %8535 = vrot.lane.b32.xlu1 %v8534_v16, %s9576_s30 }
 0x222   :  { %v10370_v7 = vpop.permute.xlu1 %737  ;;  %v8401_v16 = vpop.permute.xlu0 %8400 }
 0x223   :  { %12804 = vst [vmem:[#allocation113_spill] sm:$0xff] %v10370_v7  ;;  %v756_v2 = vmul.f32 %v10370_v7, %v701_v11  ;;  %v769_v11 = vld [vmem:[#allocation2 + $0x70] sm:$0xf]  ;;  %v8402_v7 = vunpack.i.l.bf16 %v8401_v16 }
 0x225   :  { %v8539_v28 = vpack.i.bf16 %v10373_v43, %v756_v2  ;;  %v8382_v43 = vunpack.i.l.bf16 %v8381_v17 }
 0x226   :  { %v10377_v60 = vpop.permute.xlu1 %745  ;;  %v8411_v2 = vpop.permute.xlu0 %8410 }
 0x227   :  { %12806 = vst [vmem:[#allocation115_spill] sm:$0xff] %v10377_v60  ;;  %v758_v21 = vmul.f32 %v10377_v60, %v703_v37  ;;  %8540 = vrot.lane.b32.xlu1 %v8539_v28, %s9577_s18  ;;  %v287_v28 = vmul.f32 %v9284_v26, %v10336_v18  ;;  %v8362_v18 = vunpack.i.l.bf16 %v10360_v30  ;;  %v8392_v30 = vunpack.i.l.bf16 %v8391_v39 }
 0x228   :  { %v8412_v17 = vunpack.i.l.bf16 %v8411_v2 }
 0x229   :  { %1120 = vrot.lane.b32.xlu0 %v758_v21, %s9577_s18  ;;  %v8353_v21 = vunpack.i.h.bf16 %v10346_v3 }
 0x22b   :  { %v10382_v20 = vpop.permute.xlu1 %803 }
 0x22c   :  { %12807 = vst [vmem:[#allocation116_spill] sm:$0xff] %v10382_v20  ;;  %v822_v19 = vmul.f32 %v10382_v20, %v767_v53 }
 0x22e   :  { %v8544_v57 = vpack.i.bf16 %v10385_v59, %v822_v19  ;;  %v1178_v19 = vsel %vm207_vm0, %v287_v28, %v8353_v21  ;;  %v8403_v28 = vunpack.i.h.bf16 %v8401_v16 }
 0x22f   :  { %v10389_v51 = vpop.permute.xlu1 %811  ;;  %v1190_v50 = vsel %vm1188_vm4, %v1178_v19, %v8363_v1 }
 0x230   :  { %12809 = vst [vmem:[#allocation118_spill] sm:$0xff] %v10389_v51  ;;  %v824_v37 = vmul.f32 %v10389_v51, %v769_v11  ;;  %8545 = vrot.lane.b32.xlu1 %v8544_v57, %s9578_s4  ;;  %v8352_v11 = vunpack.i.l.bf16 %v10346_v3  ;;  %v8373_v57 = vunpack.i.h.bf16 %v8371_v23 }
 0x232   :  { %1164 = vrot.lane.b32.xlu0 %v824_v37, %s9578_s4  ;;  %v10396_v6 = vpop.permute.xlu0 %258  ;;  %v8372_v37 = vunpack.i.l.bf16 %v8371_v23 }
 0x233   :  { %12810 = vst [vmem:[#allocation119_spill] sm:$0xff] %v10396_v6 }
 0x234   :  { %v10399_v53 = vpop.permute.xlu1 %233 }
 0x235   :  { %12811 = vst [vmem:[#allocation120_spill] sm:$0xff] %v10399_v53  ;;  %v286_v25 = vmul.f32 %v9284_v26, %v10399_v53  ;;  %v1202_v26 = vsel %vm1200_vm5, %v1190_v50, %v8373_v57  ;;  %v8413_v53 = vunpack.i.h.bf16 %v8411_v2 }
 0x236   :  { %v8421_v61 = vpop.permute.xlu0 %8420  ;;  %v1214_v23 = vsel %vm1212_vm6, %v1202_v26, %v8383_v47 }
 0x237   :  { %v1177_v60 = vsel %vm207_vm0, %v286_v25, %v8352_v11  ;;  %v8423_v25 = vunpack.i.h.bf16 %v8421_v61  ;;  %v1226_v1 = vsel %vm1224_vm7, %v1214_v23, %v8393_v45 }
 0x238   :  { %v1189_v3 = vsel %vm1188_vm4, %v1177_v60, %v8362_v18  ;;  %v10408_v21 = vpop.permute.xlu1 %243  ;;  %v8422_v18 = vunpack.i.l.bf16 %v8421_v61  ;;  %v1238_v50 = vsel %vm1236_vm8, %v1226_v1, %v8403_v28 }
 0x239   :  { %12812 = vst [vmem:[#allocation121_spill] sm:$0xff] %v10408_v21  ;;  %v1201_v32 = vsel %vm1200_vm5, %v1189_v3, %v8372_v37  ;;  %v1250_v47 = vsel %vm1248_vm9, %v1238_v50, %v8413_v53  ;;  %v291_v50 = vmul.f32 %v10142_v4, %v10396_v6 }
 0x23a   :  { %v1213_v11 = vsel %vm1212_vm6, %v1201_v32, %v8382_v43  ;;  %v1262_v32 = vsel %vm1260_vm10, %v1250_v47, %v8423_v25 }
 0x23b   :  { %v1225_v19 = vsel %vm1224_vm7, %v1213_v11, %v8392_v30 }
 0x23c   :  { %v10416_v60 = vpop.permute.xlu1 %248  ;;  %v1237_v39 = vsel %vm1236_vm8, %v1225_v19, %v8402_v7  ;;  %v9285_v19 = vld [vmem:[#allocation2 + $0x18] sm:$0xff] }
 0x23d   :  { %12813 = vst [vmem:[#allocation122_spill] sm:$0xff] %v10416_v60  ;;  %v1249_v57 = vsel %vm1248_vm9, %v1237_v39, %v8412_v17 }
 0x23e   :  { %v1261_v16 = vsel %vm1260_vm10, %v1249_v57, %v8422_v18  ;;  %v289_v18 = vmul.f32 %v9285_v19, %v10416_v60  ;;  %v9286_v57 = vld [vmem:[#allocation2 + $0x10] sm:$0xff] }
 0x23f   :  { %v10424_v45 = vpop.permute.xlu0 %268  ;;  %v1272_v43 = vpack.c.bf16 %v1262_v32, %v1261_v16  ;;  %v288_v47 = vmul.f32 %v9286_v57, %v10408_v21 }
 0x240   :  { %v8356_v2 = vpop.permute.xlu1 %8355 }
 0x241   :  { %8097 = vmatprep.mubr.msk.bf16.mxu0 %vm1300_vm11, %v1272_v43  ;;  %v8358_v11 = vunpack.i.h.bf16 %v8356_v2  ;;  %v8357_v1 = vunpack.i.l.bf16 %v8356_v2 }
 0x243   :  { %v8431_v61 = vpop.permute.xlu0 %8430  ;;  %v1180_v49 = vsel %vm207_vm0, %v289_v18, %v8358_v11  ;;  %v1179_v2 = vsel %vm207_vm0, %v288_v47, %v8357_v1 }
 0x244   :  { %v8366_v37 = vpop.permute.xlu1 %8365  ;;  %v8433_v17 = vunpack.i.h.bf16 %v8431_v61  ;;  %v8432_v56 = vunpack.i.l.bf16 %v8431_v61 }
 0x245   :  { %v8368_v39 = vunpack.i.h.bf16 %v8366_v37  ;;  %v8367_v16 = vunpack.i.l.bf16 %v8366_v37 }
 0x246   :  { %v1182_v12 = vsel %vm207_vm0, %v291_v50, %v8433_v17 }
 0x247   :  { %v8441_v7 = vpop.permute.xlu0 %8440  ;;  %v1192_v4 = vsel %vm1188_vm4, %v1180_v49, %v8368_v39  ;;  %v1191_v37 = vsel %vm1188_vm4, %v1179_v2, %v8367_v16 }
 0x248   :  { %v8376_v3 = vpop.permute.xlu1 %8375  ;;  %v8443_v32 = vunpack.i.h.bf16 %v8441_v7  ;;  %v8442_v6 = vunpack.i.l.bf16 %v8441_v7 }
 0x249   :  { %v8378_v60 = vunpack.i.h.bf16 %v8376_v3  ;;  %v8377_v57 = vunpack.i.l.bf16 %v8376_v3 }
 0x24a   :  { %v1194_v21 = vsel %vm1188_vm4, %v1182_v12, %v8443_v32 }
 0x24b   :  { %v8451_v28 = vpop.permute.xlu0 %8450  ;;  %v1203_v3 = vsel %vm1200_vm5, %v1191_v37, %v8377_v57  ;;  %v1204_v12 = vsel %vm1200_vm5, %v1192_v4, %v8378_v60 }
 0x24c   :  { %v8386_v26 = vpop.permute.xlu1 %8385  ;;  %v8452_v11 = vunpack.i.l.bf16 %v8451_v28  ;;  %v8453_v1 = vunpack.i.h.bf16 %v8451_v28 }
 0x24d   :  { %v8388_v47 = vunpack.i.h.bf16 %v8386_v26 }
 0x24e   :  { %v1206_v32 = vsel %vm1200_vm5, %v1194_v21, %v8453_v1 }
 0x24f   :  { %v8461_v30 = vpop.permute.xlu0 %8460  ;;  %v1216_v57 = vsel %vm1212_vm6, %v1204_v12, %v8388_v47 }
 0x250   :  { %v10427_v23 = vpop.permute.xlu1 %8395  ;;  %v8462_v17 = vunpack.i.l.bf16 %v8461_v30 }
 0x251   :  { %v8398_v39 = vunpack.i.h.bf16 %v10427_v23  ;;  %v8397_v28 = vunpack.i.l.bf16 %v10427_v23 }
 0x253   :  { %v10429_v53 = vpop.permute.xlu0 %8470 }
 0x254   :  { %v10431_v25 = vpop.permute.xlu1 %8405  ;;  %v8472_v49 = vunpack.i.l.bf16 %v10429_v53  ;;  %v8473_v16 = vunpack.i.h.bf16 %v10429_v53 }
 0x255   :  { %v8407_v2 = vunpack.i.l.bf16 %v10431_v25 }
 0x257   :  { %v8481_v43 = vpop.permute.xlu0 %8480 }
 0x258   :  { %v10438_v9 = vpop.permute.xlu1 %253  ;;  %v8482_v60 = vunpack.i.l.bf16 %v8481_v43 }
 0x259   :  { %12814 = vst [vmem:[#allocation123_spill] sm:$0xff] %v10438_v9  ;;  %v290_v19 = vmul.f32 %v10140_v40, %v10438_v9  ;;  %v8387_v40 = vunpack.i.l.bf16 %v8386_v26  ;;  %v8463_v9 = vunpack.i.h.bf16 %v8461_v30 }
 0x25b   :  { %v1181_v18 = vsel %vm207_vm0, %v290_v19, %v8432_v56  ;;  %v8491_v29 = vpop.permute.xlu0 %8490  ;;  %v8483_v19 = vunpack.i.h.bf16 %v8481_v43  ;;  %v1215_v23 = vsel %vm1212_vm6, %v1203_v3, %v8387_v40  ;;  %v1218_v53 = vsel %vm1212_vm6, %v1206_v32, %v8463_v9 }
 0x25c   :  { %v1193_v61 = vsel %vm1188_vm4, %v1181_v18, %v8442_v6  ;;  %v8416_v50 = vpop.permute.xlu1 %8415  ;;  %v8408_v6 = vunpack.i.h.bf16 %v10431_v25  ;;  %v8493_v37 = vunpack.i.h.bf16 %v8491_v29  ;;  %v1227_v21 = vsel %vm1224_vm7, %v1215_v23, %v8397_v28 }
 0x25d   :  { %v1205_v7 = vsel %vm1200_vm5, %v1193_v61, %v8452_v11  ;;  %v1228_v11 = vsel %vm1224_vm7, %v1216_v57, %v8398_v39  ;;  %v8417_v61 = vunpack.i.l.bf16 %v8416_v50  ;;  %v1230_v25 = vsel %vm1224_vm7, %v1218_v53, %v8473_v16 }
 0x25e   :  { %v1217_v56 = vsel %vm1212_vm6, %v1205_v7, %v8462_v17  ;;  %v8418_v17 = vunpack.i.h.bf16 %v8416_v50  ;;  %v1240_v43 = vsel %vm1236_vm8, %v1228_v11, %v8408_v6  ;;  %v8492_v1 = vunpack.i.l.bf16 %v8491_v29 }
 0x25f   :  { %v1229_v26 = vsel %vm1224_vm7, %v1217_v56, %v8472_v49  ;;  %v10459_v30 = vpop.permute.xlu0 %278  ;;  %v1239_v47 = vsel %vm1236_vm8, %v1227_v21, %v8407_v2  ;;  %v1242_v40 = vsel %vm1236_vm8, %v1230_v25, %v8483_v19  ;;  %v293_v25 = vmul.f32 %v10179_v44, %v10424_v45 }
 0x260   :  { %v10463_v4 = vpop.permute.xlu1 %263  ;;  %v1241_v18 = vsel %vm1236_vm8, %v1229_v26, %v8482_v60  ;;  %v1254_v39 = vsel %vm1248_vm9, %v1242_v40, %v8493_v37  ;;  %v1251_v28 = vsel %vm1248_vm9, %v1239_v47, %v8417_v61  ;;  %v1252_v16 = vsel %vm1248_vm9, %v1240_v43, %v8418_v17 }
 0x261   :  { %v1253_v12 = vsel %vm1248_vm9, %v1241_v18, %v8492_v1  ;;  %v292_v43 = vmul.f32 %v10191_v42, %v10463_v4 }
 0x263   :  { %v8501_v49 = vpop.permute.xlu0 %8500 }
 0x264   :  { %v8503_v9 = vunpack.i.h.bf16 %v8501_v49  ;;  %v8502_v7 = vunpack.i.l.bf16 %v8501_v49  ;;  %v8426_v3 = vpop.permute.xlu1 %8425 }
 0x265   :  { %v8428_v50 = vunpack.i.h.bf16 %v8426_v3  ;;  %v8427_v56 = vunpack.i.l.bf16 %v8426_v3 }
 0x266   :  { %v1265_v29 = vsel %vm1260_vm10, %v1253_v12, %v8502_v7  ;;  %v1266_v6 = vsel %vm1260_vm10, %v1254_v39, %v8503_v9 }
 0x267   :  { %v1264_v26 = vsel %vm1260_vm10, %v1252_v16, %v8428_v50  ;;  %v1263_v32 = vsel %vm1260_vm10, %v1251_v28, %v8427_v56  ;;  %v1274_v60 = vpack.c.bf16 %v1266_v6, %v1265_v29  ;;  %v8506_v16 = vpop.permute.xlu0 %8505 }
 0x268   :  { %v8436_v2 = vpop.permute.xlu1 %8435  ;;  %v1273_v19 = vpack.c.bf16 %v1264_v26, %v1263_v32 }
 0x269   :  { %v8438_v18 = vunpack.i.h.bf16 %v8436_v2  ;;  %v8437_v17 = vunpack.i.l.bf16 %v8436_v2 }
 0x26a   :  { %8098 = vmatmul.mubr.msk.bf16.vlgmr.msra.gmra.mrb[0].mxu0 %vm1300_vm11, %v1273_v19 }
 0x26b   :  { %8101 = vmatprep.mubr.msk.bf16.mxu0 %vm1300_vm11, %v1274_v60  ;;  %v1183_v7 = vsel %vm207_vm0, %v292_v43, %v8437_v17  ;;  %v1184_v3 = vsel %vm207_vm0, %v293_v25, %v8438_v18  ;;  %v857_v43 = vpop.permute.xlu0 %856 }
 0x26c   :  { %v8446_v57 = vpop.permute.xlu1 %8445 }
 0x26d   :  { %v8448_v61 = vunpack.i.h.bf16 %v8446_v57  ;;  %v8447_v21 = vunpack.i.l.bf16 %v8446_v57 }
 0x26f   :  { %v1195_v50 = vsel %vm1188_vm4, %v1183_v7, %v8447_v21  ;;  %v1196_v56 = vsel %vm1188_vm4, %v1184_v3, %v8448_v61 }
 0x270   :  { %v8456_v23 = vpop.permute.xlu1 %8455 }
 0x271   :  { %v8458_v1 = vunpack.i.h.bf16 %v8456_v23  ;;  %v8457_v49 = vunpack.i.l.bf16 %v8456_v23  ;;  %v8508_v23 = vunpack.i.h.bf16 %v8506_v16 }
 0x273   :  { %v1207_v42 = vsel %vm1200_vm5, %v1195_v50, %v8457_v49  ;;  %v1208_v29 = vsel %vm1200_vm5, %v1196_v56, %v8458_v1 }
 0x274   :  { %v8466_v53 = vpop.permute.xlu1 %8465 }
 0x275   :  { %v8468_v47 = vunpack.i.h.bf16 %v8466_v53  ;;  %v8467_v40 = vunpack.i.l.bf16 %v8466_v53  ;;  %v8507_v53 = vunpack.i.l.bf16 %v8506_v16 }
 0x277   :  { %v1219_v6 = vsel %vm1212_vm6, %v1207_v42, %v8467_v40  ;;  %v1220_v26 = vsel %vm1212_vm6, %v1208_v29, %v8468_v47  ;;  %v901_v47 = vpop.permute.xlu0 %900  ;;  %v230_v40 = vld [vmem:[#allocation2 + $0x50] sm:$0xf] }
 0x278   :  { %v8476_v37 = vpop.permute.xlu1 %8475 }
 0x279   :  { %v8478_v12 = vunpack.i.h.bf16 %v8476_v37  ;;  %v8477_v39 = vunpack.i.l.bf16 %v8476_v37 }
 0x27b   :  { %v1231_v2 = vsel %vm1224_vm7, %v1219_v6, %v8477_v39  ;;  %v1232_v19 = vsel %vm1224_vm7, %v1220_v26, %v8478_v12  ;;  %v945_v3 = vpop.permute.xlu0 %944 }
 0x27c   :  { %v8486_v11 = vpop.permute.xlu1 %8485 }
 0x27d   :  { %v8488_v44 = vunpack.i.h.bf16 %v8486_v11  ;;  %v8487_v28 = vunpack.i.l.bf16 %v8486_v11 }
 0x27f   :  { %v1243_v37 = vsel %vm1236_vm8, %v1231_v2, %v8487_v28  ;;  %v1244_v11 = vsel %vm1236_vm8, %v1232_v19, %v8488_v44 }
 0x280   :  { %v10489_v9 = vpop.permute.xlu1 %273  ;;  %v989_v50 = vpop.permute.xlu0 %988 }
 0x284   :  { %v8496_v32 = vpop.permute.xlu1 %8495 }
 0x285   :  { %v8498_v60 = vunpack.i.h.bf16 %v8496_v32  ;;  %v8497_v57 = vunpack.i.l.bf16 %v8496_v32 }
 0x287   :  { %v1255_v18 = vsel %vm1248_vm9, %v1243_v37, %v8497_v57  ;;  %v1256_v17 = vsel %vm1248_vm9, %v1244_v11, %v8498_v60 }
 0x288   :  { %v10505_v61 = vpop.permute.xlu1 %283  ;;  %v1267_v21 = vsel %vm1260_vm10, %v1255_v18, %v8507_v53  ;;  %v1268_v25 = vsel %vm1260_vm10, %v1256_v17, %v8508_v23  ;;  %v295_v23 = vmul.f32 %v10251_v38, %v10459_v30  ;;  %v294_v53 = vmul.f32 %v10254_v31, %v10489_v9 }
 0x289   :  { %12815 = vst [vmem:[#allocation124_spill] sm:$0xff] %v10505_v61  ;;  %v1275_v1 = vpack.c.bf16 %v1268_v25, %v1267_v21  ;;  %v296_v12 = vmul.f32 %v10505_v61, %v230_v40  ;;  %v1033_v16 = vpop.permute.xlu0 %1032 }
 0x28b   :  { %8102 = vmatmul.mubr.msk.bf16.gmra.mrb[4].mxu0 %vm1300_vm11, %v1275_v1  ;;  %v1187_v56 = vsel %vm207_vm0, %v296_v12, %v857_v43 }
 0x28c   :  { %v8511_v49 = vpop.permute.xlu1 %8510  ;;  %v1199_v28 = vsel %vm1188_vm4, %v1187_v56, %v901_v47 }
 0x28d   :  { %v1211_v29 = vsel %vm1200_vm5, %v1199_v28, %v945_v3  ;;  %v8513_v32 = vunpack.i.h.bf16 %v8511_v49  ;;  %v8512_v2 = vunpack.i.l.bf16 %v8511_v49 }
 0x28e   :  { %v1223_v26 = vsel %vm1212_vm6, %v1211_v29, %v989_v50 }
 0x28f   :  { %v1235_v18 = vsel %vm1224_vm7, %v1223_v26, %v1033_v16  ;;  %v1185_v43 = vsel %vm207_vm0, %v294_v53, %v8512_v2  ;;  %v1186_v1 = vsel %vm207_vm0, %v295_v23, %v8513_v32  ;;  %vm4287_vm0 = vcmask 779776  }
 0x290   :  { %v8516_v7 = vpop.permute.xlu1 %8515 }
 0x291   :  { %v8518_v60 = vunpack.i.h.bf16 %v8516_v7  ;;  %v8517_v57 = vunpack.i.l.bf16 %v8516_v7 }
 0x292   :  { %v1077_v6 = vpop.permute.xlu0 %1076 }
 0x293   :  { %v1197_v7 = vsel %vm1188_vm4, %v1185_v43, %v8517_v57  ;;  %v1198_v38 = vsel %vm1188_vm4, %v1186_v1, %v8518_v60  ;;  %v8663_v43 = vld [vmem:[#allocation11 + $0x108] sm:$0xff]   ;;  %v8664_v1 = vld [vmem:[#allocation11 + $0x110] sm:$0xff]   ;;  %vm7274_vm4 = vcmask 1041408  }
 0x294   :  { %v8521_v39 = vpop.permute.xlu1 %8520 }
 0x295   :  { %v8523_v37 = vunpack.i.h.bf16 %v8521_v39  ;;  %v8522_v11 = vunpack.i.l.bf16 %v8521_v39 }
 0x297   :  { %v1209_v12 = vsel %vm1200_vm5, %v1197_v7, %v8522_v11  ;;  %v1210_v39 = vsel %vm1200_vm5, %v1198_v38, %v8523_v37  ;;  %v8668_v7 = vld [vmem:[#allocation11 + $0x48] sm:$0xff]  }
 0x298   :  { %v8526_v44 = vpop.permute.xlu1 %8525  ;;  %v8669_v38 = vld [vmem:[#allocation11 + $0x8] sm:$0xff]  }
 0x299   :  { %v8528_v17 = vunpack.i.h.bf16 %v8526_v44  ;;  %v8527_v21 = vunpack.i.l.bf16 %v8526_v44  ;;  %v1247_v44 = vsel %vm1236_vm8, %v1235_v18, %v1077_v6 }
 0x29b   :  { %v1121_v25 = vpop.permute.xlu0 %1120  ;;  %v1221_v28 = vsel %vm1212_vm6, %v1209_v12, %v8527_v21  ;;  %v1222_v16 = vsel %vm1212_vm6, %v1210_v39, %v8528_v17  ;;  %v8672_v12 = vld [vmem:[#allocation11 + $0x58] sm:$0xff]  }
 0x29c   :  { %v8531_v42 = vpop.permute.xlu1 %8530  ;;  %v1259_v29 = vsel %vm1248_vm9, %v1247_v44, %v1121_v25  ;;  %v8662_v25 = vld [vmem:[#allocation11 + $0x100] sm:$0xff]   ;;  %v8673_v39 = vld [vmem:[#allocation11 + $0x18] sm:$0xff]   ;;  %v8676_v44 = vld [vmem:[#allocation11 + $0x68] sm:$0xff]  }
 0x29d   :  { %v8533_v49 = vunpack.i.h.bf16 %v8531_v42  ;;  %v8532_v47 = vunpack.i.l.bf16 %v8531_v42  ;;  %8109 = vmatprep.subr.bf16.mxu1 %v8662_v25 }
 0x29e   :  { %8110 = vmatpush3.bf16.msra.mxu1 %v8662_v25 }
 0x29f   :  { %v1233_v26 = vsel %vm1224_vm7, %v1221_v28, %v8532_v47  ;;  %v1234_v32 = vsel %vm1224_vm7, %v1222_v16, %v8533_v49  ;;  %8111 = vmatprep.subr.bf16.mxu1 %v8663_v43  ;;  %v8665_v49 = vld [vmem:[#allocation11 + $0x118] sm:$0xff]   ;;  %v8666_v47 = vld [vmem:[#allocation11 + $0x40] sm:$0xff]   ;;  %v8677_v16 = vld [vmem:[#allocation11 + $0x28] sm:$0xff]  }
 0x2a0   :  { %v8536_v19 = vpop.permute.xlu1 %8535  ;;  %7812 = vmatprep.subr.bf16.mxu0 %v8666_v47  ;;  %v10541_v28 = vld [vmem:[#allocation9] ss:$0 sm:$0xff]  ;;  %v12816_v47 = vld [vmem:[#allocation32_spill] sm:$0xff] }
 0x2a1   :  { %v8538_v3 = vunpack.i.h.bf16 %v8536_v19  ;;  %v8537_v31 = vunpack.i.l.bf16 %v8536_v19 }
 0x2a2   :  { %8112 = vmatpush3.bf16.msra.mxu1 %v8663_v43 }
 0x2a3   :  { %v1245_v19 = vsel %vm1236_vm8, %v1233_v26, %v8537_v31  ;;  %v1246_v60 = vsel %vm1236_vm8, %v1234_v32, %v8538_v3  ;;  %8113 = vmatprep.subr.bf16.mxu1 %v8664_v1  ;;  %v8670_v3 = vld [vmem:[#allocation11 + $0x50] sm:$0xff]  }
 0x2a4   :  { %v8541_v40 = vpop.permute.xlu1 %8540  ;;  %v1165_v42 = vpop.permute.xlu0 %1164  ;;  %v8671_v31 = vld [vmem:[#allocation11 + $0x10] sm:$0xff]  }
 0x2a5   :  { %v8543_v50 = vunpack.i.h.bf16 %v8541_v40  ;;  %v8542_v56 = vunpack.i.l.bf16 %v8541_v40  ;;  %v1271_v37 = vsel %vm1260_vm10, %v1259_v29, %v1165_v42  ;;  %v8667_v40 = vld [vmem:[#allocation11] sm:$0xff]  }
 0x2a6   :  { %v1277_v21 = vpack.c.bf16 %v1271_v37, %v1271_v37  ;;  %8114 = vmatpush3.bf16.msra.mxu1 %v8664_v1  ;;  %7813 = vmatpush3.bf16.msra.mxu0 %v8667_v40 }
 0x2a7   :  { %v1257_v6 = vsel %vm1248_vm9, %v1245_v19, %v8542_v56  ;;  %v1258_v53 = vsel %vm1248_vm9, %v1246_v60, %v8543_v50  ;;  %8115 = vmatprep.subr.bf16.mxu1 %v8665_v49  ;;  %7814 = vmatprep.subr.bf16.mxu0 %v8668_v7  ;;  %v8674_v50 = vld [vmem:[#allocation11 + $0x60] sm:$0xff]  }
 0x2a8   :  { %v8546_v2 = vpop.permute.xlu1 %8545  ;;  %v8675_v56 = vld [vmem:[#allocation11 + $0x20] sm:$0xff]  }
 0x2a9   :  { %v8548_v57 = vunpack.i.h.bf16 %v8546_v2  ;;  %v8547_v23 = vunpack.i.l.bf16 %v8546_v2  ;;  %v12817_v7 = vld [vmem:[#allocation34_spill] sm:$0xff] }
 0x2aa   :  { %8116 = vmatpush3.bf16.msra.mxu1 %v8665_v49  ;;  %7815 = vmatpush3.bf16.msra.mxu0 %v8669_v38  ;;  %v9287_v49 = vld [vmem:[#allocation2 + $0x2] sm:$0xff] }
 0x2ab   :  { %v1269_v11 = vsel %vm1260_vm10, %v1257_v6, %v8547_v23  ;;  %v1270_v18 = vsel %vm1260_vm10, %v1258_v53, %v8548_v57  ;;  %7816 = vmatprep.subr.bf16.mxu0 %v8670_v3  ;;  %v10554_v40 = vmul.f32 %v9287_v49, %v12816_v47 }
 0x2ac   :  { %v1276_v17 = vpack.c.bf16 %v1270_v18, %v1269_v11  ;;  %v8678_v11 = vld [vmem:[#allocation11 + $0x70] sm:$0xff]  }
 0x2ad   :  { %v8679_v18 = vld [vmem:[#allocation11 + $0x30] sm:$0xff]  }
 0x2ae   :  { %8105 = vmatprep.mubr.msk.bf16.mxu0 %vm1300_vm11, %v1276_v17  ;;  %7817 = vmatpush3.bf16.msra.mxu0 %v8671_v31  ;;  %v8680_v17 = vld [vmem:[#allocation11 + $0x78] sm:$0xff]  }
 0x2af   :  { %8106 = vmatmul.mubr.msk.bf16.gmra.mrb[8].mxu0 %vm1300_vm11, %v1277_v21  ;;  %7818 = vmatprep.subr.bf16.mxu0 %v8672_v12  ;;  %v8681_v21 = vld [vmem:[#allocation11 + $0x38] sm:$0xff]  }
 0x2b0   :  { %v12818_v12 = vld [vmem:[#allocation85_spill] sm:$0xff] }
 0x2b2   :  { %7819 = vmatpush3.bf16.msra.mxu0 %v8673_v39 }
 0x2b3   :  { %7820 = vmatprep.subr.bf16.mxu0 %v8674_v50  ;;  %v12819_v50 = vld [vmem:[#allocation65_spill] sm:$0xff] }
 0x2b6   :  { %7821 = vmatpush3.bf16.msra.mxu0 %v8675_v56 }
 0x2b7   :  { %7822 = vmatprep.subr.bf16.mxu0 %v8676_v44 }
 0x2ba   :  { %7823 = vmatpush3.bf16.msra.mxu0 %v8677_v16  ;;  %v12820_v16 = vld [vmem:[#allocation39_spill] sm:$0xff] }
 0x2bb   :  { %7824 = vmatprep.subr.bf16.mxu0 %v8678_v11 }
 0x2be   :  { %7825 = vmatpush3.bf16.msra.mxu0 %v8679_v18 }
 0x2bf   :  { %7826 = vmatprep.subr.bf16.mxu0 %v8680_v17 }
 0x2c2   :  { %7827 = vmatpush3.bf16.msra.mxu0 %v8681_v21 }
 0x33d   :  { %v8099_v42 = vpop.f32.mrb[0].mxu0 }
 0x33e   :  { %v1369_v29 = vadd.f32 %v8099_v42, %v10541_v28  ;;  %v1360_v26 = vpop.f32.mrb[1].mxu0 }
 0x33f   :  { %v1361_v32 = vadd.f32 %v10541_v28, %v1360_v26  ;;  %v8100_v2 = vpop.f32.mrb[2].mxu0 }
 0x340   :  { %v1408_v19 = vmax.f32 %v1369_v29, 0.0  ;;  %v1372_v60 = vadd.f32 %v8100_v2, %v10541_v28  ;;  %v1363_v57 = vpop.f32.mrb[3].mxu0  ;;  %v12821_v2 = vld [vmem:[#allocation48_spill] sm:$0xff] }
 0x341   :  { %v1406_v23 = vmax.f32 %v1361_v32, 0.0  ;;  %v1364_v6 = vadd.f32 %v10541_v28, %v1363_v57 }
 0x342   :  { %v1409_v53 = vmax.f32 %v1372_v60, 0.0  ;;  %1420 = vst.msk [vmem:[#allocation2 + $0x20] sm:$0xff] %vm1417_vm12, %v1408_v19  ;;  %v12822_v60 = vld [vmem:[#allocation31_spill] sm:$0xff] }
 0x343   :  { %v1407_v37 = vmax.f32 %v1364_v6, 0.0  ;;  %1418 = vst.msk [vmem:[#allocation2 + $0x10] sm:$0xff] %vm1417_vm12, %v1406_v23  ;;  %v12823_v23 = vld [vmem:[#allocation33_spill] sm:$0xff] }
 0x344   :  { %1421 = vst.msk [vmem:[#allocation2 + $0x28] sm:$0xff] %vm1417_vm12, %v1409_v53 }
 0x345   :  { %1419 = vst.msk [vmem:[#allocation2 + $0x18] sm:$0xff] %vm1417_vm12, %v1407_v37 }
 0x349   :  { %v10551_v25 = vld [vmem:[#allocation2 + $0x20] sm:$0xff] }
 0x34a   :  { %v1453_v43 = vld [vmem:[#allocation2 + $0xa] sm:$0xff]  ;;  %v1586_v39 = vmul.f32 %v10551_v25, %v12818_v12 }
 0x34b   :  { %v1496_v1 = vld [vmem:[#allocation2 + $0xe] sm:$0xff]  ;;  %v1464_v38 = vmul.f32 %v1453_v43, %v12817_v7  ;;  %v10559_v31 = vld [vmem:[#allocation2 + $0x26] sm:$0xff] }
 0x34c   :  { %v10557_v3 = vld [vmem:[#allocation2 + $0x28] sm:$0xff]  ;;  %v1497_v44 = vld [vmem:[#allocation2 + $0x16] sm:$0xff]  ;;  %v1507_v42 = vmul.f32 %v1496_v1, %v12820_v16  ;;  %v10576_v53 = vld [vmem:[#allocation2 + $0x1e] sm:$0xff]  ;;  %v1510_v17 = vmul.f32 %v10559_v31, %v9992_v54 }
 0x34d   :  { %v1587_v56 = vmul.f32 %v10557_v3, %v12819_v50  ;;  %v10566_v29 = vld [vmem:[#allocation2 + $0x12] sm:$0xff]  ;;  %v10568_v26 = vld [vmem:[#allocation2 + $0x1a] sm:$0xff]  ;;  %v8554_v32 = vpack.i.bf16 %v1464_v38, %v10554_v40  ;;  %v1508_v19 = vmul.f32 %v1497_v44, %v12821_v2  ;;  %v1509_v18 = vmul.f32 %v10576_v53, %v9986_v52 }
 0x34e   :  { %v1465_v57 = vmul.f32 %v10566_v29, %v12822_v60  ;;  %v1466_v6 = vmul.f32 %v10568_v26, %v12823_v23 }
 0x34f   :  { %v1821_v37 = vpack.c.bf16 %v1587_v56, %v1586_v39  ;;  %8555 = vrot.lane.b32.xlu0 %v8554_v32, %s9555_s0  ;;  %v8549_v11 = vpack.i.bf16 %v1508_v19, %v1507_v42  ;;  %v8559_v43 = vpack.i.bf16 %v1510_v17, %v1509_v18 }
 0x350   :  { %v8564_v21 = vpack.i.bf16 %v1466_v6, %v1465_v57 }
 0x351   :  { %8117 = vmatprep.mubr.msk.bf16.mxu1 %vm1417_vm12, %v1821_v37  ;;  %8550 = vrot.lane.b32.xlu1 %v8549_v11, %s9555_s0  ;;  %v10595_v37 = vld [vmem:[#allocation2 + $0x22] sm:$0xff] }
 0x353   :  { %8565 = vrot.lane.b32.xlu0 %v8564_v21, %s9555_s0  ;;  %v12824_v21 = vld [vmem:[#allocation69_spill] sm:$0xff] }
 0x355   :  { %8560 = vrot.lane.b32.xlu1 %v8559_v43, %s9555_s0  ;;  %v1467_v43 = vmul.f32 %v10595_v37, %v12824_v21 }
 0x35e   :  { %v8103_v1 = vpop.f32.mrb[4].mxu0 }
 0x35f   :  { %v1385_v49 = vadd.f32 %v8103_v1, %v10541_v28  ;;  %v1376_v47 = vpop.f32.mrb[5].mxu0 }
 0x360   :  { %v1377_v38 = vadd.f32 %v10541_v28, %v1376_v47  ;;  %v8104_v39 = vpop.f32.mrb[6].mxu0 }
 0x361   :  { %v1412_v56 = vmax.f32 %v1385_v49, 0.0  ;;  %v1388_v44 = vadd.f32 %v8104_v39, %v10541_v28  ;;  %v1379_v42 = vpop.f32.mrb[7].mxu0 }
 0x362   :  { %v1410_v32 = vmax.f32 %v1377_v38, 0.0  ;;  %v1380_v19 = vadd.f32 %v10541_v28, %v1379_v42 }
 0x363   :  { %1424 = vst.msk [vmem:[#allocation2 + $0x40] sm:$0xff] %vm1417_vm12, %v1412_v56  ;;  %v1413_v57 = vmax.f32 %v1388_v44, 0.0 }
 0x364   :  { %1422 = vst.msk [vmem:[#allocation2 + $0x30] sm:$0xff] %vm1417_vm12, %v1410_v32  ;;  %v1411_v6 = vmax.f32 %v1380_v19, 0.0 }
 0x365   :  { %1425 = vst.msk [vmem:[#allocation2 + $0x48] sm:$0xff] %vm1417_vm12, %v1413_v57 }
 0x366   :  { %1423 = vst.msk [vmem:[#allocation2 + $0x38] sm:$0xff] %vm1417_vm12, %v1411_v6 }
 0x36a   :  { %v10607_v49 = vld [vmem:[#allocation2 + $0x40] sm:$0xff] }
 0x36b   :  { %v10597_v11 = vld [vmem:[#allocation2 + $0x2a] sm:$0xff] }
 0x36c   :  { %v10599_v18 = vld [vmem:[#allocation2 + $0x30] sm:$0xff]  ;;  %v1468_v1 = vmul.f32 %v10597_v11, %v9960_v36  ;;  %v10609_v47 = vld [vmem:[#allocation2 + $0x48] sm:$0xff] }
 0x36d   :  { %v10601_v17 = vld [vmem:[#allocation2 + $0x2e] sm:$0xff]  ;;  %v10611_v38 = vld [vmem:[#allocation2 + $0x46] sm:$0xff]  ;;  %v10613_v39 = vld [vmem:[#allocation2 + $0x38] sm:$0xff]  ;;  %v1588_v56 = vmul.f32 %v10599_v18, %v10078_v22  ;;  %v1591_v32 = vmul.f32 %v10609_v47, %v10256_v14 }
 0x36e   :  { %v10617_v44 = vld [vmem:[#allocation2 + $0x36] sm:$0xff]  ;;  %v1511_v42 = vmul.f32 %v10601_v17, %v10120_v63  ;;  %v8574_v57 = vpack.i.bf16 %v1468_v1, %v1467_v43  ;;  %v1589_v6 = vmul.f32 %v10613_v39, %v10233_v58  ;;  %v10633_v52 = vld [vmem:[#allocation2 + $0x3e] sm:$0xff]  ;;  %v1590_v63 = vmul.f32 %v10607_v49, %v10246_v34 }
 0x36f   :  { %v10623_v19 = vld [vmem:[#allocation2 + $0x32] sm:$0xff]  ;;  %v1512_v12 = vmul.f32 %v10617_v44, %v10017_v5  ;;  %v10629_v50 = vld [vmem:[#allocation2 + $0x3a] sm:$0xff]  ;;  %v1513_v5 = vmul.f32 %v10633_v52, %v10128_v13  ;;  %v1514_v54 = vmul.f32 %v10611_v38, %v10134_v15 }
 0x370   :  { %v1469_v22 = vmul.f32 %v10623_v19, %v10097_v0  ;;  %v1470_v14 = vmul.f32 %v10629_v50, %v10104_v10  ;;  %v8682_v43 = vld [vmem:[#allocation11 + $0xc0] sm:$0xff]   ;;  %8575 = vrot.lane.b32.xlu0 %v8574_v57, %s9555_s0  ;;  %v1826_v1 = vpack.c.bf16 %v1589_v6, %v1588_v56  ;;  %v1831_v16 = vpack.c.bf16 %v1591_v32, %v1590_v63 }
 0x371   :  { %v8569_v58 = vpack.i.bf16 %v1512_v12, %v1511_v42  ;;  %7864 = vmatprep.subr.bf16.mxu0 %v8682_v43  ;;  %v8579_v57 = vpack.i.bf16 %v1514_v54, %v1513_v5  ;;  %v10655_v5 = vld [vmem:[#allocation2 + $0x42] sm:$0xff] }
 0x372   :  { %8118 = vmatmul.mubr.msk.bf16.vlgmr.msra.gmra.mrb[0].mxu1 %vm1417_vm12, %v1826_v1  ;;  %v8584_v34 = vpack.i.bf16 %v1470_v14, %v1469_v22 }
 0x373   :  { %8570 = vrot.lane.b32.xlu1 %v8569_v58, %s9555_s0  ;;  %8121 = vmatprep.mubr.msk.bf16.mxu1 %vm1417_vm12, %v1831_v16 }
 0x374   :  { %8585 = vrot.lane.b32.xlu0 %v8584_v34, %s9555_s0 }
 0x377   :  { %8580 = vrot.lane.b32.xlu1 %v8579_v57, %s9555_s0  ;;  %v1471_v57 = vmul.f32 %v10655_v5, %v10284_v46 }
 0x382   :  { %v8107_v12 = vpop.f32.mrb[8].mxu0 }
 0x383   :  { %v1401_v56 = vadd.f32 %v8107_v12, %v10541_v28  ;;  %v1392_v42 = vpop.f32.mrb[9].mxu0 }
 0x384   :  { %v1393_v6 = vadd.f32 %v10541_v28, %v1392_v42  ;;  %v8108_v63 = vpop.f32.mrb[10].mxu0 }
 0x385   :  { %v1416_v32 = vmax.f32 %v1401_v56, 0.0  ;;  %v1395_v43 = vpop.f32.mrb[11].mxu0  ;;  %v12825_v63 = vld [vmem:[#allocation59_spill] sm:$0xff] }
 0x386   :  { %v1414_v1 = vmax.f32 %v1393_v6, 0.0  ;;  %v1396_v22 = vadd.f32 %v10541_v28, %v1395_v43  ;;  %v12826_v43 = vld [vmem:[#allocation80_spill] sm:$0xff] }
 0x387   :  { %1429 = vst.msk [vmem:[#allocation2 + $0x60] sm:$0xf] %vm1428_vm13, %v1416_v32  ;;  %v1564_v32 = vmul.f32 %v10576_v53, %v12825_v63 }
 0x388   :  { %1426 = vst.msk [vmem:[#allocation2 + $0x50] sm:$0xff] %vm1417_vm12, %v1414_v1  ;;  %v1415_v54 = vmax.f32 %v1396_v22, 0.0  ;;  %v1565_v1 = vmul.f32 %v10559_v31, %v12826_v43  ;;  %v10755_v43 = vld [vmem:[#allocation2 + $0x18] sm:$0xff] }
 0x38a   :  { %1427 = vst.msk [vmem:[#allocation2 + $0x58] sm:$0xff] %vm1417_vm12, %v1415_v54  ;;  %v8604_v31 = vpack.i.bf16 %v1565_v1, %v1564_v32  ;;  %v12830_v32 = vld [vmem:[#allocation82_spill] sm:$0xff] }
 0x38e   :  { %v1583_v14 = vld [vmem:[#allocation2 + $0x60] sm:$0xff] }
 0x38f   :  { %v1461_v58 = vld [vmem:[#allocation2 + $0x4a] sm:$0xff]  ;;  %v1594_v6 = vmul.f32 %v1583_v14, %v10382_v20 }
 0x390   :  { %v10657_v34 = vld [vmem:[#allocation2 + $0x50] sm:$0xff]  ;;  %v1472_v12 = vmul.f32 %v1461_v58, %v9968_v41 }
 0x391   :  { %v1504_v16 = vld [vmem:[#allocation2 + $0x4e] sm:$0xff]  ;;  %v10662_v28 = vld [vmem:[#allocation2 + $0x58] sm:$0xff]  ;;  %v1592_v56 = vmul.f32 %v10657_v34, %v10274_v48  ;;  %v1841_v63 = vpack.c.bf16 %v10385_v59, %v1594_v6 }
 0x392   :  { %v1505_v42 = vld [vmem:[#allocation2 + $0x56] sm:$0xff]  ;;  %v1506_v22 = vld [vmem:[#allocation2 + $0x5e] sm:$0xf]  ;;  %v8594_v54 = vpack.i.bf16 %v1472_v12, %v1471_v57  ;;  %v1593_v13 = vmul.f32 %v10662_v28, %v10272_v27  ;;  %v1515_v15 = vmul.f32 %v1504_v16, %v10312_v55  ;;  %v1462_v41 = vld [vmem:[#allocation2 + $0x52] sm:$0xf]  ;;  %v1567_v12 = vmul.f32 %v10617_v44, %v10062_v35 }
 0x393   :  { %v1516_v2 = vmul.f32 %v1505_v42, %v10026_v8  ;;  %v1585_v48 = vld [vmem:[#allocation2 + $0x70] sm:$0xf]  ;;  %v1517_v53 = vmul.f32 %v1506_v22, %v10317_v33  ;;  %v1473_v57 = vmul.f32 %v1462_v41, %v10292_v62  ;;  %v12829_v44 = vld [vmem:[#allocation92_spill] sm:$0xff] }
 0x394   :  { %8595 = vrot.lane.b32.xlu0 %v8594_v54, %s9555_s0  ;;  %v1836_v14 = vpack.c.bf16 %v1593_v13, %v1592_v56  ;;  %v1596_v27 = vmul.f32 %v1585_v48, %v10389_v51  ;;  %v1568_v48 = vmul.f32 %v10633_v52, %v12829_v44 }
 0x395   :  { %v8589_v20 = vpack.i.bf16 %v1516_v2, %v1515_v15  ;;  %v8599_v13 = vpack.i.bf16 %v1473_v57, %v1517_v53  ;;  %v1566_v15 = vmul.f32 %v10601_v17, %v10053_v24  ;;  %v12827_v2 = vld [vmem:[#allocation49_spill] sm:$0xff]  ;;  %v12833_v53 = vld [vmem:[#allocation95_spill] sm:$0xff] }
 0x396   :  { %8122 = vmatmul.mubr.msk.bf16.gmra.mrb[4].mxu1 %vm1417_vm12, %v1836_v14  ;;  %v1535_v56 = vmul.f32 %v10566_v29, %v12827_v2  ;;  %v1846_v1 = vpack.c.bf16 %v1596_v27, %v1596_v27  ;;  %v12831_v17 = vld [vmem:[#allocation53_spill] sm:$0xff]  ;;  %v1571_v52 = vmul.f32 %v1505_v42, %v12833_v53 }
 0x397   :  { %8590 = vrot.lane.b32.xlu1 %v8589_v20, %s9555_s0  ;;  %8125 = vmatprep.mubr.msk.bf16.mxu1 %vm1417_vm12, %v1841_v63  ;;  %v12828_v20 = vld [vmem:[#allocation64_spill] sm:$0xff]  ;;  %v8614_v41 = vpack.i.bf16 %v1567_v12, %v1566_v15  ;;  %v1569_v63 = vmul.f32 %v10611_v38, %v12830_v32  ;;  %v1538_v54 = vmul.f32 %v10597_v11, %v12831_v17  ;;  %v12834_v38 = vld [vmem:[#allocation93_spill] sm:$0xff]  ;;  %v12835_v12 = vld [vmem:[#allocation87_spill] sm:$0xff] }
 0x398   :  { %8605 = vrot.lane.b32.xlu0 %v8604_v31, %s9555_s0  ;;  %v1536_v6 = vmul.f32 %v10568_v26, %v12828_v20  ;;  %v12832_v26 = vld [vmem:[#allocation51_spill] sm:$0xff]  ;;  %v1561_v31 = vld [vmem:[#allocation2 + $0x5e] sm:$0xff]  ;;  %v1570_v57 = vmul.f32 %v1504_v16, %v12834_v38 }
 0x399   :  { %v8624_v29 = vpack.i.bf16 %v1569_v63, %v1568_v48  ;;  %v1537_v14 = vmul.f32 %v10595_v37, %v12832_v26  ;;  %v12836_v11 = vld [vmem:[#allocation66_spill] sm:$0xff]  ;;  %v12838_v48 = vld [vmem:[#allocation89_spill] sm:$0xff] }
 0x39a   :  { %v8609_v22 = vpack.i.bf16 %v1536_v6, %v1535_v56  ;;  %v1540_v15 = vmul.f32 %v10629_v50, %v12836_v11  ;;  %v8634_v56 = vpack.i.bf16 %v1571_v52, %v1570_v57  ;;  %v12837_v6 = vld [vmem:[#allocation113_spill] sm:$0xff]  ;;  %v1542_v63 = vmul.f32 %v1461_v58, %v12838_v48  ;;  %v12844_v58 = vld [vmem:[#allocation68_spill] sm:$0xff] }
 0x39b   :  { %8600 = vrot.lane.b32.xlu1 %v8599_v13, %s9555_s0  ;;  %v8619_v27 = vpack.i.bf16 %v1538_v54, %v1537_v14  ;;  %v1539_v13 = vmul.f32 %v10623_v19, %v12835_v12  ;;  %v1534_v37 = vld [vmem:[#allocation2 + $0x62] sm:$0xf]  ;;  %v1533_v16 = vld [vmem:[#allocation2 + $0x5a] sm:$0xff] }
 0x39c   :  { %8615 = vrot.lane.b32.xlu0 %v8614_v41, %s9555_s0  ;;  %v1572_v41 = vmul.f32 %v1561_v31, %v12837_v6  ;;  %v12839_v19 = vld [vmem:[#allocation114_spill] sm:$0xff]  ;;  %v10777_v48 = vld [vmem:[#allocation2 + $0x34] sm:$0xff]  ;;  %v10781_v12 = vld [vmem:[#allocation2 + $0x3c] sm:$0xff] }
 0x39d   :  { %v8629_v42 = vpack.i.bf16 %v1540_v15, %v1539_v13  ;;  %v12841_v14 = vld [vmem:[#allocation110_spill] sm:$0xff]  ;;  %v12843_v13 = vld [vmem:[#allocation109_spill] sm:$0xff] }
 0x39e   :  { %8126 = vmatmul.mubr.msk.bf16.gmra.mrb[8].mxu1 %vm1417_vm12, %v1846_v1  ;;  %v1563_v1 = vld [vmem:[#allocation2 + $0x6e] sm:$0xf]  ;;  %v8644_v54 = vpack.i.bf16 %v12839_v19, %v1572_v41  ;;  %v1545_v52 = vmul.f32 %v1534_v37, %v12841_v14  ;;  %v10745_v19 = vld [vmem:[#allocation2 + $0x1c] sm:$0xff] }
 0x39f   :  { %8610 = vrot.lane.b32.xlu1 %v8609_v22, %s9555_s0  ;;  %v1532_v22 = vld [vmem:[#allocation2 + $0x52] sm:$0xff]  ;;  %v8684_v14 = vld [vmem:[#allocation11 + $0xc8] sm:$0xff]   ;;  %v12858_v2 = vld [vmem:[#allocation77_spill] sm:$0xff] }
 0x3a0   :  { %8625 = vrot.lane.b32.xlu0 %v8624_v29, %s9555_s0  ;;  %v12840_v29 = vld [vmem:[#allocation88_spill] sm:$0xff]  ;;  %v1543_v15 = vmul.f32 %v1532_v22, %v12843_v13  ;;  %v1491_v20 = vmul.f32 %v10777_v48, %v12858_v2 }
 0x3a1   :  { %v1541_v50 = vmul.f32 %v10655_v5, %v12840_v29  ;;  %v12846_v22 = vld [vmem:[#allocation120_spill] sm:$0xff] }
 0x3a3   :  { %8620 = vrot.lane.b32.xlu1 %v8619_v27, %s9555_s0  ;;  %v12842_v27 = vld [vmem:[#allocation115_spill] sm:$0xff]  ;;  %v8639_v57 = vpack.i.bf16 %v1542_v63, %v1541_v50 }
 0x3a4   :  { %8635 = vrot.lane.b32.xlu0 %v8634_v56, %s9555_s0  ;;  %v1574_v31 = vmul.f32 %v1563_v1, %v12842_v27  ;;  %v1544_v56 = vmul.f32 %v1533_v16, %v12844_v58  ;;  %v10727_v1 = vld [vmem:[#allocation2] sm:$0xff]  ;;  %v8686_v58 = vld [vmem:[#allocation11 + $0xd0] sm:$0xff]  }
 0x3a5   :  { %v10735_v16 = vmul.f32 %v10727_v1, %v12846_v22 }
 0x3a6   :  { %v8654_v51 = vpack.i.bf16 %v1545_v52, %v1574_v31  ;;  %v8649_v41 = vpack.i.bf16 %v1544_v56, %v1543_v15  ;;  %v9289_v52 = vld [vmem:[#allocation2 + $0x4] sm:$0xff]  ;;  %v12849_v56 = vld [vmem:[#allocation35_spill] sm:$0xff] }
 0x3a7   :  { %8630 = vrot.lane.b32.xlu1 %v8629_v42, %s9555_s0  ;;  %v1475_v42 = vld [vmem:[#allocation2 + $0xc] sm:$0xff] }
 0x3a8   :  { %8645 = vrot.lane.b32.xlu0 %v8644_v54, %s9555_s0  ;;  %v12845_v54 = vld [vmem:[#allocation108_spill] sm:$0xff] }
 0x3a9   :  { %v10731_v63 = vmul.f32 %v10727_v1, %v12845_v54 }
 0x3ab   :  { %8640 = vrot.lane.b32.xlu1 %v8639_v57, %s9555_s0 }
 0x3ac   :  { %8655 = vrot.lane.b32.xlu0 %v8654_v51, %s9555_s0  ;;  %v12847_v51 = vld [vmem:[#allocation38_spill] sm:$0xff] }
 0x3ad   :  { %v10738_v31 = vmul.f32 %v9289_v52, %v12847_v51 }
 0x3af   :  { %8650 = vrot.lane.b32.xlu1 %v8649_v41, %s9555_s0  ;;  %12848 = vst [vmem:[#allocation32_spill] sm:$0xff] %v10738_v31  ;;  %v1486_v41 = vmul.f32 %v1475_v42, %v12849_v56  ;;  %v8683_v42 = vld [vmem:[#allocation11 + $0x80] sm:$0xff]  }
 0x3c1   :  { %v8556_v5 = vpop.permute.xlu0 %8555 }
 0x3c2   :  { %v8558_v37 = vunpack.i.h.bf16 %v8556_v5  ;;  %v8557_v59 = vunpack.i.l.bf16 %v8556_v5  ;;  %v1476_v5 = vld [vmem:[#allocation2 + $0x14] sm:$0xff] }
 0x3c3   :  { %v8551_v50 = vpop.permute.xlu1 %8550 }
 0x3c4   :  { %v8553_v57 = vunpack.i.h.bf16 %v8551_v50  ;;  %v8552_v15 = vunpack.i.l.bf16 %v8551_v50  ;;  %v1774_v27 = vsel %vm1417_vm12, %v10731_v63, %v8558_v37  ;;  %v1773_v54 = vsel %vm1417_vm12, %v10735_v16, %v8557_v59  ;;  %v12850_v50 = vld [vmem:[#allocation37_spill] sm:$0xff]  ;;  %v12851_v37 = vld [vmem:[#allocation40_spill] sm:$0xff] }
 0x3c5   :  { %v8566_v22 = vpop.permute.xlu0 %8565  ;;  %v1487_v53 = vmul.f32 %v1476_v5, %v12850_v50  ;;  %v1817_v44 = vpack.c.bf16 %v1774_v27, %v1773_v54  ;;  %v1488_v35 = vmul.f32 %v10745_v19, %v12851_v37  ;;  %v10753_v59 = vld [vmem:[#allocation2 + $0x10] sm:$0xff]  ;;  %v12852_v27 = vld [vmem:[#allocation121_spill] sm:$0xff]  ;;  %v12853_v54 = vld [vmem:[#allocation122_spill] sm:$0xff] }
 0x3c6   :  { %v1784_v6 = vsel %vm1417_vm12, %v10738_v31, %v8552_v15  ;;  %v1785_v52 = vsel %vm1417_vm12, %v1486_v41, %v8553_v57  ;;  %v8568_v13 = vunpack.i.h.bf16 %v8566_v22  ;;  %v8567_v15 = vunpack.i.l.bf16 %v8566_v22 }
 0x3c7   :  { %v8561_v51 = vpop.permute.xlu1 %8560  ;;  %v1818_v38 = vpack.c.bf16 %v1785_v52, %v1784_v6  ;;  %v1443_v5 = vmul.f32 %v10753_v59, %v12852_v27  ;;  %v1444_v52 = vmul.f32 %v10755_v43, %v12853_v54 }
 0x3c8   :  { %v8563_v32 = vunpack.i.h.bf16 %v8561_v51  ;;  %v8562_v24 = vunpack.i.l.bf16 %v8561_v51  ;;  %v8685_v51 = vld [vmem:[#allocation11 + $0x88] sm:$0xff]  }
 0x3c9   :  { %2192 = vmatprep.mubr.bf16.mxu0 %v1818_v38  ;;  %v1775_v22 = vsel %vm1417_vm12, %v1443_v5, %v8567_v15  ;;  %v8690_v38 = vld [vmem:[#allocation11 + $0xe0] sm:$0xff]   ;;  %v8694_v15 = vld [vmem:[#allocation11 + $0xf0] sm:$0xff]  }
 0x3ca   :  { %2193 = vmatmul.mubr.bf16.vlgmr.msra.gmra.mrb[12].mxu0 %v1817_v44  ;;  %v1786_v6 = vsel %vm1417_vm12, %v1487_v53, %v8562_v24  ;;  %v1787_v57 = vsel %vm1417_vm12, %v1488_v35, %v8563_v32  ;;  %v1776_v44 = vsel %vm1417_vm12, %v1444_v52, %v8568_v13  ;;  %v8687_v24 = vld [vmem:[#allocation11 + $0x90] sm:$0xff]   ;;  %v8688_v35 = vld [vmem:[#allocation11 + $0xd8] sm:$0xff]  }
 0x3cb   :  { %v1823_v41 = vpack.c.bf16 %v1787_v57, %v1786_v6  ;;  %7865 = vmatpush3.bf16.msra.mxu0 %v8683_v42  ;;  %v1822_v53 = vpack.c.bf16 %v1776_v44, %v1775_v22  ;;  %v8689_v32 = vld [vmem:[#allocation11 + $0x98] sm:$0xff]   ;;  %v8691_v42 = vld [vmem:[#allocation11 + $0xa0] sm:$0xff]   ;;  %v8693_v6 = vld [vmem:[#allocation11 + $0xa8] sm:$0xff]  }
 0x3cc   :  { %7866 = vmatprep.subr.bf16.mxu0 %v8684_v14  ;;  %v8692_v14 = vld [vmem:[#allocation11 + $0xe8] sm:$0xff]   ;;  %v8695_v13 = vld [vmem:[#allocation11 + $0xb0] sm:$0xff]   ;;  %v8696_v57 = vld [vmem:[#allocation11 + $0xf8] sm:$0xff]  }
 0x3cd   :  { %2200 = vmatprep.mubr.bf16.mxu0 %v1823_v41  ;;  %v10767_v5 = vld [vmem:[#allocation2 + $0x2c] sm:$0xff]  ;;  %v8697_v22 = vld [vmem:[#allocation11 + $0xb8] sm:$0xff]  }
 0x3cf   :  { %7867 = vmatpush3.bf16.msra.mxu0 %v8685_v51 }
 0x3d0   :  { %7868 = vmatprep.subr.bf16.mxu0 %v8686_v58  ;;  %v10765_v58 = vld [vmem:[#allocation2 + $0x24] sm:$0xff] }
 0x3d2   :  { %2201 = vmatmul.mubr.bf16.gmra.mrb[16].mxu0 %v1822_v53 }
 0x3d3   :  { %7869 = vmatpush3.bf16.msra.mxu0 %v8687_v24  ;;  %v12854_v24 = vld [vmem:[#allocation123_spill] sm:$0xff] }
 0x3d4   :  { %7870 = vmatprep.subr.bf16.mxu0 %v8688_v35  ;;  %v1445_v53 = vmul.f32 %v10551_v25, %v12854_v24  ;;  %v12855_v35 = vld [vmem:[#allocation119_spill] sm:$0xff] }
 0x3d7   :  { %7871 = vmatpush3.bf16.msra.mxu0 %v8689_v32  ;;  %v1446_v32 = vmul.f32 %v10557_v3, %v12855_v35 }
 0x3d8   :  { %7872 = vmatprep.subr.bf16.mxu0 %v8690_v38 }
 0x3db   :  { %7873 = vmatpush3.bf16.msra.mxu0 %v8691_v42 }
 0x3dc   :  { %7874 = vmatprep.subr.bf16.mxu0 %v8692_v14  ;;  %v12856_v14 = vld [vmem:[#allocation42_spill] sm:$0xff] }
 0x3df   :  { %7875 = vmatpush3.bf16.msra.mxu0 %v8693_v6  ;;  %v1489_v6 = vmul.f32 %v10765_v58, %v12856_v14  ;;  %v12859_v14 = vld [vmem:[#allocation44_spill] sm:$0xff] }
 0x3e0   :  { %7876 = vmatprep.subr.bf16.mxu0 %v8694_v15  ;;  %v12857_v15 = vld [vmem:[#allocation75_spill] sm:$0xff] }
 0x3e1   :  { %v1490_v29 = vmul.f32 %v10767_v5, %v12857_v15  ;;  %v12862_v15 = vld [vmem:[#allocation103_spill] sm:$0xff] }
 0x3e2   :  { %v8576_v41 = vpop.permute.xlu0 %8575 }
 0x3e3   :  { %v8578_v52 = vunpack.i.h.bf16 %v8576_v41  ;;  %v8577_v51 = vunpack.i.l.bf16 %v8576_v41  ;;  %7877 = vmatpush3.bf16.msra.mxu0 %v8695_v13 }
 0x3e4   :  { %7878 = vmatprep.subr.bf16.mxu0 %v8696_v57 }
 0x3e5   :  { %v8571_v44 = vpop.permute.xlu1 %8570  ;;  %v1777_v13 = vsel %vm1417_vm12, %v1445_v53, %v8577_v51  ;;  %v1778_v41 = vsel %vm1417_vm12, %v1446_v32, %v8578_v52  ;;  %v1492_v51 = vmul.f32 %v10781_v12, %v12859_v14 }
 0x3e6   :  { %v8573_v38 = vunpack.i.h.bf16 %v8571_v44  ;;  %v8572_v42 = vunpack.i.l.bf16 %v8571_v44  ;;  %v8586_v11 = vpop.permute.xlu0 %8585  ;;  %v1827_v8 = vpack.c.bf16 %v1778_v41, %v1777_v13  ;;  %v1449_v41 = vmul.f32 %v10607_v49, %v10489_v9 }
 0x3e7   :  { %7879 = vmatpush3.bf16.msra.mxu0 %v8697_v22  ;;  %v8588_v52 = vunpack.i.h.bf16 %v8586_v11  ;;  %v8587_v53 = vunpack.i.l.bf16 %v8586_v11 }
 0x3e8   :  { %v1788_v26 = vsel %vm1417_vm12, %v1489_v6, %v8572_v42  ;;  %v1789_v57 = vsel %vm1417_vm12, %v1490_v29, %v8573_v38  ;;  %v1448_v38 = vmul.f32 %v10613_v39, %v10424_v45 }
 0x3e9   :  { %v8581_v44 = vpop.permute.xlu1 %8580  ;;  %v1828_v17 = vpack.c.bf16 %v1789_v57, %v1788_v26  ;;  %v1447_v26 = vmul.f32 %v10599_v18, %v10463_v4  ;;  %v1450_v57 = vmul.f32 %v10609_v47, %v10459_v30 }
 0x3ea   :  { %v8583_v33 = vunpack.i.h.bf16 %v8581_v44  ;;  %v8582_v55 = vunpack.i.l.bf16 %v8581_v44  ;;  %v1780_v6 = vsel %vm1417_vm12, %v1448_v38, %v8588_v52  ;;  %v1484_v38 = vld [vmem:[#allocation2 + $0x54] sm:$0xf] }
 0x3eb   :  { %2208 = vmatprep.mubr.bf16.mxu0 %v1828_v17  ;;  %v1779_v42 = vsel %vm1417_vm12, %v1447_v26, %v8587_v53  ;;  %v12860_v53 = vld [vmem:[#allocation102_spill] sm:$0xff]  ;;  %v1495_v50 = vmul.f32 %v1484_v38, %v12862_v15 }
 0x3ec   :  { %2209 = vmatmul.mubr.bf16.gmra.mrb[20].mxu0 %v1827_v8  ;;  %v1790_v32 = vsel %vm1417_vm12, %v1491_v20, %v8582_v55  ;;  %v1791_v29 = vsel %vm1417_vm12, %v1492_v51, %v8583_v33  ;;  %v1832_v13 = vpack.c.bf16 %v1780_v6, %v1779_v42  ;;  %v10797_v8 = vld [vmem:[#allocation2 + $0x44] sm:$0xff]  ;;  %v10799_v55 = vld [vmem:[#allocation2 + $0x4c] sm:$0xff] }
 0x3ed   :  { %v1833_v22 = vpack.c.bf16 %v1791_v29, %v1790_v32  ;;  %v1493_v52 = vmul.f32 %v10797_v8, %v12860_v53  ;;  %v12861_v32 = vld [vmem:[#allocation46_spill] sm:$0xff]  ;;  %v1440_v53 = vld [vmem:[#allocation2 + $0x50] sm:$0xf] }
 0x3ee   :  { %v1494_v29 = vmul.f32 %v10799_v55, %v12861_v32 }
 0x3ef   :  { %2216 = vmatprep.mubr.bf16.mxu0 %v1833_v22 }
 0x3f4   :  { %2217 = vmatmul.mubr.bf16.gmra.mrb[24].mxu0 %v1832_v13 }
 0x406   :  { %v8596_v17 = vpop.permute.xlu0 %8595 }
 0x407   :  { %v8598_v33 = vunpack.i.h.bf16 %v8596_v17  ;;  %v8597_v20 = vunpack.i.l.bf16 %v8596_v17 }
 0x409   :  { %v8591_v11 = vpop.permute.xlu1 %8590  ;;  %v1781_v22 = vsel %vm1417_vm12, %v1449_v41, %v8597_v20  ;;  %v1782_v26 = vsel %vm1417_vm12, %v1450_v57, %v8598_v33  ;;  %v1451_v41 = vmul.f32 %v1440_v53, %v10505_v61  ;;  %v12863_v57 = vld [vmem:[#allocation70_spill] sm:$0xff] }
 0x40a   :  { %v8593_v44 = vunpack.i.h.bf16 %v8591_v11  ;;  %v8592_v51 = vunpack.i.l.bf16 %v8591_v11  ;;  %v8606_v13 = vpop.permute.xlu0 %8605  ;;  %v1837_v11 = vpack.c.bf16 %v1782_v26, %v1781_v22 }
 0x40b   :  { %v8608_v32 = vunpack.i.h.bf16 %v8606_v13  ;;  %v8607_v31 = vunpack.i.l.bf16 %v8606_v13 }
 0x40c   :  { %v1792_v42 = vsel %vm1417_vm12, %v1493_v52, %v8592_v51  ;;  %v1793_v6 = vsel %vm1417_vm12, %v1494_v29, %v8593_v44  ;;  %v1550_v44 = vmul.f32 %v10745_v19, %v12863_v57  ;;  %v12864_v51 = vld [vmem:[#allocation55_spill] sm:$0xff]  ;;  %v12865_v19 = vld [vmem:[#allocation45_spill] sm:$0xff] }
 0x40d   :  { %v8601_v17 = vpop.permute.xlu1 %8600  ;;  %v1838_v2 = vpack.c.bf16 %v1793_v6, %v1792_v42  ;;  %v1551_v52 = vmul.f32 %v10765_v58, %v12864_v51  ;;  %v12866_v58 = vld [vmem:[#allocation54_spill] sm:$0xff] }
 0x40e   :  { %v8602_v14 = vunpack.i.l.bf16 %v8601_v17  ;;  %v8603_v37 = vunpack.i.h.bf16 %v8601_v17  ;;  %v8616_v38 = vpop.permute.xlu0 %8615  ;;  %v1522_v17 = vmul.f32 %v10755_v43, %v12865_v19 }
 0x40f   :  { %2224 = vmatprep.mubr.bf16.mxu0 %v1838_v2  ;;  %v1806_v2 = vsel %vm1417_vm12, %v1550_v44, %v8607_v31  ;;  %v1807_v26 = vsel %vm1417_vm12, %v1551_v52, %v8608_v32  ;;  %v8618_v53 = vunpack.i.h.bf16 %v8616_v38  ;;  %v8617_v13 = vunpack.i.l.bf16 %v8616_v38 }
 0x410   :  { %2225 = vmatmul.mubr.bf16.gmra.mrb[28].mxu0 %v1837_v11  ;;  %v1794_v33 = vsel %vm1417_vm12, %v1495_v50, %v8602_v14  ;;  %v1783_v29 = vsel %vm1417_vm12, %v1451_v41, %v8603_v37  ;;  %v1820_v6 = vpack.c.bf16 %v1807_v26, %v1806_v2  ;;  %v1521_v11 = vmul.f32 %v10753_v59, %v12866_v58  ;;  %v12867_v37 = vld [vmem:[#allocation57_spill] sm:$0xff] }
 0x411   :  { %v1843_v20 = vpack.c.bf16 %v1794_v33, %v1794_v33  ;;  %v8611_v22 = vpop.permute.xlu1 %8610  ;;  %v1842_v42 = vpack.c.bf16 %v1783_v29, %v1783_v29  ;;  %v1552_v31 = vmul.f32 %v10767_v5, %v12867_v37  ;;  %v12868_v33 = vld [vmem:[#allocation72_spill] sm:$0xff]  ;;  %v12869_v5 = vld [vmem:[#allocation47_spill] sm:$0xff] }
 0x412   :  { %v8613_v50 = vunpack.i.h.bf16 %v8611_v22  ;;  %v8612_v14 = vunpack.i.l.bf16 %v8611_v22  ;;  %v1553_v32 = vmul.f32 %v10777_v48, %v12868_v33  ;;  %v8626_v43 = vpop.permute.xlu0 %8625  ;;  %v1523_v48 = vmul.f32 %v10551_v25, %v12869_v5 }
 0x413   :  { %2232 = vmatprep.mubr.bf16.mxu0 %v1843_v20  ;;  %v1808_v52 = vsel %vm1417_vm12, %v1552_v31, %v8617_v13  ;;  %v8628_v38 = vunpack.i.h.bf16 %v8626_v43 }
 0x414   :  { %v1796_v20 = vsel %vm1417_vm12, %v1522_v17, %v8613_v50  ;;  %v1795_v41 = vsel %vm1417_vm12, %v1521_v11, %v8612_v14  ;;  %v1809_v29 = vsel %vm1417_vm12, %v1553_v32, %v8618_v53  ;;  %v12870_v50 = vld [vmem:[#allocation56_spill] sm:$0xff]  ;;  %v12872_v17 = vld [vmem:[#allocation90_spill] sm:$0xff] }
 0x415   :  { %v8621_v44 = vpop.permute.xlu1 %8620  ;;  %v1819_v22 = vpack.c.bf16 %v1796_v20, %v1795_v41  ;;  %v1825_v26 = vpack.c.bf16 %v1809_v29, %v1808_v52  ;;  %v1524_v14 = vmul.f32 %v10557_v3, %v12870_v50  ;;  %v1555_v53 = vmul.f32 %v10797_v8, %v12872_v17  ;;  %v12873_v8 = vld [vmem:[#allocation58_spill] sm:$0xff] }
 0x416   :  { %v8623_v2 = vunpack.i.h.bf16 %v8621_v44  ;;  %v8622_v59 = vunpack.i.l.bf16 %v8621_v44  ;;  %v8636_v44 = vpop.permute.xlu0 %8635 }
 0x417   :  { %v1811_v41 = vsel %vm1417_vm12, %v1555_v53, %v8628_v38  ;;  %v12876_v38 = vld [vmem:[#allocation76_spill] sm:$0xff] }
 0x418   :  { %2233 = vmatmul.mubr.bf16.gmra.mrb[32].mxu0 %v1842_v42  ;;  %v8627_v42 = vunpack.i.l.bf16 %v8626_v43  ;;  %v1797_v11 = vsel %vm1417_vm12, %v1523_v48, %v8622_v59  ;;  %v1798_v31 = vsel %vm1417_vm12, %v1524_v14, %v8623_v2  ;;  %v1546_v43 = vld [vmem:[#allocation2 + $0x54] sm:$0xff]  ;;  %v1525_v59 = vmul.f32 %v10599_v18, %v12873_v8 }
 0x419   :  { %2272 = vmatprep.mubr.bf16.mxu0 %v1820_v6  ;;  %v12871_v6 = vld [vmem:[#allocation74_spill] sm:$0xff]  ;;  %v8631_v32 = vpop.permute.xlu1 %8630  ;;  %v1824_v25 = vpack.c.bf16 %v1798_v31, %v1797_v11  ;;  %v12875_v48 = vld [vmem:[#allocation91_spill] sm:$0xff]  ;;  %v1557_v14 = vmul.f32 %v1546_v43, %v12876_v38  ;;  %v12878_v43 = vld [vmem:[#allocation60_spill] sm:$0xff] }
 0x41a   :  { %v1554_v13 = vmul.f32 %v10781_v12, %v12871_v6  ;;  %v8633_v52 = vunpack.i.h.bf16 %v8631_v32  ;;  %v8632_v29 = vunpack.i.l.bf16 %v8631_v32  ;;  %v8637_v12 = vunpack.i.l.bf16 %v8636_v44 }
 0x41c   :  { %v1810_v20 = vsel %vm1417_vm12, %v1554_v13, %v8627_v42  ;;  %v1556_v42 = vmul.f32 %v10799_v55, %v12875_v48  ;;  %v1799_v13 = vsel %vm1417_vm12, %v1525_v59, %v8632_v29  ;;  %v12877_v55 = vld [vmem:[#allocation86_spill] sm:$0xff] }
 0x41d   :  { %v1830_v3 = vpack.c.bf16 %v1811_v41, %v1810_v20  ;;  %v8641_v11 = vpop.permute.xlu1 %8640  ;;  %v8646_v20 = vpop.permute.xlu0 %8645  ;;  %v1527_v29 = vmul.f32 %v10607_v49, %v12877_v55  ;;  %v12879_v59 = vld [vmem:[#allocation78_spill] sm:$0xff] }
 0x41e   :  { %v1812_v31 = vsel %vm1417_vm12, %v1556_v42, %v8637_v12  ;;  %v8643_v18 = vunpack.i.h.bf16 %v8641_v11  ;;  %v8647_v6 = vunpack.i.l.bf16 %v8646_v20  ;;  %v10864_v12 = vmul.f32 %v10727_v1, %v12879_v59 }
 0x420   :  { %2273 = vmatmul.mubr.bf16.vlgmr.msra.gmra.mrb[36].mxu0 %v1819_v22  ;;  %v8638_v22 = vunpack.i.h.bf16 %v8636_v44  ;;  %v8642_v44 = vunpack.i.l.bf16 %v8641_v11  ;;  %12880 = vst [vmem:[#allocation34_spill] sm:$0xff] %v10864_v12 }
 0x421   :  { %2280 = vmatprep.mubr.bf16.mxu0 %v1825_v26  ;;  %v12874_v26 = vld [vmem:[#allocation84_spill] sm:$0xff]  ;;  %v8656_v49 = vpop.permute.xlu0 %8655 }
 0x422   :  { %v1526_v2 = vmul.f32 %v10613_v39, %v12874_v26  ;;  %v1813_v32 = vsel %vm1417_vm12, %v1557_v14, %v8638_v22  ;;  %v1547_v39 = vld [vmem:[#allocation2 + $0x5c] sm:$0xff]  ;;  %v12881_v22 = vld [vmem:[#allocation111_spill] sm:$0xff]  ;;  %v1801_v42 = vsel %vm1417_vm12, %v1527_v29, %v8642_v44  ;;  %v8657_v1 = vunpack.i.l.bf16 %v8656_v49 }
 0x423   :  { %v12884_v29 = vld [vmem:[#allocation112_spill] sm:$0xff] }
 0x424   :  { %v1800_v53 = vsel %vm1417_vm12, %v1526_v2, %v8633_v52  ;;  %v1528_v52 = vmul.f32 %v10609_v47, %v12878_v43  ;;  %v1558_v2 = vmul.f32 %v1547_v39, %v12881_v22  ;;  %v12883_v39 = vld [vmem:[#allocation62_spill] sm:$0xff] }
 0x425   :  { %v1829_v41 = vpack.c.bf16 %v1800_v53, %v1799_v13  ;;  %v8651_v13 = vpop.permute.xlu1 %8650 }
 0x426   :  { %v1802_v14 = vsel %vm1417_vm12, %v1528_v52, %v8643_v18  ;;  %v1814_v53 = vsel %vm1417_vm12, %v1558_v2, %v8647_v6  ;;  %v8653_v47 = vunpack.i.h.bf16 %v8651_v13  ;;  %v1530_v18 = vmul.f32 %v10662_v28, %v12883_v39 }
 0x428   :  { %2281 = vmatmul.mubr.bf16.gmra.mrb[40].mxu0 %v1824_v25  ;;  %v1835_v25 = vpack.c.bf16 %v1813_v32, %v1812_v31  ;;  %v1834_v31 = vpack.c.bf16 %v1802_v14, %v1801_v42  ;;  %v1549_v32 = vld [vmem:[#allocation2 + $0x6c] sm:$0xf]  ;;  %v1520_v42 = vld [vmem:[#allocation2 + $0x60] sm:$0xf]  ;;  %v8658_v14 = vunpack.i.h.bf16 %v8656_v49 }
 0x429   :  { %2288 = vmatprep.mubr.bf16.mxu0 %v1830_v3  ;;  %v8648_v3 = vunpack.i.h.bf16 %v8646_v20  ;;  %v8652_v20 = vunpack.i.l.bf16 %v8651_v13  ;;  %v1560_v6 = vmul.f32 %v1549_v32, %v12884_v29  ;;  %v8703_v49 = vld [vmem:[#allocation14 + $0x14] ss:$8 sps:$4 sm:$0xff]  }
 0x42a   :  { %v8739_v29 = vld [vmem:[#allocation14 + $0xd4] ss:$8 sps:$4 sm:$0xff]  }
 0x42b   :  { %v1815_v11 = vsel %vm1417_vm12, %v10864_v12, %v8648_v3  ;;  %v1804_v3 = vsel %vm1417_vm12, %v1530_v18, %v8653_v47  ;;  %v1816_v59 = vsel %vm1417_vm12, %v1560_v6, %v8657_v1  ;;  %v8700_v1 = vld [vmem:[#allocation14 + $0x4] ss:$8 sps:$4 sm:$0xff]   ;;  %v8704_v6 = vld [vmem:[#allocation14 + $0x20] ss:$8 sps:$4 sm:$0xff]  }
 0x42c   :  { %v1845_v13 = vpack.c.bf16 %v1816_v59, %v1816_v59  ;;  %3519 = vmatprep.subr.bf16.mxu0 %v8700_v1  ;;  %v8706_v18 = vld [vmem:[#allocation14 + $0x24] ss:$8 sps:$4 sm:$0xff]   ;;  %v8740_v12 = vld [vmem:[#allocation14 + $0xe0] ss:$8 sps:$4 sm:$0xff]  }
 0x42d   :  { %v8712_v59 = vld [vmem:[#allocation14 + $0x44] ss:$8 sps:$4 sm:$0xff]  }
 0x430   :  { %2289 = vmatmul.mubr.bf16.gmra.mrb[44].mxu0 %v1829_v41  ;;  %v1840_v41 = vpack.c.bf16 %v1815_v11, %v1814_v53  ;;  %v12885_v53 = vld [vmem:[#allocation107_spill] sm:$0xff] }
 0x431   :  { %2296 = vmatprep.mubr.bf16.mxu0 %v1835_v25  ;;  %v12882_v25 = vld [vmem:[#allocation106_spill] sm:$0xff]  ;;  %v1531_v11 = vmul.f32 %v1520_v42, %v12885_v53  ;;  %v8715_v42 = vld [vmem:[#allocation14 + $0x54] ss:$8 sps:$4 sm:$0xff]  }
 0x432   :  { %v1529_v44 = vmul.f32 %v10657_v34, %v12882_v25 }
 0x433   :  { %v1805_v34 = vsel %vm1417_vm12, %v1531_v11, %v8658_v14  ;;  %v8713_v14 = vld [vmem:[#allocation14 + $0x50] ss:$8 sps:$4 sm:$0xff]   ;;  %v8716_v11 = vld [vmem:[#allocation14 + $0x60] ss:$8 sps:$4 sm:$0xff]  }
 0x434   :  { %v1803_v52 = vsel %vm1417_vm12, %v1529_v44, %v8652_v20  ;;  %v1844_v28 = vpack.c.bf16 %v1805_v34, %v1805_v34  ;;  %v8701_v44 = vld [vmem:[#allocation14 + $0x10] ss:$8 sps:$4 sm:$0xff]  }
 0x435   :  { %v1839_v2 = vpack.c.bf16 %v1804_v3, %v1803_v52  ;;  %v8709_v52 = vld [vmem:[#allocation14 + $0x34] ss:$8 sps:$4 sm:$0xff]   ;;  %v8707_v3 = vld [vmem:[#allocation14 + $0x30] ss:$8 sps:$4 sm:$0xff]  }
 0x436   :  { %v8719_v34 = vld [vmem:[#allocation14 + $0x70] ss:$8 sps:$4 sm:$0xff]  }
 0x438   :  { %2297 = vmatmul.mubr.bf16.gmra.mrb[48].mxu0 %v1834_v31 }
 0x439   :  { %2304 = vmatprep.mubr.bf16.mxu0 %v1840_v41  ;;  %v8698_v41 = vld [vmem:[#allocation14] ss:$8 sps:$4 sm:$0xff]  }
 0x43a   :  { %3520 = vmatpush1.bf16.msra.mxu0 %v8698_v41  ;;  %v8724_v41 = vld [vmem:[#allocation14 + $0x84] ss:$8 sps:$4 sm:$0xff]  }
 0x43b   :  { %3521 = vmatprep.subr.bf16.mxu0 %v8703_v49  ;;  %v8722_v49 = vld [vmem:[#allocation14 + $0x80] ss:$8 sps:$4 sm:$0xff]  }
 0x43e   :  { %3522 = vmatpush1.bf16.msra.mxu0 %v8701_v44 }
 0x43f   :  { %3523 = vmatprep.subr.bf16.mxu0 %v8706_v18 }
 0x440   :  { %2305 = vmatmul.mubr.bf16.gmra.mrb[52].mxu0 %v1839_v2  ;;  %v8710_v2 = vld [vmem:[#allocation14 + $0x40] ss:$8 sps:$4 sm:$0xff]  }
 0x441   :  { %2312 = vmatprep.mubr.bf16.mxu0 %v1845_v13  ;;  %v8718_v13 = vld [vmem:[#allocation14 + $0x64] ss:$8 sps:$4 sm:$0xff]  }
 0x442   :  { %3524 = vmatpush1.bf16.msra.mxu0 %v8704_v6 }
 0x443   :  { %3525 = vmatprep.subr.bf16.mxu0 %v8709_v52  ;;  %v8725_v52 = vld [vmem:[#allocation14 + $0x90] ss:$8 sps:$4 sm:$0xff]  }
 0x445   :  { %v10882_v31 = vpop.f32.mrb[0].mxu1 }
 0x446   :  { %v10884_v32 = vpop.f32.mrb[1].mxu1  ;;  %3526 = vmatpush1.bf16.msra.mxu0 %v8707_v3  ;;  %v8727_v3 = vld [vmem:[#allocation14 + $0x94] ss:$8 sps:$4 sm:$0xff]  }
 0x447   :  { %v10886_v20 = vpop.f32.mrb[2].mxu1  ;;  %3527 = vmatprep.subr.bf16.mxu0 %v8712_v59  ;;  %v8730_v59 = vld [vmem:[#allocation14 + $0xa4] ss:$8 sps:$4 sm:$0xff]  }
 0x448   :  { %2313 = vmatmul.mubr.bf16.gmra.mrb[56].mxu0 %v1844_v28  ;;  %v10888_v47 = vpop.f32.mrb[3].mxu1  ;;  %v8721_v28 = vld [vmem:[#allocation14 + $0x74] ss:$8 sps:$4 sm:$0xff]  }
 0x44a   :  { %3528 = vmatpush1.bf16.msra.mxu0 %v8710_v2 }
 0x44b   :  { %3529 = vmatprep.subr.bf16.mxu0 %v8715_v42  ;;  %v8728_v42 = vld [vmem:[#allocation14 + $0xa0] ss:$8 sps:$4 sm:$0xff]  }
 0x44e   :  { %3530 = vmatpush1.bf16.msra.mxu0 %v8713_v14 }
 0x44f   :  { %3531 = vmatprep.subr.bf16.mxu0 %v8718_v13 }
 0x452   :  { %3532 = vmatpush1.bf16.msra.mxu0 %v8716_v11 }
 0x453   :  { %3533 = vmatprep.subr.bf16.mxu0 %v8721_v28  ;;  %v8733_v28 = vld [vmem:[#allocation14 + $0xb4] ss:$8 sps:$4 sm:$0xff]  }
 0x456   :  { %3534 = vmatpush1.bf16.msra.mxu0 %v8719_v34  ;;  %v8731_v34 = vld [vmem:[#allocation14 + $0xb0] ss:$8 sps:$4 sm:$0xff]  }
 0x457   :  { %3535 = vmatprep.subr.bf16.mxu0 %v8724_v41  ;;  %v8736_v41 = vld [vmem:[#allocation14 + $0xc4] ss:$8 sps:$4 sm:$0xff]  }
 0x45a   :  { %3536 = vmatpush1.bf16.msra.mxu0 %v8722_v49  ;;  %v8734_v49 = vld [vmem:[#allocation14 + $0xc0] ss:$8 sps:$4 sm:$0xff]  }
 0x45b   :  { %3537 = vmatprep.subr.bf16.mxu0 %v8727_v3  ;;  %v8737_v3 = vld [vmem:[#allocation14 + $0xd0] ss:$8 sps:$4 sm:$0xff]  }
 0x45e   :  { %3538 = vmatpush1.bf16.msra.mxu0 %v8725_v52  ;;  %v8742_v52 = vld [vmem:[#allocation14 + $0xe4] ss:$8 sps:$4 sm:$0xff]  }
 0x45f   :  { %3539 = vmatprep.subr.bf16.mxu0 %v8730_v59  ;;  %v8743_v59 = vld [vmem:[#allocation14 + $0xf0] ss:$8 sps:$4 sm:$0xff]  }
 0x462   :  { %3540 = vmatpush1.bf16.msra.mxu0 %v8728_v42  ;;  %v8748_v42 = vld [vmem:[#allocation14 + $0x104] ss:$8 sps:$4 sm:$0xff]  }
 0x463   :  { %3541 = vmatprep.subr.bf16.mxu0 %v8733_v28 }
 0x466   :  { %3542 = vmatpush1.bf16.msra.mxu0 %v8731_v34 }
 0x467   :  { %3543 = vmatprep.subr.bf16.mxu0 %v8736_v41 }
 0x469   :  { %v10890_v1 = vpop.f32.mrb[4].mxu1 }
 0x46a   :  { %v10892_v44 = vpop.f32.mrb[5].mxu1  ;;  %3544 = vmatpush1.bf16.msra.mxu0 %v8734_v49 }
 0x46b   :  { %v10894_v18 = vpop.f32.mrb[6].mxu1  ;;  %3545 = vmatprep.subr.bf16.mxu0 %v8739_v29 }
 0x46c   :  { %v10896_v6 = vpop.f32.mrb[7].mxu1 }
 0x46e   :  { %3546 = vmatpush1.bf16.msra.mxu0 %v8737_v3 }
 0x46f   :  { %3547 = vmatprep.subr.bf16.mxu0 %v8742_v52 }
 0x471   :  { %v10898_v2 = vpop.f32.mrb[8].mxu1 }
 0x472   :  { %12886 = vst [vmem:[#allocation31_spill] sm:$0xff] %v10898_v2  ;;  %v10900_v14 = vpop.f32.mrb[9].mxu1  ;;  %3548 = vmatpush1.bf16.msra.mxu0 %v8740_v12 }
 0x473   :  { %v8128_v13 = vpop.f32.mrb[10].mxu1 }
 0x474   :  { %v10902_v11 = vpop.f32.mrb[11].mxu1  ;;  %v8745_v13 = vld [vmem:[#allocation14 + $0xf4] ss:$8 sps:$4 sm:$0xff]  }
 0x475   :  { %3549 = vmatprep.subr.bf16.mxu0 %v8745_v13 }
 0x476   :  { %3550 = vmatpush1.bf16.msra.mxu0 %v8743_v59 }
 0x477   :  { %3610 = vmatprep.subr.bf16.mxu0 %v8748_v42 }
 0x49d   :  { %v7828_v28 = vpop.f32.mrb[12].mxu0 }
 0x49e   :  { %v7829_v22 = vpop.f32.mrb[13].mxu0 }
 0x49f   :  { %v7830_v34 = vadd.f32 %v7829_v22, %v7828_v28  ;;  %v7831_v48 = vpop.f32.mrb[14].mxu0 }
 0x4a0   :  { %v7832_v41 = vpop.f32.mrb[15].mxu0 }
 0x4a1   :  { %v7833_v49 = vadd.f32 %v7832_v41, %v7831_v48 }
 0x4a5   :  { %v7834_v38 = vpop.f32.mrb[16].mxu0 }
 0x4a6   :  { %v7835_v17 = vpop.f32.mrb[17].mxu0 }
 0x4a7   :  { %v7836_v29 = vadd.f32 %v7835_v17, %v7834_v38  ;;  %v7837_v37 = vpop.f32.mrb[18].mxu0 }
 0x4a8   :  { %v7838_v3 = vpop.f32.mrb[19].mxu0 }
 0x4a9   :  { %v7839_v33 = vadd.f32 %v7838_v3, %v7837_v37 }
 0x4bf   :  { %v7840_v52 = vpop.f32.mrb[20].mxu0 }
 0x4c0   :  { %v7841_v12 = vpop.f32.mrb[21].mxu0 }
 0x4c1   :  { %v7842_v57 = vadd.f32 %v7841_v12, %v7840_v52  ;;  %v7843_v51 = vpop.f32.mrb[22].mxu0 }
 0x4c2   :  { %v7844_v13 = vpop.f32.mrb[23].mxu0 }
 0x4c3   :  { %v10904_v53 = vadd.f32 %v7844_v13, %v7843_v51 }
 0x4c7   :  { %v7846_v59 = vpop.f32.mrb[24].mxu0 }
 0x4c8   :  { %v7847_v42 = vpop.f32.mrb[25].mxu0 }
 0x4c9   :  { %v10906_v15 = vadd.f32 %v7847_v42, %v7846_v59  ;;  %v7849_v22 = vpop.f32.mrb[26].mxu0  ;;  %v10916_v59 = vld [vmem:[#allocation12] ss:$0 sm:$0xff] }
 0x4ca   :  { %v7850_v28 = vpop.f32.mrb[27].mxu0  ;;  %v2203_v2 = vadd.f32 %v7836_v29, %v10916_v59 }
 0x4cb   :  { %v10908_v48 = vadd.f32 %v7850_v28, %v7849_v22  ;;  %v2195_v22 = vadd.f32 %v7830_v34, %v10916_v59 }
 0x4e3   :  { %v7852_v41 = vpop.f32.mrb[28].mxu0 }
 0x4e4   :  { %v7853_v17 = vpop.f32.mrb[29].mxu0 }
 0x4e5   :  { %v10910_v38 = vadd.f32 %v7853_v17, %v7852_v41  ;;  %v7855_v37 = vpop.f32.mrb[30].mxu0  ;;  %v2198_v17 = vadd.f32 %v7833_v49, %v10916_v59 }
 0x4e6   :  { %v7856_v3 = vpop.f32.mrb[31].mxu0 }
 0x4e7   :  { %v10912_v56 = vadd.f32 %v7856_v3, %v7855_v37 }
 0x4eb   :  { %v7858_v52 = vpop.f32.mrb[32].mxu0 }
 0x4ec   :  { %v7859_v12 = vpop.f32.mrb[33].mxu0 }
 0x4ed   :  { %v10914_v51 = vadd.f32 %v7859_v12, %v7858_v52  ;;  %v7861_v13 = vpop.f32.mrb[34].mxu0 }
 0x4ee   :  { %v7862_v61 = vpop.f32.mrb[35].mxu0 }
 0x4f3   :  { %v7880_v42 = vpop.f32.mrb[36].mxu0 }
 0x4f4   :  { %v7881_v62 = vpop.f32.mrb[37].mxu0 }
 0x4f5   :  { %v7882_v28 = vadd.f32 %v7881_v62, %v7880_v42  ;;  %v7883_v46 = vpop.f32.mrb[38].mxu0  ;;  %v2206_v42 = vadd.f32 %v7839_v33, %v10916_v59 }
 0x4f6   :  { %v7884_v41 = vpop.f32.mrb[39].mxu0 }
 0x4f7   :  { %v2275_v39 = vadd.f32 %v7882_v28, %v2195_v22  ;;  %v7885_v37 = vadd.f32 %v7884_v41, %v7883_v46 }
 0x4f9   :  { %v2355_v3 = vadd.f32 %v10884_v32, %v2275_v39  ;;  %v2278_v25 = vadd.f32 %v7885_v37, %v2198_v17 }
 0x4fb   :  { %v2400_v52 = vmax.f32 %v2355_v3, 0.0  ;;  %v2358_v12 = vadd.f32 %v10888_v47, %v2278_v25  ;;  %v7886_v61 = vpop.f32.mrb[40].mxu0  ;;  %v2214_v3 = vadd.f32 %v10904_v53, %v10916_v59 }
 0x4fc   :  { %v7887_v13 = vpop.f32.mrb[41].mxu0 }
 0x4fd   :  { %2411 = vst [vmem:[#allocation2 + $0x10] sm:$0xff] %v2400_v52  ;;  %v2401_v10 = vmax.f32 %v2358_v12, 0.0  ;;  %v7888_v34 = vadd.f32 %v7887_v13, %v7886_v61  ;;  %v7889_v62 = vpop.f32.mrb[42].mxu0  ;;  %v10925_v49 = vmul.f32 %v2400_v52, %v12852_v27  ;;  %v10928_v46 = vmul.f32 %v2400_v52, %v12866_v58  ;;  %v8746_v61 = vld [vmem:[#allocation14 + $0x100] ss:$8 sps:$4 sm:$0xff]  }
 0x4fe   :  { %v7890_v0 = vpop.f32.mrb[43].mxu0  ;;  %v2589_v13 = vpack.c.bf16 %v10731_v63, %v10735_v16 }
 0x4ff   :  { %2412 = vst [vmem:[#allocation2 + $0x18] sm:$0xff] %v2401_v10  ;;  %v2283_v39 = vadd.f32 %v7888_v34, %v2203_v2  ;;  %v7891_v25 = vadd.f32 %v7890_v0, %v7889_v62  ;;  %v10931_v32 = vmul.f32 %v2401_v10, %v12853_v54  ;;  %v10934_v47 = vmul.f32 %v2401_v10, %v12865_v19 }
 0x500   :  { %v2211_v54 = vadd.f32 %v7842_v57, %v10916_v59  ;;  %v8751_v57 = vld [vmem:[#allocation14 + $0x114] ss:$8 sps:$4 sm:$0xff]  }
 0x501   :  { %v2363_v29 = vadd.f32 %v10882_v31, %v2283_v39  ;;  %v2286_v22 = vadd.f32 %v7891_v25, %v2206_v42  ;;  %v2598_v33 = vpack.c.bf16 %v10931_v32, %v10925_v49  ;;  %v2593_v27 = vpack.c.bf16 %v10934_v47, %v10928_v46  ;;  %v8851_v46 = vld [vmem:[#allocation14 + $0x330] ss:$8 sps:$4 sm:$0xff]   ;;  %v8856_v47 = vld [vmem:[#allocation14 + $0x344] ss:$8 sps:$4 sm:$0xff]  }
 0x502   :  { %v2227_v49 = vadd.f32 %v10910_v38, %v10916_v59  ;;  %v2230_v38 = vadd.f32 %v10912_v56, %v10916_v59 }
 0x503   :  { %v2402_v58 = vmax.f32 %v2363_v29, 0.0  ;;  %v2366_v28 = vadd.f32 %v10886_v20, %v2286_v22  ;;  %v7892_v2 = vpop.f32.mrb[44].mxu0  ;;  %v8754_v22 = vld [vmem:[#allocation14 + $0x124] ss:$8 sps:$4 sm:$0xff]  }
 0x504   :  { %v7893_v0 = vpop.f32.mrb[45].mxu0  ;;  %v2445_v41 = vld [vmem:[#allocation2 + $0xa] sm:$0xff] }
 0x505   :  { %2413 = vst [vmem:[#allocation2 + $0x20] sm:$0xff] %v2402_v58  ;;  %v2403_v10 = vmax.f32 %v2366_v28, 0.0  ;;  %v7894_v19 = vadd.f32 %v7893_v0, %v7892_v2  ;;  %v7895_v17 = vpop.f32.mrb[46].mxu0  ;;  %v2456_v31 = vmul.f32 %v2445_v41, %v12817_v7  ;;  %v10950_v34 = vmul.f32 %v2402_v58, %v12854_v24 }
 0x506   :  { %v7896_v37 = vpop.f32.mrb[47].mxu0  ;;  %v10957_v53 = vmul.f32 %v2402_v58, %v12869_v5  ;;  %v10962_v39 = vld [vmem:[#allocation2 + $0x12] sm:$0xff]  ;;  %v2219_v5 = vadd.f32 %v10906_v15, %v10916_v59 }
 0x507   :  { %2414 = vst [vmem:[#allocation2 + $0x28] sm:$0xff] %v2403_v10  ;;  %v2291_v52 = vadd.f32 %v7894_v19, %v2211_v54  ;;  %v7897_v12 = vadd.f32 %v7896_v37, %v7895_v17  ;;  %v2590_v20 = vpack.c.bf16 %v2456_v31, %v10554_v40  ;;  %v10953_v62 = vmul.f32 %v2403_v10, %v12855_v35  ;;  %v8752_v17 = vld [vmem:[#allocation14 + $0x120] ss:$8 sps:$4 sm:$0xff]   ;;  %v8757_v31 = vld [vmem:[#allocation14 + $0x134] ss:$8 sps:$4 sm:$0xff]  }
 0x508   :  { %v10960_v40 = vmul.f32 %v2403_v10, %v12870_v50  ;;  %v2222_v54 = vadd.f32 %v10908_v48, %v10916_v59 }
 0x509   :  { %v2371_v7 = vadd.f32 %v10892_v44, %v2291_v52  ;;  %v2294_v42 = vadd.f32 %v7897_v12, %v2214_v3  ;;  %3551 = vmatprep.mubr.bf16.mxu0 %v2590_v20  ;;  %v2607_v63 = vpack.c.bf16 %v10953_v62, %v10950_v34  ;;  %v8749_v44 = vld [vmem:[#allocation14 + $0x110] ss:$8 sps:$4 sm:$0xff]  }
 0x50a   :  { %3552 = vmatmul.mubr.bf16.vlgmr.msra.gmra.mrb[60].mxu0 %v2589_v13  ;;  %v2602_v25 = vpack.c.bf16 %v10960_v40, %v10957_v53  ;;  %v8760_v13 = vld [vmem:[#allocation14 + $0x144] ss:$8 sps:$4 sm:$0xff]   ;;  %v8857_v40 = vld [vmem:[#allocation14 + $0x350] ss:$8 sps:$4 sm:$0xff]  }
 0x50b   :  { %v2404_v16 = vmax.f32 %v2371_v7, 0.0  ;;  %v2374_v24 = vadd.f32 %v10896_v6, %v2294_v42  ;;  %3611 = vmatpush1.bf16.msra.mxu0 %v8746_v61  ;;  %v7898_v35 = vpop.f32.mrb[48].mxu0  ;;  %v2457_v6 = vmul.f32 %v10962_v39, %v12822_v60  ;;  %v8755_v61 = vld [vmem:[#allocation14 + $0x130] ss:$8 sps:$4 sm:$0xff]  }
 0x50c   :  { %v7899_v50 = vpop.f32.mrb[49].mxu0  ;;  %3612 = vmatprep.subr.bf16.mxu0 %v8751_v57  ;;  %v10971_v29 = vld [vmem:[#allocation2 + $0x1a] sm:$0xff] }
 0x50d   :  { %2415 = vst [vmem:[#allocation2 + $0x30] sm:$0xff] %v2404_v16  ;;  %v2405_v58 = vmax.f32 %v2374_v24, 0.0  ;;  %v7900_v28 = vadd.f32 %v7899_v50, %v7898_v35  ;;  %v7901_v2 = vpop.f32.mrb[50].mxu0  ;;  %v2458_v0 = vmul.f32 %v10971_v29, %v12823_v23  ;;  %v10980_v37 = vmul.f32 %v2404_v16, %v10463_v4  ;;  %v8763_v50 = vld [vmem:[#allocation14 + $0x154] ss:$8 sps:$4 sm:$0xff]  }
 0x50e   :  { %v7902_v41 = vpop.f32.mrb[51].mxu0  ;;  %v10989_v48 = vld [vmem:[#allocation2 + $0x22] sm:$0xff]  ;;  %v10994_v12 = vmul.f32 %v2404_v16, %v12873_v8 }
 0x50f   :  { %2416 = vst [vmem:[#allocation2 + $0x38] sm:$0xff] %v2405_v58  ;;  %v2299_v15 = vadd.f32 %v7900_v28, %v2219_v5  ;;  %v7903_v10 = vadd.f32 %v7902_v41, %v7901_v2  ;;  %3613 = vmatpush1.bf16.msra.mxu0 %v8749_v44  ;;  %v2599_v19 = vpack.c.bf16 %v2458_v0, %v2457_v6  ;;  %v8758_v5 = vld [vmem:[#allocation14 + $0x140] ss:$8 sps:$4 sm:$0xff]   ;;  %v8761_v0 = vld [vmem:[#allocation14 + $0x150] ss:$8 sps:$4 sm:$0xff]  }
 0x510   :  { %3614 = vmatprep.subr.bf16.mxu0 %v8754_v22  ;;  %v10983_v60 = vmul.f32 %v2405_v58, %v10424_v45  ;;  %v10997_v4 = vmul.f32 %v2405_v58, %v12874_v26  ;;  %v2235_v41 = vadd.f32 %v10914_v51, %v10916_v59 }
 0x511   :  { %v2379_v23 = vadd.f32 %v10890_v1, %v2299_v15  ;;  %v2302_v3 = vadd.f32 %v7903_v10, %v2222_v54  ;;  %3561 = vmatprep.mubr.bf16.mxu0 %v2599_v19  ;;  %v12887_v10 = vld [vmem:[#allocation71_spill] sm:$0xff]  ;;  %v12888_v19 = vld [vmem:[#allocation73_spill] sm:$0xff] }
 0x512   :  { %3562 = vmatmul.mubr.bf16.gmra.mrb[64].mxu0 %v2598_v33  ;;  %v2616_v52 = vpack.c.bf16 %v10983_v60, %v10980_v37  ;;  %v2611_v8 = vpack.c.bf16 %v10997_v4, %v10994_v12  ;;  %v12894_v60 = vld [vmem:[#allocation101_spill] sm:$0xff] }
 0x513   :  { %v2406_v45 = vmax.f32 %v2379_v23, 0.0  ;;  %v2382_v1 = vadd.f32 %v10894_v18, %v2302_v3  ;;  %3615 = vmatpush1.bf16.msra.mxu0 %v8752_v17  ;;  %v7904_v20 = vpop.f32.mrb[52].mxu0  ;;  %v2459_v18 = vmul.f32 %v10989_v48, %v12824_v21  ;;  %v8764_v23 = vld [vmem:[#allocation14 + $0x160] ss:$8 sps:$4 sm:$0xff]   ;;  %v8769_v3 = vld [vmem:[#allocation14 + $0x174] ss:$8 sps:$4 sm:$0xff]  }
 0x514   :  { %v7905_v32 = vpop.f32.mrb[53].mxu0  ;;  %3616 = vmatprep.subr.bf16.mxu0 %v8757_v31  ;;  %v11002_v33 = vld [vmem:[#allocation2 + $0x2a] sm:$0xff]  ;;  %v8914_v12 = vld [vmem:[%s12542_s8 + $0x40] sm:$0xff]  }
 0x515   :  { %2417 = vst [vmem:[#allocation2 + $0x40] sm:$0xff] %v2406_v45  ;;  %v2407_v26 = vmax.f32 %v2382_v1, 0.0  ;;  %v7906_v57 = vadd.f32 %v7905_v32, %v7904_v20  ;;  %v7907_v7 = vpop.f32.mrb[54].mxu0  ;;  %v2460_v42 = vmul.f32 %v11002_v33, %v9960_v36  ;;  %v2441_v22 = vmul.f32 %v2406_v45, %v10489_v9  ;;  %v12890_v20 = vld [vmem:[#allocation106_spill] sm:$0xff]  ;;  %7926 = vmatprep.subr.bf16.mxu1 %v8914_v12  ;;  %v8895_v12 = vld [vmem:[#allocation14 + $0x414] ss:$8 sps:$4 sm:$0xff]  }
 0x516   :  { %v7908_v16 = vpop.f32.mrb[55].mxu0  ;;  %v11018_v36 = vld [vmem:[#allocation2 + $0x32] sm:$0xff]  ;;  %v11021_v2 = vmul.f32 %v2406_v45, %v12877_v55  ;;  %v8915_v4 = vld [vmem:[%s12542_s8] sm:$0xff]  }
 0x517   :  { %2418 = vst [vmem:[#allocation2 + $0x48] sm:$0xff] %v2407_v26  ;;  %v2307_v24 = vadd.f32 %v7906_v57, %v2227_v49  ;;  %v7909_v35 = vadd.f32 %v7908_v16, %v7907_v7  ;;  %3617 = vmatpush1.bf16.msra.mxu0 %v8755_v61  ;;  %v2608_v44 = vpack.c.bf16 %v2460_v42, %v2459_v18  ;;  %v12889_v45 = vld [vmem:[#allocation31_spill] sm:$0xff]  ;;  %v12891_v49 = vld [vmem:[#allocation62_spill] sm:$0xff] }
 0x518   :  { %3618 = vmatprep.subr.bf16.mxu0 %v8760_v13  ;;  %v2442_v58 = vmul.f32 %v2407_v26, %v10459_v30  ;;  %v11024_v6 = vmul.f32 %v2407_v26, %v12878_v43  ;;  %v8767_v57 = vld [vmem:[#allocation14 + $0x170] ss:$8 sps:$4 sm:$0xff]   ;;  %v8772_v42 = vld [vmem:[#allocation14 + $0x184] ss:$8 sps:$4 sm:$0xff]   ;;  %7927 = vmatpush3.bf16.msra.mxu1 %v8915_v4 }
 0x519   :  { %v2387_v21 = vadd.f32 %v10900_v14, %v2307_v24  ;;  %v2310_v28 = vadd.f32 %v7909_v35, %v2230_v38  ;;  %3571 = vmatprep.mubr.bf16.mxu0 %v2608_v44  ;;  %v12892_v38 = vld [vmem:[#allocation100_spill] sm:$0xff] }
 0x51a   :  { %3572 = vmatmul.mubr.bf16.gmra.mrb[68].mxu0 %v2607_v63  ;;  %v2625_v56 = vpack.c.bf16 %v2442_v58, %v2441_v22  ;;  %v8766_v63 = vld [vmem:[#allocation14 + $0x164] ss:$8 sps:$4 sm:$0xff]   ;;  %v2620_v55 = vpack.c.bf16 %v11024_v6, %v11021_v2  ;;  %v12893_v35 = vld [vmem:[#allocation36_spill] sm:$0xff] }
 0x51b   :  { %v2408_v9 = vmax.f32 %v2387_v21, 0.0  ;;  %v2390_v30 = vadd.f32 %v10902_v11, %v2310_v28  ;;  %3619 = vmatpush1.bf16.msra.mxu0 %v8758_v5  ;;  %v7910_v14 = vpop.f32.mrb[56].mxu0  ;;  %v2461_v11 = vmul.f32 %v11018_v36, %v12887_v10  ;;  %v8770_v5 = vld [vmem:[#allocation14 + $0x180] ss:$8 sps:$4 sm:$0xff]   ;;  %v2489_v21 = vld [vmem:[#allocation2 + $0x16] sm:$0xff] }
 0x51c   :  { %v7911_v34 = vpop.f32.mrb[57].mxu0  ;;  %3620 = vmatprep.subr.bf16.mxu0 %v8763_v50  ;;  %v11029_v62 = vld [vmem:[#allocation2 + $0x3a] sm:$0xff]  ;;  %v12928_v2 = vld [vmem:[#allocation110_spill] sm:$0xff] }
 0x51d   :  { %2419 = vst [vmem:[#allocation2 + $0x50] sm:$0xff] %v2408_v9  ;;  %v2409_v43 = vmax.f32 %v2390_v30, 0.0  ;;  %v7912_v54 = vadd.f32 %v7911_v34, %v7910_v14  ;;  %v7913_v15 = vpop.f32.mrb[58].mxu0  ;;  %v2462_v17 = vmul.f32 %v11029_v62, %v12888_v19  ;;  %v11039_v61 = vmul.f32 %v2408_v9, %v12890_v20  ;;  %v8775_v50 = vld [vmem:[#allocation14 + $0x194] ss:$8 sps:$4 sm:$0xff]  }
 0x51e   :  { %v7914_v31 = vpop.f32.mrb[59].mxu0  ;;  %v11047_v13 = vld [vmem:[#allocation2 + $0x42] sm:$0xff]  ;;  %v8773_v28 = vld [vmem:[#allocation14 + $0x190] ss:$8 sps:$4 sm:$0xff]   ;;  %v8781_v10 = vld [vmem:[#allocation14 + $0x1b4] ss:$8 sps:$4 sm:$0xff]  }
 0x51f   :  { %2420 = vst [vmem:[#allocation2 + $0x58] sm:$0xff] %v2409_v43  ;;  %v2315_v51 = vadd.f32 %v7912_v54, %v2235_v41  ;;  %3621 = vmatpush1.bf16.msra.mxu0 %v8761_v0  ;;  %v2617_v59 = vpack.c.bf16 %v2462_v17, %v2461_v11  ;;  %v11042_v32 = vmul.f32 %v2409_v43, %v12891_v49  ;;  %v8778_v9 = vld [vmem:[#allocation14 + $0x1a4] ss:$8 sps:$4 sm:$0xff]   ;;  %v12895_v30 = vld [vmem:[#allocation124_spill] sm:$0xff]  ;;  %v8782_v17 = vld [vmem:[#allocation14 + $0x1c0] ss:$8 sps:$4 sm:$0xff]  }
 0x520   :  { %3622 = vmatprep.subr.bf16.mxu0 %v8766_v63  ;;  %v2463_v24 = vmul.f32 %v11047_v13, %v12892_v38  ;;  %v2488_v0 = vld [vmem:[#allocation2 + $0xe] sm:$0xff]  ;;  %v8776_v63 = vld [vmem:[#allocation14 + $0x1a0] ss:$8 sps:$4 sm:$0xff]  }
 0x521   :  { %v2395_v1 = vadd.f32 %v12889_v45, %v2315_v51  ;;  %3581 = vmatprep.mubr.bf16.mxu0 %v2617_v59  ;;  %v2629_v7 = vpack.c.bf16 %v11042_v32, %v11039_v61  ;;  %v12896_v41 = vld [vmem:[#allocation48_spill] sm:$0xff]  ;;  %v12897_v43 = vld [vmem:[#allocation39_spill] sm:$0xff]  ;;  %v8922_v32 = vld [vmem:[%s12542_s8 + $0x60] sm:$0xff]  }
 0x522   :  { %3582 = vmatmul.mubr.bf16.gmra.mrb[72].mxu0 %v2616_v52  ;;  %v2500_v34 = vmul.f32 %v2489_v21, %v12896_v41  ;;  %v2499_v54 = vmul.f32 %v2488_v0, %v12897_v43  ;;  %v8784_v19 = vld [vmem:[#allocation14 + $0x1c4] ss:$8 sps:$4 sm:$0xff]   ;;  %v8787_v31 = vld [vmem:[#allocation14 + $0x1d4] ss:$8 sps:$4 sm:$0xff]   ;;  %v8785_v51 = vld [vmem:[#allocation14 + $0x1d0] ss:$8 sps:$4 sm:$0xff]  }
 0x523   :  { %v2410_v26 = vmax.f32 %v2395_v1, 0.0  ;;  %3623 = vmatpush1.bf16.msra.mxu0 %v8764_v23  ;;  %v8790_v59 = vld [vmem:[#allocation14 + $0x1e4] ss:$8 sps:$4 sm:$0xff]   ;;  %v8788_v23 = vld [vmem:[#allocation14 + $0x1e0] ss:$8 sps:$4 sm:$0xff]   ;;  %v2468_v21 = vld [vmem:[#allocation2 + $0x14] sm:$0xff] }
 0x524   :  { %3624 = vmatprep.subr.bf16.mxu0 %v8769_v3  ;;  %v11051_v18 = vld [vmem:[#allocation2 + $0x4a] sm:$0xff]  ;;  %v2454_v16 = vld [vmem:[#allocation2 + $0x52] sm:$0xf]  ;;  %v2592_v11 = vpack.c.bf16 %v2500_v34, %v2499_v54  ;;  %v12904_v34 = vld [vmem:[#allocation37_spill] sm:$0xff] }
 0x525   :  { %2421 = vst [vmem:[#allocation2 + $0x60] sm:$0xf] %v2410_v26  ;;  %v2464_v37 = vmul.f32 %v11051_v18, %v12893_v35  ;;  %v2465_v52 = vmul.f32 %v2454_v16, %v12894_v60  ;;  %v2432_v58 = vld [vmem:[#allocation2 + $0x50] sm:$0xf]  ;;  %v8793_v3 = vld [vmem:[#allocation14 + $0x1f4] ss:$8 sps:$4 sm:$0xff]  }
 0x526   :  { %v2443_v14 = vmul.f32 %v2432_v58, %v12895_v30  ;;  %v2467_v45 = vld [vmem:[#allocation2 + $0xc] sm:$0xff]  ;;  %v12900_v35 = vld [vmem:[#allocation41_spill] sm:$0xff]  ;;  %v12901_v60 = vld [vmem:[#allocation32_spill] sm:$0xff] }
 0x527   :  { %3625 = vmatpush1.bf16.msra.mxu0 %v8767_v57  ;;  %v2626_v44 = vpack.c.bf16 %v2464_v37, %v2463_v24  ;;  %v2635_v22 = vpack.c.bf16 %v2465_v52, %v2465_v52  ;;  %v11061_v1 = vld [vmem:[#allocation2 + $0x26] sm:$0xff]  ;;  %v8791_v20 = vld [vmem:[#allocation14 + $0x1f0] ss:$8 sps:$4 sm:$0xff]  }
 0x528   :  { %3626 = vmatprep.subr.bf16.mxu0 %v8772_v42  ;;  %v2634_v15 = vpack.c.bf16 %v2443_v14, %v2443_v14  ;;  %v12898_v49 = vld [vmem:[#allocation35_spill] sm:$0xff]  ;;  %v11064_v42 = vld [vmem:[#allocation2 + $0x1e] sm:$0xff] }
 0x529   :  { %3591 = vmatprep.mubr.bf16.mxu0 %v2626_v44  ;;  %v2478_v26 = vmul.f32 %v2467_v45, %v12898_v49  ;;  %v8796_v57 = vld [vmem:[#allocation14 + $0x204] ss:$8 sps:$4 sm:$0xff]   ;;  %v8794_v24 = vld [vmem:[#allocation14 + $0x200] ss:$8 sps:$4 sm:$0xff]   ;;  %v2501_v37 = vmul.f32 %v11064_v42, %v12900_v35  ;;  %v8799_v44 = vld [vmem:[#allocation14 + $0x214] ss:$8 sps:$4 sm:$0xff]  }
 0x52a   :  { %3592 = vmatmul.mubr.bf16.gmra.mrb[76].mxu0 %v2625_v56  ;;  %v8779_v56 = vld [vmem:[#allocation14 + $0x1b0] ss:$8 sps:$4 sm:$0xff]   ;;  %v8802_v30 = vld [vmem:[#allocation14 + $0x224] ss:$8 sps:$4 sm:$0xff]   ;;  %v8800_v43 = vld [vmem:[#allocation14 + $0x220] ss:$8 sps:$4 sm:$0xff]  }
 0x52b   :  { %3627 = vmatpush1.bf16.msra.mxu0 %v8770_v5  ;;  %3601 = vmatprep.mubr.bf16.mxu0 %v2635_v22  ;;  %v12899_v16 = vld [vmem:[#allocation43_spill] sm:$0xff]  ;;  %v2591_v52 = vpack.c.bf16 %v2478_v26, %v12901_v60  ;;  %v11073_v22 = vld [vmem:[#allocation2 + $0x36] sm:$0xff]  ;;  %v12903_v0 = vld [vmem:[#allocation50_spill] sm:$0xff] }
 0x52c   :  { %3628 = vmatprep.subr.bf16.mxu0 %v8775_v50  ;;  %v2502_v38 = vmul.f32 %v11061_v1, %v12899_v16  ;;  %v11071_v50 = vld [vmem:[#allocation2 + $0x1c] sm:$0xff]  ;;  %v11077_v14 = vld [vmem:[#allocation2 + $0x2e] sm:$0xff]  ;;  %v2504_v41 = vmul.f32 %v11073_v22, %v12903_v0  ;;  %v12908_v26 = vld [vmem:[#allocation42_spill] sm:$0xff] }
 0x52d   :  { %v8797_v58 = vld [vmem:[#allocation14 + $0x210] ss:$8 sps:$4 sm:$0xff]   ;;  %v11092_v45 = vld [vmem:[#allocation2 + $0x3e] sm:$0xff] }
 0x52e   :  { %v2601_v5 = vpack.c.bf16 %v2502_v38, %v2501_v37  ;;  %v12905_v54 = vld [vmem:[#allocation79_spill] sm:$0xff]  ;;  %v8806_v16 = vld [vmem:[#allocation14 + $0x240] ss:$8 sps:$4 sm:$0xff]   ;;  %v8811_v37 = vld [vmem:[#allocation14 + $0x254] ss:$8 sps:$4 sm:$0xff]  }
 0x52f   :  { %3629 = vmatpush1.bf16.msra.mxu0 %v8773_v28  ;;  %v12902_v28 = vld [vmem:[#allocation40_spill] sm:$0xff]  ;;  %v12909_v38 = vld [vmem:[#allocation81_spill] sm:$0xff] }
 0x530   :  { %3630 = vmatprep.subr.bf16.mxu0 %v8778_v9  ;;  %v2480_v9 = vmul.f32 %v11071_v50, %v12902_v28  ;;  %v12911_v0 = vld [vmem:[#allocation52_spill] sm:$0xff] }
 0x531   :  { %v2525_v53 = vld [vmem:[#allocation2 + $0x5a] sm:$0xff] }
 0x532   :  { %3602 = vmatmul.mubr.bf16.gmra.mrb[80].mxu0 %v2634_v15  ;;  %v2503_v15 = vmul.f32 %v11077_v14, %v12905_v54  ;;  %v12913_v54 = vld [vmem:[#allocation104_spill] sm:$0xff] }
 0x533   :  { %3631 = vmatpush1.bf16.msra.mxu0 %v8776_v63  ;;  %3642 = vmatprep.mubr.bf16.mxu0 %v2592_v11  ;;  %v2479_v63 = vmul.f32 %v2468_v21, %v12904_v34  ;;  %v8805_v11 = vld [vmem:[#allocation14 + $0x234] ss:$8 sps:$4 sm:$0xff]  }
 0x534   :  { %3632 = vmatprep.subr.bf16.mxu0 %v8781_v10  ;;  %v12910_v21 = vld [vmem:[#allocation44_spill] sm:$0xff]  ;;  %v12912_v34 = vld [vmem:[#allocation77_spill] sm:$0xff] }
 0x535   :  { %v2600_v10 = vpack.c.bf16 %v2480_v9, %v2479_v63  ;;  %v8814_v9 = vld [vmem:[#allocation14 + $0x264] ss:$8 sps:$4 sm:$0xff]   ;;  %v8921_v61 = vld [vmem:[%s12542_s8 + $0x18] sm:$0xff]  }
 0x537   :  { %3633 = vmatpush1.bf16.msra.mxu0 %v8779_v56  ;;  %v2610_v56 = vpack.c.bf16 %v2504_v41, %v2503_v15 }
 0x538   :  { %3634 = vmatprep.subr.bf16.mxu0 %v8784_v19  ;;  %v11084_v19 = vld [vmem:[#allocation2 + $0x2c] sm:$0xff] }
 0x53b   :  { %3635 = vmatpush1.bf16.msra.mxu0 %v8782_v17  ;;  %v11086_v17 = vld [vmem:[#allocation2 + $0x46] sm:$0xff] }
 0x53c   :  { %3636 = vmatprep.subr.bf16.mxu0 %v8787_v31  ;;  %v8803_v31 = vld [vmem:[#allocation14 + $0x230] ss:$8 sps:$4 sm:$0xff]  }
 0x53f   :  { %3637 = vmatpush1.bf16.msra.mxu0 %v8785_v51  ;;  %v11088_v51 = vld [vmem:[#allocation2 + $0x24] sm:$0xff] }
 0x540   :  { %3638 = vmatprep.subr.bf16.mxu0 %v8790_v59  ;;  %v12906_v59 = vld [vmem:[#allocation75_spill] sm:$0xff] }
 0x543   :  { %3639 = vmatpush1.bf16.msra.mxu0 %v8788_v23  ;;  %v2482_v23 = vmul.f32 %v11084_v19, %v12906_v59  ;;  %v2498_v59 = vld [vmem:[#allocation2 + $0x5e] sm:$0xf] }
 0x544   :  { %3640 = vmatprep.subr.bf16.mxu0 %v8793_v3  ;;  %v8808_v3 = vld [vmem:[#allocation14 + $0x244] ss:$8 sps:$4 sm:$0xff]  }
 0x547   :  { %3641 = vmatpush1.bf16.msra.mxu0 %v8791_v20  ;;  %v12907_v20 = vld [vmem:[#allocation83_spill] sm:$0xff] }
 0x548   :  { %3701 = vmatprep.subr.bf16.mxu0 %v8796_v57  ;;  %v2506_v49 = vmul.f32 %v11086_v17, %v12907_v20  ;;  %v2481_v57 = vmul.f32 %v11088_v51, %v12908_v26  ;;  %v12914_v20 = vld [vmem:[#allocation46_spill] sm:$0xff] }
 0x549   :  { %v8820_v26 = vld [vmem:[#allocation14 + $0x284] ss:$8 sps:$4 sm:$0xff]  }
 0x54a   :  { %3643 = vmatmul.mubr.bf16.vlgmr.msra.gmra.mrb[60].mxu0 %v2591_v52  ;;  %v2609_v35 = vpack.c.bf16 %v2482_v23, %v2481_v57  ;;  %v11100_v52 = vld [vmem:[#allocation2 + $0x3c] sm:$0xff] }
 0x54b   :  { %3652 = vmatprep.mubr.bf16.mxu0 %v2601_v5  ;;  %3702 = vmatpush1.bf16.msra.mxu0 %v8794_v24  ;;  %v2505_v24 = vmul.f32 %v11092_v45, %v12909_v38  ;;  %v8809_v5 = vld [vmem:[#allocation14 + $0x250] ss:$8 sps:$4 sm:$0xff]   ;;  %v2484_v28 = vmul.f32 %v11100_v52, %v12910_v21  ;;  %v12915_v57 = vld [vmem:[#allocation105_spill] sm:$0xff]  ;;  %v12916_v38 = vld [vmem:[#allocation102_spill] sm:$0xff] }
 0x54c   :  { %3703 = vmatprep.subr.bf16.mxu0 %v8799_v44  ;;  %v11102_v44 = vld [vmem:[#allocation2 + $0x56] sm:$0xff] }
 0x54d   :  { %v2619_v60 = vpack.c.bf16 %v2506_v49, %v2505_v24  ;;  %v2508_v41 = vmul.f32 %v11102_v44, %v12911_v0  ;;  %v8815_v23 = vld [vmem:[#allocation14 + $0x270] ss:$8 sps:$4 sm:$0xff]  }
 0x54e   :  { %v2476_v21 = vld [vmem:[#allocation2 + $0x54] sm:$0xf] }
 0x54f   :  { %3704 = vmatpush1.bf16.msra.mxu0 %v8797_v58  ;;  %v11104_v58 = vld [vmem:[#allocation2 + $0x34] sm:$0xff] }
 0x550   :  { %3705 = vmatprep.subr.bf16.mxu0 %v8802_v30  ;;  %v11108_v30 = vld [vmem:[#allocation2 + $0x4e] sm:$0xff]  ;;  %v2483_v63 = vmul.f32 %v11104_v58, %v12912_v34 }
 0x551   :  { %v2507_v15 = vmul.f32 %v11108_v30, %v12913_v54  ;;  %v12918_v34 = vld [vmem:[#allocation64_spill] sm:$0xff]  ;;  %v12919_v54 = vld [vmem:[#allocation49_spill] sm:$0xff] }
 0x552   :  { %3653 = vmatmul.mubr.bf16.gmra.mrb[64].mxu0 %v2600_v10  ;;  %v2618_v10 = vpack.c.bf16 %v2484_v28, %v2483_v63  ;;  %v8821_v28 = vld [vmem:[#allocation14 + $0x290] ss:$8 sps:$4 sm:$0xff]   ;;  %v2528_v63 = vmul.f32 %v10971_v29, %v12918_v34  ;;  %v8848_v34 = vld [vmem:[#allocation14 + $0x320] ss:$8 sps:$4 sm:$0xff]  }
 0x553   :  { %3662 = vmatprep.mubr.bf16.mxu0 %v2610_v56  ;;  %3706 = vmatpush1.bf16.msra.mxu0 %v8800_v43  ;;  %v8812_v43 = vld [vmem:[#allocation14 + $0x260] ss:$8 sps:$4 sm:$0xff]   ;;  %v2628_v56 = vpack.c.bf16 %v2508_v41, %v2507_v15  ;;  %v8826_v41 = vld [vmem:[#allocation14 + $0x2a4] ss:$8 sps:$4 sm:$0xff]   ;;  %v2527_v15 = vmul.f32 %v10962_v39, %v12919_v54  ;;  %v8833_v29 = vld [vmem:[#allocation14 + $0x2d0] ss:$8 sps:$4 sm:$0xff]  }
 0x554   :  { %3707 = vmatprep.subr.bf16.mxu0 %v8805_v11  ;;  %v8817_v11 = vld [vmem:[#allocation14 + $0x274] ss:$8 sps:$4 sm:$0xff]   ;;  %v8836_v39 = vld [vmem:[#allocation14 + $0x2e0] ss:$8 sps:$4 sm:$0xff]  }
 0x557   :  { %3708 = vmatpush1.bf16.msra.mxu0 %v8803_v31  ;;  %v11116_v31 = vld [vmem:[#allocation2 + $0x4c] sm:$0xff] }
 0x558   :  { %3709 = vmatprep.subr.bf16.mxu0 %v8808_v3  ;;  %v11118_v3 = vld [vmem:[#allocation2 + $0x44] sm:$0xff]  ;;  %v2486_v49 = vmul.f32 %v11116_v31, %v12914_v20 }
 0x559   :  { %v2485_v24 = vmul.f32 %v11118_v3, %v12916_v38  ;;  %v8830_v20 = vld [vmem:[#allocation14 + $0x2c0] ss:$8 sps:$4 sm:$0xff]   ;;  %v8844_v38 = vld [vmem:[#allocation14 + $0x304] ss:$8 sps:$4 sm:$0xff]  }
 0x55a   :  { %3663 = vmatmul.mubr.bf16.gmra.mrb[68].mxu0 %v2609_v35  ;;  %v8818_v35 = vld [vmem:[#allocation14 + $0x280] ss:$8 sps:$4 sm:$0xff]  }
 0x55b   :  { %3672 = vmatprep.mubr.bf16.mxu0 %v2619_v60  ;;  %3710 = vmatpush1.bf16.msra.mxu0 %v8806_v16  ;;  %v2509_v16 = vmul.f32 %v2498_v59, %v12915_v57  ;;  %v8823_v60 = vld [vmem:[#allocation14 + $0x294] ss:$8 sps:$4 sm:$0xff]   ;;  %v8827_v59 = vld [vmem:[#allocation14 + $0x2b0] ss:$8 sps:$4 sm:$0xff]  }
 0x55c   :  { %3711 = vmatprep.subr.bf16.mxu0 %v8811_v37  ;;  %v2627_v37 = vpack.c.bf16 %v2486_v49, %v2485_v24  ;;  %v8835_v49 = vld [vmem:[#allocation14 + $0x2d4] ss:$8 sps:$4 sm:$0xff]  }
 0x55d   :  { %v8841_v57 = vld [vmem:[#allocation14 + $0x2f4] ss:$8 sps:$4 sm:$0xff]  }
 0x55e   :  { %v12920_v24 = vld [vmem:[#allocation53_spill] sm:$0xff] }
 0x55f   :  { %3712 = vmatpush1.bf16.msra.mxu0 %v8809_v5  ;;  %v2637_v5 = vpack.c.bf16 %v2509_v16, %v2509_v16  ;;  %v8839_v16 = vld [vmem:[#allocation14 + $0x2f0] ss:$8 sps:$4 sm:$0xff]  }
 0x560   :  { %3713 = vmatprep.subr.bf16.mxu0 %v8814_v9  ;;  %v12917_v9 = vld [vmem:[#allocation103_spill] sm:$0xff] }
 0x561   :  { %v2487_v0 = vmul.f32 %v2476_v21, %v12917_v9  ;;  %v8847_v21 = vld [vmem:[#allocation14 + $0x314] ss:$8 sps:$4 sm:$0xff]   ;;  %v8845_v9 = vld [vmem:[#allocation14 + $0x310] ss:$8 sps:$4 sm:$0xff]  }
 0x562   :  { %3673 = vmatmul.mubr.bf16.gmra.mrb[72].mxu0 %v2618_v10 }
 0x563   :  { %3682 = vmatprep.mubr.bf16.mxu0 %v2628_v56  ;;  %3714 = vmatpush1.bf16.msra.mxu0 %v8812_v43  ;;  %v8824_v43 = vld [vmem:[#allocation14 + $0x2a0] ss:$8 sps:$4 sm:$0xff]   ;;  %v2636_v10 = vpack.c.bf16 %v2487_v0, %v2487_v0  ;;  %v2594_v56 = vpack.c.bf16 %v2528_v63, %v2527_v15  ;;  %v8850_v0 = vld [vmem:[#allocation14 + $0x324] ss:$8 sps:$4 sm:$0xff]  }
 0x564   :  { %3715 = vmatprep.subr.bf16.mxu0 %v8817_v11  ;;  %v8829_v11 = vld [vmem:[#allocation14 + $0x2b4] ss:$8 sps:$4 sm:$0xff]   ;;  %v12923_v63 = vld [vmem:[#allocation87_spill] sm:$0xff]  ;;  %v8854_v15 = vld [vmem:[#allocation14 + $0x340] ss:$8 sps:$4 sm:$0xff]  }
 0x567   :  { %3716 = vmatpush1.bf16.msra.mxu0 %v8815_v23  ;;  %v8832_v23 = vld [vmem:[#allocation14 + $0x2c4] ss:$8 sps:$4 sm:$0xff]  }
 0x568   :  { %3717 = vmatprep.subr.bf16.mxu0 %v8820_v26  ;;  %v8838_v26 = vld [vmem:[#allocation14 + $0x2e4] ss:$8 sps:$4 sm:$0xff]  }
 0x56a   :  { %3683 = vmatmul.mubr.bf16.gmra.mrb[76].mxu0 %v2627_v37  ;;  %v8842_v37 = vld [vmem:[#allocation14 + $0x300] ss:$8 sps:$4 sm:$0xff]  }
 0x56b   :  { %3692 = vmatprep.mubr.bf16.mxu0 %v2637_v5  ;;  %3718 = vmatpush1.bf16.msra.mxu0 %v8818_v35  ;;  %v2530_v35 = vmul.f32 %v11002_v33, %v12920_v24  ;;  %v8866_v24 = vld [vmem:[#allocation14 + $0x380] ss:$8 sps:$4 sm:$0xff]  }
 0x56c   :  { %3719 = vmatprep.subr.bf16.mxu0 %v8823_v60  ;;  %v12921_v60 = vld [vmem:[#allocation51_spill] sm:$0xff] }
 0x56d   :  { %v2529_v5 = vmul.f32 %v10989_v48, %v12921_v60  ;;  %v2531_v48 = vmul.f32 %v11018_v36, %v12923_v63  ;;  %v2512_v60 = vld [vmem:[#allocation2 + $0x60] sm:$0xf]  ;;  %v12931_v63 = vld [vmem:[#allocation59_spill] sm:$0xff] }
 0x56f   :  { %3720 = vmatpush1.bf16.msra.mxu0 %v8821_v28  ;;  %v2603_v28 = vpack.c.bf16 %v2530_v35, %v2529_v5  ;;  %v8871_v35 = vld [vmem:[#allocation14 + $0x394] ss:$8 sps:$4 sm:$0xff]  }
 0x570   :  { %3721 = vmatprep.subr.bf16.mxu0 %v8826_v41  ;;  %v12922_v41 = vld [vmem:[#allocation66_spill] sm:$0xff]  ;;  %v8919_v5 = vld [vmem:[%s12542_s8 + $0x10] sm:$0xff]  }
 0x571   :  { %v2532_v33 = vmul.f32 %v11029_v62, %v12922_v41  ;;  %v8874_v41 = vld [vmem:[#allocation14 + $0x3a4] ss:$8 sps:$4 sm:$0xff]  }
 0x572   :  { %3693 = vmatmul.mubr.bf16.gmra.mrb[80].mxu0 %v2636_v10  ;;  %v12925_v10 = vld [vmem:[#allocation88_spill] sm:$0xff] }
 0x573   :  { %3722 = vmatpush1.bf16.msra.mxu0 %v8824_v43  ;;  %3733 = vmatprep.mubr.bf16.mxu0 %v2594_v56  ;;  %v8853_v43 = vld [vmem:[#allocation14 + $0x334] ss:$8 sps:$4 sm:$0xff]   ;;  %v2612_v54 = vpack.c.bf16 %v2532_v33, %v2531_v48  ;;  %v2533_v36 = vmul.f32 %v11047_v13, %v12925_v10  ;;  %v2556_v48 = vmul.f32 %v11064_v42, %v12931_v63  ;;  %v8880_v42 = vld [vmem:[#allocation14 + $0x3c4] ss:$8 sps:$4 sm:$0xff]   ;;  %v8881_v10 = vld [vmem:[#allocation14 + $0x3d0] ss:$8 sps:$4 sm:$0xff]  }
 0x574   :  { %3723 = vmatprep.subr.bf16.mxu0 %v8829_v11  ;;  %v8859_v11 = vld [vmem:[#allocation14 + $0x354] ss:$8 sps:$4 sm:$0xff]  }
 0x575   :  { %v12930_v33 = vld [vmem:[#allocation80_spill] sm:$0xff] }
 0x576   :  { %v12944_v63 = vld [vmem:[#allocation76_spill] sm:$0xff] }
 0x577   :  { %3724 = vmatpush1.bf16.msra.mxu0 %v8827_v59  ;;  %v2524_v59 = vld [vmem:[#allocation2 + $0x52] sm:$0xff] }
 0x578   :  { %3725 = vmatprep.subr.bf16.mxu0 %v8832_v23 }
 0x57b   :  { %3726 = vmatpush1.bf16.msra.mxu0 %v8830_v20  ;;  %v8860_v20 = vld [vmem:[#allocation14 + $0x360] ss:$8 sps:$4 sm:$0xff]  }
 0x57c   :  { %3727 = vmatprep.subr.bf16.mxu0 %v8835_v49  ;;  %v12927_v49 = vld [vmem:[#allocation109_spill] sm:$0xff] }
 0x57d   :  { %v2535_v13 = vmul.f32 %v2524_v59, %v12927_v49  ;;  %v8892_v59 = vld [vmem:[#allocation14 + $0x404] ss:$8 sps:$4 sm:$0xff]  }
 0x57f   :  { %3728 = vmatpush1.bf16.msra.mxu0 %v8833_v29  ;;  %v8865_v29 = vld [vmem:[#allocation14 + $0x374] ss:$8 sps:$4 sm:$0xff]  }
 0x580   :  { %3729 = vmatprep.subr.bf16.mxu0 %v8838_v26 }
 0x583   :  { %3730 = vmatpush1.bf16.msra.mxu0 %v8836_v39  ;;  %v2526_v39 = vld [vmem:[#allocation2 + $0x62] sm:$0xf] }
 0x584   :  { %3731 = vmatprep.subr.bf16.mxu0 %v8841_v57  ;;  %v8863_v57 = vld [vmem:[#allocation14 + $0x370] ss:$8 sps:$4 sm:$0xff]   ;;  %v2537_v6 = vmul.f32 %v2526_v39, %v12928_v2  ;;  %v12938_v2 = vld [vmem:[#allocation57_spill] sm:$0xff] }
 0x587   :  { %3732 = vmatpush1.bf16.msra.mxu0 %v8839_v16  ;;  %v8868_v16 = vld [vmem:[#allocation14 + $0x384] ss:$8 sps:$4 sm:$0xff]  }
 0x588   :  { %3792 = vmatprep.subr.bf16.mxu0 %v8844_v38  ;;  %v8918_v38 = vld [vmem:[%s12542_s8 + $0x50] sm:$0xff]  }
 0x58a   :  { %3734 = vmatmul.mubr.bf16.vlgmr.msra.gmra.mrb[60].mxu0 %v2593_v27  ;;  %v12924_v27 = vld [vmem:[#allocation89_spill] sm:$0xff] }
 0x58b   :  { %3743 = vmatprep.mubr.bf16.mxu0 %v2603_v28  ;;  %3793 = vmatpush1.bf16.msra.mxu0 %v8842_v37  ;;  %v2534_v62 = vmul.f32 %v11051_v18, %v12924_v27  ;;  %v12926_v18 = vld [vmem:[#allocation68_spill] sm:$0xff]  ;;  %v2639_v37 = vpack.c.bf16 %v2537_v6, %v2537_v6  ;;  %v2544_v6 = vmul.f32 %v11084_v19, %v12938_v2 }
 0x58c   :  { %3794 = vmatprep.subr.bf16.mxu0 %v8847_v21  ;;  %v2536_v23 = vmul.f32 %v2525_v53, %v12926_v18  ;;  %v8920_v21 = vld [vmem:[%s12542_s8 + $0x58] sm:$0xff]   ;;  %v12933_v18 = vld [vmem:[#allocation63_spill] sm:$0xff] }
 0x58d   :  { %v2621_v56 = vpack.c.bf16 %v2534_v62, %v2533_v36  ;;  %v8869_v28 = vld [vmem:[#allocation14 + $0x390] ss:$8 sps:$4 sm:$0xff]   ;;  %v8878_v62 = vld [vmem:[#allocation14 + $0x3c0] ss:$8 sps:$4 sm:$0xff]   ;;  %v8886_v36 = vld [vmem:[#allocation14 + $0x3e4] ss:$8 sps:$4 sm:$0xff]  }
 0x58e   :  { %v2630_v26 = vpack.c.bf16 %v2536_v23, %v2535_v13  ;;  %v8875_v27 = vld [vmem:[#allocation14 + $0x3b0] ss:$8 sps:$4 sm:$0xff]   ;;  %v2559_v23 = vmul.f32 %v11073_v22, %v12933_v18  ;;  %v8890_v13 = vld [vmem:[#allocation14 + $0x400] ss:$8 sps:$4 sm:$0xff]  }
 0x58f   :  { %3795 = vmatpush1.bf16.msra.mxu0 %v8845_v9  ;;  %v12929_v9 = vld [vmem:[#allocation107_spill] sm:$0xff]  ;;  %v12951_v18 = vld [vmem:[#allocation112_spill] sm:$0xff] }
 0x590   :  { %3796 = vmatprep.subr.bf16.mxu0 %v8850_v0  ;;  %v2523_v0 = vmul.f32 %v2512_v60, %v12929_v9  ;;  %v8887_v53 = vld [vmem:[#allocation14 + $0x3f0] ss:$8 sps:$4 sm:$0xff]   ;;  %v12940_v60 = vld [vmem:[#allocation90_spill] sm:$0xff]  ;;  %v12943_v9 = vld [vmem:[#allocation93_spill] sm:$0xff] }
 0x592   :  { %3744 = vmatmul.mubr.bf16.gmra.mrb[64].mxu0 %v2602_v25  ;;  %v8862_v25 = vld [vmem:[#allocation14 + $0x364] ss:$8 sps:$4 sm:$0xff]  }
 0x593   :  { %3753 = vmatprep.mubr.bf16.mxu0 %v2612_v54  ;;  %3797 = vmatpush1.bf16.msra.mxu0 %v8848_v34  ;;  %v2557_v34 = vmul.f32 %v11061_v1, %v12930_v33  ;;  %v8877_v54 = vld [vmem:[#allocation14 + $0x3b4] ss:$8 sps:$4 sm:$0xff]  }
 0x594   :  { %3798 = vmatprep.subr.bf16.mxu0 %v8853_v43  ;;  %v2638_v43 = vpack.c.bf16 %v2523_v0, %v2523_v0  ;;  %v8923_v1 = vld [vmem:[%s12542_s8 + $0x20] sm:$0xff]   ;;  %v2562_v0 = vmul.f32 %v11108_v30, %v12943_v9 }
 0x595   :  { %v2575_v9 = vld [vmem:[#allocation2 + $0x60] sm:$0xff] }
 0x597   :  { %3799 = vmatpush1.bf16.msra.mxu0 %v8851_v46  ;;  %v2596_v46 = vpack.c.bf16 %v2557_v34, %v2556_v48  ;;  %v8907_v34 = vld [vmem:[#allocation14 + $0x454] ss:$8 sps:$4 sm:$0xff]   ;;  %v8910_v48 = vld [vmem:[#allocation14 + $0x464] ss:$8 sps:$4 sm:$0xff]  }
 0x598   :  { %3800 = vmatprep.subr.bf16.mxu0 %v8856_v47  ;;  %v8924_v47 = vld [vmem:[%s12542_s8 + $0x68] sm:$0xff]  }
 0x59a   :  { %3754 = vmatmul.mubr.bf16.gmra.mrb[68].mxu0 %v2611_v8  ;;  %v8916_v8 = vld [vmem:[%s12542_s8 + $0x48] sm:$0xff]  }
 0x59b   :  { %3763 = vmatprep.mubr.bf16.mxu0 %v2621_v56  ;;  %3801 = vmatpush1.bf16.msra.mxu0 %v8854_v15  ;;  %v8883_v15 = vld [vmem:[#allocation14 + $0x3d4] ss:$8 sps:$4 sm:$0xff]  }
 0x59c   :  { %3802 = vmatprep.subr.bf16.mxu0 %v8859_v11  ;;  %7928 = vmatprep.subr.bf16.mxu1 %v8916_v8  ;;  %v8884_v11 = vld [vmem:[#allocation14 + $0x3e0] ss:$8 sps:$4 sm:$0xff]   ;;  %v8889_v56 = vld [vmem:[#allocation14 + $0x3f4] ss:$8 sps:$4 sm:$0xff]  }
 0x59d   :  { %v12936_v8 = vld [vmem:[#allocation72_spill] sm:$0xff] }
 0x59e   :  { %v2545_v22 = vmul.f32 %v11104_v58, %v12936_v8  ;;  %v8899_v58 = vld [vmem:[#allocation14 + $0x430] ss:$8 sps:$4 sm:$0xff]  }
 0x59f   :  { %3803 = vmatpush1.bf16.msra.mxu0 %v8857_v40  ;;  %v12932_v40 = vld [vmem:[#allocation55_spill] sm:$0xff]  ;;  %v2570_v8 = vld [vmem:[#allocation2 + $0x38] sm:$0xff] }
 0x5a0   :  { %3804 = vmatprep.subr.bf16.mxu0 %v8862_v25  ;;  %v2543_v25 = vmul.f32 %v11088_v51, %v12932_v40  ;;  %v8893_v51 = vld [vmem:[#allocation14 + $0x410] ss:$8 sps:$4 sm:$0xff]  }
 0x5a2   :  { %3764 = vmatmul.mubr.bf16.gmra.mrb[72].mxu0 %v2620_v55  ;;  %v8917_v55 = vld [vmem:[%s12542_s8 + $0x8] sm:$0xff]  }
 0x5a3   :  { %3773 = vmatprep.mubr.bf16.mxu0 %v2630_v26  ;;  %3805 = vmatpush1.bf16.msra.mxu0 %v8860_v20  ;;  %v12934_v20 = vld [vmem:[#allocation70_spill] sm:$0xff] }
 0x5a4   :  { %3806 = vmatprep.subr.bf16.mxu0 %v8865_v29  ;;  %7929 = vmatpush3.bf16.msra.mxu1 %v8917_v55  ;;  %v2542_v49 = vmul.f32 %v11071_v50, %v12934_v20  ;;  %v12935_v29 = vld [vmem:[#allocation61_spill] sm:$0xff] }
 0x5a5   :  { %7930 = vmatprep.subr.bf16.mxu1 %v8918_v38  ;;  %v2558_v26 = vmul.f32 %v11077_v14, %v12935_v29  ;;  %v12939_v14 = vld [vmem:[#allocation92_spill] sm:$0xff]  ;;  %v8896_v38 = vld [vmem:[#allocation14 + $0x420] ss:$8 sps:$4 sm:$0xff]  }
 0x5a6   :  { %v2595_v39 = vpack.c.bf16 %v2543_v25, %v2542_v49  ;;  %v2560_v55 = vmul.f32 %v11092_v45, %v12939_v14  ;;  %v2568_v49 = vld [vmem:[#allocation2 + $0x28] sm:$0xff]  ;;  %v2567_v29 = vld [vmem:[#allocation2 + $0x20] sm:$0xff] }
 0x5a7   :  { %3807 = vmatpush1.bf16.msra.mxu0 %v8863_v57  ;;  %v2605_v4 = vpack.c.bf16 %v2559_v23, %v2558_v26  ;;  %v8898_v57 = vld [vmem:[#allocation14 + $0x424] ss:$8 sps:$4 sm:$0xff]   ;;  %v12953_v26 = vld [vmem:[#allocation65_spill] sm:$0xff] }
 0x5a8   :  { %3808 = vmatprep.subr.bf16.mxu0 %v8868_v16  ;;  %7931 = vmatpush3.bf16.msra.mxu1 %v8919_v5  ;;  %v12937_v16 = vld [vmem:[#allocation82_spill] sm:$0xff]  ;;  %v2547_v5 = vmul.f32 %v11118_v3, %v12940_v60  ;;  %v2574_v60 = vld [vmem:[#allocation2 + $0x58] sm:$0xff] }
 0x5a9   :  { %7932 = vmatprep.subr.bf16.mxu1 %v8920_v21  ;;  %v2561_v50 = vmul.f32 %v11086_v17, %v12937_v16  ;;  %v8904_v17 = vld [vmem:[#allocation14 + $0x444] ss:$8 sps:$4 sm:$0xff]  }
 0x5aa   :  { %3774 = vmatmul.mubr.bf16.gmra.mrb[76].mxu0 %v2629_v7  ;;  %v8872_v7 = vld [vmem:[#allocation14 + $0x3a0] ss:$8 sps:$4 sm:$0xff]   ;;  %v12941_v21 = vld [vmem:[#allocation95_spill] sm:$0xff] }
 0x5ab   :  { %3783 = vmatprep.mubr.bf16.mxu0 %v2639_v37  ;;  %3809 = vmatpush1.bf16.msra.mxu0 %v8866_v24  ;;  %v2604_v24 = vpack.c.bf16 %v2545_v22, %v2544_v6  ;;  %v2614_v37 = vpack.c.bf16 %v2561_v50, %v2560_v55  ;;  %v2563_v19 = vmul.f32 %v11102_v44, %v12941_v21  ;;  %v2553_v3 = vld [vmem:[#allocation2 + $0x5e] sm:$0xff]  ;;  %v2569_v22 = vld [vmem:[#allocation2 + $0x30] sm:$0xff]  ;;  %v2572_v14 = vld [vmem:[#allocation2 + $0x48] sm:$0xff] }
 0x5ac   :  { %3810 = vmatprep.subr.bf16.mxu0 %v8871_v35  ;;  %7933 = vmatpush3.bf16.msra.mxu1 %v8921_v61  ;;  %v8901_v35 = vld [vmem:[#allocation14 + $0x434] ss:$8 sps:$4 sm:$0xff]   ;;  %v12956_v50 = vld [vmem:[#allocation67_spill] sm:$0xff] }
 0x5ad   :  { %7934 = vmatprep.subr.bf16.mxu1 %v8922_v32  ;;  %v2623_v61 = vpack.c.bf16 %v2563_v19, %v2562_v0  ;;  %v2538_v32 = vld [vmem:[#allocation2 + $0x54] sm:$0xff]  ;;  %v2580_v2 = vmul.f32 %v2569_v22, %v12956_v50  ;;  %v2571_v55 = vld [vmem:[#allocation2 + $0x40] sm:$0xff] }
 0x5ae   :  { %v2549_v44 = vmul.f32 %v2538_v32, %v12944_v63  ;;  %v12960_v19 = vld [vmem:[#allocation99_spill] sm:$0xff]  ;;  %v12961_v0 = vld [vmem:[#allocation116_spill] sm:$0xff]  ;;  %v12963_v32 = vld [vmem:[#allocation118_spill] sm:$0xff] }
 0x5af   :  { %3811 = vmatpush1.bf16.msra.mxu0 %v8869_v28  ;;  %v12942_v28 = vld [vmem:[#allocation74_spill] sm:$0xff] }
 0x5b0   :  { %3812 = vmatprep.subr.bf16.mxu0 %v8874_v41  ;;  %7935 = vmatpush3.bf16.msra.mxu1 %v8923_v1  ;;  %v2546_v45 = vmul.f32 %v11100_v52, %v12942_v28  ;;  %v8902_v41 = vld [vmem:[#allocation14 + $0x440] ss:$8 sps:$4 sm:$0xff]  }
 0x5b1   :  { %7936 = vmatprep.subr.bf16.mxu1 %v8924_v47  ;;  %v12945_v52 = vld [vmem:[#allocation113_spill] sm:$0xff]  ;;  %v8925_v63 = vld [vmem:[%s12542_s8 + $0x28] sm:$0xff]  }
 0x5b2   :  { %3784 = vmatmul.mubr.bf16.gmra.mrb[80].mxu0 %v2638_v43  ;;  %v2613_v33 = vpack.c.bf16 %v2547_v5, %v2546_v45  ;;  %v2564_v43 = vmul.f32 %v2553_v3, %v12945_v52  ;;  %v8913_v47 = vld [vmem:[#allocation14 + $0x474] ss:$8 sps:$4 sm:$0xff]  }
 0x5b3   :  { %3813 = vmatpush1.bf16.msra.mxu0 %v8872_v7  ;;  %3824 = vmatprep.mubr.bf16.mxu0 %v2596_v46  ;;  %v8905_v7 = vld [vmem:[#allocation14 + $0x450] ss:$8 sps:$4 sm:$0xff]   ;;  %v8908_v46 = vld [vmem:[#allocation14 + $0x460] ss:$8 sps:$4 sm:$0xff]  }
 0x5b4   :  { %3814 = vmatprep.subr.bf16.mxu0 %v8877_v54  ;;  %v12946_v54 = vld [vmem:[#allocation91_spill] sm:$0xff]  ;;  %7937 = vmatpush3.bf16.msra.mxu1 %v8925_v63  ;;  %v8928_v52 = vld [vmem:[%s12542_s8 + $0x78] sm:$0xff]  }
 0x5b5   :  { %v2548_v30 = vmul.f32 %v11116_v31, %v12946_v54  ;;  %v12950_v31 = vld [vmem:[#allocation34_spill] sm:$0xff]  ;;  %v2573_v5 = vld [vmem:[#allocation2 + $0x50] sm:$0xff]  ;;  %v2789_v54 = vlaneseq }
 0x5b6   :  { %v2584_v28 = vmul.f32 %v2573_v5, %v12960_v19 }
 0x5b7   :  { %3815 = vmatpush1.bf16.msra.mxu0 %v8875_v27  ;;  %v2622_v1 = vpack.c.bf16 %v2549_v44, %v2548_v30  ;;  %v12947_v27 = vld [vmem:[#allocation114_spill] sm:$0xff]  ;;  %v8926_v44 = vld [vmem:[%s12542_s8 + $0x70] sm:$0xff]   ;;  %v11263_v30 = vshrl.u32 %v2789_v54, 7 }
 0x5b8   :  { %3816 = vmatprep.subr.bf16.mxu0 %v8880_v42  ;;  %v2632_v42 = vpack.c.bf16 %v12947_v27, %v2564_v43  ;;  %7938 = vmatprep.subr.bf16.mxu1 %v8926_v44  ;;  %v8929_v43 = vld [vmem:[%s12542_s8 + $0x38] sm:$0xff]  }
 0x5bb   :  { %3817 = vmatpush1.bf16.msra.mxu0 %v8878_v62  ;;  %v2539_v62 = vld [vmem:[#allocation2 + $0x5c] sm:$0xff] }
 0x5bc   :  { %3818 = vmatprep.subr.bf16.mxu0 %v8883_v15  ;;  %v2555_v15 = vld [vmem:[#allocation2 + $0x6e] sm:$0xf] }
 0x5bf   :  { %3819 = vmatpush1.bf16.msra.mxu0 %v8881_v10  ;;  %v8911_v10 = vld [vmem:[#allocation14 + $0x470] ss:$8 sps:$4 sm:$0xff]  }
 0x5c0   :  { %3820 = vmatprep.subr.bf16.mxu0 %v8886_v36  ;;  %v12948_v36 = vld [vmem:[#allocation111_spill] sm:$0xff] }
 0x5c3   :  { %3821 = vmatpush1.bf16.msra.mxu0 %v8884_v11  ;;  %v2550_v11 = vmul.f32 %v2539_v62, %v12948_v36 }
 0x5c4   :  { %3822 = vmatprep.subr.bf16.mxu0 %v8889_v56  ;;  %v12949_v56 = vld [vmem:[#allocation115_spill] sm:$0xff] }
 0x5c5   :  { %v2631_v40 = vpack.c.bf16 %v12950_v31, %v2550_v11 }
 0x5c7   :  { %3823 = vmatpush1.bf16.msra.mxu0 %v8887_v53  ;;  %v2566_v53 = vmul.f32 %v2555_v15, %v12949_v56 }
 0x5c8   :  { %3883 = vmatprep.subr.bf16.mxu0 %v8892_v59  ;;  %v2541_v59 = vld [vmem:[#allocation2 + $0x6c] sm:$0xf] }
 0x5c9   :  { %v2641_v25 = vpack.c.bf16 %v2566_v53, %v2566_v53  ;;  %v2552_v23 = vmul.f32 %v2541_v59, %v12951_v18 }
 0x5ca   :  { %3825 = vmatmul.mubr.bf16.vlgmr.msra.gmra.mrb[60].mxu0 %v2595_v39  ;;  %v2579_v39 = vmul.f32 %v2568_v49, %v12953_v26 }
 0x5cb   :  { %3834 = vmatprep.mubr.bf16.mxu0 %v2605_v4  ;;  %3884 = vmatpush1.bf16.msra.mxu0 %v8890_v13  ;;  %v2640_v20 = vpack.c.bf16 %v2552_v23, %v2552_v23  ;;  %v12952_v13 = vmov 0  }
 0x5cc   :  { %3885 = vmatprep.subr.bf16.mxu0 %v8895_v12  ;;  %v12954_v12 = vld [vmem:[#allocation85_spill] sm:$0xff] }
 0x5cd   :  { %v2578_v4 = vmul.f32 %v2567_v29, %v12954_v12 }
 0x5cf   :  { %3886 = vmatpush1.bf16.msra.mxu0 %v8893_v51  ;;  %v2597_v51 = vpack.c.bf16 %v2579_v39, %v2578_v4 }
 0x5d0   :  { %3887 = vmatprep.subr.bf16.mxu0 %v8898_v57  ;;  %v12955_v57 = vld [vmem:[#allocation94_spill] sm:$0xff] }
 0x5d1   :  { %v2581_v16 = vmul.f32 %v2570_v8, %v12955_v57 }
 0x5d2   :  { %3835 = vmatmul.mubr.bf16.gmra.mrb[64].mxu0 %v2604_v24 }
 0x5d3   :  { %3844 = vmatprep.mubr.bf16.mxu0 %v2614_v37  ;;  %3888 = vmatpush1.bf16.msra.mxu0 %v8896_v38  ;;  %v2606_v6 = vpack.c.bf16 %v2581_v16, %v2580_v2  ;;  %v12957_v38 = vld [vmem:[#allocation97_spill] sm:$0xff] }
 0x5d4   :  { %3889 = vmatprep.subr.bf16.mxu0 %v8901_v35  ;;  %v2583_v24 = vmul.f32 %v2572_v14, %v12957_v38  ;;  %v12958_v35 = vld [vmem:[#allocation96_spill] sm:$0xff] }
 0x5d5   :  { %v2582_v37 = vmul.f32 %v2571_v55, %v12958_v35 }
 0x5d7   :  { %3890 = vmatpush1.bf16.msra.mxu0 %v8899_v58  ;;  %v2615_v58 = vpack.c.bf16 %v2583_v24, %v2582_v37 }
 0x5d8   :  { %3891 = vmatprep.subr.bf16.mxu0 %v8904_v17  ;;  %v12959_v17 = vld [vmem:[#allocation98_spill] sm:$0xff] }
 0x5d9   :  { %v2585_v21 = vmul.f32 %v2574_v60, %v12959_v17 }
 0x5da   :  { %3845 = vmatmul.mubr.bf16.gmra.mrb[68].mxu0 %v2613_v33  ;;  %v12962_v33 = vld [vmem:[#allocation117_spill] sm:$0xff] }
 0x5db   :  { %3854 = vmatprep.mubr.bf16.mxu0 %v2623_v61  ;;  %3892 = vmatpush1.bf16.msra.mxu0 %v8902_v41  ;;  %v2624_v45 = vpack.c.bf16 %v2585_v21, %v2584_v28  ;;  %v2586_v41 = vmul.f32 %v2575_v9, %v12961_v0  ;;  %v2577_v61 = vld [vmem:[#allocation2 + $0x70] sm:$0xf] }
 0x5dc   :  { %3893 = vmatprep.subr.bf16.mxu0 %v8907_v34  ;;  %v2588_v3 = vmul.f32 %v2577_v61, %v12963_v32 }
 0x5dd   :  { %v2633_v34 = vpack.c.bf16 %v12962_v33, %v2586_v41 }
 0x5df   :  { %3894 = vmatpush1.bf16.msra.mxu0 %v8905_v7  ;;  %v2642_v7 = vpack.c.bf16 %v2588_v3, %v2588_v3 }
 0x5e0   :  { %3895 = vmatprep.subr.bf16.mxu0 %v8910_v48  ;;  %v8927_v48 = vld [vmem:[%s12542_s8 + $0x30] sm:$0xff]  }
 0x5e1   :  { %7939 = vmatpush3.bf16.msra.mxu1 %v8927_v48 }
 0x5e2   :  { %3855 = vmatmul.mubr.bf16.gmra.mrb[72].mxu0 %v2622_v1  ;;  %7940 = vmatprep.subr.bf16.mxu1 %v8928_v52  ;;  %v2787_v1 = vld [vmem:[#allocation15] sm:$0x3] }
 0x5e3   :  { %3864 = vmatprep.mubr.bf16.mxu0 %v2632_v42  ;;  %3896 = vmatpush1.bf16.msra.mxu0 %v8908_v46  ;;  %v11266_v46 = vsub.s32 0, %v11263_v30 }
 0x5e4   :  { %3897 = vmatprep.subr.bf16.mxu0 %v8913_v47  ;;  %v11269_v47 = vsub.s32 1, %v11263_v30 }
 0x5e5   :  { %7941 = vmatpush3.bf16.msra.mxu1 %v8929_v43  ;;  %v11272_v27 = vrot.slane %v2787_v1, %v11266_v46 }
 0x5e6   :  { %v11275_v42 = vrot.slane %v2787_v1, %v11269_v47 }
 0x5e7   :  { %3898 = vmatpush1.bf16.msra.mxu0 %v8911_v10 }
 0x5ea   :  { %3865 = vmatmul.mubr.bf16.gmra.mrb[76].mxu0 %v2631_v40 }
 0x5eb   :  { %3874 = vmatprep.mubr.bf16.mxu0 %v2641_v25 }
 0x5f2   :  { %3875 = vmatmul.mubr.bf16.gmra.mrb[80].mxu0 %v2640_v20 }
 0x5f3   :  { %3915 = vmatprep.mubr.bf16.mxu0 %v12952_v13 }
 0x5fa   :  { %3916 = vmatmul.mubr.bf16.vlgmr.msra.gmra.mrb[60].mxu0 %v2597_v51 }
 0x5fb   :  { %3925 = vmatprep.mubr.bf16.mxu0 %v12952_v13 }
 0x602   :  { %3926 = vmatmul.mubr.bf16.gmra.mrb[64].mxu0 %v2606_v6 }
 0x603   :  { %3935 = vmatprep.mubr.bf16.mxu0 %v12952_v13 }
 0x60a   :  { %3936 = vmatmul.mubr.bf16.gmra.mrb[68].mxu0 %v2615_v58 }
 0x60b   :  { %3945 = vmatprep.mubr.bf16.mxu0 %v12952_v13 }
 0x612   :  { %3946 = vmatmul.mubr.bf16.gmra.mrb[72].mxu0 %v2624_v45 }
 0x613   :  { %3955 = vmatprep.mubr.bf16.mxu0 %v12952_v13 }
 0x61a   :  { %3956 = vmatmul.mubr.bf16.gmra.mrb[76].mxu0 %v2633_v34 }
 0x61b   :  { %3965 = vmatprep.mubr.bf16.mxu0 %v12952_v13 }
 0x622   :  { %3966 = vmatmul.mubr.bf16.gmra.mrb[80].mxu0 %v2642_v7 }
 0x6cd   :  { %v3917_v62 = vpop.f32.mrb[60].mxu0 }
 0x6ce   :  { %v8141_v15 = vadd.f32 %v3917_v62, %v11272_v27  ;;  %v3919_v10 = vpop.f32.mrb[61].mxu0 }
 0x6cf   :  { %v8142_v36 = vadd.f32 %v3919_v10, %v11275_v42  ;;  %v3921_v11 = vpop.f32.mrb[62].mxu0 }
 0x6d0   :  { %v8143_v56 = vadd.f32 %v3921_v11, %v11272_v27  ;;  %v3923_v53 = vpop.f32.mrb[63].mxu0  ;;  %v3974_v40 = vmax.f32 %v8141_v15, 0.0 }
 0x6d1   :  { %v8144_v31 = vadd.f32 %v3923_v53, %v11275_v42  ;;  %v3975_v59 = vmax.f32 %v8142_v36, 0.0 }
 0x6d2   :  { %v3976_v25 = vmax.f32 %v8143_v56, 0.0 }
 0x6d3   :  { %v3977_v18 = vmax.f32 %v8144_v31, 0.0 }
 0x6d4   :  { %v3996_v23 = vpack.c.bf16 %v3976_v25, %v3974_v40 }
 0x6d5   :  { %v3997_v20 = vpack.c.bf16 %v3977_v18, %v3975_v59  ;;  %v3927_v49 = vpop.f32.mrb[64].mxu0 }
 0x6d6   :  { %v8145_v29 = vadd.f32 %v3927_v49, %v11272_v27  ;;  %v3929_v26 = vpop.f32.mrb[65].mxu0 }
 0x6d7   :  { %v8146_v39 = vadd.f32 %v3929_v26, %v11275_v42  ;;  %v3931_v12 = vpop.f32.mrb[66].mxu0  ;;  %4175 = vmatprep.mubr.bf16.mxu1 %v3997_v20 }
 0x6d8   :  { %v8147_v4 = vadd.f32 %v3931_v12, %v11272_v27  ;;  %v3933_v51 = vpop.f32.mrb[67].mxu0  ;;  %4176 = vmatmul.mubr.bf16.vlgmr.msra.gmra.mrb[12].mxu1 %v3996_v23  ;;  %v3978_v22 = vmax.f32 %v8145_v29, 0.0 }
 0x6d9   :  { %v8148_v8 = vadd.f32 %v3933_v51, %v11275_v42  ;;  %v3979_v16 = vmax.f32 %v8146_v39, 0.0 }
 0x6da   :  { %v3980_v57 = vmax.f32 %v8147_v4, 0.0 }
 0x6db   :  { %v3981_v50 = vmax.f32 %v8148_v8, 0.0 }
 0x6dc   :  { %v3998_v2 = vpack.c.bf16 %v3980_v57, %v3978_v22  ;;  %v8930_v22 = vld [vmem:[%s12544_s10 + $0x40] sm:$0xff]   ;;  %v8933_v57 = vld [vmem:[%s12544_s10 + $0x8] sm:$0xff]  }
 0x6dd   :  { %v3999_v6 = vpack.c.bf16 %v3981_v50, %v3979_v16  ;;  %v3937_v14 = vpop.f32.mrb[68].mxu0  ;;  %7978 = vmatprep.subr.bf16.mxu1 %v8930_v22  ;;  %v11311_v50 = vld [vmem:[#allocation17] ss:$0 sm:$0xff] }
 0x6de   :  { %v8149_v55 = vadd.f32 %v3937_v14, %v11272_v27  ;;  %v3939_v38 = vpop.f32.mrb[69].mxu0 }
 0x6df   :  { %v8150_v24 = vadd.f32 %v3939_v38, %v11275_v42  ;;  %v3941_v35 = vpop.f32.mrb[70].mxu0  ;;  %4183 = vmatprep.mubr.bf16.mxu1 %v3999_v6 }
 0x6e0   :  { %v8151_v37 = vadd.f32 %v3941_v35, %v11272_v27  ;;  %v3943_v58 = vpop.f32.mrb[71].mxu0  ;;  %4184 = vmatmul.mubr.bf16.gmra.mrb[16].mxu1 %v3998_v2  ;;  %v3982_v5 = vmax.f32 %v8149_v55, 0.0  ;;  %v8934_v55 = vld [vmem:[%s12544_s10 + $0x50] sm:$0xff]  }
 0x6e1   :  { %v8152_v60 = vadd.f32 %v3943_v58, %v11275_v42  ;;  %v3983_v21 = vmax.f32 %v8150_v24, 0.0 }
 0x6e2   :  { %v3984_v17 = vmax.f32 %v8151_v37, 0.0  ;;  %v8935_v37 = vld [vmem:[%s12544_s10 + $0x10] sm:$0xff]  }
 0x6e3   :  { %v3985_v19 = vmax.f32 %v8152_v60, 0.0 }
 0x6e4   :  { %v4000_v28 = vpack.c.bf16 %v3984_v17, %v3982_v5 }
 0x6e5   :  { %v4001_v45 = vpack.c.bf16 %v3985_v19, %v3983_v21  ;;  %v3947_v9 = vpop.f32.mrb[72].mxu0  ;;  %v8936_v21 = vld [vmem:[%s12544_s10 + $0x58] sm:$0xff]  }
 0x6e6   :  { %v8153_v0 = vadd.f32 %v3947_v9, %v11272_v27  ;;  %v3949_v41 = vpop.f32.mrb[73].mxu0 }
 0x6e7   :  { %v8154_v33 = vadd.f32 %v3949_v41, %v11275_v42  ;;  %v3951_v34 = vpop.f32.mrb[74].mxu0  ;;  %4191 = vmatprep.mubr.bf16.mxu1 %v4001_v45 }
 0x6e8   :  { %v8155_v61 = vadd.f32 %v3951_v34, %v11272_v27  ;;  %v3953_v32 = vpop.f32.mrb[75].mxu0  ;;  %4192 = vmatmul.mubr.bf16.gmra.mrb[20].mxu1 %v4000_v28  ;;  %v3986_v7 = vmax.f32 %v8153_v0, 0.0  ;;  %v9580_v28 = vmov 1983009808  }
 0x6e9   :  { %v8156_v3 = vadd.f32 %v3953_v32, %v11275_v42  ;;  %v3987_v44 = vmax.f32 %v8154_v33, 0.0  ;;  %v4250_v45 = vunpack.c.l.s4 %v9580_v28 }
 0x6ea   :  { %v3988_v63 = vmax.f32 %v8155_v61, 0.0  ;;  %v8937_v61 = vld [vmem:[%s12544_s10 + $0x18] sm:$0xff]  }
 0x6eb   :  { %v3989_v48 = vmax.f32 %v8156_v3, 0.0  ;;  %v4251_v32 = vunpack.c.0.s8 %v4250_v45 }
 0x6ec   :  { %v4002_v52 = vpack.c.bf16 %v3988_v63, %v3986_v7 }
 0x6ed   :  { %v4003_v43 = vpack.c.bf16 %v3989_v48, %v3987_v44  ;;  %v3957_v54 = vpop.f32.mrb[76].mxu0 }
 0x6ee   :  { %v8157_v1 = vadd.f32 %v3957_v54, %v11272_v27  ;;  %v3959_v62 = vpop.f32.mrb[77].mxu0  ;;  %v8938_v54 = vld [vmem:[%s12544_s10 + $0x60] sm:$0xff]  }
 0x6ef   :  { %v8158_v15 = vadd.f32 %v3959_v62, %v11275_v42  ;;  %v3961_v10 = vpop.f32.mrb[78].mxu0  ;;  %4199 = vmatprep.mubr.bf16.mxu1 %v4003_v43 }
 0x6f0   :  { %v8159_v36 = vadd.f32 %v3961_v10, %v11272_v27  ;;  %v3963_v11 = vpop.f32.mrb[79].mxu0  ;;  %4200 = vmatmul.mubr.bf16.gmra.mrb[24].mxu1 %v4002_v52  ;;  %v3990_v53 = vmax.f32 %v8157_v1, 0.0  ;;  %v11342_v1 = vsub.s32 %v4251_v32, %v11263_v30 }
 0x6f1   :  { %v8160_v56 = vadd.f32 %v3963_v11, %v11275_v42  ;;  %v3991_v40 = vmax.f32 %v8158_v15, 0.0 }
 0x6f2   :  { %v3992_v31 = vmax.f32 %v8159_v36, 0.0  ;;  %v8939_v36 = vld [vmem:[%s12544_s10 + $0x20] sm:$0xff]  }
 0x6f3   :  { %v3993_v25 = vmax.f32 %v8160_v56, 0.0 }
 0x6f4   :  { %v4004_v59 = vpack.c.bf16 %v3992_v31, %v3990_v53 }
 0x6f5   :  { %v4005_v18 = vpack.c.bf16 %v3993_v25, %v3991_v40  ;;  %v3967_v23 = vpop.f32.mrb[80].mxu0 }
 0x6f6   :  { %v8161_v20 = vadd.f32 %v3967_v23, %v11272_v27  ;;  %v3969_v49 = vpop.f32.mrb[81].mxu0  ;;  %v8931_v27 = vld [vmem:[%s12544_s10] sm:$0xff]  }
 0x6f7   :  { %v8162_v29 = vadd.f32 %v3969_v49, %v11275_v42  ;;  %v3971_v26 = vpop.f32.mrb[82].mxu0  ;;  %4207 = vmatprep.mubr.bf16.mxu1 %v4005_v18  ;;  %7979 = vmatpush3.bf16.msra.mxu1 %v8931_v27  ;;  %v8932_v42 = vld [vmem:[%s12544_s10 + $0x48] sm:$0xff]  }
 0x6f8   :  { %v3972_v39 = vpop.f32.mrb[83].mxu0  ;;  %4208 = vmatmul.mubr.bf16.gmra.mrb[28].mxu1 %v4004_v59  ;;  %v3994_v4 = vmax.f32 %v8161_v20, 0.0  ;;  %7980 = vmatprep.subr.bf16.mxu1 %v8932_v42  ;;  %v8940_v49 = vld [vmem:[%s12544_s10 + $0x68] sm:$0xff]   ;;  %v8942_v42 = vld [vmem:[%s12544_s10 + $0x70] sm:$0xff]  }
 0x6f9   :  { %v3995_v12 = vmax.f32 %v8162_v29, 0.0 }
 0x6fa   :  { %v4006_v8 = vpack.c.bf16 %v3994_v4, %v3994_v4 }
 0x6fb   :  { %v4007_v51 = vpack.c.bf16 %v3995_v12, %v3995_v12  ;;  %7981 = vmatpush3.bf16.msra.mxu1 %v8933_v57 }
 0x6fc   :  { %7982 = vmatprep.subr.bf16.mxu1 %v8934_v55  ;;  %v8943_v55 = vld [vmem:[%s12544_s10 + $0x30] sm:$0xff]  }
 0x6fd   :  { %4215 = vmatprep.mubr.bf16.mxu1 %v4007_v51  ;;  %v8941_v51 = vld [vmem:[%s12544_s10 + $0x28] sm:$0xff]  }
 0x6ff   :  { %7983 = vmatpush3.bf16.msra.mxu1 %v8935_v37 }
 0x700   :  { %4216 = vmatmul.mubr.bf16.gmra.mrb[32].mxu1 %v4006_v8  ;;  %7984 = vmatprep.subr.bf16.mxu1 %v8936_v21 }
 0x703   :  { %7985 = vmatpush3.bf16.msra.mxu1 %v8937_v61 }
 0x704   :  { %7986 = vmatprep.subr.bf16.mxu1 %v8938_v54 }
 0x707   :  { %7987 = vmatpush3.bf16.msra.mxu1 %v8939_v36 }
 0x708   :  { %7988 = vmatprep.subr.bf16.mxu1 %v8940_v49 }
 0x70b   :  { %7989 = vmatpush3.bf16.msra.mxu1 %v8941_v51 }
 0x70c   :  { %7990 = vmatprep.subr.bf16.mxu1 %v8942_v42  ;;  %v8952_v42 = vld [vmem:[%s12546_s12 + $0x10] ss:$8 sps:$4 sm:$0xff]  }
 0x70f   :  { %7991 = vmatpush3.bf16.msra.mxu1 %v8943_v55 }
 0x7ab   :  { %v7942_v16 = vpop.f32.mrb[12].mxu1 }
 0x7ac   :  { %v7943_v2 = vpop.f32.mrb[13].mxu1 }
 0x7ad   :  { %v7944_v6 = vadd.f32 %v7943_v2, %v7942_v16  ;;  %v7945_v14 = vpop.f32.mrb[14].mxu1 }
 0x7ae   :  { %v7946_v38 = vpop.f32.mrb[15].mxu1 }
 0x7af   :  { %v4178_v24 = vadd.f32 %v7944_v6, %v11311_v50  ;;  %v7947_v35 = vadd.f32 %v7946_v38, %v7945_v14 }
 0x7b1   :  { %v4223_v58 = vmax.f32 %v4178_v24, 0.0  ;;  %v4181_v60 = vadd.f32 %v7947_v35, %v11311_v50 }
 0x7b3   :  { %4234 = vst.msk [vmem:[#allocation2 + $0x10] sm:$0xff] %vm1417_vm12, %v4223_v58  ;;  %v4224_v5 = vmax.f32 %v4181_v60, 0.0  ;;  %v7948_v17 = vpop.f32.mrb[16].mxu1 }
 0x7b4   :  { %v7949_v19 = vpop.f32.mrb[17].mxu1 }
 0x7b5   :  { %4235 = vst.msk [vmem:[#allocation2 + $0x18] sm:$0xff] %vm1417_vm12, %v4224_v5  ;;  %v7950_v9 = vadd.f32 %v7949_v19, %v7948_v17  ;;  %v7951_v0 = vpop.f32.mrb[18].mxu1  ;;  %v8944_v19 = vld [vmem:[%s12544_s10 + $0x78] sm:$0xff]  }
 0x7b6   :  { %v7952_v41 = vpop.f32.mrb[19].mxu1  ;;  %7992 = vmatprep.subr.bf16.mxu1 %v8944_v19 }
 0x7b7   :  { %v4186_v33 = vadd.f32 %v7950_v9, %v11311_v50  ;;  %v7953_v34 = vadd.f32 %v7952_v41, %v7951_v0 }
 0x7b9   :  { %v4225_v3 = vmax.f32 %v4186_v33, 0.0  ;;  %v4189_v7 = vadd.f32 %v7953_v34, %v11311_v50 }
 0x7ba   :  { %v11331_v63 = vld.sshfl [vmem:[#allocation2 + $0x14] sm:$0x3 pattern:$0x76325410]  ;;  %v11352_v56 = vld [vmem:[#allocation2 + $0x12] sm:$0x3] }
 0x7bb   :  { %4236 = vst.msk [vmem:[#allocation2 + $0x20] sm:$0xff] %vm1417_vm12, %v4225_v3  ;;  %v4226_v44 = vmax.f32 %v4189_v7, 0.0  ;;  %v7954_v48 = vpop.f32.mrb[20].mxu1  ;;  %4284 = vrot.lane.b32.xlu1 %v11331_v63, %s9555_s0  ;;  %v11354_v53 = vld [vmem:[#allocation2 + $0x10] sm:$0x3]  ;;  %v4268_v20 = vrot.slane %v11352_v56, %v11342_v1  ;;  %v8945_v3 = vld [vmem:[%s12544_s10 + $0x38] sm:$0xff]  }
 0x7bc   :  { %v7955_v52 = vpop.f32.mrb[21].mxu1  ;;  %v11336_v43 = vld.sshfl [vmem:[#allocation2 + $0x1c] sm:$0x3 pattern:$0x76325410]  ;;  %7993 = vmatpush3.bf16.msra.mxu1 %v8945_v3 }
 0x7bd   :  { %4237 = vst.msk [vmem:[#allocation2 + $0x28] sm:$0xff] %vm1417_vm12, %v4226_v44  ;;  %v7956_v62 = vadd.f32 %v7955_v52, %v7954_v48  ;;  %v7957_v15 = vpop.f32.mrb[22].mxu1  ;;  %4348 = vrot.lane.b32.xlu0 %v11336_v43, %s9555_s0  ;;  %v11347_v10 = vld.sshfl [vmem:[#allocation2 + $0x16] sm:$0x3 pattern:$0x76325410] }
 0x7be   :  { %v7958_v11 = vpop.f32.mrb[23].mxu1  ;;  %v11359_v40 = vld [vmem:[#allocation2 + $0x18] sm:$0x3]  ;;  %4247 = vst.msk [vmem:[#allocation3] sm:$0x3] %vm4246_vm14, %v11354_v53 }
 0x7bf   :  { %v4194_v30 = vadd.f32 %v7956_v62, %v11311_v50  ;;  %v7959_v31 = vadd.f32 %v7958_v11, %v7957_v15  ;;  %4302 = vrot.lane.b32.xlu1 %v11347_v10, %s9581_s9  ;;  %v11363_v25 = vld.sshfl [vmem:[#allocation2 + $0x1e] sm:$0x3 pattern:$0x76325410]  ;;  %v11365_v59 = vld [vmem:[#allocation2 + $0x1a] sm:$0x3] }
 0x7c0   :  { %4312 = vst.msk [vmem:[#allocation3 + $0x2] sm:$0x3] %vm4246_vm14, %v11359_v40  ;;  %v4333_v39 = vrot.slane %v11365_v59, %v11342_v1  ;;  %v8949_v11 = vld [vmem:[%s12544_s10 + $0xc0] sm:$0xff]   ;;  %v8974_v3 = vld [vmem:[%s12546_s12 + $0x54] ss:$8 sps:$4 sm:$0xff]  }
 0x7c1   :  { %v4227_v18 = vmax.f32 %v4194_v30, 0.0  ;;  %v4197_v23 = vadd.f32 %v7959_v31, %v11311_v50  ;;  %4365 = vrot.lane.b32.xlu0 %v11363_v25, %s9581_s9  ;;  %8000 = vmatprep.subr.bf16.mxu1 %v8949_v11 }
 0x7c2   :  { %v11381_v4 = vld.sshfl [vmem:[#allocation2 + $0x24] sm:$0x3 pattern:$0x76325410]  ;;  %v11388_v27 = vld [vmem:[#allocation2 + $0x20] sm:$0x3] }
 0x7c3   :  { %4238 = vst.msk [vmem:[#allocation2 + $0x30] sm:$0xff] %vm1417_vm12, %v4227_v18  ;;  %v4228_v29 = vmax.f32 %v4197_v23, 0.0  ;;  %v7960_v26 = vpop.f32.mrb[24].mxu1  ;;  %4269 = vrot.lane.b32.xlu1 %v4268_v20, %s9582_s1  ;;  %v11393_v16 = vld [vmem:[#allocation2 + $0x22] sm:$0x3] }
 0x7c4   :  { %v7961_v12 = vpop.f32.mrb[25].mxu1  ;;  %4374 = vst.msk [vmem:[#allocation3 + $0x4] sm:$0x3] %vm4246_vm14, %v11388_v27  ;;  %v11400_v14 = vld [vmem:[#allocation2 + $0x28] sm:$0x3]  ;;  %v4395_v58 = vrot.slane %v11393_v16, %v11342_v1 }
 0x7c5   :  { %4239 = vst.msk [vmem:[#allocation2 + $0x38] sm:$0xff] %vm1417_vm12, %v4228_v29  ;;  %v7962_v8 = vadd.f32 %v7961_v12, %v7960_v26  ;;  %v7963_v22 = vpop.f32.mrb[26].mxu1  ;;  %4334 = vrot.lane.b32.xlu0 %v4333_v39, %s9582_s1  ;;  %v11405_v38 = vld.sshfl [vmem:[#allocation2 + $0x2c] sm:$0x3 pattern:$0x76325410] }
 0x7c6   :  { %v7964_v57 = vpop.f32.mrb[27].mxu1  ;;  %v11407_v24 = vld [vmem:[#allocation2 + $0x2a] sm:$0x3]  ;;  %4436 = vst.msk [vmem:[#allocation3 + $0x6] sm:$0x3] %vm4246_vm14, %v11400_v14 }
 0x7c7   :  { %v4202_v2 = vadd.f32 %v7962_v8, %v11311_v50  ;;  %v7965_v6 = vadd.f32 %v7964_v57, %v7963_v22  ;;  %4410 = vrot.lane.b32.xlu1 %v11381_v4, %s9555_s0  ;;  %v4457_v17 = vrot.slane %v11407_v24, %v11342_v1  ;;  %v11425_v9 = vld.sshfl [vmem:[#allocation2 + $0x26] sm:$0x3 pattern:$0x76325410]  ;;  %v8946_v39 = vld [vmem:[%s12546_s12] ss:$8 sps:$4 sm:$0xff]  }
 0x7c8   :  { %v11436_v32 = vld.sshfl [vmem:[#allocation2 + $0x2e] sm:$0x3 pattern:$0x76325410] }
 0x7c9   :  { %v4229_v35 = vmax.f32 %v4202_v2, 0.0  ;;  %v4205_v37 = vadd.f32 %v7965_v6, %v11311_v50  ;;  %4472 = vrot.lane.b32.xlu0 %v11405_v38, %s9555_s0  ;;  %v8948_v12 = vld [vmem:[%s12546_s12 + $0x4] ss:$8 sps:$4 sm:$0xff]  }
 0x7ca   :  { %v11427_v41 = vld [vmem:[#allocation2 + $0x30] sm:$0x3]  ;;  %v11446_v48 = vld.sshfl [vmem:[#allocation2 + $0x34] sm:$0x3 pattern:$0x76325410]  ;;  %7012 = vmatprep.subr.bf16.mxu0 %v8948_v12 }
 0x7cb   :  { %4240 = vst.msk [vmem:[#allocation2 + $0x40] sm:$0xff] %vm1417_vm12, %v4229_v35  ;;  %v4230_v60 = vmax.f32 %v4205_v37, 0.0  ;;  %v7966_v5 = vpop.f32.mrb[28].mxu1  ;;  %4396 = vrot.lane.b32.xlu1 %v4395_v58, %s9582_s1  ;;  %v11461_v18 = vld [vmem:[#allocation2 + $0x32] sm:$0x3]  ;;  %7013 = vmatpush1.bf16.msra.mxu0 %v8946_v39 }
 0x7cc   :  { %v7967_v21 = vpop.f32.mrb[29].mxu1  ;;  %v11432_v61 = vld [vmem:[#allocation2 + $0x38] sm:$0x3]  ;;  %4498 = vst.msk [vmem:[#allocation3 + $0x8] sm:$0x3] %vm4246_vm14, %v11427_v41  ;;  %v4519_v22 = vrot.slane %v11461_v18, %v11342_v1 }
 0x7cd   :  { %4241 = vst.msk [vmem:[#allocation2 + $0x48] sm:$0xff] %vm1417_vm12, %v4230_v60  ;;  %v7968_v28 = vadd.f32 %v7967_v21, %v7966_v5  ;;  %v7969_v45 = vpop.f32.mrb[30].mxu1  ;;  %4458 = vrot.lane.b32.xlu0 %v4457_v17, %s9582_s1  ;;  %v11451_v15 = vld.sshfl [vmem:[#allocation2 + $0x3c] sm:$0x3 pattern:$0x76325410] }
 0x7ce   :  { %v7970_v0 = vpop.f32.mrb[31].mxu1  ;;  %4560 = vst.msk [vmem:[#allocation3 + $0xa] sm:$0x3] %vm4246_vm14, %v11432_v61  ;;  %v11480_v51 = vld [vmem:[#allocation2 + $0x3a] sm:$0x3] }
 0x7cf   :  { %v4210_v33 = vadd.f32 %v7968_v28, %v11311_v50  ;;  %v7971_v34 = vadd.f32 %v7970_v0, %v7969_v45  ;;  %4427 = vrot.lane.b32.xlu1 %v11425_v9, %s9581_s9  ;;  %v11453_v36 = vld.sshfl [vmem:[#allocation2 + $0x36] sm:$0x3 pattern:$0x76325410]  ;;  %v4581_v57 = vrot.slane %v11480_v51, %v11342_v1  ;;  %v8959_v6 = vld [vmem:[%s12546_s12 + $0x24] ss:$8 sps:$4 sm:$0xff]  }
 0x7d0   :  { %v11465_v49 = vld.sshfl [vmem:[#allocation2 + $0x3e] sm:$0x3 pattern:$0x76325410]  ;;  %v8957_v58 = vld [vmem:[%s12546_s12 + $0x20] ss:$8 sps:$4 sm:$0xff]  }
 0x7d1   :  { %v4231_v7 = vmax.f32 %v4210_v33, 0.0  ;;  %v4213_v44 = vadd.f32 %v7971_v34, %v11311_v50  ;;  %4489 = vrot.lane.b32.xlu0 %v11436_v32, %s9581_s9  ;;  %v8964_v60 = vld [vmem:[%s12546_s12 + $0x34] ss:$8 sps:$4 sm:$0xff]   ;;  %v8962_v28 = vld [vmem:[%s12546_s12 + $0x30] ss:$8 sps:$4 sm:$0xff]  }
 0x7d2   :  { %v11463_v23 = vld [vmem:[#allocation2 + $0x40] sm:$0x3]  ;;  %v11506_v55 = vld.sshfl [vmem:[#allocation2 + $0x44] sm:$0x3 pattern:$0x76325410] }
 0x7d3   :  { %4242 = vst.msk [vmem:[#allocation2 + $0x50] sm:$0xff] %vm1417_vm12, %v4231_v7  ;;  %v4232_v52 = vmax.f32 %v4213_v44, 0.0  ;;  %v7972_v54 = vpop.f32.mrb[32].mxu1  ;;  %4534 = vrot.lane.b32.xlu1 %v11446_v48, %s9555_s0  ;;  %v11510_v37 = vld [vmem:[#allocation2 + $0x42] sm:$0x3] }
 0x7d4   :  { %v7973_v62 = vpop.f32.mrb[33].mxu1  ;;  %4622 = vst.msk [vmem:[#allocation3 + $0xc] sm:$0x3] %vm4246_vm14, %v11463_v23  ;;  %v11472_v26 = vld [vmem:[#allocation2 + $0x48] sm:$0x3]  ;;  %v4643_v21 = vrot.slane %v11510_v37, %v11342_v1 }
 0x7d5   :  { %4243 = vst.msk [vmem:[#allocation2 + $0x58] sm:$0xff] %vm1417_vm12, %v4232_v52  ;;  %v7974_v30 = vadd.f32 %v7973_v62, %v7972_v54  ;;  %v7975_v31 = vpop.f32.mrb[34].mxu1  ;;  %4596 = vrot.lane.b32.xlu0 %v11451_v15, %s9555_s0  ;;  %v11522_v5 = vld.sshfl [vmem:[#allocation2 + $0x4c] sm:$0x3 pattern:$0x76325410] }
 0x7d6   :  { %v7976_v20 = vpop.f32.mrb[35].mxu1  ;;  %4684 = vst.msk [vmem:[#allocation3 + $0xe] sm:$0x3] %vm4246_vm14, %v11472_v26  ;;  %v11524_v17 = vld [vmem:[#allocation2 + $0x4a] sm:$0x3] }
 0x7d7   :  { %v4218_v29 = vadd.f32 %v7974_v30, %v11311_v50  ;;  %4551 = vrot.lane.b32.xlu1 %v11453_v36, %s9581_s9  ;;  %v8954_v50 = vld [vmem:[%s12546_s12 + $0x14] ss:$8 sps:$4 sm:$0xff]   ;;  %v4705_v45 = vrot.slane %v11524_v17, %v11342_v1  ;;  %v8969_v0 = vld [vmem:[%s12546_s12 + $0x44] ss:$8 sps:$4 sm:$0xff]   ;;  %v8967_v34 = vld [vmem:[%s12546_s12 + $0x40] ss:$8 sps:$4 sm:$0xff]  }
 0x7d8   :  { %7014 = vmatprep.subr.bf16.mxu0 %v8954_v50  ;;  %v11544_v33 = vld.sshfl [vmem:[#allocation2 + $0x46] sm:$0x3 pattern:$0x76325410]  ;;  %v8972_v52 = vld [vmem:[%s12546_s12 + $0x50] ss:$8 sps:$4 sm:$0xff]  }
 0x7d9   :  { %v4233_v8 = vmax.f32 %v4218_v29, 0.0  ;;  %4613 = vrot.lane.b32.xlu0 %v11465_v49, %s9581_s9  ;;  %7015 = vmatpush1.bf16.msra.mxu0 %v8952_v42  ;;  %v11554_v7 = vld.sshfl [vmem:[#allocation2 + $0x4e] sm:$0x3 pattern:$0x76325410] }
 0x7da   :  { %v11498_v2 = vld [vmem:[#allocation2 + $0x50] sm:$0x3]  ;;  %7016 = vmatprep.subr.bf16.mxu0 %v8959_v6  ;;  %v11558_v44 = vld.sshfl [vmem:[#allocation2 + $0x54] sm:$0x3 pattern:$0x76325410] }
 0x7db   :  { %4244 = vst.msk [vmem:[#allocation2 + $0x60] sm:$0xf] %vm1428_vm13, %v4233_v8  ;;  %4520 = vrot.lane.b32.xlu1 %v4519_v22, %s9582_s1  ;;  %v8979_v54 = vld [vmem:[%s12546_s12 + $0x64] ss:$8 sps:$4 sm:$0xff]   ;;  %v11574_v30 = vld [vmem:[#allocation2 + $0x52] sm:$0x3] }
 0x7dc   :  { %4746 = vst.msk [vmem:[#allocation3 + $0x10] sm:$0x3] %vm4246_vm14, %v11498_v2  ;;  %v11508_v35 = vld [vmem:[#allocation2 + $0x58] sm:$0x3]  ;;  %v11570_v11 = vld [vmem:[#allocation2 + $0x5a] sm:$0x3]  ;;  %v4767_v12 = vrot.slane %v11574_v30, %v11342_v1 }
 0x7dd   :  { %4582 = vrot.lane.b32.xlu0 %v4581_v57, %s9582_s1  ;;  %4808 = vst.msk [vmem:[#allocation3 + $0x12] sm:$0x3] %vm4246_vm14, %v11508_v35  ;;  %7017 = vmatpush1.bf16.msra.mxu0 %v8957_v58  ;;  %v11568_v62 = vld.sshfl [vmem:[#allocation2 + $0x5c] sm:$0x3 pattern:$0x76325410]  ;;  %v4829_v29 = vrot.slane %v11570_v11, %v11342_v1  ;;  %v4255_v58 = vrot.slane %v11354_v53, %v11342_v1 }
 0x7de   :  { %7018 = vmatprep.subr.bf16.mxu0 %v8964_v60  ;;  %v11576_v31 = vld.sshfl [vmem:[#allocation2 + $0x56] sm:$0x3 pattern:$0x76325410]  ;;  %v8977_v20 = vld [vmem:[%s12546_s12 + $0x60] ss:$8 sps:$4 sm:$0xff]   ;;  %v4382_v53 = vrot.slane %v11388_v27, %v11342_v1 }
 0x7df   :  { %4658 = vrot.lane.b32.xlu1 %v11506_v55, %s9555_s0  ;;  %v8984_v39 = vld [vmem:[%s12546_s12 + $0x74] ss:$8 sps:$4 sm:$0xff]   ;;  %v8982_v8 = vld [vmem:[%s12546_s12 + $0x70] ss:$8 sps:$4 sm:$0xff]   ;;  %v8989_v22 = vld [vmem:[%s12546_s12 + $0x84] ss:$8 sps:$4 sm:$0xff]  }
 0x7e0   :  { %v11600_v42 = vld.sshfl [vmem:[#allocation2 + $0x5e] sm:$0x3 pattern:$0x76325410]  ;;  %v8987_v6 = vld [vmem:[%s12546_s12 + $0x80] ss:$8 sps:$4 sm:$0xff]  }
 0x7e1   :  { %4720 = vrot.lane.b32.xlu0 %v11522_v5, %s9555_s0  ;;  %7019 = vmatpush1.bf16.msra.mxu0 %v8962_v28  ;;  %v8994_v60 = vld [vmem:[%s12546_s12 + $0x94] ss:$8 sps:$4 sm:$0xff]   ;;  %v8992_v28 = vld [vmem:[%s12546_s12 + $0x90] ss:$8 sps:$4 sm:$0xff]  }
 0x7e2   :  { %v11530_v19 = vld [vmem:[#allocation2 + $0x60] sm:$0x3]  ;;  %7020 = vmatprep.subr.bf16.mxu0 %v8969_v0  ;;  %v11591_v50 = vld [vmem:[#allocation2 + $0x62] sm:$0x3]  ;;  %v9004_v27 = vld [vmem:[%s12546_s12 + $0xb4] ss:$8 sps:$4 sm:$0xff]  }
 0x7e3   :  { %4644 = vrot.lane.b32.xlu1 %v4643_v21, %s9582_s1  ;;  %4870 = vst.msk [vmem:[#allocation3 + $0x14] sm:$0x3] %vm4246_vm14, %v11530_v19  ;;  %v4891_v57 = vrot.slane %v11591_v50, %v11342_v1  ;;  %v4320_v21 = vrot.slane %v11359_v40, %v11342_v1  ;;  %v4444_v40 = vrot.slane %v11400_v14, %v11342_v1  ;;  %v8997_v0 = vld [vmem:[%s12546_s12 + $0xa0] ss:$8 sps:$4 sm:$0xff]   ;;  %v9002_v14 = vld [vmem:[%s12546_s12 + $0xb0] ss:$8 sps:$4 sm:$0xff]  }
 0x7e5   :  { %4706 = vrot.lane.b32.xlu0 %v4705_v45, %s9582_s1  ;;  %7021 = vmatpush1.bf16.msra.mxu0 %v8967_v34  ;;  %v8999_v45 = vld [vmem:[%s12546_s12 + $0xa4] ss:$8 sps:$4 sm:$0xff]  }
 0x7e6   :  { %7022 = vmatprep.subr.bf16.mxu0 %v8974_v3  ;;  %v9009_v34 = vld [vmem:[%s12546_s12 + $0xc4] ss:$8 sps:$4 sm:$0xff]   ;;  %v4506_v3 = vrot.slane %v11427_v41, %v11342_v1  ;;  %v4630_v41 = vrot.slane %v11463_v23, %v11342_v1 }
 0x7e7   :  { %4675 = vrot.lane.b32.xlu1 %v11544_v33, %s9581_s9 }
 0x7e9   :  { %4737 = vrot.lane.b32.xlu0 %v11554_v7, %s9581_s9  ;;  %7023 = vmatpush1.bf16.msra.mxu0 %v8972_v52  ;;  %v9022_v52 = vld [vmem:[%s12546_s12 + $0xf0] ss:$8 sps:$4 sm:$0xff]  }
 0x7ea   :  { %7024 = vmatprep.subr.bf16.mxu0 %v8979_v54 }
 0x7eb   :  { %4782 = vrot.lane.b32.xlu1 %v11558_v44, %s9555_s0 }
 0x7ed   :  { %4844 = vrot.lane.b32.xlu0 %v11568_v62, %s9555_s0  ;;  %7025 = vmatpush1.bf16.msra.mxu0 %v8977_v20 }
 0x7ee   :  { %7026 = vmatprep.subr.bf16.mxu0 %v8984_v39 }
 0x7ef   :  { %4799 = vrot.lane.b32.xlu1 %v11576_v31, %s9581_s9 }
 0x7f1   :  { %4830 = vrot.lane.b32.xlu0 %v4829_v29, %s9582_s1  ;;  %7027 = vmatpush1.bf16.msra.mxu0 %v8982_v8 }
 0x7f2   :  { %7028 = vmatprep.subr.bf16.mxu0 %v8989_v22 }
 0x7f3   :  { %4768 = vrot.lane.b32.xlu1 %v4767_v12, %s9582_s1 }
 0x7f5   :  { %4861 = vrot.lane.b32.xlu0 %v11600_v42, %s9581_s9  ;;  %7029 = vmatpush1.bf16.msra.mxu0 %v8987_v6 }
 0x7f6   :  { %7030 = vmatprep.subr.bf16.mxu0 %v8994_v60  ;;  %v8950_v60 = vld [vmem:[%s12544_s10 + $0x80] sm:$0xff]  }
 0x7f7   :  { %4892 = vrot.lane.b32.xlu1 %v4891_v57, %s9582_s1 }
 0x7f9   :  { %4256 = vrot.lane.b32.xlu0 %v4255_v58, %s9581_s9  ;;  %7031 = vmatpush1.bf16.msra.mxu0 %v8992_v28 }
 0x7fa   :  { %7032 = vmatprep.subr.bf16.mxu0 %v8999_v45  ;;  %v8955_v45 = vld [vmem:[%s12544_s10 + $0xc8] sm:$0xff]  }
 0x7fb   :  { %4321 = vrot.lane.b32.xlu1 %v4320_v21, %s9581_s9 }
 0x7fd   :  { %4383 = vrot.lane.b32.xlu0 %v4382_v53, %s9581_s9  ;;  %7033 = vmatpush1.bf16.msra.mxu0 %v8997_v0 }
 0x7fe   :  { %7034 = vmatprep.subr.bf16.mxu0 %v9004_v27  ;;  %v8956_v27 = vld [vmem:[%s12544_s10 + $0x88] sm:$0xff]  }
 0x7ff   :  { %4445 = vrot.lane.b32.xlu1 %v4444_v40, %s9581_s9 }
 0x801   :  { %4289 = vrot.lane.b32.xlu0 %v11331_v63, %s9582_s1  ;;  %7035 = vmatpush1.bf16.msra.mxu0 %v9002_v14  ;;  %v9007_v63 = vld [vmem:[%s12546_s12 + $0xc0] ss:$8 sps:$4 sm:$0xff]  }
 0x802   :  { %7036 = vmatprep.subr.bf16.mxu0 %v9009_v34  ;;  %v8960_v34 = vld [vmem:[%s12544_s10 + $0xd0] sm:$0xff]  }
 0x803   :  { %4352 = vrot.lane.b32.xlu1 %v11336_v43, %s9582_s1  ;;  %v9014_v43 = vld [vmem:[%s12546_s12 + $0xd4] ss:$8 sps:$4 sm:$0xff]  }
 0x805   :  { %4414 = vrot.lane.b32.xlu0 %v11381_v4, %s9582_s1  ;;  %7037 = vmatpush1.bf16.msra.mxu0 %v9007_v63  ;;  %v9012_v4 = vld [vmem:[%s12546_s12 + $0xd0] ss:$8 sps:$4 sm:$0xff]  }
 0x806   :  { %7038 = vmatprep.subr.bf16.mxu0 %v9014_v43  ;;  %v8961_v43 = vld [vmem:[%s12544_s10 + $0x90] sm:$0xff]  }
 0x807   :  { %4476 = vrot.lane.b32.xlu1 %v11405_v38, %s9582_s1  ;;  %v9019_v38 = vld [vmem:[%s12546_s12 + $0xe4] ss:$8 sps:$4 sm:$0xff]  }
 0x809   :  { %4307 = vrot.lane.b32.xlu0 %v11347_v10, %s9555_s0  ;;  %7039 = vmatpush1.bf16.msra.mxu0 %v9012_v4  ;;  %v9017_v10 = vld [vmem:[%s12546_s12 + $0xe0] ss:$8 sps:$4 sm:$0xff]  }
 0x80a   :  { %7040 = vmatprep.subr.bf16.mxu0 %v9019_v38  ;;  %v8965_v38 = vld [vmem:[%s12544_s10 + $0xd8] sm:$0xff]  }
 0x80b   :  { %4369 = vrot.lane.b32.xlu1 %v11363_v25, %s9555_s0  ;;  %v9024_v25 = vld [vmem:[%s12546_s12 + $0xf4] ss:$8 sps:$4 sm:$0xff]  }
 0x80d   :  { %4431 = vrot.lane.b32.xlu0 %v11425_v9, %s9555_s0  ;;  %v4568_v9 = vrot.slane %v11432_v61, %v11342_v1  ;;  %7041 = vmatpush1.bf16.msra.mxu0 %v9017_v10  ;;  %v9040_v61 = vld [vmem:[%s12546_s12 + $0x504] ss:$8 sps:$4 sm:$0xff]  }
 0x80e   :  { %7042 = vmatprep.subr.bf16.mxu0 %v9024_v25 }
 0x80f   :  { %4493 = vrot.lane.b32.xlu1 %v11436_v32, %s9555_s0  ;;  %v4692_v32 = vrot.slane %v11472_v26, %v11342_v1 }
 0x811   :  { %4507 = vrot.lane.b32.xlu0 %v4506_v3, %s9581_s9  ;;  %7043 = vmatpush1.bf16.msra.mxu0 %v9022_v52  ;;  %v8966_v3 = vld [vmem:[%s12544_s10 + $0x98] sm:$0xff]  }
 0x812   :  { %7217 = vmatprep.subr.bf16.mxu0 %v9040_v61  ;;  %v8975_v61 = vld [vmem:[%s12544_s10 + $0xe8] sm:$0xff]  }
 0x813   :  { %4569 = vrot.lane.b32.xlu1 %v4568_v9, %s9581_s9  ;;  %v8970_v9 = vld [vmem:[%s12544_s10 + $0xe0] sm:$0xff]  }
 0x815   :  { %4631 = vrot.lane.b32.xlu0 %v4630_v41, %s9581_s9  ;;  %v8971_v41 = vld [vmem:[%s12544_s10 + $0xa0] sm:$0xff]  }
 0x817   :  { %4693 = vrot.lane.b32.xlu1 %v4692_v32, %s9581_s9 }
 0x819   :  { %4538 = vrot.lane.b32.xlu0 %v11446_v48, %s9582_s1  ;;  %v4754_v48 = vrot.slane %v11498_v2, %v11342_v1 }
 0x81b   :  { %4600 = vrot.lane.b32.xlu1 %v11451_v15, %s9582_s1  ;;  %v4816_v15 = vrot.slane %v11508_v35, %v11342_v1 }
 0x81d   :  { %4662 = vrot.lane.b32.xlu0 %v11506_v55, %s9582_s1 }
 0x81f   :  { %4724 = vrot.lane.b32.xlu1 %v11522_v5, %s9582_s1 }
 0x821   :  { %4555 = vrot.lane.b32.xlu0 %v11453_v36, %s9555_s0 }
 0x823   :  { %4617 = vrot.lane.b32.xlu1 %v11465_v49, %s9555_s0  ;;  %v4878_v49 = vrot.slane %v11530_v19, %v11342_v1 }
 0x825   :  { %4679 = vrot.lane.b32.xlu0 %v11544_v33, %s9555_s0 }
 0x827   :  { %4741 = vrot.lane.b32.xlu1 %v11554_v7, %s9555_s0 }
 0x829   :  { %4755 = vrot.lane.b32.xlu0 %v4754_v48, %s9581_s9 }
 0x82b   :  { %4817 = vrot.lane.b32.xlu1 %v4816_v15, %s9581_s9  ;;  %v8976_v15 = vld [vmem:[%s12544_s10 + $0xa8] sm:$0xff]  }
 0x82d   :  { %v4285_v36 = vpop.permute.xlu1 %4284  ;;  %4786 = vrot.lane.b32.xlu0 %v11558_v44, %s9582_s1 }
 0x82f   :  { %v4349_v23 = vpop.permute.xlu0 %4348  ;;  %4848 = vrot.lane.b32.xlu1 %v11568_v62, %s9582_s1 }
 0x831   :  { %v4303_v26 = vpop.permute.xlu1 %4302  ;;  %4879 = vrot.lane.b32.xlu0 %v4878_v49, %s9581_s9 }
 0x833   :  { %v4366_v2 = vpop.permute.xlu0 %4365  ;;  %4803 = vrot.lane.b32.xlu1 %v11576_v31, %s9555_s0 }
 0x835   :  { %v4270_v55 = vpop.permute.xlu1 %4269  ;;  %4865 = vrot.lane.b32.xlu0 %v11600_v42, %s9555_s0 }
 0x836   :  { %4273 = vst.msk [vmem:[#allocation3] sm:$0x3] %vm4272_vm15, %v4270_v55 }
 0x837   :  { %4288 = vst.msk [vmem:[#allocation3] sm:$0x3] %vm4287_vm0, %v4285_v36  ;;  %v4335_v35 = vpop.permute.xlu0 %4334 }
 0x838   :  { %4306 = vst.msk [vmem:[#allocation3] sm:$0x3] %vm4305_vm1, %v4303_v26 }
 0x839   :  { %4337 = vst.msk [vmem:[#allocation3 + $0x2] sm:$0x3] %vm4272_vm15, %v4335_v35  ;;  %v4411_v5 = vpop.permute.xlu1 %4410  ;;  %v8985_v35 = vld [vmem:[%s12544_s10 + $0xf8] sm:$0xff]  }
 0x83a   :  { %4351 = vst.msk [vmem:[#allocation3 + $0x2] sm:$0x3] %vm4287_vm0, %v4349_v23  ;;  %v8980_v23 = vld [vmem:[%s12544_s10 + $0xf0] sm:$0xff]  }
 0x83b   :  { %4368 = vst.msk [vmem:[#allocation3 + $0x2] sm:$0x3] %vm4305_vm1, %v4366_v2  ;;  %v4473_v19 = vpop.permute.xlu0 %4472  ;;  %v8981_v2 = vld [vmem:[%s12544_s10 + $0xb0] sm:$0xff]  }
 0x83d   :  { %v4397_v33 = vpop.permute.xlu1 %4396 }
 0x83e   :  { %4399 = vst.msk [vmem:[#allocation3 + $0x4] sm:$0x3] %vm4272_vm15, %v4397_v33  ;;  %v8986_v33 = vld [vmem:[%s12544_s10 + $0xb8] sm:$0xff]  }
 0x83f   :  { %4413 = vst.msk [vmem:[#allocation3 + $0x4] sm:$0x3] %vm4287_vm0, %v4411_v5  ;;  %v4459_v7 = vpop.permute.xlu0 %4458 }
 0x840   :  { %4461 = vst.msk [vmem:[#allocation3 + $0x6] sm:$0x3] %vm4272_vm15, %v4459_v7 }
 0x841   :  { %4475 = vst.msk [vmem:[#allocation3 + $0x6] sm:$0x3] %vm4287_vm0, %v4473_v19  ;;  %v4428_v44 = vpop.permute.xlu1 %4427 }
 0x842   :  { %4430 = vst.msk [vmem:[#allocation3 + $0x4] sm:$0x3] %vm4305_vm1, %v4428_v44  ;;  %v8990_v44 = vld [vmem:[%s12544_s10 + $0x140] sm:$0xff]  }
 0x843   :  { %v4490_v54 = vpop.permute.xlu0 %4489 }
 0x844   :  { %4492 = vst.msk [vmem:[#allocation3 + $0x6] sm:$0x3] %vm4305_vm1, %v4490_v54 }
 0x845   :  { %v4535_v62 = vpop.permute.xlu1 %4534 }
 0x847   :  { %v4597_v31 = vpop.permute.xlu0 %4596 }
 0x849   :  { %v4552_v20 = vpop.permute.xlu1 %4551 }
 0x84b   :  { %v4614_v29 = vpop.permute.xlu0 %4613  ;;  %v4897_v39 = vld [vmem:[#allocation3] sm:$0xff] }
 0x84c   :  { %v4910_v12 = vrot.slane %v4897_v39, %v11342_v1  ;;  %v4903_v8 = vcombine.high %v4897_v39, %v4897_v39 }
 0x84d   :  { %v4521_v22 = vpop.permute.xlu1 %4520 }
 0x84e   :  { %4523 = vst.msk [vmem:[#allocation3 + $0x8] sm:$0x3] %vm4272_vm15, %v4521_v22  ;;  %v4918_v42 = vcombine.high %v4910_v12, %v4910_v12  ;;  %v11743_v57 = vrot.slane %v4903_v8, %v11342_v1  ;;  %v4964_v53 = vpack.c.bf16 %v4910_v12, %v4910_v12  ;;  %v9000_v8 = vld [vmem:[%s12544_s10 + $0x150] sm:$0xff]  }
 0x84f   :  { %4537 = vst.msk [vmem:[#allocation3 + $0x8] sm:$0x3] %vm4287_vm0, %v4535_v62  ;;  %v4583_v6 = vpop.permute.xlu0 %4582 }
 0x850   :  { %4554 = vst.msk [vmem:[#allocation3 + $0x8] sm:$0x3] %vm4305_vm1, %v4552_v20  ;;  %v4965_v58 = vpack.c.bf16 %v4918_v42, %v4918_v42  ;;  %v4919_v21 = vcombine.high %v11743_v57, %v11743_v57  ;;  %v4966_v20 = vpack.c.bf16 %v11743_v57, %v11743_v57  ;;  %v9005_v57 = vld [vmem:[%s12544_s10 + $0x158] sm:$0xff]  }
 0x851   :  { %4585 = vst.msk [vmem:[#allocation3 + $0xa] sm:$0x3] %vm4272_vm15, %v4583_v6  ;;  %v4659_v28 = vpop.permute.xlu1 %4658 }
 0x852   :  { %4599 = vst.msk [vmem:[#allocation3 + $0xa] sm:$0x3] %vm4287_vm0, %v4597_v31  ;;  %5689 = vmatprep.mubr.bf16.mxu1 %v4965_v58  ;;  %v4967_v40 = vpack.c.bf16 %v4919_v21, %v4919_v21  ;;  %v9006_v58 = vld [vmem:[%s12544_s10 + $0x118] sm:$0xff]   ;;  %v9010_v21 = vld [vmem:[%s12544_s10 + $0x160] sm:$0xff]  }
 0x853   :  { %4616 = vst.msk [vmem:[#allocation3 + $0xa] sm:$0x3] %vm4305_vm1, %v4614_v29  ;;  %v4721_v0 = vpop.permute.xlu0 %4720  ;;  %5690 = vmatmul.mubr.bf16.vlgmr.msra.gmra.mrb[36].mxu1 %v4964_v53  ;;  %v9011_v53 = vld [vmem:[%s12544_s10 + $0x120] sm:$0xff]  }
 0x854   :  { %8001 = vmatpush3.bf16.msra.mxu1 %v8950_v60  ;;  %5729 = vmatprep.mubr.bf16.mxu1 %v4967_v40  ;;  %v9015_v40 = vld [vmem:[%s12544_s10 + $0x168] sm:$0xff]  }
 0x855   :  { %v4645_v14 = vpop.permute.xlu1 %4644  ;;  %8002 = vmatprep.subr.bf16.mxu1 %v8955_v45 }
 0x856   :  { %4647 = vst.msk [vmem:[#allocation3 + $0xc] sm:$0x3] %vm4272_vm15, %v4645_v14 }
 0x857   :  { %4661 = vst.msk [vmem:[#allocation3 + $0xc] sm:$0x3] %vm4287_vm0, %v4659_v28  ;;  %v4707_v63 = vpop.permute.xlu0 %4706 }
 0x858   :  { %4709 = vst.msk [vmem:[#allocation3 + $0xe] sm:$0x3] %vm4272_vm15, %v4707_v63  ;;  %8003 = vmatpush3.bf16.msra.mxu1 %v8956_v27  ;;  %v9016_v27 = vld [vmem:[%s12544_s10 + $0x128] sm:$0xff]  }
 0x859   :  { %4723 = vst.msk [vmem:[#allocation3 + $0xe] sm:$0x3] %vm4287_vm0, %v4721_v0  ;;  %v4676_v4 = vpop.permute.xlu1 %4675  ;;  %8004 = vmatprep.subr.bf16.mxu1 %v8960_v34  ;;  %v9020_v34 = vld [vmem:[%s12544_s10 + $0x170] sm:$0xff]  }
 0x85a   :  { %4678 = vst.msk [vmem:[#allocation3 + $0xc] sm:$0x3] %vm4305_vm1, %v4676_v4 }
 0x85b   :  { %v4738_v10 = vpop.permute.xlu0 %4737 }
 0x85c   :  { %4740 = vst.msk [vmem:[#allocation3 + $0xe] sm:$0x3] %vm4305_vm1, %v4738_v10  ;;  %8005 = vmatpush3.bf16.msra.mxu1 %v8961_v43 }
 0x85d   :  { %v4783_v25 = vpop.permute.xlu1 %4782  ;;  %8006 = vmatprep.subr.bf16.mxu1 %v8965_v38  ;;  %v9025_v38 = vld [vmem:[%s12544_s10 + $0x178] sm:$0xff]  }
 0x85f   :  { %v4845_v52 = vpop.permute.xlu0 %4844 }
 0x860   :  { %8007 = vmatpush3.bf16.msra.mxu1 %v8966_v3 }
 0x861   :  { %v4800_v32 = vpop.permute.xlu1 %4799  ;;  %8008 = vmatprep.subr.bf16.mxu1 %v8970_v9 }
 0x863   :  { %v4831_v48 = vpop.permute.xlu0 %4830  ;;  %v11798_v26 = vld [vmem:[#allocation3 + $0x8] sm:$0xff] }
 0x864   :  { %4833 = vst.msk [vmem:[#allocation3 + $0x12] sm:$0x3] %vm4272_vm15, %v4831_v48  ;;  %8009 = vmatpush3.bf16.msra.mxu1 %v8971_v41  ;;  %v11811_v5 = vrot.slane %v11798_v26, %v11342_v1  ;;  %v4920_v63 = vcombine.high %v11798_v26, %v11798_v26  ;;  %v9027_v41 = vld [vmem:[%s12544_s10 + $0x1c0] sm:$0xff]  }
 0x865   :  { %4847 = vst.msk [vmem:[#allocation3 + $0x12] sm:$0x3] %vm4287_vm0, %v4845_v52  ;;  %v4769_v36 = vpop.permute.xlu1 %4768  ;;  %8010 = vmatprep.subr.bf16.mxu1 %v8975_v61  ;;  %v9038_v61 = vld [vmem:[%s12546_s12 + $0x500] ss:$8 sps:$4 sm:$0xff]  }
 0x866   :  { %4771 = vst.msk [vmem:[#allocation3 + $0x10] sm:$0x3] %vm4272_vm15, %v4769_v36  ;;  %v4935_v54 = vcombine.high %v11811_v5, %v11811_v5  ;;  %v11902_v3 = vrot.slane %v4920_v63, %v11342_v1  ;;  %v9045_v36 = vld [vmem:[%s12546_s12 + $0x514] ss:$8 sps:$4 sm:$0xff]   ;;  %v4968_v26 = vpack.c.bf16 %v11811_v5, %v11811_v5  ;;  %v9050_v5 = vld [vmem:[%s12546_s12 + $0x524] ss:$8 sps:$4 sm:$0xff]  }
 0x867   :  { %4785 = vst.msk [vmem:[#allocation3 + $0x10] sm:$0x3] %vm4287_vm0, %v4783_v25  ;;  %v4862_v49 = vpop.permute.xlu0 %4861  ;;  %v9026_v25 = vld [vmem:[%s12544_s10 + $0x138] sm:$0xff]   ;;  %v9058_v63 = vld [vmem:[%s12544_s10 + $0x248] sm:$0xff]  }
 0x868   :  { %4802 = vst.msk [vmem:[#allocation3 + $0x10] sm:$0x3] %vm4305_vm1, %v4800_v32  ;;  %4864 = vst.msk [vmem:[#allocation3 + $0x12] sm:$0x3] %vm4305_vm1, %v4862_v49  ;;  %8011 = vmatpush3.bf16.msra.mxu1 %v8976_v15  ;;  %v4969_v29 = vpack.c.bf16 %v4935_v54, %v4935_v54 }
 0x869   :  { %v4893_v55 = vpop.permute.xlu1 %4892  ;;  %8012 = vmatprep.subr.bf16.mxu1 %v8980_v23  ;;  %v9028_v23 = vld [vmem:[%s12544_s10 + $0x180] sm:$0xff]  }
 0x86a   :  { %4895 = vst.msk [vmem:[#allocation3 + $0x14] sm:$0x3] %vm4272_vm15, %v4893_v55 }
 0x86b   :  { %v4257_v19 = vpop.permute.xlu0 %4256 }
 0x86c   :  { %4259 = vst.msk [vmem:[#allocation4] sm:$0x3] %vm4246_vm14, %v4257_v19  ;;  %8013 = vmatpush3.bf16.msra.mxu1 %v8981_v2  ;;  %v9029_v2 = vld [vmem:[%s12544_s10 + $0x1c8] sm:$0xff]  }
 0x86d   :  { %4274 = vst.msk [vmem:[#allocation4] sm:$0x3] %vm4272_vm15, %v11352_v56  ;;  %v4322_v7 = vpop.permute.xlu1 %4321  ;;  %8014 = vmatprep.subr.bf16.mxu1 %v8985_v35  ;;  %v8991_v56 = vld [vmem:[%s12544_s10 + $0x100] sm:$0xff]   ;;  %v9043_v35 = vld [vmem:[%s12546_s12 + $0x510] ss:$8 sps:$4 sm:$0xff]  }
 0x86e   :  { %4324 = vst.msk [vmem:[#allocation4 + $0x2] sm:$0x3] %vm4246_vm14, %v4322_v7 }
 0x86f   :  { %4338 = vst.msk [vmem:[#allocation4 + $0x2] sm:$0x3] %vm4272_vm15, %v11365_v59  ;;  %v4384_v62 = vpop.permute.xlu0 %4383  ;;  %v8995_v59 = vld [vmem:[%s12544_s10 + $0x148] sm:$0xff]  }
 0x870   :  { %4386 = vst.msk [vmem:[#allocation4 + $0x4] sm:$0x3] %vm4246_vm14, %v4384_v62  ;;  %8015 = vmatpush3.bf16.msra.mxu1 %v8986_v33  ;;  %v9030_v33 = vld [vmem:[%s12544_s10 + $0x188] sm:$0xff]   ;;  %v9055_v62 = vld [vmem:[%s12546_s12 + $0x534] ss:$8 sps:$4 sm:$0xff]  }
 0x871   :  { %4400 = vst.msk [vmem:[#allocation4 + $0x4] sm:$0x3] %vm4272_vm15, %v11393_v16  ;;  %v4446_v31 = vpop.permute.xlu1 %4445  ;;  %8022 = vmatprep.subr.bf16.mxu1 %v8990_v44  ;;  %v8996_v16 = vld [vmem:[%s12544_s10 + $0x108] sm:$0xff]  }
 0x872   :  { %4448 = vst.msk [vmem:[#allocation4 + $0x6] sm:$0x3] %vm4246_vm14, %v4446_v31  ;;  %v9048_v44 = vld [vmem:[%s12546_s12 + $0x520] ss:$8 sps:$4 sm:$0xff]  }
 0x873   :  { %4462 = vst.msk [vmem:[#allocation4 + $0x6] sm:$0x3] %vm4272_vm15, %v11407_v24  ;;  %5730 = vmatmul.mubr.bf16.vlgmr.msra.gmra.mrb[40].mxu1 %v4966_v20  ;;  %v4290_v39 = vpop.permute.xlu0 %4289  ;;  %v9001_v24 = vld [vmem:[%s12544_s10 + $0x110] sm:$0xff]   ;;  %v9033_v20 = vld [vmem:[%s12544_s10 + $0x1d8] sm:$0xff]  }
 0x874   :  { %4292 = vst.msk [vmem:[#allocation4] sm:$0x3] %vm4287_vm0, %v4290_v39  ;;  %8023 = vmatpush3.bf16.msra.mxu1 %v8991_v56  ;;  %5769 = vmatprep.mubr.bf16.mxu1 %v4969_v29  ;;  %v9032_v56 = vld [vmem:[%s12544_s10 + $0x190] sm:$0xff]   ;;  %v9034_v39 = vld [vmem:[%s12544_s10 + $0x198] sm:$0xff]  }
 0x875   :  { %v4353_v12 = vpop.permute.xlu1 %4352  ;;  %8024 = vmatprep.subr.bf16.mxu1 %v8995_v59  ;;  %v9053_v59 = vld [vmem:[%s12546_s12 + $0x530] ss:$8 sps:$4 sm:$0xff]  }
 0x876   :  { %4355 = vst.msk [vmem:[#allocation4 + $0x2] sm:$0x3] %vm4287_vm0, %v4353_v12  ;;  %v9035_v12 = vld [vmem:[%s12544_s10 + $0x1e0] sm:$0xff]  }
 0x877   :  { %v4415_v22 = vpop.permute.xlu0 %4414 }
 0x878   :  { %4417 = vst.msk [vmem:[#allocation4 + $0x4] sm:$0x3] %vm4287_vm0, %v4415_v22  ;;  %8025 = vmatpush3.bf16.msra.mxu1 %v8996_v16 }
 0x879   :  { %v4477_v42 = vpop.permute.xlu1 %4476  ;;  %8026 = vmatprep.subr.bf16.mxu1 %v9000_v8 }
 0x87a   :  { %4479 = vst.msk [vmem:[#allocation4 + $0x6] sm:$0x3] %vm4287_vm0, %v4477_v42 }
 0x87b   :  { %v4308_v6 = vpop.permute.xlu0 %4307 }
 0x87c   :  { %4310 = vst.msk [vmem:[#allocation4] sm:$0x3] %vm4305_vm1, %v4308_v6  ;;  %8027 = vmatpush3.bf16.msra.mxu1 %v9001_v24  ;;  %v9037_v24 = vld [vmem:[%s12544_s10 + $0x1e8] sm:$0xff]   ;;  %v9042_v6 = vld [vmem:[%s12544_s10 + $0x1f0] sm:$0xff]  }
 0x87d   :  { %v4370_v60 = vpop.permute.xlu1 %4369  ;;  %8028 = vmatprep.subr.bf16.mxu1 %v9005_v57 }
 0x87e   :  { %4372 = vst.msk [vmem:[#allocation4 + $0x2] sm:$0x3] %vm4305_vm1, %v4370_v60  ;;  %v11994_v60 = vld [vmem:[#allocation3 + $0x10] sm:$0x3f] }
 0x87f   :  { %v4432_v28 = vpop.permute.xlu0 %4431 }
 0x880   :  { %4434 = vst.msk [vmem:[#allocation4 + $0x4] sm:$0x3] %vm4305_vm1, %v4432_v28  ;;  %8029 = vmatpush3.bf16.msra.mxu1 %v9006_v58  ;;  %v4944_v28 = vrot.slane %v11994_v60, %v11342_v1 }
 0x881   :  { %v4494_v45 = vpop.permute.xlu1 %4493  ;;  %8030 = vmatprep.subr.bf16.mxu1 %v9010_v21  ;;  %v9046_v21 = vld [vmem:[%s12544_s10 + $0x1b0] sm:$0xff]  }
 0x882   :  { %4496 = vst.msk [vmem:[#allocation4 + $0x6] sm:$0x3] %vm4305_vm1, %v4494_v45  ;;  %v9052_v45 = vld [vmem:[%s12544_s10 + $0x240] sm:$0xff]  }
 0x883   :  { %v4508_v0 = vpop.permute.xlu0 %4507 }
 0x884   :  { %4510 = vst.msk [vmem:[#allocation4 + $0x8] sm:$0x3] %vm4246_vm14, %v4508_v0  ;;  %8031 = vmatpush3.bf16.msra.mxu1 %v9011_v53  ;;  %v9051_v53 = vld [vmem:[%s12544_s10 + $0x1b8] sm:$0xff]  }
 0x885   :  { %4524 = vst.msk [vmem:[#allocation4 + $0x8] sm:$0x3] %vm4272_vm15, %v11461_v18  ;;  %v4570_v14 = vpop.permute.xlu1 %4569  ;;  %8032 = vmatprep.subr.bf16.mxu1 %v9015_v40  ;;  %v9021_v18 = vld [vmem:[%s12544_s10 + $0x130] sm:$0xff]   ;;  %v4952_v40 = vcombine.high %v4944_v28, %v4944_v28 }
 0x886   :  { %4572 = vst.msk [vmem:[#allocation4 + $0xa] sm:$0x3] %vm4246_vm14, %v4570_v14 }
 0x887   :  { %4586 = vst.msk [vmem:[#allocation4 + $0xa] sm:$0x3] %vm4272_vm15, %v11480_v51  ;;  %v4632_v43 = vpop.permute.xlu0 %4631 }
 0x888   :  { %4634 = vst.msk [vmem:[#allocation4 + $0xc] sm:$0x3] %vm4246_vm14, %v4632_v43  ;;  %8033 = vmatpush3.bf16.msra.mxu1 %v9016_v27  ;;  %v9056_v27 = vld [vmem:[%s12544_s10 + $0x200] sm:$0xff]   ;;  %v4973_v43 = vpack.c.bf16 %v4952_v40, %v4952_v40  ;;  %v9118_v40 = vld [vmem:[%s12546_s12 + $0x1d4] ss:$8 sps:$4 sm:$0xff]  }
 0x889   :  { %4648 = vst.msk [vmem:[#allocation4 + $0xc] sm:$0x3] %vm4272_vm15, %v11510_v37  ;;  %v4694_v4 = vpop.permute.xlu1 %4693  ;;  %8034 = vmatprep.subr.bf16.mxu1 %v9020_v34  ;;  %v11896_v10 = vld [vmem:[#allocation4] sm:$0xff]  ;;  %v4970_v34 = vpack.c.bf16 %v11902_v3, %v11902_v3 }
 0x88a   :  { %4696 = vst.msk [vmem:[#allocation4 + $0xe] sm:$0x3] %vm4246_vm14, %v4694_v4  ;;  %v5924_v51 = vrot.slane %v11896_v10, %v11342_v1 }
 0x88b   :  { %4710 = vst.msk [vmem:[#allocation4 + $0xe] sm:$0x3] %vm4272_vm15, %v11524_v17  ;;  %v4539_v37 = vpop.permute.xlu0 %4538  ;;  %v4936_v17 = vcombine.high %v11902_v3, %v11902_v3  ;;  %v9062_v3 = vld [vmem:[%s12544_s10 + $0x210] sm:$0xff]  }
 0x88c   :  { %4541 = vst.msk [vmem:[#allocation4 + $0x8] sm:$0x3] %vm4287_vm0, %v4539_v37  ;;  %8035 = vmatpush3.bf16.msra.mxu1 %v9021_v18  ;;  %v5932_v9 = vcombine.high %v5924_v51, %v5924_v51  ;;  %v5978_v15 = vpack.c.bf16 %v5924_v51, %v5924_v51  ;;  %v9061_v51 = vld [vmem:[%s12544_s10 + $0x250] sm:$0xff]   ;;  %v9063_v37 = vld [vmem:[%s12544_s10 + $0x258] sm:$0xff]  }
 0x88d   :  { %v4601_v52 = vpop.permute.xlu1 %4600  ;;  %8036 = vmatprep.subr.bf16.mxu1 %v9025_v38  ;;  %v4971_v55 = vpack.c.bf16 %v4936_v17, %v4936_v17  ;;  %v9060_v38 = vld [vmem:[%s12544_s10 + $0x208] sm:$0xff]   ;;  %v9069_v17 = vld [vmem:[%s12544_s10 + $0x270] sm:$0xff]  }
 0x88e   :  { %4603 = vst.msk [vmem:[#allocation4 + $0xa] sm:$0x3] %vm4287_vm0, %v4601_v52  ;;  %v5979_v32 = vpack.c.bf16 %v5932_v9, %v5932_v9  ;;  %v9065_v9 = vld [vmem:[%s12544_s10 + $0x260] sm:$0xff]  }
 0x88f   :  { %v4663_v48 = vpop.permute.xlu0 %4662  ;;  %v9066_v52 = vld [vmem:[%s12544_s10 + $0x220] sm:$0xff]  }
 0x890   :  { %4665 = vst.msk [vmem:[#allocation4 + $0xc] sm:$0x3] %vm4287_vm0, %v4663_v48  ;;  %8037 = vmatpush3.bf16.msra.mxu1 %v9026_v25  ;;  %7044 = vmatprep.mubr.bf16.mxu0 %v5979_v32  ;;  %v9064_v25 = vld [vmem:[%s12544_s10 + $0x218] sm:$0xff]   ;;  %v9068_v32 = vld [vmem:[%s12544_s10 + $0x228] sm:$0xff]  }
 0x891   :  { %v4725_v49 = vpop.permute.xlu1 %4724  ;;  %7045 = vmatmul.mubr.bf16.vlgmr.msra.gmra.mrb[84].mxu0 %v5978_v15  ;;  %8044 = vmatprep.subr.bf16.mxu1 %v9027_v41  ;;  %v9067_v41 = vld [vmem:[%s12544_s10 + $0x268] sm:$0xff]   ;;  %v9071_v48 = vld [vmem:[%s12544_s10 + $0x278] sm:$0xff]  }
 0x892   :  { %4727 = vst.msk [vmem:[#allocation4 + $0xe] sm:$0x3] %vm4287_vm0, %v4725_v49  ;;  %7218 = vmatpush1.bf16.msra.mxu0 %v9038_v61  ;;  %7249 = vmatprep.mubr.bf16.mxu0 %v12952_v13  ;;  %v9031_v13 = vld [vmem:[%s12544_s10 + $0x1d0] sm:$0xff]   ;;  %v9072_v15 = vld [vmem:[%s12544_s10 + $0x238] sm:$0xff]   ;;  %v9290_v49 = vld [vmem:[#allocation2] sm:$0xff] }
 0x893   :  { %5770 = vmatmul.mubr.bf16.vlgmr.msra.gmra.mrb[44].mxu1 %v4968_v26  ;;  %v4556_v19 = vpop.permute.xlu0 %4555  ;;  %7219 = vmatprep.subr.bf16.mxu0 %v9045_v36  ;;  %v9070_v61 = vld [vmem:[%s12544_s10 + $0x230] sm:$0xff]   ;;  %v9073_v36 = vld [vmem:[%s12544_s10 + $0x280] sm:$0xff]   ;;  %v9074_v26 = vld [vmem:[%s12544_s10 + $0x288] sm:$0xff]  }
 0x894   :  { %4558 = vst.msk [vmem:[#allocation4 + $0x8] sm:$0x3] %vm4305_vm1, %v4556_v19  ;;  %8045 = vmatpush3.bf16.msra.mxu1 %v9028_v23  ;;  %5809 = vmatprep.mubr.bf16.mxu1 %v4971_v55  ;;  %v4972_v23 = vpack.c.bf16 %v4944_v28, %v4944_v28  ;;  %v9075_v55 = vld [vmem:[%s12544_s10 + $0x290] sm:$0xff]  }
 0x895   :  { %v4618_v7 = vpop.permute.xlu1 %4617  ;;  %8046 = vmatprep.subr.bf16.mxu1 %v9029_v2  ;;  %v5917_v2 = vcombine.high %v11896_v10, %v11896_v10  ;;  %v9079_v10 = vld [vmem:[%s12546_s12 + $0x104] ss:$8 sps:$4 sm:$0xff]   ;;  %v9110_v28 = vld [vmem:[%s12546_s12 + $0x1b0] ss:$8 sps:$4 sm:$0xff]  }
 0x896   :  { %4620 = vst.msk [vmem:[#allocation4 + $0xa] sm:$0x3] %vm4305_vm1, %v4618_v7  ;;  %7220 = vmatpush1.bf16.msra.mxu0 %v9043_v35  ;;  %v4937_v35 = vcombine.high %v11994_v60, %v11994_v60  ;;  %v9109_v60 = vld [vmem:[%s12546_s12 + $0x1a4] ss:$8 sps:$4 sm:$0xff]  }
 0x897   :  { %v4680_v54 = vpop.permute.xlu0 %4679  ;;  %7221 = vmatprep.subr.bf16.mxu0 %v9050_v5  ;;  %v12078_v19 = vrot.slane %v5917_v2, %v11342_v1  ;;  %v9076_v5 = vld [vmem:[%s12544_s10 + $0x298] sm:$0xff]   ;;  %v9137_v2 = vld [vmem:[%s12546_s12 + $0x240] ss:$8 sps:$4 sm:$0xff]  }
 0x898   :  { %4682 = vst.msk [vmem:[#allocation4 + $0xc] sm:$0x3] %vm4305_vm1, %v4680_v54  ;;  %8047 = vmatpush3.bf16.msra.mxu1 %v9030_v33  ;;  %v4951_v33 = vrot.slane %v4937_v35, %v11342_v1  ;;  %v9082_v54 = vld [vmem:[%s12546_s12 + $0x114] ss:$8 sps:$4 sm:$0xff]   ;;  %v9140_v35 = vld [vmem:[%s12546_s12 + $0x250] ss:$8 sps:$4 sm:$0xff]  }
 0x899   :  { %v4742_v31 = vpop.permute.xlu1 %4741  ;;  %8048 = vmatprep.subr.bf16.mxu1 %v9031_v13  ;;  %v5933_v7 = vcombine.high %v12078_v19, %v12078_v19  ;;  %v9077_v13 = vld [vmem:[%s12546_s12 + $0x100] ss:$8 sps:$4 sm:$0xff]  }
 0x89a   :  { %4744 = vst.msk [vmem:[#allocation4 + $0xe] sm:$0x3] %vm4305_vm1, %v4742_v31  ;;  %7222 = vmatpush1.bf16.msra.mxu0 %v9048_v44  ;;  %v4974_v44 = vpack.c.bf16 %v4951_v33, %v4951_v33  ;;  %v9085_v31 = vld [vmem:[%s12546_s12 + $0x124] ss:$8 sps:$4 sm:$0xff]   ;;  %v9148_v33 = vld [vmem:[%s12546_s12 + $0x274] ss:$8 sps:$4 sm:$0xff]  }
 0x89b   :  { %v4756_v29 = vpop.permute.xlu0 %4755  ;;  %7223 = vmatprep.subr.bf16.mxu0 %v9055_v62  ;;  %v5981_v62 = vpack.c.bf16 %v5933_v7, %v5933_v7  ;;  %v9151_v7 = vld [vmem:[%s12546_s12 + $0x284] ss:$8 sps:$4 sm:$0xff]  }
 0x89c   :  { %4758 = vst.msk [vmem:[#allocation4 + $0x10] sm:$0x3] %vm4246_vm14, %v4756_v29  ;;  %8049 = vmatpush3.bf16.msra.mxu1 %v9032_v56  ;;  %v9080_v56 = vld [vmem:[%s12546_s12 + $0x110] ss:$8 sps:$4 sm:$0xff]  }
 0x89d   :  { %4772 = vst.msk [vmem:[#allocation4 + $0x10] sm:$0x3] %vm4272_vm15, %v11574_v30  ;;  %v4818_v16 = vpop.permute.xlu1 %4817  ;;  %8050 = vmatprep.subr.bf16.mxu1 %v9033_v20  ;;  %v9036_v30 = vld [vmem:[%s12544_s10 + $0x1a0] sm:$0xff]   ;;  %v9086_v29 = vld [vmem:[%s12546_s12 + $0x130] ss:$8 sps:$4 sm:$0xff]  }
 0x89e   :  { %4820 = vst.msk [vmem:[#allocation4 + $0x12] sm:$0x3] %vm4246_vm14, %v4818_v16  ;;  %7224 = vmatpush1.bf16.msra.mxu0 %v9053_v59  ;;  %v9083_v20 = vld [vmem:[%s12546_s12 + $0x120] ss:$8 sps:$4 sm:$0xff]   ;;  %v9088_v59 = vld [vmem:[%s12546_s12 + $0x134] ss:$8 sps:$4 sm:$0xff]  }
 0x89f   :  { %4834 = vst.msk [vmem:[#allocation4 + $0x12] sm:$0x3] %vm4272_vm15, %v11570_v11  ;;  %v4787_v8 = vpop.permute.xlu0 %4786  ;;  %v9041_v11 = vld [vmem:[%s12544_s10 + $0x1a8] sm:$0xff]  }
 0x8a0   :  { %4789 = vst.msk [vmem:[#allocation4 + $0x10] sm:$0x3] %vm4287_vm0, %v4787_v8  ;;  %8051 = vmatpush3.bf16.msra.mxu1 %v9034_v39  ;;  %v9091_v39 = vld [vmem:[%s12546_s12 + $0x144] ss:$8 sps:$4 sm:$0xff]   ;;  %v9089_v16 = vld [vmem:[%s12546_s12 + $0x140] ss:$8 sps:$4 sm:$0xff]  }
 0x8a1   :  { %v4849_v22 = vpop.permute.xlu1 %4848  ;;  %8052 = vmatprep.subr.bf16.mxu1 %v9035_v12  ;;  %v9094_v12 = vld [vmem:[%s12546_s12 + $0x154] ss:$8 sps:$4 sm:$0xff]   ;;  %v9092_v8 = vld [vmem:[%s12546_s12 + $0x150] ss:$8 sps:$4 sm:$0xff]  }
 0x8a2   :  { %4851 = vst.msk [vmem:[#allocation4 + $0x12] sm:$0x3] %vm4287_vm0, %v4849_v22  ;;  %v9095_v22 = vld [vmem:[%s12546_s12 + $0x160] ss:$8 sps:$4 sm:$0xff]  }
 0x8a3   :  { %v4880_v42 = vpop.permute.xlu0 %4879 }
 0x8a4   :  { %4882 = vst.msk [vmem:[#allocation4 + $0x14] sm:$0x3] %vm4246_vm14, %v4880_v42  ;;  %8053 = vmatpush3.bf16.msra.mxu1 %v9036_v30  ;;  %v9097_v30 = vld [vmem:[%s12546_s12 + $0x164] ss:$8 sps:$4 sm:$0xff]   ;;  %v9098_v42 = vld [vmem:[%s12546_s12 + $0x170] ss:$8 sps:$4 sm:$0xff]  }
 0x8a5   :  { %4896 = vst.msk [vmem:[#allocation4 + $0x14] sm:$0x3] %vm4272_vm15, %v11591_v50  ;;  %v4804_v57 = vpop.permute.xlu1 %4803  ;;  %8054 = vmatprep.subr.bf16.mxu1 %v9037_v24  ;;  %v9047_v50 = vld [vmem:[%s12544_s10 + $0x1f8] sm:$0xff]  }
 0x8a6   :  { %4806 = vst.msk [vmem:[#allocation4 + $0x10] sm:$0x3] %vm4305_vm1, %v4804_v57  ;;  %v9100_v24 = vld [vmem:[%s12546_s12 + $0x174] ss:$8 sps:$4 sm:$0xff]   ;;  %v9101_v57 = vld [vmem:[%s12546_s12 + $0x180] ss:$8 sps:$4 sm:$0xff]  }
 0x8a7   :  { %v4866_v58 = vpop.permute.xlu0 %4865 }
 0x8a8   :  { %4868 = vst.msk [vmem:[#allocation4 + $0x12] sm:$0x3] %vm4305_vm1, %v4866_v58  ;;  %8055 = vmatpush3.bf16.msra.mxu1 %v9041_v11  ;;  %v9103_v11 = vld [vmem:[%s12546_s12 + $0x184] ss:$8 sps:$4 sm:$0xff]   ;;  %v9104_v58 = vld [vmem:[%s12546_s12 + $0x190] ss:$8 sps:$4 sm:$0xff]  }
 0x8a9   :  { %8056 = vmatprep.subr.bf16.mxu1 %v9042_v6  ;;  %v9106_v6 = vld [vmem:[%s12546_s12 + $0x194] ss:$8 sps:$4 sm:$0xff]  }
 0x8ac   :  { %8057 = vmatpush3.bf16.msra.mxu1 %v9046_v21  ;;  %v9107_v21 = vld [vmem:[%s12546_s12 + $0x1a0] ss:$8 sps:$4 sm:$0xff]  }
 0x8ad   :  { %8058 = vmatprep.subr.bf16.mxu1 %v9047_v50  ;;  %v9112_v50 = vld [vmem:[%s12546_s12 + $0x1b4] ss:$8 sps:$4 sm:$0xff]  }
 0x8af   :  { %v12011_v0 = vld [vmem:[#allocation4 + $0x10] sm:$0x3f] }
 0x8b0   :  { %8059 = vmatpush3.bf16.msra.mxu1 %v9051_v53  ;;  %v5951_v14 = vcombine.high %v12011_v0, %v12011_v0  ;;  %v9115_v53 = vld [vmem:[%s12546_s12 + $0x1c4] ss:$8 sps:$4 sm:$0xff]  }
 0x8b1   :  { %8066 = vmatprep.subr.bf16.mxu1 %v9052_v45  ;;  %v9113_v45 = vld [vmem:[%s12546_s12 + $0x1c0] ss:$8 sps:$4 sm:$0xff]  }
 0x8b2   :  { %v5965_v18 = vrot.slane %v5951_v14, %v11342_v1  ;;  %v9121_v14 = vld [vmem:[%s12546_s12 + $0x1e4] ss:$8 sps:$4 sm:$0xff]  }
 0x8b3   :  { %5810 = vmatmul.mubr.bf16.vlgmr.msra.gmra.mrb[48].mxu1 %v4970_v34  ;;  %v12174_v34 = vld [vmem:[#allocation4 + $0x8] sm:$0xff] }
 0x8b4   :  { %8067 = vmatpush3.bf16.msra.mxu1 %v9056_v27  ;;  %5849 = vmatprep.mubr.bf16.mxu1 %v4973_v43  ;;  %v5988_v4 = vpack.c.bf16 %v5965_v18, %v5965_v18  ;;  %v9116_v27 = vld [vmem:[%s12546_s12 + $0x1d0] ss:$8 sps:$4 sm:$0xff]   ;;  %v9124_v43 = vld [vmem:[%s12546_s12 + $0x1f4] ss:$8 sps:$4 sm:$0xff]   ;;  %v12184_v18 = vrot.slane %v12174_v34, %v11342_v1 }
 0x8b5   :  { %8068 = vmatprep.subr.bf16.mxu1 %v9058_v63  ;;  %v9119_v63 = vld [vmem:[%s12546_s12 + $0x1e0] ss:$8 sps:$4 sm:$0xff]  }
 0x8b6   :  { %7802 = vmatmul.mubr.msk.bf16.vlgmr.msra.gmra.mrb[88].mxu0 %vm1417_vm12, %v5988_v4  ;;  %v9122_v4 = vld [vmem:[%s12546_s12 + $0x1f0] ss:$8 sps:$4 sm:$0xff]  }
 0x8b8   :  { %8069 = vmatpush3.bf16.msra.mxu1 %v9060_v38  ;;  %v9127_v38 = vld [vmem:[%s12546_s12 + $0x204] ss:$8 sps:$4 sm:$0xff]  }
 0x8b9   :  { %8070 = vmatprep.subr.bf16.mxu1 %v9061_v51  ;;  %v5949_v51 = vcombine.high %v12184_v18, %v12184_v18 }
 0x8bc   :  { %8071 = vmatpush3.bf16.msra.mxu1 %v9062_v3  ;;  %v9125_v3 = vld [vmem:[%s12546_s12 + $0x200] ss:$8 sps:$4 sm:$0xff]  }
 0x8bd   :  { %8072 = vmatprep.subr.bf16.mxu1 %v9063_v37  ;;  %v5980_v37 = vpack.c.bf16 %v12078_v19, %v12078_v19  ;;  %v9145_v19 = vld [vmem:[%s12546_s12 + $0x264] ss:$8 sps:$4 sm:$0xff]  }
 0x8c0   :  { %8073 = vmatpush3.bf16.msra.mxu1 %v9064_v25  ;;  %v9130_v25 = vld [vmem:[%s12546_s12 + $0x214] ss:$8 sps:$4 sm:$0xff]  }
 0x8c1   :  { %8074 = vmatprep.subr.bf16.mxu1 %v9065_v9  ;;  %v5983_v9 = vpack.c.bf16 %v5949_v51, %v5949_v51 }
 0x8c4   :  { %8075 = vmatpush3.bf16.msra.mxu1 %v9066_v52  ;;  %v9128_v52 = vld [vmem:[%s12546_s12 + $0x210] ss:$8 sps:$4 sm:$0xff]  }
 0x8c5   :  { %8076 = vmatprep.subr.bf16.mxu1 %v9067_v41  ;;  %v9133_v41 = vld [vmem:[%s12546_s12 + $0x224] ss:$8 sps:$4 sm:$0xff]  }
 0x8c8   :  { %8077 = vmatpush3.bf16.msra.mxu1 %v9068_v32 }
 0x8c9   :  { %8078 = vmatprep.subr.bf16.mxu1 %v9069_v17 }
 0x8cc   :  { %8079 = vmatpush3.bf16.msra.mxu1 %v9070_v61 }
 0x8cd   :  { %8080 = vmatprep.subr.bf16.mxu1 %v9071_v48 }
 0x8d0   :  { %8081 = vmatpush3.bf16.msra.mxu1 %v9072_v15  ;;  %v9131_v15 = vld [vmem:[%s12546_s12 + $0x220] ss:$8 sps:$4 sm:$0xff]  }
 0x8d1   :  { %8129 = vmatprep.subr.bf16.mxu1 %v9290_v49 }
 0x8d3   :  { %5850 = vmatmul.mubr.bf16.vlgmr.msra.gmra.mrb[52].mxu1 %v4972_v23  ;;  %v9136_v23 = vld [vmem:[%s12546_s12 + $0x234] ss:$8 sps:$4 sm:$0xff]  }
 0x8d4   :  { %8130 = vmatpush3.bf16.msra.mxu1 %v9073_v36  ;;  %8137 = vmatprep.mubr.msk.bf16.mxu1 %vm9583_vm2, %v9290_v49 }
 0x8d5   :  { %8131 = vmatprep.subr.bf16.mxu1 %v9290_v49 }
 0x8d8   :  { %8132 = vmatpush3.bf16.msra.mxu1 %v9074_v26  ;;  %v9139_v26 = vld [vmem:[%s12546_s12 + $0x244] ss:$8 sps:$4 sm:$0xff]  }
 0x8d9   :  { %8133 = vmatprep.subr.bf16.mxu1 %v9290_v49 }
 0x8dc   :  { %8134 = vmatpush3.bf16.msra.mxu1 %v9075_v55  ;;  %v9142_v55 = vld [vmem:[%s12546_s12 + $0x254] ss:$8 sps:$4 sm:$0xff]  }
 0x8dd   :  { %8135 = vmatprep.subr.bf16.mxu1 %v9290_v49  ;;  %v9134_v49 = vld [vmem:[%s12546_s12 + $0x230] ss:$8 sps:$4 sm:$0xff]  }
 0x8e0   :  { %8136 = vmatpush3.bf16.msra.mxu1 %v9076_v5  ;;  %v9143_v5 = vld [vmem:[%s12546_s12 + $0x260] ss:$8 sps:$4 sm:$0xff]  }
 0x8e1   :  { %7053 = vmatprep.subr.bf16.mxu1 %v9079_v10  ;;  %v9146_v10 = vld [vmem:[%s12546_s12 + $0x270] ss:$8 sps:$4 sm:$0xff]  }
 0x8e3   :  { %8138 = vmatmul.mubr.msk.bf16.vlgmr.msra.gmra.mrb[56].mxu1 %vm1417_vm12, %v4974_v44  ;;  %v9154_v44 = vld [vmem:[%s12546_s12 + $0x294] ss:$8 sps:$4 sm:$0xff]  }
 0x8e4   :  { %7054 = vmatpush1.bf16.msra.mxu1 %v9077_v13  ;;  %7085 = vmatprep.mubr.bf16.mxu1 %v5981_v62  ;;  %v9149_v13 = vld [vmem:[%s12546_s12 + $0x280] ss:$8 sps:$4 sm:$0xff]   ;;  %v7548_v62 = vld [vmem:[#allocation18] ss:$0 sm:$0xff] }
 0x8e5   :  { %7055 = vmatprep.subr.bf16.mxu1 %v9082_v54  ;;  %v9152_v54 = vld [vmem:[%s12546_s12 + $0x290] ss:$8 sps:$4 sm:$0xff]  }
 0x8e8   :  { %7056 = vmatpush1.bf16.msra.mxu1 %v9080_v56  ;;  %v9157_v56 = vld [vmem:[%s12546_s12 + $0x2a4] ss:$8 sps:$4 sm:$0xff]  }
 0x8e9   :  { %7057 = vmatprep.subr.bf16.mxu1 %v9085_v31 }
 0x8ec   :  { %7058 = vmatpush1.bf16.msra.mxu1 %v9083_v20 }
 0x8ed   :  { %7059 = vmatprep.subr.bf16.mxu1 %v9088_v59 }
 0x8f0   :  { %7060 = vmatpush1.bf16.msra.mxu1 %v9086_v29 }
 0x8f1   :  { %7061 = vmatprep.subr.bf16.mxu1 %v9091_v39 }
 0x8f4   :  { %7062 = vmatpush1.bf16.msra.mxu1 %v9089_v16  ;;  %v9155_v16 = vld [vmem:[%s12546_s12 + $0x2a0] ss:$8 sps:$4 sm:$0xff]  }
 0x8f5   :  { %7063 = vmatprep.subr.bf16.mxu1 %v9094_v12 }
 0x8f8   :  { %7064 = vmatpush1.bf16.msra.mxu1 %v9092_v8  ;;  %v9160_v8 = vld [vmem:[%s12546_s12 + $0x2b4] ss:$8 sps:$4 sm:$0xff]  }
 0x8f9   :  { %7065 = vmatprep.subr.bf16.mxu1 %v9097_v30 }
 0x8fc   :  { %7066 = vmatpush1.bf16.msra.mxu1 %v9095_v22  ;;  %v9158_v22 = vld [vmem:[%s12546_s12 + $0x2b0] ss:$8 sps:$4 sm:$0xff]  }
 0x8fd   :  { %7067 = vmatprep.subr.bf16.mxu1 %v9100_v24  ;;  %v9163_v24 = vld [vmem:[%s12546_s12 + $0x2c4] ss:$8 sps:$4 sm:$0xff]  }
 0x900   :  { %7068 = vmatpush1.bf16.msra.mxu1 %v9098_v42  ;;  %v9161_v42 = vld [vmem:[%s12546_s12 + $0x2c0] ss:$8 sps:$4 sm:$0xff]  }
 0x901   :  { %7069 = vmatprep.subr.bf16.mxu1 %v9103_v11  ;;  %v9166_v11 = vld [vmem:[%s12546_s12 + $0x2d4] ss:$8 sps:$4 sm:$0xff]  }
 0x904   :  { %7070 = vmatpush1.bf16.msra.mxu1 %v9101_v57  ;;  %v9164_v57 = vld [vmem:[%s12546_s12 + $0x2d0] ss:$8 sps:$4 sm:$0xff]  }
 0x905   :  { %7071 = vmatprep.subr.bf16.mxu1 %v9106_v6  ;;  %v9169_v6 = vld [vmem:[%s12546_s12 + $0x2e4] ss:$8 sps:$4 sm:$0xff]  }
 0x908   :  { %7072 = vmatpush1.bf16.msra.mxu1 %v9104_v58  ;;  %v5934_v58 = vcombine.high %v12174_v34, %v12174_v34 }
 0x909   :  { %7073 = vmatprep.subr.bf16.mxu1 %v9109_v60  ;;  %v9167_v60 = vld [vmem:[%s12546_s12 + $0x2e0] ss:$8 sps:$4 sm:$0xff]  }
 0x90c   :  { %7074 = vmatpush1.bf16.msra.mxu1 %v9107_v21  ;;  %v9172_v21 = vld [vmem:[%s12546_s12 + $0x2f4] ss:$8 sps:$4 sm:$0xff]  }
 0x90d   :  { %7075 = vmatprep.subr.bf16.mxu1 %v9112_v50  ;;  %v12289_v50 = vrot.slane %v5934_v58, %v11342_v1  ;;  %v9219_v58 = vld [vmem:[%s12546_s12 + $0x3f0] ss:$8 sps:$4 sm:$0xff]  }
 0x910   :  { %7076 = vmatpush1.bf16.msra.mxu1 %v9110_v28  ;;  %v9170_v28 = vld [vmem:[%s12546_s12 + $0x2f0] ss:$8 sps:$4 sm:$0xff]  }
 0x911   :  { %7077 = vmatprep.subr.bf16.mxu1 %v9115_v53  ;;  %v9175_v53 = vld [vmem:[%s12546_s12 + $0x304] ss:$8 sps:$4 sm:$0xff]  }
 0x914   :  { %7078 = vmatpush1.bf16.msra.mxu1 %v9113_v45  ;;  %v5950_v45 = vcombine.high %v12289_v50, %v12289_v50 }
 0x915   :  { %7079 = vmatprep.subr.bf16.mxu1 %v9118_v40  ;;  %v9173_v40 = vld [vmem:[%s12546_s12 + $0x300] ss:$8 sps:$4 sm:$0xff]  }
 0x916   :  { %v5985_v34 = vpack.c.bf16 %v5950_v45, %v5950_v45  ;;  %v9225_v45 = vld [vmem:[%s12546_s12 + $0x410] ss:$8 sps:$4 sm:$0xff]  }
 0x918   :  { %7080 = vmatpush1.bf16.msra.mxu1 %v9116_v27  ;;  %v5982_v27 = vpack.c.bf16 %v12184_v18, %v12184_v18  ;;  %v9182_v18 = vld [vmem:[%s12546_s12 + $0x324] ss:$8 sps:$4 sm:$0xff]  }
 0x919   :  { %7081 = vmatprep.subr.bf16.mxu1 %v9121_v14  ;;  %v9179_v14 = vld [vmem:[%s12546_s12 + $0x314] ss:$8 sps:$4 sm:$0xff]  }
 0x91c   :  { %7082 = vmatpush1.bf16.msra.mxu1 %v9119_v63 }
 0x91d   :  { %7083 = vmatprep.subr.bf16.mxu1 %v9124_v43  ;;  %v9177_v43 = vld [vmem:[%s12546_s12 + $0x310] ss:$8 sps:$4 sm:$0xff]  }
 0x920   :  { %7084 = vmatpush1.bf16.msra.mxu1 %v9122_v4 }
 0x921   :  { %7094 = vmatprep.subr.bf16.mxu1 %v9127_v38 }
 0x923   :  { %7086 = vmatmul.mubr.bf16.vlgmr.msra.gmra.mrb[60].mxu1 %v5980_v37 }
 0x924   :  { %7095 = vmatpush1.bf16.msra.mxu1 %v9125_v3  ;;  %7126 = vmatprep.mubr.bf16.mxu1 %v5983_v9 }
 0x925   :  { %7096 = vmatprep.subr.bf16.mxu1 %v9130_v25 }
 0x926   :  { %v7994_v32 = vpop.f32.mrb[36].mxu1 }
 0x927   :  { %v7995_v17 = vpop.f32.mrb[37].mxu1 }
 0x928   :  { %v7996_v61 = vadd.f32 %v7995_v17, %v7994_v32  ;;  %7097 = vmatpush1.bf16.msra.mxu1 %v9128_v52  ;;  %v7997_v48 = vpop.f32.mrb[38].mxu1  ;;  %v9180_v52 = vld [vmem:[%s12546_s12 + $0x320] ss:$8 sps:$4 sm:$0xff]   ;;  %v9185_v32 = vld [vmem:[%s12546_s12 + $0x334] ss:$8 sps:$4 sm:$0xff]  }
 0x929   :  { %v7998_v36 = vpop.f32.mrb[39].mxu1  ;;  %7098 = vmatprep.subr.bf16.mxu1 %v9133_v41  ;;  %v9188_v48 = vld [vmem:[%s12546_s12 + $0x344] ss:$8 sps:$4 sm:$0xff]  }
 0x92a   :  { %v5692_v59 = vadd.f32 %v7996_v61, %v7548_v62  ;;  %v9183_v61 = vld [vmem:[%s12546_s12 + $0x330] ss:$8 sps:$4 sm:$0xff]   ;;  %v9191_v36 = vld [vmem:[%s12546_s12 + $0x354] ss:$8 sps:$4 sm:$0xff]   ;;  %v9204_v62 = vld [vmem:[%s12546_s12 + $0x3a0] ss:$8 sps:$4 sm:$0xff]  }
 0x92c   :  { %7099 = vmatpush1.bf16.msra.mxu1 %v9131_v15  ;;  %v9186_v15 = vld [vmem:[%s12546_s12 + $0x340] ss:$8 sps:$4 sm:$0xff]  }
 0x92d   :  { %7100 = vmatprep.subr.bf16.mxu1 %v9136_v23  ;;  %v9189_v23 = vld [vmem:[%s12546_s12 + $0x350] ss:$8 sps:$4 sm:$0xff]  }
 0x930   :  { %7101 = vmatpush1.bf16.msra.mxu1 %v9134_v49  ;;  %v9194_v49 = vld [vmem:[%s12546_s12 + $0x364] ss:$8 sps:$4 sm:$0xff]  }
 0x931   :  { %7102 = vmatprep.subr.bf16.mxu1 %v9139_v26  ;;  %v9192_v26 = vld [vmem:[%s12546_s12 + $0x360] ss:$8 sps:$4 sm:$0xff]  }
 0x934   :  { %7103 = vmatpush1.bf16.msra.mxu1 %v9137_v2  ;;  %v9197_v2 = vld [vmem:[%s12546_s12 + $0x374] ss:$8 sps:$4 sm:$0xff]  }
 0x935   :  { %7104 = vmatprep.subr.bf16.mxu1 %v9142_v55  ;;  %v9195_v55 = vld [vmem:[%s12546_s12 + $0x370] ss:$8 sps:$4 sm:$0xff]  }
 0x938   :  { %7105 = vmatpush1.bf16.msra.mxu1 %v9140_v35  ;;  %v9200_v35 = vld [vmem:[%s12546_s12 + $0x384] ss:$8 sps:$4 sm:$0xff]  }
 0x939   :  { %7106 = vmatprep.subr.bf16.mxu1 %v9145_v19  ;;  %v9198_v19 = vld [vmem:[%s12546_s12 + $0x380] ss:$8 sps:$4 sm:$0xff]  }
 0x93c   :  { %7107 = vmatpush1.bf16.msra.mxu1 %v9143_v5  ;;  %v9203_v5 = vld [vmem:[%s12546_s12 + $0x394] ss:$8 sps:$4 sm:$0xff]  }
 0x93d   :  { %7108 = vmatprep.subr.bf16.mxu1 %v9148_v33  ;;  %v9201_v33 = vld [vmem:[%s12546_s12 + $0x390] ss:$8 sps:$4 sm:$0xff]  }
 0x940   :  { %7109 = vmatpush1.bf16.msra.mxu1 %v9146_v10  ;;  %v9206_v10 = vld [vmem:[%s12546_s12 + $0x3a4] ss:$8 sps:$4 sm:$0xff]  }
 0x941   :  { %7110 = vmatprep.subr.bf16.mxu1 %v9151_v7 }
 0x944   :  { %7111 = vmatpush1.bf16.msra.mxu1 %v9149_v13 }
 0x945   :  { %7112 = vmatprep.subr.bf16.mxu1 %v9154_v44 }
 0x946   :  { %v8016_v31 = vpop.f32.mrb[40].mxu1 }
 0x947   :  { %v8017_v20 = vpop.f32.mrb[41].mxu1 }
 0x948   :  { %v8018_v29 = vadd.f32 %v8017_v20, %v8016_v31  ;;  %v8019_v39 = vpop.f32.mrb[42].mxu1  ;;  %7113 = vmatpush1.bf16.msra.mxu1 %v9152_v54  ;;  %v9209_v20 = vld [vmem:[%s12546_s12 + $0x3b4] ss:$8 sps:$4 sm:$0xff]  }
 0x949   :  { %v8020_v12 = vpop.f32.mrb[43].mxu1  ;;  %7114 = vmatprep.subr.bf16.mxu1 %v9157_v56 }
 0x94a   :  { %v5732_v30 = vadd.f32 %v8018_v29, %v5692_v59  ;;  %v9207_v12 = vld [vmem:[%s12546_s12 + $0x3b0] ss:$8 sps:$4 sm:$0xff]  }
 0x94c   :  { %7115 = vmatpush1.bf16.msra.mxu1 %v9155_v16 }
 0x94d   :  { %7116 = vmatprep.subr.bf16.mxu1 %v9160_v8  ;;  %v9212_v8 = vld [vmem:[%s12546_s12 + $0x3c4] ss:$8 sps:$4 sm:$0xff]  }
 0x950   :  { %7117 = vmatpush1.bf16.msra.mxu1 %v9158_v22  ;;  %v9215_v22 = vld [vmem:[%s12546_s12 + $0x3d4] ss:$8 sps:$4 sm:$0xff]  }
 0x951   :  { %7118 = vmatprep.subr.bf16.mxu1 %v9163_v24  ;;  %v9213_v24 = vld [vmem:[%s12546_s12 + $0x3d0] ss:$8 sps:$4 sm:$0xff]  }
 0x954   :  { %7119 = vmatpush1.bf16.msra.mxu1 %v9161_v42  ;;  %v9218_v42 = vld [vmem:[%s12546_s12 + $0x3e4] ss:$8 sps:$4 sm:$0xff]  }
 0x955   :  { %7120 = vmatprep.subr.bf16.mxu1 %v9166_v11  ;;  %v9216_v11 = vld [vmem:[%s12546_s12 + $0x3e0] ss:$8 sps:$4 sm:$0xff]  }
 0x958   :  { %7121 = vmatpush1.bf16.msra.mxu1 %v9164_v57  ;;  %v9221_v57 = vld [vmem:[%s12546_s12 + $0x3f4] ss:$8 sps:$4 sm:$0xff]  }
 0x959   :  { %7122 = vmatprep.subr.bf16.mxu1 %v9169_v6  ;;  %v12401_v6 = vrot.slane %v12011_v0, %v11342_v1  ;;  %v5984_v1 = vpack.c.bf16 %v12289_v50, %v12289_v50  ;;  %v9227_v0 = vld [vmem:[%s12546_s12 + $0x414] ss:$8 sps:$4 sm:$0xff]  }
 0x95c   :  { %7123 = vmatpush1.bf16.msra.mxu1 %v9167_v60  ;;  %v9224_v60 = vld [vmem:[%s12546_s12 + $0x404] ss:$8 sps:$4 sm:$0xff]  }
 0x95d   :  { %7124 = vmatprep.subr.bf16.mxu1 %v9172_v21  ;;  %v5966_v21 = vcombine.high %v12401_v6, %v12401_v6 }
 0x960   :  { %7125 = vmatpush1.bf16.msra.mxu1 %v9170_v28  ;;  %v9222_v28 = vld [vmem:[%s12546_s12 + $0x400] ss:$8 sps:$4 sm:$0xff]  }
 0x961   :  { %7135 = vmatprep.subr.bf16.mxu1 %v9175_v53  ;;  %v5987_v53 = vpack.c.bf16 %v5966_v21, %v5966_v21 }
 0x963   :  { %7127 = vmatmul.mubr.bf16.vlgmr.msra.gmra.mrb[60].mxu1 %v5982_v27 }
 0x964   :  { %7136 = vmatpush1.bf16.msra.mxu1 %v9173_v40  ;;  %7167 = vmatprep.mubr.bf16.mxu1 %v5985_v34  ;;  %v12307_v63 = vpop.f32.mrb[84].mxu0  ;;  %v9230_v40 = vld [vmem:[%s12546_s12 + $0x424] ss:$8 sps:$4 sm:$0xff]  }
 0x965   :  { %v12312_v4 = vpop.f32.mrb[85].mxu0  ;;  %7137 = vmatprep.subr.bf16.mxu1 %v9179_v14 }
 0x966   :  { %v8038_v38 = vpop.f32.mrb[44].mxu1  ;;  %v7050_v51 = vpop.f32.mrb[86].mxu0 }
 0x967   :  { %v8039_v3 = vpop.f32.mrb[45].mxu1  ;;  %v7051_v37 = vpop.f32.mrb[87].mxu0 }
 0x968   :  { %v8040_v25 = vadd.f32 %v8039_v3, %v8038_v38  ;;  %v8041_v9 = vpop.f32.mrb[46].mxu1  ;;  %7138 = vmatpush1.bf16.msra.mxu1 %v9177_v43  ;;  %v9228_v43 = vld [vmem:[%s12546_s12 + $0x420] ss:$8 sps:$4 sm:$0xff]   ;;  %v9233_v38 = vld [vmem:[%s12546_s12 + $0x434] ss:$8 sps:$4 sm:$0xff]  }
 0x969   :  { %v8042_v41 = vpop.f32.mrb[47].mxu1  ;;  %7139 = vmatprep.subr.bf16.mxu1 %v9182_v18  ;;  %v9231_v3 = vld [vmem:[%s12546_s12 + $0x430] ss:$8 sps:$4 sm:$0xff]   ;;  %v9236_v37 = vld [vmem:[%s12546_s12 + $0x444] ss:$8 sps:$4 sm:$0xff]  }
 0x96a   :  { %v5772_v17 = vadd.f32 %v8040_v25, %v5732_v30  ;;  %v9210_v30 = vld [vmem:[%s12546_s12 + $0x3c0] ss:$8 sps:$4 sm:$0xff]   ;;  %v9239_v9 = vld [vmem:[%s12546_s12 + $0x454] ss:$8 sps:$4 sm:$0xff]   ;;  %v9242_v41 = vld [vmem:[%s12546_s12 + $0x464] ss:$8 sps:$4 sm:$0xff]  }
 0x96b   :  { %v9234_v25 = vld [vmem:[%s12546_s12 + $0x440] ss:$8 sps:$4 sm:$0xff]  }
 0x96c   :  { %7140 = vmatpush1.bf16.msra.mxu1 %v9180_v52  ;;  %v9237_v52 = vld [vmem:[%s12546_s12 + $0x450] ss:$8 sps:$4 sm:$0xff]  }
 0x96d   :  { %7141 = vmatprep.subr.bf16.mxu1 %v9185_v32 }
 0x970   :  { %7142 = vmatpush1.bf16.msra.mxu1 %v9183_v61 }
 0x971   :  { %7143 = vmatprep.subr.bf16.mxu1 %v9188_v48 }
 0x974   :  { %7144 = vmatpush1.bf16.msra.mxu1 %v9186_v15  ;;  %v9240_v15 = vld [vmem:[%s12546_s12 + $0x460] ss:$8 sps:$4 sm:$0xff]  }
 0x975   :  { %7145 = vmatprep.subr.bf16.mxu1 %v9191_v36 }
 0x978   :  { %7146 = vmatpush1.bf16.msra.mxu1 %v9189_v23 }
 0x979   :  { %7147 = vmatprep.subr.bf16.mxu1 %v9194_v49  ;;  %v9245_v49 = vld [vmem:[%s12546_s12 + $0x474] ss:$8 sps:$4 sm:$0xff]  }
 0x97c   :  { %7148 = vmatpush1.bf16.msra.mxu1 %v9192_v26  ;;  %v9243_v26 = vld [vmem:[%s12546_s12 + $0x470] ss:$8 sps:$4 sm:$0xff]  }
 0x97d   :  { %7149 = vmatprep.subr.bf16.mxu1 %v9197_v2  ;;  %v9248_v2 = vld [vmem:[%s12546_s12 + $0x484] ss:$8 sps:$4 sm:$0xff]  }
 0x980   :  { %7150 = vmatpush1.bf16.msra.mxu1 %v9195_v55  ;;  %v9246_v55 = vld [vmem:[%s12546_s12 + $0x480] ss:$8 sps:$4 sm:$0xff]  }
 0x981   :  { %7151 = vmatprep.subr.bf16.mxu1 %v9200_v35  ;;  %v9251_v35 = vld [vmem:[%s12546_s12 + $0x494] ss:$8 sps:$4 sm:$0xff]  }
 0x984   :  { %7152 = vmatpush1.bf16.msra.mxu1 %v9198_v19  ;;  %v9249_v19 = vld [vmem:[%s12546_s12 + $0x490] ss:$8 sps:$4 sm:$0xff]  }
 0x985   :  { %7153 = vmatprep.subr.bf16.mxu1 %v9203_v5  ;;  %v9254_v5 = vld [vmem:[%s12546_s12 + $0x4a4] ss:$8 sps:$4 sm:$0xff]  }
 0x986   :  { %v8060_v7 = vpop.f32.mrb[48].mxu1 }
 0x987   :  { %v8061_v13 = vpop.f32.mrb[49].mxu1 }
 0x988   :  { %v8062_v44 = vadd.f32 %v8061_v13, %v8060_v7  ;;  %v8063_v54 = vpop.f32.mrb[50].mxu1  ;;  %7154 = vmatpush1.bf16.msra.mxu1 %v9201_v33  ;;  %v9252_v33 = vld [vmem:[%s12546_s12 + $0x4a0] ss:$8 sps:$4 sm:$0xff]   ;;  %v9255_v7 = vld [vmem:[%s12546_s12 + $0x4b0] ss:$8 sps:$4 sm:$0xff]  }
 0x989   :  { %v8064_v56 = vpop.f32.mrb[51].mxu1  ;;  %v12368_v31 = vpop.f32.mrb[88].mxu0  ;;  %7155 = vmatprep.subr.bf16.mxu1 %v9206_v10  ;;  %v9257_v10 = vld [vmem:[%s12546_s12 + $0x4b4] ss:$8 sps:$4 sm:$0xff]   ;;  %v9260_v13 = vld [vmem:[%s12546_s12 + $0x4c4] ss:$8 sps:$4 sm:$0xff]  }
 0x98a   :  { %v5812_v59 = vadd.f32 %v8062_v44, %v5772_v17  ;;  %v12373_v29 = vpop.f32.mrb[89].mxu0  ;;  %v9258_v44 = vld [vmem:[%s12546_s12 + $0x4c0] ss:$8 sps:$4 sm:$0xff]   ;;  %v9263_v54 = vld [vmem:[%s12546_s12 + $0x4d4] ss:$8 sps:$4 sm:$0xff]  }
 0x98b   :  { %v7255_v39 = vpop.f32.mrb[90].mxu0  ;;  %v9266_v56 = vld [vmem:[%s12546_s12 + $0x4e4] ss:$8 sps:$4 sm:$0xff]  }
 0x98c   :  { %7156 = vmatpush1.bf16.msra.mxu1 %v9204_v62  ;;  %v7256_v16 = vpop.f32.mrb[91].mxu0  ;;  %v9261_v62 = vld [vmem:[%s12546_s12 + $0x4d0] ss:$8 sps:$4 sm:$0xff]  }
 0x98d   :  { %7157 = vmatprep.subr.bf16.mxu1 %v9209_v20  ;;  %v9264_v20 = vld [vmem:[%s12546_s12 + $0x4e0] ss:$8 sps:$4 sm:$0xff]   ;;  %v9267_v39 = vld [vmem:[%s12546_s12 + $0x4f0] ss:$8 sps:$4 sm:$0xff]   ;;  %v5986_v16 = vpack.c.bf16 %v12401_v6, %v12401_v6 }
 0x98e   :  { %v7260_v6 = vld [vmem:[#allocation21] sm:$0x3] }
 0x990   :  { %7158 = vmatpush1.bf16.msra.mxu1 %v9207_v12 }
 0x991   :  { %7159 = vmatprep.subr.bf16.mxu1 %v9212_v8 }
 0x994   :  { %7160 = vmatpush1.bf16.msra.mxu1 %v9210_v30 }
 0x995   :  { %7161 = vmatprep.subr.bf16.mxu1 %v9215_v22 }
 0x998   :  { %7162 = vmatpush1.bf16.msra.mxu1 %v9213_v24 }
 0x999   :  { %7163 = vmatprep.subr.bf16.mxu1 %v9218_v42  ;;  %v6157_v42 = vld [vmem:[#allocation20] sm:$0x3] }
 0x99c   :  { %7164 = vmatpush1.bf16.msra.mxu1 %v9216_v11  ;;  %v6162_v11 = vrot.slane %v6157_v42, %v11266_v46 }
 0x99d   :  { %7165 = vmatprep.subr.bf16.mxu1 %v9221_v57  ;;  %v6166_v57 = vrot.slane %v6157_v42, %v11269_v47 }
 0x9a0   :  { %7166 = vmatpush1.bf16.msra.mxu1 %v9219_v58  ;;  %v7047_v58 = vadd.f32 %v12307_v63, %v6162_v11 }
 0x9a1   :  { %7176 = vmatprep.subr.bf16.mxu1 %v9224_v60  ;;  %v7049_v60 = vadd.f32 %v12312_v4, %v6166_v57 }
 0x9a3   :  { %7168 = vmatmul.mubr.bf16.vlgmr.msra.gmra.mrb[60].mxu1 %v5984_v1 }
 0x9a4   :  { %7177 = vmatpush1.bf16.msra.mxu1 %v9222_v28  ;;  %7208 = vmatprep.mubr.bf16.mxu1 %v5987_v53 }
 0x9a5   :  { %7178 = vmatprep.subr.bf16.mxu1 %v9227_v0 }
 0x9a6   :  { %v8082_v27 = vpop.f32.mrb[52].mxu1 }
 0x9a7   :  { %v8083_v50 = vpop.f32.mrb[53].mxu1 }
 0x9a8   :  { %v8084_v14 = vadd.f32 %v8083_v50, %v8082_v27  ;;  %v8085_v34 = vpop.f32.mrb[54].mxu1  ;;  %7179 = vmatpush1.bf16.msra.mxu1 %v9225_v45 }
 0x9a9   :  { %v8086_v18 = vpop.f32.mrb[55].mxu1  ;;  %7180 = vmatprep.subr.bf16.mxu1 %v9230_v40  ;;  %v7265_v40 = vrot.slane %v7260_v6, %v11266_v46 }
 0x9aa   :  { %v5852_v51 = vadd.f32 %v8084_v14, %v5812_v59  ;;  %v9269_v59 = vld [vmem:[%s12546_s12 + $0x4f4] ss:$8 sps:$4 sm:$0xff]   ;;  %v7269_v14 = vrot.slane %v7260_v6, %v11269_v47  ;;  %s9584_s12 = smov [#allocation23]  }
 0x9ab   :  { %s7297_s5 = sshll.u32 %s9584_s12, 4  ;;  %s7298_s5 = int_to_ptr.vmem [resolvable:$true] %s7297_s5 }
 0x9ac   :  { %7181 = vmatpush1.bf16.msra.mxu1 %v9228_v43  ;;  %s9511_s2 = scalar_lea.vmem %s7298_s5, 32  ;;  %p9516_p11 = scmp.lt.s32.totalorder %s7298_s5, %s7298_s5 }
 0x9ad   :  { %7182 = vmatprep.subr.bf16.mxu1 %v9233_v38  ;;  %p9512_p10 = scmp.ne.s32.totalorder %s7298_s5, %s9511_s2  ;;  %p9517_p12 = scmp.lt.s32.totalorder %s9511_s2, %s9511_s2 }
 0x9af   :  { %p9518_p13 = por %p9517_p12, %p9516_p11 }
 0x9b0   :  { %7183 = vmatpush1.bf16.msra.mxu1 %v9231_v3 }
 0x9b1   :  { %7184 = vmatprep.subr.bf16.mxu1 %v9236_v37  ;;  %p9519_p0 = pnand %p9518_p13, %p9512_p10 }
 0x9b4   :  { %7185 = vmatpush1.bf16.msra.mxu1 %v9234_v25 }
 0x9b5   :  { %7186 = vmatprep.subr.bf16.mxu1 %v9239_v9 }
 0x9b6   :  { %v5891_v32 = vpop.f32.mrb[56].mxu1 }
 0x9b7   :  { %v5892_v17 = vadd.f32 %v5891_v32, %v5852_v51  ;;  %v8139_v61 = vpop.f32.mrb[57].mxu1 }
 0x9b8   :  { %v5894_v48 = vpop.f32.mrb[58].mxu1  ;;  %7187 = vmatpush1.bf16.msra.mxu1 %v9237_v52 }
 0x9b9   :  { %v8140_v36 = vpop.f32.mrb[59].mxu1  ;;  %v5898_v23 = vsel %vm5897_vm3, %v5892_v17, -inf  ;;  %7188 = vmatprep.subr.bf16.mxu1 %v9242_v41 }
 0x9ba   :  { %5899 = vmax.xlane.f32.xlu1 %v5898_v23 }
 0x9bc   :  { %7189 = vmatpush1.bf16.msra.mxu1 %v9240_v15 }
 0x9bd   :  { %7190 = vmatprep.subr.bf16.mxu1 %v9245_v49 }
 0x9c0   :  { %7191 = vmatpush1.bf16.msra.mxu1 %v9243_v26 }
 0x9c1   :  { %7192 = vmatprep.subr.bf16.mxu1 %v9248_v2 }
 0x9c4   :  { %7193 = vmatpush1.bf16.msra.mxu1 %v9246_v55 }
 0x9c5   :  { %7194 = vmatprep.subr.bf16.mxu1 %v9251_v35 }
 0x9c8   :  { %7195 = vmatpush1.bf16.msra.mxu1 %v9249_v19 }
 0x9c9   :  { %7196 = vmatprep.subr.bf16.mxu1 %v9254_v5 }
 0x9cc   :  { %7197 = vmatpush1.bf16.msra.mxu1 %v9252_v33 }
 0x9cd   :  { %7198 = vmatprep.subr.bf16.mxu1 %v9257_v10 }
 0x9d0   :  { %7199 = vmatpush1.bf16.msra.mxu1 %v9255_v7 }
 0x9d1   :  { %7200 = vmatprep.subr.bf16.mxu1 %v9260_v13 }
 0x9d4   :  { %7201 = vmatpush1.bf16.msra.mxu1 %v9258_v44 }
 0x9d5   :  { %7202 = vmatprep.subr.bf16.mxu1 %v9263_v54 }
 0x9d8   :  { %7203 = vmatpush1.bf16.msra.mxu1 %v9261_v62 }
 0x9d9   :  { %7204 = vmatprep.subr.bf16.mxu1 %v9266_v56 }
 0x9dc   :  { %7205 = vmatpush1.bf16.msra.mxu1 %v9264_v20 }
 0x9dd   :  { %7206 = vmatprep.subr.bf16.mxu1 %v9269_v59 }
 0x9e0   :  { %7207 = vmatpush1.bf16.msra.mxu1 %v9267_v39 }
 0x9e3   :  { %7209 = vmatmul.mubr.bf16.vlgmr.msra.gmra.mrb[60].mxu1 %v5986_v16 }
 0xa47   :  { %v5900_v12 = vpop.xlane.xlu1 %5899 }
 0xa48   :  { %v5901_v8 = vsub.f32 %v5892_v17, %v5900_v12 }
 0xa4a   :  { %v5902_v30 = vmul.f32 1.442695, %v5901_v8 }
 0xa4c   :  { %9270 = vpow2.f32 %v5902_v30 }
 0xa56   :  { %v9271_v22 = vpop.eup %9270 }
 0xa57   :  { %v5904_v24 = vsel %vm5897_vm3, %v9271_v22, 0.0 }
 0xa58   :  { %5905 = vadd.xlane.f32.xlu0 %v5904_v24 }
 0xab6   :  { %v7210_v21 = vpop.f32.mrb[60].mxu1 }
 0xab7   :  { %v8164_v28 = vadd.f32 %v7210_v21, %v7047_v58  ;;  %v7212_v1 = vpop.f32.mrb[61].mxu1 }
 0xab8   :  { %v8167_v0 = vadd.f32 %v7212_v1, %v7049_v60  ;;  %v7214_v53 = vpop.f32.mrb[62].mxu1 }
 0xab9   :  { %v8165_v45 = vadd.f32 %v8164_v28, %v12368_v31  ;;  %v7215_v27 = vpop.f32.mrb[63].mxu1 }
 0xaba   :  { %v8168_v50 = vadd.f32 %v8167_v0, %v12373_v29 }
 0xabb   :  { %v7258_v34 = vmax.f32 %v8165_v45, 0.0 }
 0xabc   :  { %v7259_v43 = vmax.f32 %v8168_v50, 0.0 }
 0xabd   :  { %v7272_v63 = vmul.f32 %v7265_v40, %v7258_v34 }
 0xabe   :  { %v7273_v4 = vmul.f32 %v7269_v14, %v7259_v43 }
 0xabf   :  { %v7275_v18 = vsel %vm7274_vm4, %v7272_v63, 0.0 }
 0xac0   :  { %v7276_v38 = vsel %vm7274_vm4, %v7273_v4, 0.0 }
 0xac1   :  { %v7277_v51 = vadd.f32 %v7276_v38, %v7275_v18 }
 0xac3   :  { %7278 = vadd.xlane.f32.xlu0 %v7277_v51 }
 0xae5   :  { %v5906_v3 = vpop.xlane.xlu0 %5905 }
 0xae6   :  { %9272 = vlog2.f32 %v5906_v3 }
 0xaf0   :  { %v9273_v37 = vpop.eup %9272 }
 0xaf1   :  { %v5908_v46 = vmul.f32 0.6931472, %v9273_v37 }
 0xaf3   :  { %v5909_v31 = vsub.f32 %v5901_v8, %v5908_v46 }
 0xaf5   :  { %5910 = vst.msk [vmem:[#allocation23] sm:$0x3] %vm5897_vm3, %v5909_v31 }
 0xaf6   :  { %9522 = shalt.err (!%p9519_p0)
}
 0xaf7   :  { %s9523_s15 = scalar_lea.hbm %s12550_s16, 32 }
 0xaf8   :  { %p9524_p1 = scmp.ne.s32.totalorder %s12550_s16, %s9523_s15  ;;  %p9527_p2 = scmp.lt.u32.totalorder %s9523_s15, %s12550_s16 }
 0xafa   :  { %p9529_p3 = pnand %p9527_p2, %p9524_p1 }
 0xafc   :  { %9532 = shalt.err (!%p9529_p3)
}
 0xafd   :  { %7300 = dma.vmem_to_hbm [thread:$0]  %s7298_s5, 32, %s12550_s16, [#allocation8]   ;;  %v7803_v47 = vld [vmem:[#allocation5] ss:$0 sm:$0xff]  ;;  %vm7289_vm5 = vcmask 1024  }
 0xb50   :  { %v7279_v29 = vpop.xlane.xlu0 %7278 }
 0xb51   :  { %v7287_v25 = vadd.f32 %v7803_v47, %v7279_v29 }
 0xb53   :  { %9274 = vtanh.f32 %v7287_v25 }
 0xb5d   :  { %v9275_v9 = vpop.eup %9274 }
 0xb5e   :  { %7290 = vst.msk [vmem:[%s12551_s17] sm:$0x3] %vm7289_vm5, %v9275_v9 }
 0xb5f   :  { %9545 = dma.done.wait [#allocation8], 32  }
 0xb60   :  { %9546 = vsyncadd [#allocation8], 4294967264 }
 0xb61   :  { %7308 = vsyncpa [#allocation7], 1 }
 0xb62   :  { %7309 = vsyncpa [#allocation10], 1 }
 0xb63   :  { %7310 = vsyncpa [#allocation13], 1 }
 0xb64   :  { %7311 = vsyncpa [#allocation16], 1 }
 0xb65   :  { %7312 = vsyncpa [#allocation19], 1 }
 0xb66   :  { %7313 = vsyncpa [#allocation22], 1 }
 0xb67   :  { %7314 = vsyncpa [#allocation8], 1 }

</bundles_post_ra>
